<compile_context>
chip_gen: v7x
topology: tpu7x:2x2x1
jax: 0.10.0
libtpu: 0.0.40
codegen_flags: <defaults>
</compile_context>

<pallas_src>
import jax
import jax.numpy as jnp
from jax.experimental import pallas as pl
from jax.experimental.pallas import tpu as pltpu

EPS = 1e-5


def _bn_scale_bias(y, gamma, beta):
    """Fold batch-stats BatchNorm (biased variance) into per-channel scale/bias.

    y: (P, C) f32. Returns (scale, bias) such that bn(y) == y * scale + bias.
    Single pass: sum and sum-of-squares, var = E[y^2] - E[y]^2.
    """
    inv_p = 1.0 / y.shape[0]
    mean = jnp.sum(y, axis=0, keepdims=True) * inv_p
    mean_sq = jnp.sum(y * y, axis=0, keepdims=True) * inv_p
    var = mean_sq - mean * mean
    scale = gamma * jax.lax.rsqrt(var + EPS)
    bias = beta - mean * scale
    return scale, bias


def bottleneck_kernel(x_ref, w1_ref, g1_ref, b1_ref,
                      w2_ref, g2_ref, b2_ref,
                      w3_ref, g3_ref, b3_ref,
                      o_ref, h1p_ref):
    # x_ref: (N, H, W, Cin); w1: (Cin, width); w2: (9*width, width) im2col layout;
    # w3: (width, Cout); g*/b*: (1, C); h1p_ref: VMEM scratch (N, H+2, W+2, width).
    N, H, W, Cin = x_ref.shape
    width = w1_ref.shape[1]
    Cout = w3_ref.shape[1]
    P = N * H * W

    x2d = x_ref[...].reshape(P, Cin)

    # --- stage 1: conv1x1 -> BN -> ReLU (stays in VMEM) ---
    y1 = jnp.dot(x2d, w1_ref[...], preferred_element_type=jnp.float32)
    s1, t1 = _bn_scale_bias(y1, g1_ref[...], b1_ref[...])
    h1 = jnp.maximum(y1 * s1 + t1, 0.0).reshape(N, H, W, width)

    # --- reflect pad (padding=1) into VMEM scratch: interior + halo slice copies ---
    h1p_ref[:, 1:H + 1, 1:W + 1, :] = h1
    h1p_ref[:, 0:1, 1:W + 1, :] = h1[:, 1:2, :, :]                    # top row    <- row 1
    h1p_ref[:, H + 1:H + 2, 1:W + 1, :] = h1[:, H - 2:H - 1, :, :]    # bottom row <- row H-2
    h1p_ref[:, :, 0:1, :] = h1p_ref[:, :, 2:3, :]                     # left col  (incl. corners)
    h1p_ref[:, :, W + 1:W + 2, :] = h1p_ref[:, :, W - 1:W, :]         # right col (incl. corners)

    # --- stage 2: conv3x3 as a single im2col matmul (K = 9*width) -> BN -> ReLU ---
    xp = h1p_ref[...]
    taps = [xp[:, dy:dy + H, dx:dx + W, :].reshape(P, width)
            for dy in range(3) for dx in range(3)]
    patches = jnp.concatenate(taps, axis=-1)                          # (P, 9*width)
    y2 = jnp.dot(patches, w2_ref[...], preferred_element_type=jnp.float32)
    s2, t2 = _bn_scale_bias(y2, g2_ref[...], b2_ref[...])
    h2 = jnp.maximum(y2 * s2 + t2, 0.0)

    # --- stage 3: conv1x1 -> BN -> + identity -> ReLU ---
    y3 = jnp.dot(h2, w3_ref[...], preferred_element_type=jnp.float32)
    s3, t3 = _bn_scale_bias(y3, g3_ref[...], b3_ref[...])
    out = jnp.maximum(y3 * s3 + t3 + x2d, 0.0)
    o_ref[...] = out.reshape(N, H, W, Cout)


def bottleneck_forward(x_nchw, w1, g1, b1, w2_hwio, g2, b2, w3, g3, b3):
    """x_nchw: (N, Cin, H, W). Returns (N, Cout, H, W), Cout == Cin (downsample=None)."""
    x = jnp.transpose(x_nchw, (0, 2, 3, 1)).astype(jnp.float32)       # NCHW -> NHWC
    N, H, W, Cin = x.shape
    width = w1.shape[1]
    Cout = w3.shape[1]
    assert Cin == Cout, "downsample=None requires inplanes == planes * expansion"

    # im2col weight layout: (ky, kx, Cin, Cout) -> (9*Cin, Cout), row-major over (ky, kx, ci)
    w2_im2col = w2_hwio.reshape(9 * width, width)

    vmem = pl.BlockSpec(memory_space=pltpu.MemorySpace.VMEM)

    out = pl.pallas_call(
        bottleneck_kernel,
        out_shape=jax.ShapeDtypeStruct((N, H, W, Cout), jnp.float32),
        in_specs=[vmem] * 10,
        out_specs=vmem,
        scratch_shapes=[pltpu.VMEM((N, H + 2, W + 2, width), jnp.float32)],
        compiler_params=pltpu.CompilerParams(vmem_limit_bytes=32 * 1024 * 1024),
    )(x, w1, g1, b1, w2_im2col, g2, b2, w3, g3, b3)

    return jnp.transpose(out, (0, 3, 1, 2))                           # back to NCHW


def bottleneck_reference(x_nchw, w1, g1, b1, w2_hwio, g2, b2, w3, g3, b3):
    """Pure-JAX reference (same math, via lax.conv) for validation."""
    x = jnp.transpose(x_nchw, (0, 2, 3, 1)).astype(jnp.float32)

    def bn(y, g, b):
        m = jnp.mean(y, axis=(0, 1, 2), keepdims=True)
        v = jnp.mean((y - m) ** 2, axis=(0, 1, 2), keepdims=True)
        return (y - m) * jax.lax.rsqrt(v + EPS) * g.reshape(1, 1, 1, -1) + b.reshape(1, 1, 1, -1)

    h = jnp.einsum("nhwc,cd->nhwd", x, w1)
    h = jax.nn.relu(bn(h, g1, b1))
    hp = jnp.pad(h, ((0, 0), (1, 1), (1, 1), (0, 0)), mode="reflect")
    h2 = jax.lax.conv_general_dilated(
        hp, w2_hwio, window_strides=(1, 1), padding="VALID",
        dimension_numbers=("NHWC", "HWIO", "NHWC"))
    h2 = jax.nn.relu(bn(h2, g2, b2))
    h3 = jnp.einsum("nhwc,cd->nhwd", h2, w3)
    h3 = bn(h3, g3, b3) + x
    return jnp.transpose(jax.nn.relu(h3), (0, 3, 1, 2))


if __name__ == "__main__":
    # Bottleneck(inplanes=planes*4, planes) so that downsample=None is valid.
    N, H, W = 2, 16, 16
    planes = 8
    width = planes              # base_width=64, groups=1 -> width = planes
    Cin = Cout = planes * 4     # expansion = 4

    key = jax.random.PRNGKey(0)
    ks = jax.random.split(key, 10)
    x = jax.random.normal(ks[0], (N, Cin, H, W), jnp.float32)

    # conv1/conv3 weights in matmul-friendly layout (Cin, Cout); conv2 in HWIO.
    w1 = 0.2 * jax.random.normal(ks[1], (Cin, width), jnp.float32)
    g1 = 1.0 + 0.1 * jax.random.normal(ks[2], (1, width), jnp.float32)
    b1 = 0.1 * jax.random.normal(ks[3], (1, width), jnp.float32)
    w2_hwio = 0.1 * jax.random.normal(ks[4], (3, 3, width, width), jnp.float32)
    g2 = 1.0 + 0.1 * jax.random.normal(ks[5], (1, width), jnp.float32)
    b2 = 0.1 * jax.random.normal(ks[6], (1, width), jnp.float32)
    w3 = 0.2 * jax.random.normal(ks[7], (width, Cout), jnp.float32)
    g3 = 1.0 + 0.1 * jax.random.normal(ks[8], (1, Cout), jnp.float32)
    b3 = 0.1 * jax.random.normal(ks[9], (1, Cout), jnp.float32)

    out = bottleneck_forward(x, w1, g1, b1, w2_hwio, g2, b2, w3, g3, b3)
    out = jax.block_until_ready(out)

    ref = bottleneck_reference(x, w1, g1, b1, w2_hwio, g2, b2, w3, g3, b3)
    assert out.shape == (N, Cout, H, W), out.shape
    assert bool(jnp.allclose(out, ref, atol=1e-3, rtol=1e-3)), "mismatch vs JAX reference"
    print("KERNEL_OK")
</pallas_src>

<mosaic_0001>
module attributes {stable_mosaic.version = 11 : i64} {
  func.func @bottleneck_kernel(%arg0: memref<2x16x16x32xf32, #tpu.memory_space<vmem>>, %arg1: memref<32x8xf32, #tpu.memory_space<vmem>>, %arg2: memref<1x8xf32, #tpu.memory_space<vmem>>, %arg3: memref<1x8xf32, #tpu.memory_space<vmem>>, %arg4: memref<72x8xf32, #tpu.memory_space<vmem>>, %arg5: memref<1x8xf32, #tpu.memory_space<vmem>>, %arg6: memref<1x8xf32, #tpu.memory_space<vmem>>, %arg7: memref<8x32xf32, #tpu.memory_space<vmem>>, %arg8: memref<1x32xf32, #tpu.memory_space<vmem>>, %arg9: memref<1x32xf32, #tpu.memory_space<vmem>>, %arg10: memref<2x16x16x32xf32, #tpu.memory_space<vmem>>, %arg11: memref<2x18x18x8xf32, #tpu.memory_space<vmem>>) attributes {dimension_semantics = [], scalar_prefetch = 0 : i64, scratch_operands = 1 : i64, tpu.core_type = #tpu.core_type<tc>} {
    %c0 = arith.constant 0 : index
    %c0_0 = arith.constant 0 : index
    %c0_1 = arith.constant 0 : index
    %c0_2 = arith.constant 0 : index
    %0 = vector.load %arg0[%c0, %c0_0, %c0_1, %c0_2] : memref<2x16x16x32xf32, #tpu.memory_space<vmem>>, vector<2x16x16x32xf32>
    %1 = vector.shape_cast %0 : vector<2x16x16x32xf32> to vector<512x32xf32>
    %c0_3 = arith.constant 0 : index
    %c0_4 = arith.constant 0 : index
    %2 = vector.load %arg1[%c0_3, %c0_4] : memref<32x8xf32, #tpu.memory_space<vmem>>, vector<32x8xf32>
    %cst = arith.constant dense<0.000000e+00> : vector<512x8xf32>
    %3 = tpu.matmul %1, %2, %cst {dimension_numbers = #tpu.dot_dimension_numbers<[1], [0], [0], [1], [0, 0, 1, 1], [], []>} : vector<512x32xf32>, vector<32x8xf32>, vector<512x8xf32> -> vector<512x8xf32>
    %c0_5 = arith.constant 0 : index
    %c0_6 = arith.constant 0 : index
    %4 = vector.load %arg2[%c0_5, %c0_6] : memref<1x8xf32, #tpu.memory_space<vmem>>, vector<1x8xf32>
    %c0_7 = arith.constant 0 : index
    %c0_8 = arith.constant 0 : index
    %5 = vector.load %arg3[%c0_7, %c0_8] : memref<1x8xf32, #tpu.memory_space<vmem>>, vector<1x8xf32>
    %cst_9 = arith.constant dense<0.000000e+00> : vector<8xf32>
    %6 = vector.multi_reduction <add>, %3, %cst_9 [0] : vector<512x8xf32> to vector<8xf32>
    %7 = vector.shape_cast %6 : vector<8xf32> to vector<1x8xf32>
    %cst_10 = arith.constant 0.001953125 : f32
    %8 = vector.broadcast %cst_10 : f32 to vector<1x8xf32>
    %9 = arith.mulf %7, %8 : vector<1x8xf32>
    %10 = arith.mulf %3, %3 : vector<512x8xf32>
    %cst_11 = arith.constant dense<0.000000e+00> : vector<8xf32>
    %11 = vector.multi_reduction <add>, %10, %cst_11 [0] : vector<512x8xf32> to vector<8xf32>
    %12 = vector.shape_cast %11 : vector<8xf32> to vector<1x8xf32>
    %cst_12 = arith.constant 0.001953125 : f32
    %13 = vector.broadcast %cst_12 : f32 to vector<1x8xf32>
    %14 = arith.mulf %12, %13 : vector<1x8xf32>
    %15 = arith.mulf %9, %9 : vector<1x8xf32>
    %16 = arith.subf %14, %15 : vector<1x8xf32>
    %cst_13 = arith.constant 9.99999974E-6 : f32
    %17 = vector.broadcast %cst_13 : f32 to vector<1x8xf32>
    %18 = arith.addf %16, %17 : vector<1x8xf32>
    %19 = math.rsqrt %18 : vector<1x8xf32>
    %20 = arith.mulf %4, %19 : vector<1x8xf32>
    %21 = arith.mulf %9, %20 : vector<1x8xf32>
    %22 = arith.subf %5, %21 : vector<1x8xf32>
    %23 = vector.broadcast %20 : vector<1x8xf32> to vector<512x8xf32>
    %24 = arith.mulf %3, %23 : vector<512x8xf32>
    %25 = vector.broadcast %22 : vector<1x8xf32> to vector<512x8xf32>
    %26 = arith.addf %24, %25 : vector<512x8xf32>
    %cst_14 = arith.constant 0.000000e+00 : f32
    %27 = vector.broadcast %cst_14 : f32 to vector<512x8xf32>
    %28 = arith.maximumf %26, %27 : vector<512x8xf32>
    %29 = vector.shape_cast %28 : vector<512x8xf32> to vector<2x16x16x8xf32>
    %c0_15 = arith.constant 0 : index
    %c1 = arith.constant 1 : index
    %c1_16 = arith.constant 1 : index
    %c0_17 = arith.constant 0 : index
    %30 = vector.load %arg11[%c0_15, %c1, %c1_16, %c0_17] : memref<2x18x18x8xf32, #tpu.memory_space<vmem>>, vector<2x16x16x8xf32>
    tpu.vector_store %arg11[%c0_15, %c1, %c1_16, %c0_17], %29 {strides = array<i32>} : memref<2x18x18x8xf32, #tpu.memory_space<vmem>>, vector<2x16x16x8xf32>,
    %31 = vector.extract_strided_slice %29 {offsets = [0, 1, 0, 0], sizes = [2, 1, 16, 8], strides = [1, 1, 1, 1]} : vector<2x16x16x8xf32> to vector<2x1x16x8xf32>
    %c0_18 = arith.constant 0 : index
    %c0_19 = arith.constant 0 : index
    %c1_20 = arith.constant 1 : index
    %c0_21 = arith.constant 0 : index
    %32 = vector.load %arg11[%c0_18, %c0_19, %c1_20, %c0_21] : memref<2x18x18x8xf32, #tpu.memory_space<vmem>>, vector<2x1x16x8xf32>
    tpu.vector_store %arg11[%c0_18, %c0_19, %c1_20, %c0_21], %31 {strides = array<i32>} : memref<2x18x18x8xf32, #tpu.memory_space<vmem>>, vector<2x1x16x8xf32>,
    %33 = vector.extract_strided_slice %29 {offsets = [0, 14, 0, 0], sizes = [2, 1, 16, 8], strides = [1, 1, 1, 1]} : vector<2x16x16x8xf32> to vector<2x1x16x8xf32>
    %c0_22 = arith.constant 0 : index
    %c17 = arith.constant 17 : index
    %c1_23 = arith.constant 1 : index
    %c0_24 = arith.constant 0 : index
    %34 = vector.load %arg11[%c0_22, %c17, %c1_23, %c0_24] : memref<2x18x18x8xf32, #tpu.memory_space<vmem>>, vector<2x1x16x8xf32>
    tpu.vector_store %arg11[%c0_22, %c17, %c1_23, %c0_24], %33 {strides = array<i32>} : memref<2x18x18x8xf32, #tpu.memory_space<vmem>>, vector<2x1x16x8xf32>,
    %c0_25 = arith.constant 0 : index
    %c0_26 = arith.constant 0 : index
    %c2 = arith.constant 2 : index
    %c0_27 = arith.constant 0 : index
    %35 = vector.load %arg11[%c0_25, %c0_26, %c2, %c0_27] : memref<2x18x18x8xf32, #tpu.memory_space<vmem>>, vector<2x18x1x8xf32>
    %c0_28 = arith.constant 0 : index
    %c0_29 = arith.constant 0 : index
    %c0_30 = arith.constant 0 : index
    %c0_31 = arith.constant 0 : index
    %36 = vector.load %arg11[%c0_28, %c0_29, %c0_30, %c0_31] : memref<2x18x18x8xf32, #tpu.memory_space<vmem>>, vector<2x18x1x8xf32>
    tpu.vector_store %arg11[%c0_28, %c0_29, %c0_30, %c0_31], %35 {strides = array<i32>} : memref<2x18x18x8xf32, #tpu.memory_space<vmem>>, vector<2x18x1x8xf32>,
    %c0_32 = arith.constant 0 : index
    %c0_33 = arith.constant 0 : index
    %c15 = arith.constant 15 : index
    %c0_34 = arith.constant 0 : index
    %37 = vector.load %arg11[%c0_32, %c0_33, %c15, %c0_34] : memref<2x18x18x8xf32, #tpu.memory_space<vmem>>, vector<2x18x1x8xf32>
    %c0_35 = arith.constant 0 : index
    %c0_36 = arith.constant 0 : index
    %c17_37 = arith.constant 17 : index
    %c0_38 = arith.constant 0 : index
    %38 = vector.load %arg11[%c0_35, %c0_36, %c17_37, %c0_38] : memref<2x18x18x8xf32, #tpu.memory_space<vmem>>, vector<2x18x1x8xf32>
    tpu.vector_store %arg11[%c0_35, %c0_36, %c17_37, %c0_38], %37 {strides = array<i32>} : memref<2x18x18x8xf32, #tpu.memory_space<vmem>>, vector<2x18x1x8xf32>,
    %c0_39 = arith.constant 0 : index
    %c0_40 = arith.constant 0 : index
    %c0_41 = arith.constant 0 : index
    %c0_42 = arith.constant 0 : index
    %39 = vector.load %arg11[%c0_39, %c0_40, %c0_41, %c0_42] : memref<2x18x18x8xf32, #tpu.memory_space<vmem>>, vector<2x18x18x8xf32>
    %40 = vector.extract_strided_slice %39 {offsets = [0, 0, 0, 0], sizes = [2, 16, 16, 8], strides = [1, 1, 1, 1]} : vector<2x18x18x8xf32> to vector<2x16x16x8xf32>
    %41 = vector.shape_cast %40 : vector<2x16x16x8xf32> to vector<512x8xf32>
    %42 = vector.extract_strided_slice %39 {offsets = [0, 0, 1, 0], sizes = [2, 16, 16, 8], strides = [1, 1, 1, 1]} : vector<2x18x18x8xf32> to vector<2x16x16x8xf32>
    %43 = vector.shape_cast %42 : vector<2x16x16x8xf32> to vector<512x8xf32>
    %44 = vector.extract_strided_slice %39 {offsets = [0, 0, 2, 0], sizes = [2, 16, 16, 8], strides = [1, 1, 1, 1]} : vector<2x18x18x8xf32> to vector<2x16x16x8xf32>
    %45 = vector.shape_cast %44 : vector<2x16x16x8xf32> to vector<512x8xf32>
    %46 = vector.extract_strided_slice %39 {offsets = [0, 1, 0, 0], sizes = [2, 16, 16, 8], strides = [1, 1, 1, 1]} : vector<2x18x18x8xf32> to vector<2x16x16x8xf32>
    %47 = vector.shape_cast %46 : vector<2x16x16x8xf32> to vector<512x8xf32>
    %48 = vector.extract_strided_slice %39 {offsets = [0, 1, 1, 0], sizes = [2, 16, 16, 8], strides = [1, 1, 1, 1]} : vector<2x18x18x8xf32> to vector<2x16x16x8xf32>
    %49 = vector.shape_cast %48 : vector<2x16x16x8xf32> to vector<512x8xf32>
    %50 = vector.extract_strided_slice %39 {offsets = [0, 1, 2, 0], sizes = [2, 16, 16, 8], strides = [1, 1, 1, 1]} : vector<2x18x18x8xf32> to vector<2x16x16x8xf32>
    %51 = vector.shape_cast %50 : vector<2x16x16x8xf32> to vector<512x8xf32>
    %52 = vector.extract_strided_slice %39 {offsets = [0, 2, 0, 0], sizes = [2, 16, 16, 8], strides = [1, 1, 1, 1]} : vector<2x18x18x8xf32> to vector<2x16x16x8xf32>
    %53 = vector.shape_cast %52 : vector<2x16x16x8xf32> to vector<512x8xf32>
    %54 = vector.extract_strided_slice %39 {offsets = [0, 2, 1, 0], sizes = [2, 16, 16, 8], strides = [1, 1, 1, 1]} : vector<2x18x18x8xf32> to vector<2x16x16x8xf32>
    %55 = vector.shape_cast %54 : vector<2x16x16x8xf32> to vector<512x8xf32>
    %56 = vector.extract_strided_slice %39 {offsets = [0, 2, 2, 0], sizes = [2, 16, 16, 8], strides = [1, 1, 1, 1]} : vector<2x18x18x8xf32> to vector<2x16x16x8xf32>
    %57 = vector.shape_cast %56 : vector<2x16x16x8xf32> to vector<512x8xf32>
    %58 = tpu.concatenate %41, %43, %45, %47, %49, %51, %53, %55, %57 in 1 : vector<512x8xf32>, vector<512x8xf32>, vector<512x8xf32>, vector<512x8xf32>, vector<512x8xf32>, vector<512x8xf32>, vector<512x8xf32>, vector<512x8xf32>, vector<512x8xf32> -> vector<512x72xf32>
    %c0_43 = arith.constant 0 : index
    %c0_44 = arith.constant 0 : index
    %59 = vector.load %arg4[%c0_43, %c0_44] : memref<72x8xf32, #tpu.memory_space<vmem>>, vector<72x8xf32>
    %cst_45 = arith.constant dense<0.000000e+00> : vector<512x8xf32>
    %60 = tpu.matmul %58, %59, %cst_45 {dimension_numbers = #tpu.dot_dimension_numbers<[1], [0], [0], [1], [0, 0, 1, 1], [], []>} : vector<512x72xf32>, vector<72x8xf32>, vector<512x8xf32> -> vector<512x8xf32>
    %c0_46 = arith.constant 0 : index
    %c0_47 = arith.constant 0 : index
    %61 = vector.load %arg5[%c0_46, %c0_47] : memref<1x8xf32, #tpu.memory_space<vmem>>, vector<1x8xf32>
    %c0_48 = arith.constant 0 : index
    %c0_49 = arith.constant 0 : index
    %62 = vector.load %arg6[%c0_48, %c0_49] : memref<1x8xf32, #tpu.memory_space<vmem>>, vector<1x8xf32>
    %cst_50 = arith.constant dense<0.000000e+00> : vector<8xf32>
    %63 = vector.multi_reduction <add>, %60, %cst_50 [0] : vector<512x8xf32> to vector<8xf32>
    %64 = vector.shape_cast %63 : vector<8xf32> to vector<1x8xf32>
    %cst_51 = arith.constant 0.001953125 : f32
    %65 = vector.broadcast %cst_51 : f32 to vector<1x8xf32>
    %66 = arith.mulf %64, %65 : vector<1x8xf32>
    %67 = arith.mulf %60, %60 : vector<512x8xf32>
    %cst_52 = arith.constant dense<0.000000e+00> : vector<8xf32>
    %68 = vector.multi_reduction <add>, %67, %cst_52 [0] : vector<512x8xf32> to vector<8xf32>
    %69 = vector.shape_cast %68 : vector<8xf32> to vector<1x8xf32>
    %cst_53 = arith.constant 0.001953125 : f32
    %70 = vector.broadcast %cst_53 : f32 to vector<1x8xf32>
    %71 = arith.mulf %69, %70 : vector<1x8xf32>
    %72 = arith.mulf %66, %66 : vector<1x8xf32>
    %73 = arith.subf %71, %72 : vector<1x8xf32>
    %cst_54 = arith.constant 9.99999974E-6 : f32
    %74 = vector.broadcast %cst_54 : f32 to vector<1x8xf32>
    %75 = arith.addf %73, %74 : vector<1x8xf32>
    %76 = math.rsqrt %75 : vector<1x8xf32>
    %77 = arith.mulf %61, %76 : vector<1x8xf32>
    %78 = arith.mulf %66, %77 : vector<1x8xf32>
    %79 = arith.subf %62, %78 : vector<1x8xf32>
    %80 = vector.broadcast %77 : vector<1x8xf32> to vector<512x8xf32>
    %81 = arith.mulf %60, %80 : vector<512x8xf32>
    %82 = vector.broadcast %79 : vector<1x8xf32> to vector<512x8xf32>
    %83 = arith.addf %81, %82 : vector<512x8xf32>
    %cst_55 = arith.constant 0.000000e+00 : f32
    %84 = vector.broadcast %cst_55 : f32 to vector<512x8xf32>
    %85 = arith.maximumf %83, %84 : vector<512x8xf32>
    %c0_56 = arith.constant 0 : index
    %c0_57 = arith.constant 0 : index
    %86 = vector.load %arg7[%c0_56, %c0_57] : memref<8x32xf32, #tpu.memory_space<vmem>>, vector<8x32xf32>
    %cst_58 = arith.constant dense<0.000000e+00> : vector<512x32xf32>
    %87 = tpu.matmul %85, %86, %cst_58 {dimension_numbers = #tpu.dot_dimension_numbers<[1], [0], [0], [1], [0, 0, 1, 1], [], []>} : vector<512x8xf32>, vector<8x32xf32>, vector<512x32xf32> -> vector<512x32xf32>
    %c0_59 = arith.constant 0 : index
    %c0_60 = arith.constant 0 : index
    %88 = vector.load %arg8[%c0_59, %c0_60] : memref<1x32xf32, #tpu.memory_space<vmem>>, vector<1x32xf32>
    %c0_61 = arith.constant 0 : index
    %c0_62 = arith.constant 0 : index
    %89 = vector.load %arg9[%c0_61, %c0_62] : memref<1x32xf32, #tpu.memory_space<vmem>>, vector<1x32xf32>
    %cst_63 = arith.constant dense<0.000000e+00> : vector<32xf32>
    %90 = vector.multi_reduction <add>, %87, %cst_63 [0] : vector<512x32xf32> to vector<32xf32>
    %91 = vector.shape_cast %90 : vector<32xf32> to vector<1x32xf32>
    %cst_64 = arith.constant 0.001953125 : f32
    %92 = vector.broadcast %cst_64 : f32 to vector<1x32xf32>
    %93 = arith.mulf %91, %92 : vector<1x32xf32>
    %94 = arith.mulf %87, %87 : vector<512x32xf32>
    %cst_65 = arith.constant dense<0.000000e+00> : vector<32xf32>
    %95 = vector.multi_reduction <add>, %94, %cst_65 [0] : vector<512x32xf32> to vector<32xf32>
    %96 = vector.shape_cast %95 : vector<32xf32> to vector<1x32xf32>
    %cst_66 = arith.constant 0.001953125 : f32
    %97 = vector.broadcast %cst_66 : f32 to vector<1x32xf32>
    %98 = arith.mulf %96, %97 : vector<1x32xf32>
    %99 = arith.mulf %93, %93 : vector<1x32xf32>
    %100 = arith.subf %98, %99 : vector<1x32xf32>
    %cst_67 = arith.constant 9.99999974E-6 : f32
    %101 = vector.broadcast %cst_67 : f32 to vector<1x32xf32>
    %102 = arith.addf %100, %101 : vector<1x32xf32>
    %103 = math.rsqrt %102 : vector<1x32xf32>
    %104 = arith.mulf %88, %103 : vector<1x32xf32>
    %105 = arith.mulf %93, %104 : vector<1x32xf32>
    %106 = arith.subf %89, %105 : vector<1x32xf32>
    %107 = vector.broadcast %104 : vector<1x32xf32> to vector<512x32xf32>
    %108 = arith.mulf %87, %107 : vector<512x32xf32>
    %109 = vector.broadcast %106 : vector<1x32xf32> to vector<512x32xf32>
    %110 = arith.addf %108, %109 : vector<512x32xf32>
    %111 = arith.addf %110, %1 : vector<512x32xf32>
    %cst_68 = arith.constant 0.000000e+00 : f32
    %112 = vector.broadcast %cst_68 : f32 to vector<512x32xf32>
    %113 = arith.maximumf %111, %112 : vector<512x32xf32>
    %114 = vector.shape_cast %113 : vector<512x32xf32> to vector<2x16x16x32xf32>
    %c0_69 = arith.constant 0 : index
    %c0_70 = arith.constant 0 : index
    %c0_71 = arith.constant 0 : index
    %c0_72 = arith.constant 0 : index
    %115 = vector.load %arg10[%c0_69, %c0_70, %c0_71, %c0_72] : memref<2x16x16x32xf32, #tpu.memory_space<vmem>>, vector<2x16x16x32xf32>
    tpu.vector_store %arg10[%c0_69, %c0_70, %c0_71, %c0_72], %114 {strides = array<i32>} : memref<2x16x16x32xf32, #tpu.memory_space<vmem>>, vector<2x16x16x32xf32>,
    return
  }
}

</mosaic_0001>

<bundles_post_ra>
// kernel: tpu_custom_call.1
= control target key start
LH: loop header
LB: loop body
LE: loop exit
PB: predicated region body
PF: predicated region fallthrough
CT: control target
= control target key end

     0   :  { %15 = vsyncpa [#allocation4], 0  ;;  %s14562_s0 = inlined_call_operand.hbm [shape: f32[2,16,16,32], index: 0, kind: input, shape index: {}]   ;;  %s14563_s1 = inlined_call_operand.vmem [shape: f32[32,8], index: 1, kind: input, shape index: {}]   ;;  %s14564_s2 = inlined_call_operand.vmem [shape: f32[1,8], index: 2, kind: input, shape index: {}]   ;;  %s14565_s3 = inlined_call_operand.vmem [shape: f32[1,8], index: 3, kind: input, shape index: {}]   ;;  %s14566_s4 = inlined_call_operand.vmem [shape: f32[72,8], index: 4, kind: input, shape index: {}]   ;;  %s14567_s5 = inlined_call_operand.vmem [shape: f32[1,8], index: 5, kind: input, shape index: {}]   ;;  %s14568_s6 = inlined_call_operand.vmem [shape: f32[1,8], index: 6, kind: input, shape index: {}]   ;;  %s14569_s7 = inlined_call_operand.vmem [shape: f32[8,32], index: 7, kind: input, shape index: {}]   ;;  %s14570_s8 = inlined_call_operand.vmem [shape: f32[1,32], index: 8, kind: input, shape index: {}]   ;;  %s14571_s9 = inlined_call_operand.vmem [shape: f32[1,32], index: 9, kind: input, shape index: {}]   ;;  %s14572_s10 = inlined_call_operand.hbm [shape: f32[2,16,16,32], index: 10, kind: output, shape index: {}]  }
   0x1   :  { %16 = vsyncpa [#allocation5], 0  ;;  %s7432_s13 = smov [#allocation3]   ;;  %s7384_s17 = scalar_lea.hbm %s14562_s0, 8192 }
   0x2   :  { %s22_s14 = sshll.u32 %s7432_s13, 4  ;;  %p7385_p0 = scmp.ne.s32.totalorder %s14562_s0, %s7384_s17  ;;  %s23_s14 = int_to_ptr.vmem [resolvable:$true] %s22_s14 }
   0x3   :  { %p7388_p1 = scmp.lt.u32.totalorder %s7384_s17, %s14562_s0 }
   0x5   :  { %p7390_p2 = pnand %p7388_p1, %p7385_p0 }
   0x7   :  { %7393 = shalt.err (!%p7390_p2)
}
   0x8   :  { %s7394_s22 = scalar_lea.vmem %s23_s14, 8192  ;;  %p7399_p4 = scmp.lt.s32.totalorder %s23_s14, %s23_s14 }
   0x9   :  { %p7395_p3 = scmp.ne.s32.totalorder %s23_s14, %s7394_s22  ;;  %p7400_p5 = scmp.lt.s32.totalorder %s7394_s22, %s7394_s22 }
   0xb   :  { %p7401_p6 = por %p7400_p5, %p7399_p4 }
   0xd   :  { %p7402_p7 = pnand %p7401_p6, %p7395_p3 }
   0xf   :  { %7405 = shalt.err (!%p7402_p7)
}
  0x10   :  { %s7433_s23 = smov 128   ;;  %s7434_s24 = smov 8  }
  0x11   :  { %28 = dma.hbm_to_vmem [thread:$0]  %s14562_s0, 8192, %s23_s14, [#allocation4], %s7433_s23, %s7433_s23, %s7434_s24  }
  0x12   :  { %7428 = dma.done.wait [#allocation4], 8192  }
  0x13   :  { %7429 = vsyncadd [#allocation4], 4294959104  ;;  %vm118_vm0 = vcmask 261120   ;;  %v114_v0 = vld [vmem:[%s14563_s1] sm:$0xff]  ;;  %v115_v1 = vld [vmem:[%s14563_s1 + $0x8] sm:$0xff]  ;;  %vm698_vm1 = vcmask 64512  }
  0x14   :  { %v116_v2 = vld [vmem:[%s14563_s1 + $0x10] sm:$0xff]  ;;  %v7207_v3 = vpack.c.bf16 %v115_v1, %v114_v0  ;;  %v117_v4 = vld [vmem:[%s14563_s1 + $0x18] sm:$0xff]  ;;  %v50_v5 = vld [vmem:[#allocation3] sm:$0xff]  ;;  %vm1352_vm2 = vcmask 57344   ;;  %vm1665_vm3 = vcmask 1046528   ;;  %vm1826_vm4 = vcmask 1045504  }
  0x15   :  { %v7211_v6 = vpack.c.bf16 %v117_v4, %v116_v2  ;;  %6899 = vmatprep.mubr.msk.f32.mxu0 %vm118_vm0, %v50_v5  ;;  %v51_v7 = vld [vmem:[#allocation3 + $0x8] sm:$0xff]  ;;  %v52_v8 = vld [vmem:[#allocation3 + $0x10] sm:$0xff]  ;;  %v53_v9 = vld [vmem:[#allocation3 + $0x18] sm:$0xff]  ;;  %s7437_s17 = smov 16   ;;  %s7438_s18 = smov 32   ;;  %vm3639_vm5 = vcmask 130048  }
  0x16   :  { %7208 = vmatprep.subr.bf16.mxu0 %v7207_v3  ;;  %7231 = vmatprep.subr.bf16.mxu1 %v7207_v3  ;;  %v82_v10 = vld [vmem:[#allocation3 + $0x100] sm:$0xff]  ;;  %v83_v11 = vld [vmem:[#allocation3 + $0x108] sm:$0xff]  ;;  %v84_v12 = vld [vmem:[#allocation3 + $0x110] sm:$0xff]  ;;  %s7439_s19 = smov 40   ;;  %s7440_s20 = smov 56   ;;  %vm3704_vm6 = vcmask 195584  }
  0x17   :  { %7210 = vmatpush3.bf16.msra.mxu0 %v7207_v3  ;;  %7233 = vmatpush3.bf16.msra.mxu1 %v7207_v3  ;;  %v54_v13 = vld [vmem:[#allocation3 + $0x20] sm:$0xff]  ;;  %v85_v14 = vld [vmem:[#allocation3 + $0x118] sm:$0xff]  ;;  %v55_v15 = vld [vmem:[#allocation3 + $0x28] sm:$0xff]  ;;  %s7441_s21 = smov 64   ;;  %vm3833_vm7 = vcmask 326656   ;;  %vm3898_vm8 = vcmask 392192  }
  0x18   :  { %7212 = vmatprep.subr.bf16.mxu0 %v7211_v6  ;;  %7232 = vmatprep.subr.bf16.mxu1 %v7211_v6  ;;  %v86_v16 = vld [vmem:[#allocation3 + $0x120] sm:$0xff]  ;;  %v56_v17 = vld [vmem:[#allocation3 + $0x30] sm:$0xff]  ;;  %v87_v18 = vld [vmem:[#allocation3 + $0x128] sm:$0xff]  ;;  %vm3963_vm9 = vcmask 457728   ;;  %vm4102_vm10 = vcmask 588800   ;;  %vm4028_vm11 = vcmask 523264  }
  0x19   :  { %6947 = vmatprep.mubr.msk.f32.mxu1 %vm118_vm0, %v82_v10  ;;  %v57_v19 = vld [vmem:[#allocation3 + $0x38] sm:$0xff]  ;;  %v88_v20 = vld [vmem:[#allocation3 + $0x130] sm:$0xff]  ;;  %v58_v21 = vld [vmem:[#allocation3 + $0x40] sm:$0xff] }
  0x1a   :  { %v89_v22 = vld [vmem:[#allocation3 + $0x138] sm:$0xff]  ;;  %v59_v23 = vld [vmem:[#allocation3 + $0x48] sm:$0xff]  ;;  %v90_v24 = vld [vmem:[#allocation3 + $0x140] sm:$0xff] }
  0x1b   :  { %7214 = vmatpush3.bf16.msra.mxu0 %v7211_v6  ;;  %7234 = vmatpush3.bf16.msra.mxu1 %v7211_v6  ;;  %v60_v25 = vld [vmem:[#allocation3 + $0x50] sm:$0xff]  ;;  %v91_v26 = vld [vmem:[#allocation3 + $0x148] sm:$0xff]  ;;  %v61_v27 = vld [vmem:[#allocation3 + $0x58] sm:$0xff] }
  0x1c   :  { %v92_v28 = vld [vmem:[#allocation3 + $0x150] sm:$0xff]  ;;  %v62_v29 = vld [vmem:[#allocation3 + $0x60] sm:$0xff]  ;;  %v93_v30 = vld [vmem:[#allocation3 + $0x158] sm:$0xff] }
  0x1d   :  { %v63_v31 = vld [vmem:[#allocation3 + $0x68] sm:$0xff]  ;;  %v94_v32 = vld [vmem:[#allocation3 + $0x160] sm:$0xff]  ;;  %v64_v33 = vld [vmem:[#allocation3 + $0x70] sm:$0xff] }
  0x1e   :  { %6900 = vmatmul.mubr.msk.f32.vlgmr.msra.gmra.mrb[0].mxu0 %vm118_vm0, %v51_v7  ;;  %6948 = vmatmul.mubr.msk.f32.vlgmr.msra.gmra.mrb[0].mxu1 %vm118_vm0, %v83_v11  ;;  %v95_v34 = vld [vmem:[#allocation3 + $0x168] sm:$0xff]  ;;  %v65_v35 = vld [vmem:[#allocation3 + $0x78] sm:$0xff]  ;;  %v96_v36 = vld [vmem:[#allocation3 + $0x170] sm:$0xff] }
  0x1f   :  { %6902 = vmatprep.mubr.msk.f32.mxu0 %vm118_vm0, %v52_v8  ;;  %6950 = vmatprep.mubr.msk.f32.mxu1 %vm118_vm0, %v84_v12  ;;  %v66_v37 = vld [vmem:[#allocation3 + $0x80] sm:$0xff]  ;;  %v97_v38 = vld [vmem:[#allocation3 + $0x178] sm:$0xff]  ;;  %v67_v39 = vld [vmem:[#allocation3 + $0x88] sm:$0xff] }
  0x20   :  { %v98_v40 = vld [vmem:[#allocation3 + $0x180] sm:$0xff]  ;;  %v68_v41 = vld [vmem:[#allocation3 + $0x90] sm:$0xff]  ;;  %v99_v42 = vld [vmem:[#allocation3 + $0x188] sm:$0xff] }
  0x21   :  { %v69_v43 = vld [vmem:[#allocation3 + $0x98] sm:$0xff]  ;;  %v100_v44 = vld [vmem:[#allocation3 + $0x190] sm:$0xff]  ;;  %v70_v45 = vld [vmem:[#allocation3 + $0xa0] sm:$0xff] }
  0x22   :  { %6903 = vmatmul.mubr.msk.f32.gmra.mrb[2].mxu0 %vm118_vm0, %v53_v9  ;;  %6951 = vmatmul.mubr.msk.f32.gmra.mrb[2].mxu1 %vm118_vm0, %v85_v14  ;;  %v101_v46 = vld [vmem:[#allocation3 + $0x198] sm:$0xff]  ;;  %v71_v47 = vld [vmem:[#allocation3 + $0xa8] sm:$0xff]  ;;  %v102_v48 = vld [vmem:[#allocation3 + $0x1a0] sm:$0xff] }
  0x23   :  { %6905 = vmatprep.mubr.msk.f32.mxu0 %vm118_vm0, %v54_v13  ;;  %6953 = vmatprep.mubr.msk.f32.mxu1 %vm118_vm0, %v86_v16  ;;  %v72_v49 = vld [vmem:[#allocation3 + $0xb0] sm:$0xff]  ;;  %v103_v50 = vld [vmem:[#allocation3 + $0x1a8] sm:$0xff]  ;;  %v73_v51 = vld [vmem:[#allocation3 + $0xb8] sm:$0xff] }
  0x24   :  { %v104_v52 = vld [vmem:[#allocation3 + $0x1b0] sm:$0xff]  ;;  %v74_v53 = vld [vmem:[#allocation3 + $0xc0] sm:$0xff]  ;;  %v105_v54 = vld [vmem:[#allocation3 + $0x1b8] sm:$0xff] }
  0x25   :  { %v75_v55 = vld [vmem:[#allocation3 + $0xc8] sm:$0xff]  ;;  %v106_v56 = vld [vmem:[#allocation3 + $0x1c0] sm:$0xff]  ;;  %v76_v57 = vld [vmem:[#allocation3 + $0xd0] sm:$0xff] }
  0x26   :  { %6906 = vmatmul.mubr.msk.f32.gmra.mrb[4].mxu0 %vm118_vm0, %v55_v15  ;;  %6954 = vmatmul.mubr.msk.f32.gmra.mrb[4].mxu1 %vm118_vm0, %v87_v18  ;;  %v107_v58 = vld [vmem:[#allocation3 + $0x1c8] sm:$0xff]  ;;  %v77_v59 = vld [vmem:[#allocation3 + $0xd8] sm:$0xff]  ;;  %v108_v60 = vld [vmem:[#allocation3 + $0x1d0] sm:$0xff] }
  0x27   :  { %6908 = vmatprep.mubr.msk.f32.mxu0 %vm118_vm0, %v56_v17  ;;  %6956 = vmatprep.mubr.msk.f32.mxu1 %vm118_vm0, %v88_v20  ;;  %v78_v61 = vld [vmem:[#allocation3 + $0xe0] sm:$0xff]  ;;  %v109_v62 = vld [vmem:[#allocation3 + $0x1d8] sm:$0xff]  ;;  %v79_v63 = vld [vmem:[#allocation3 + $0xe8] sm:$0xff] }
  0x28   :  { %v110_v0 = vld [vmem:[#allocation3 + $0x1e0] sm:$0xff]  ;;  %v80_v1 = vld [vmem:[#allocation3 + $0xf0] sm:$0xff]  ;;  %v111_v2 = vld [vmem:[#allocation3 + $0x1e8] sm:$0xff] }
  0x29   :  { %v81_v3 = vld [vmem:[#allocation3 + $0xf8] sm:$0xff]  ;;  %v112_v4 = vld [vmem:[#allocation3 + $0x1f0] sm:$0xff] }
  0x2a   :  { %6909 = vmatmul.mubr.msk.f32.gmra.mrb[6].mxu0 %vm118_vm0, %v57_v19  ;;  %6957 = vmatmul.mubr.msk.f32.gmra.mrb[6].mxu1 %vm118_vm0, %v89_v22  ;;  %v113_v5 = vld [vmem:[#allocation3 + $0x1f8] sm:$0xff] }
  0x2b   :  { %6911 = vmatprep.mubr.msk.f32.mxu0 %vm118_vm0, %v58_v21  ;;  %6959 = vmatprep.mubr.msk.f32.mxu1 %vm118_vm0, %v90_v24 }
  0x2e   :  { %6912 = vmatmul.mubr.msk.f32.gmra.mrb[8].mxu0 %vm118_vm0, %v59_v23  ;;  %6960 = vmatmul.mubr.msk.f32.gmra.mrb[8].mxu1 %vm118_vm0, %v91_v26 }
  0x2f   :  { %6914 = vmatprep.mubr.msk.f32.mxu0 %vm118_vm0, %v60_v25  ;;  %6962 = vmatprep.mubr.msk.f32.mxu1 %vm118_vm0, %v92_v28 }
  0x32   :  { %6915 = vmatmul.mubr.msk.f32.gmra.mrb[10].mxu0 %vm118_vm0, %v61_v27  ;;  %6963 = vmatmul.mubr.msk.f32.gmra.mrb[10].mxu1 %vm118_vm0, %v93_v30 }
  0x33   :  { %6917 = vmatprep.mubr.msk.f32.mxu0 %vm118_vm0, %v62_v29  ;;  %6965 = vmatprep.mubr.msk.f32.mxu1 %vm118_vm0, %v94_v32 }
  0x36   :  { %6918 = vmatmul.mubr.msk.f32.gmra.mrb[12].mxu0 %vm118_vm0, %v63_v31  ;;  %6966 = vmatmul.mubr.msk.f32.gmra.mrb[12].mxu1 %vm118_vm0, %v95_v34 }
  0x37   :  { %6920 = vmatprep.mubr.msk.f32.mxu0 %vm118_vm0, %v64_v33  ;;  %6968 = vmatprep.mubr.msk.f32.mxu1 %vm118_vm0, %v96_v36 }
  0x3a   :  { %6921 = vmatmul.mubr.msk.f32.gmra.mrb[14].mxu0 %vm118_vm0, %v65_v35  ;;  %6969 = vmatmul.mubr.msk.f32.gmra.mrb[14].mxu1 %vm118_vm0, %v97_v38 }
  0x3b   :  { %6923 = vmatprep.mubr.msk.f32.mxu0 %vm118_vm0, %v66_v37  ;;  %6971 = vmatprep.mubr.msk.f32.mxu1 %vm118_vm0, %v98_v40 }
  0x3e   :  { %6924 = vmatmul.mubr.msk.f32.gmra.mrb[16].mxu0 %vm118_vm0, %v67_v39  ;;  %6972 = vmatmul.mubr.msk.f32.gmra.mrb[16].mxu1 %vm118_vm0, %v99_v42 }
  0x3f   :  { %6926 = vmatprep.mubr.msk.f32.mxu0 %vm118_vm0, %v68_v41  ;;  %6974 = vmatprep.mubr.msk.f32.mxu1 %vm118_vm0, %v100_v44 }
  0x42   :  { %6927 = vmatmul.mubr.msk.f32.gmra.mrb[18].mxu0 %vm118_vm0, %v69_v43  ;;  %6975 = vmatmul.mubr.msk.f32.gmra.mrb[18].mxu1 %vm118_vm0, %v101_v46 }
  0x43   :  { %6929 = vmatprep.mubr.msk.f32.mxu0 %vm118_vm0, %v70_v45  ;;  %6977 = vmatprep.mubr.msk.f32.mxu1 %vm118_vm0, %v102_v48 }
  0x46   :  { %6930 = vmatmul.mubr.msk.f32.gmra.mrb[20].mxu0 %vm118_vm0, %v71_v47  ;;  %6978 = vmatmul.mubr.msk.f32.gmra.mrb[20].mxu1 %vm118_vm0, %v103_v50 }
  0x47   :  { %6932 = vmatprep.mubr.msk.f32.mxu0 %vm118_vm0, %v72_v49  ;;  %6980 = vmatprep.mubr.msk.f32.mxu1 %vm118_vm0, %v104_v52 }
  0x4a   :  { %6933 = vmatmul.mubr.msk.f32.gmra.mrb[22].mxu0 %vm118_vm0, %v73_v51  ;;  %6981 = vmatmul.mubr.msk.f32.gmra.mrb[22].mxu1 %vm118_vm0, %v105_v54 }
  0x4b   :  { %6935 = vmatprep.mubr.msk.f32.mxu0 %vm118_vm0, %v74_v53  ;;  %6983 = vmatprep.mubr.msk.f32.mxu1 %vm118_vm0, %v106_v56 }
  0x4e   :  { %6936 = vmatmul.mubr.msk.f32.gmra.mrb[24].mxu0 %vm118_vm0, %v75_v55  ;;  %6984 = vmatmul.mubr.msk.f32.gmra.mrb[24].mxu1 %vm118_vm0, %v107_v58 }
  0x4f   :  { %6938 = vmatprep.mubr.msk.f32.mxu0 %vm118_vm0, %v76_v57  ;;  %6986 = vmatprep.mubr.msk.f32.mxu1 %vm118_vm0, %v108_v60 }
  0x52   :  { %6939 = vmatmul.mubr.msk.f32.gmra.mrb[26].mxu0 %vm118_vm0, %v77_v59  ;;  %6987 = vmatmul.mubr.msk.f32.gmra.mrb[26].mxu1 %vm118_vm0, %v109_v62 }
  0x53   :  { %6941 = vmatprep.mubr.msk.f32.mxu0 %vm118_vm0, %v78_v61  ;;  %6989 = vmatprep.mubr.msk.f32.mxu1 %vm118_vm0, %v110_v0 }
  0x56   :  { %6942 = vmatmul.mubr.msk.f32.gmra.mrb[28].mxu0 %vm118_vm0, %v79_v63  ;;  %6990 = vmatmul.mubr.msk.f32.gmra.mrb[28].mxu1 %vm118_vm0, %v111_v2 }
  0x57   :  { %6944 = vmatprep.mubr.msk.f32.mxu0 %vm118_vm0, %v80_v1  ;;  %6992 = vmatprep.mubr.msk.f32.mxu1 %vm118_vm0, %v112_v4 }
  0x5a   :  { %6945 = vmatmul.mubr.msk.f32.gmra.mrb[30].mxu0 %vm118_vm0, %v81_v3  ;;  %6993 = vmatmul.mubr.msk.f32.gmra.mrb[30].mxu1 %vm118_vm0, %v113_v5 }
  0xf1   :  { %v7589_v6 = vpop.f32.mrb[0].mxu0  ;;  %v7602_v14 = vpop.f32.mrb[0].mxu1 }
  0xf2   :  { %v700_v7 = vsel %vm698_vm1, %v7589_v6, 0.0  ;;  %v834_v8 = vmul.f32 %v7589_v6, %v7589_v6  ;;  %v7595_v9 = vpop.f32.mrb[1].mxu0  ;;  %v7607_v17 = vpop.f32.mrb[1].mxu1 }
  0xf3   :  { %v699_v10 = vsel %vm698_vm1, %v7595_v9, 0.0  ;;  %v833_v11 = vmul.f32 %v7595_v9, %v7595_v9  ;;  %14868 = vst [vmem:[#allocation9_spill] sm:$0xff] %v7607_v17 }
  0xf4   :  { %v898_v12 = vsel %vm698_vm1, %v834_v8, 0.0  ;;  %v701_v13 = vadd.f32 %v700_v7, %v699_v10 }
  0xf5   :  { %v897_v15 = vsel %vm698_vm1, %v833_v11, 0.0  ;;  %v7605_v16 = vpop.f32.mrb[2].mxu0  ;;  %v7617_v24 = vpop.f32.mrb[2].mxu1 }
  0xf6   :  { %v899_v18 = vadd.f32 %v898_v12, %v897_v15  ;;  %v7609_v19 = vpop.f32.mrb[3].mxu0  ;;  %v836_v20 = vmul.f32 %v7605_v16, %v7605_v16  ;;  %v704_v25 = vsel %vm698_vm1, %v7605_v16, 0.0  ;;  %v7624_v28 = vpop.f32.mrb[3].mxu1 }
  0xf7   :  { %v702_v21 = vsel %vm698_vm1, %v7609_v19, 0.0  ;;  %v835_v22 = vmul.f32 %v7609_v19, %v7609_v19 }
  0xf8   :  { %v703_v23 = vadd.f32 %v702_v21, %v701_v13  ;;  %v902_v32 = vsel %vm698_vm1, %v836_v20, 0.0 }
  0xf9   :  { %v900_v26 = vsel %vm698_vm1, %v835_v22, 0.0  ;;  %v7622_v27 = vpop.f32.mrb[4].mxu0  ;;  %v7635_v38 = vpop.f32.mrb[4].mxu1 }
  0xfa   :  { %v705_v29 = vadd.f32 %v704_v25, %v703_v23  ;;  %v901_v30 = vadd.f32 %v900_v26, %v899_v18  ;;  %v7626_v31 = vpop.f32.mrb[5].mxu0  ;;  %v838_v33 = vmul.f32 %v7622_v27, %v7622_v27  ;;  %v708_v39 = vsel %vm698_vm1, %v7622_v27, 0.0  ;;  %v7642_v42 = vpop.f32.mrb[5].mxu1 }
  0xfb   :  { %v706_v34 = vsel %vm698_vm1, %v7626_v31, 0.0  ;;  %v837_v35 = vmul.f32 %v7626_v31, %v7626_v31 }
  0xfc   :  { %v903_v36 = vadd.f32 %v902_v32, %v901_v30  ;;  %v707_v37 = vadd.f32 %v706_v34, %v705_v29  ;;  %v906_v46 = vsel %vm698_vm1, %v838_v33, 0.0 }
  0xfd   :  { %v904_v40 = vsel %vm698_vm1, %v837_v35, 0.0  ;;  %v7640_v41 = vpop.f32.mrb[6].mxu0  ;;  %v7653_v52 = vpop.f32.mrb[6].mxu1 }
  0xfe   :  { %v905_v43 = vadd.f32 %v904_v40, %v903_v36  ;;  %v7644_v44 = vpop.f32.mrb[7].mxu0  ;;  %v709_v45 = vadd.f32 %v708_v39, %v707_v37  ;;  %v840_v47 = vmul.f32 %v7640_v41, %v7640_v41  ;;  %v712_v53 = vsel %vm698_vm1, %v7640_v41, 0.0  ;;  %v7660_v56 = vpop.f32.mrb[7].mxu1 }
  0xff   :  { %v710_v48 = vsel %vm698_vm1, %v7644_v44, 0.0  ;;  %v839_v49 = vmul.f32 %v7644_v44, %v7644_v44 }
 0x100   :  { %v711_v50 = vadd.f32 %v710_v48, %v709_v45  ;;  %v907_v51 = vadd.f32 %v906_v46, %v905_v43  ;;  %v910_v60 = vsel %vm698_vm1, %v840_v47, 0.0 }
 0x101   :  { %v908_v54 = vsel %vm698_vm1, %v839_v49, 0.0  ;;  %v7658_v55 = vpop.f32.mrb[8].mxu0  ;;  %v7671_v2 = vpop.f32.mrb[8].mxu1 }
 0x102   :  { %v909_v57 = vadd.f32 %v908_v54, %v907_v51  ;;  %v7662_v58 = vpop.f32.mrb[9].mxu0  ;;  %v713_v59 = vadd.f32 %v712_v53, %v711_v50  ;;  %v842_v61 = vmul.f32 %v7658_v55, %v7658_v55  ;;  %v716_v3 = vsel %vm698_vm1, %v7658_v55, 0.0  ;;  %v7678_v7 = vpop.f32.mrb[9].mxu1 }
 0x103   :  { %v714_v62 = vsel %vm698_vm1, %v7662_v58, 0.0  ;;  %v841_v63 = vmul.f32 %v7662_v58, %v7662_v58 }
 0x104   :  { %v715_v0 = vadd.f32 %v714_v62, %v713_v59  ;;  %v911_v1 = vadd.f32 %v910_v60, %v909_v57  ;;  %v914_v12 = vsel %vm698_vm1, %v842_v61, 0.0 }
 0x105   :  { %v912_v4 = vsel %vm698_vm1, %v841_v63, 0.0  ;;  %v7676_v5 = vpop.f32.mrb[10].mxu0  ;;  %v7689_v22 = vpop.f32.mrb[10].mxu1 }
 0x106   :  { %v913_v8 = vadd.f32 %v912_v4, %v911_v1  ;;  %v7680_v10 = vpop.f32.mrb[11].mxu0  ;;  %v717_v11 = vadd.f32 %v716_v3, %v715_v0  ;;  %v844_v13 = vmul.f32 %v7676_v5, %v7676_v5  ;;  %v720_v23 = vsel %vm698_vm1, %v7676_v5, 0.0  ;;  %v7696_v29 = vpop.f32.mrb[11].mxu1 }
 0x107   :  { %v718_v15 = vsel %vm698_vm1, %v7680_v10, 0.0  ;;  %v843_v18 = vmul.f32 %v7680_v10, %v7680_v10 }
 0x108   :  { %v719_v20 = vadd.f32 %v718_v15, %v717_v11  ;;  %v915_v21 = vadd.f32 %v914_v12, %v913_v8  ;;  %v918_v34 = vsel %vm698_vm1, %v844_v13, 0.0 }
 0x109   :  { %v916_v25 = vsel %vm698_vm1, %v843_v18, 0.0  ;;  %v7694_v26 = vpop.f32.mrb[12].mxu0  ;;  %v7707_v43 = vpop.f32.mrb[12].mxu1 }
 0x10a   :  { %v917_v30 = vadd.f32 %v916_v25, %v915_v21  ;;  %v7698_v32 = vpop.f32.mrb[13].mxu0  ;;  %v721_v33 = vadd.f32 %v720_v23, %v719_v20  ;;  %v846_v35 = vmul.f32 %v7694_v26, %v7694_v26  ;;  %v724_v45 = vsel %vm698_vm1, %v7694_v26, 0.0  ;;  %v7714_v48 = vpop.f32.mrb[13].mxu1 }
 0x10b   :  { %v722_v36 = vsel %vm698_vm1, %v7698_v32, 0.0  ;;  %v845_v37 = vmul.f32 %v7698_v32, %v7698_v32 }
 0x10c   :  { %v723_v39 = vadd.f32 %v722_v36, %v721_v33  ;;  %v919_v40 = vadd.f32 %v918_v34, %v917_v30  ;;  %v922_v53 = vsel %vm698_vm1, %v846_v35, 0.0 }
 0x10d   :  { %v920_v46 = vsel %vm698_vm1, %v845_v37, 0.0  ;;  %v7712_v47 = vpop.f32.mrb[14].mxu0  ;;  %v7725_v62 = vpop.f32.mrb[14].mxu1 }
 0x10e   :  { %14869 = vst [vmem:[#allocation10_spill] sm:$0xff] %v7712_v47  ;;  %v921_v49 = vadd.f32 %v920_v46, %v919_v40  ;;  %v7716_v50 = vpop.f32.mrb[15].mxu0  ;;  %v725_v51 = vadd.f32 %v724_v45, %v723_v39  ;;  %v848_v54 = vmul.f32 %v7712_v47, %v7712_v47  ;;  %v728_v63 = vsel %vm698_vm1, %v7712_v47, 0.0  ;;  %v7732_v3 = vpop.f32.mrb[15].mxu1 }
 0x10f   :  { %v726_v57 = vsel %vm698_vm1, %v7716_v50, 0.0  ;;  %v847_v59 = vmul.f32 %v7716_v50, %v7716_v50 }
 0x110   :  { %v727_v60 = vadd.f32 %v726_v57, %v725_v51  ;;  %v923_v61 = vadd.f32 %v922_v53, %v921_v49  ;;  %v926_v12 = vsel %vm698_vm1, %v848_v54, 0.0 }
 0x111   :  { %v924_v0 = vsel %vm698_vm1, %v847_v59, 0.0  ;;  %v7730_v1 = vpop.f32.mrb[16].mxu0  ;;  %v7743_v23 = vpop.f32.mrb[16].mxu1 }
 0x112   :  { %14870 = vst [vmem:[#allocation11_spill] sm:$0xff] %v7730_v1  ;;  %v925_v4 = vadd.f32 %v924_v0, %v923_v61  ;;  %v7734_v8 = vpop.f32.mrb[17].mxu0  ;;  %v729_v11 = vadd.f32 %v728_v63, %v727_v60  ;;  %v850_v13 = vmul.f32 %v7730_v1, %v7730_v1  ;;  %v732_v25 = vsel %vm698_vm1, %v7730_v1, 0.0  ;;  %v7750_v34 = vpop.f32.mrb[17].mxu1 }
 0x113   :  { %14871 = vst [vmem:[#allocation12_spill] sm:$0xff] %v7734_v8  ;;  %v730_v15 = vsel %vm698_vm1, %v7734_v8, 0.0  ;;  %v849_v18 = vmul.f32 %v7734_v8, %v7734_v8 }
 0x114   :  { %v731_v20 = vadd.f32 %v730_v15, %v729_v11  ;;  %v927_v21 = vadd.f32 %v926_v12, %v925_v4  ;;  %v930_v39 = vsel %vm698_vm1, %v850_v13, 0.0 }
 0x115   :  { %v928_v30 = vsel %vm698_vm1, %v849_v18, 0.0  ;;  %v7748_v33 = vpop.f32.mrb[18].mxu0  ;;  %v7761_v53 = vpop.f32.mrb[18].mxu1 }
 0x116   :  { %14872 = vst [vmem:[#allocation13_spill] sm:$0xff] %v7748_v33  ;;  %v929_v35 = vadd.f32 %v928_v30, %v927_v21  ;;  %v7752_v36 = vpop.f32.mrb[19].mxu0  ;;  %v733_v37 = vadd.f32 %v732_v25, %v731_v20  ;;  %v852_v40 = vmul.f32 %v7748_v33, %v7748_v33  ;;  %v736_v54 = vsel %vm698_vm1, %v7748_v33, 0.0  ;;  %v7768_v60 = vpop.f32.mrb[19].mxu1 }
 0x117   :  { %14873 = vst [vmem:[#allocation14_spill] sm:$0xff] %v7752_v36  ;;  %v734_v45 = vsel %vm698_vm1, %v7752_v36, 0.0  ;;  %v851_v46 = vmul.f32 %v7752_v36, %v7752_v36 }
 0x118   :  { %v735_v49 = vadd.f32 %v734_v45, %v733_v37  ;;  %v931_v51 = vadd.f32 %v930_v39, %v929_v35  ;;  %v934_v4 = vsel %vm698_vm1, %v852_v40, 0.0 }
 0x119   :  { %v932_v57 = vsel %vm698_vm1, %v851_v46, 0.0  ;;  %v7766_v59 = vpop.f32.mrb[20].mxu0  ;;  %v7779_v20 = vpop.f32.mrb[20].mxu1 }
 0x11a   :  { %14874 = vst [vmem:[#allocation15_spill] sm:$0xff] %v7766_v59  ;;  %v933_v61 = vadd.f32 %v932_v57, %v931_v51  ;;  %v7770_v63 = vpop.f32.mrb[21].mxu0  ;;  %v737_v0 = vadd.f32 %v736_v54, %v735_v49  ;;  %v854_v11 = vmul.f32 %v7766_v59, %v7766_v59  ;;  %v740_v21 = vsel %vm698_vm1, %v7766_v59, 0.0  ;;  %v7786_v35 = vpop.f32.mrb[21].mxu1 }
 0x11b   :  { %14875 = vst [vmem:[#allocation16_spill] sm:$0xff] %v7770_v63  ;;  %v738_v12 = vsel %vm698_vm1, %v7770_v63, 0.0  ;;  %v853_v13 = vmul.f32 %v7770_v63, %v7770_v63 }
 0x11c   :  { %v739_v15 = vadd.f32 %v738_v12, %v737_v0  ;;  %v935_v18 = vadd.f32 %v934_v4, %v933_v61  ;;  %v938_v45 = vsel %vm698_vm1, %v854_v11, 0.0 }
 0x11d   :  { %v936_v25 = vsel %vm698_vm1, %v853_v13, 0.0  ;;  %v7784_v30 = vpop.f32.mrb[22].mxu0  ;;  %v7797_v61 = vpop.f32.mrb[22].mxu1 }
 0x11e   :  { %14876 = vst [vmem:[#allocation17_spill] sm:$0xff] %v7784_v30  ;;  %v937_v37 = vadd.f32 %v936_v25, %v935_v18  ;;  %v7788_v39 = vpop.f32.mrb[23].mxu0  ;;  %v741_v40 = vadd.f32 %v740_v21, %v739_v15  ;;  %v856_v46 = vmul.f32 %v7784_v30, %v7784_v30  ;;  %v744_v0 = vsel %vm698_vm1, %v7784_v30, 0.0  ;;  %v7804_v11 = vpop.f32.mrb[23].mxu1 }
 0x11f   :  { %14877 = vst [vmem:[#allocation18_spill] sm:$0xff] %v7788_v39  ;;  %v742_v49 = vsel %vm698_vm1, %v7788_v39, 0.0  ;;  %v855_v51 = vmul.f32 %v7788_v39, %v7788_v39 }
 0x120   :  { %v743_v54 = vadd.f32 %v742_v49, %v741_v40  ;;  %v939_v57 = vadd.f32 %v938_v45, %v937_v37  ;;  %v942_v21 = vsel %vm698_vm1, %v856_v46, 0.0 }
 0x121   :  { %v940_v4 = vsel %vm698_vm1, %v855_v51, 0.0  ;;  %v7802_v12 = vpop.f32.mrb[24].mxu0  ;;  %v7815_v51 = vpop.f32.mrb[24].mxu1 }
 0x122   :  { %14878 = vst [vmem:[#allocation19_spill] sm:$0xff] %v7802_v12  ;;  %v941_v13 = vadd.f32 %v940_v4, %v939_v57  ;;  %v7806_v15 = vpop.f32.mrb[25].mxu0  ;;  %v745_v18 = vadd.f32 %v744_v0, %v743_v54  ;;  %v858_v25 = vmul.f32 %v7802_v12, %v7802_v12  ;;  %14880 = vst [vmem:[#allocation21_spill] sm:$0xff] %v7815_v51  ;;  %v748_v57 = vsel %vm698_vm1, %v7802_v12, 0.0  ;;  %v7822_v46 = vpop.f32.mrb[25].mxu1 }
 0x123   :  { %14879 = vst [vmem:[#allocation20_spill] sm:$0xff] %v7806_v15  ;;  %v746_v37 = vsel %vm698_vm1, %v7806_v15, 0.0  ;;  %v857_v40 = vmul.f32 %v7806_v15, %v7806_v15  ;;  %14882 = vst [vmem:[#allocation23_spill] sm:$0xff] %v7822_v46 }
 0x124   :  { %v747_v45 = vadd.f32 %v746_v37, %v745_v18  ;;  %v943_v49 = vadd.f32 %v942_v21, %v941_v13  ;;  %v946_v59 = vsel %vm698_vm1, %v858_v25, 0.0 }
 0x125   :  { %v944_v54 = vsel %vm698_vm1, %v857_v40, 0.0  ;;  %v7820_v0 = vpop.f32.mrb[26].mxu0  ;;  %v7833_v12 = vpop.f32.mrb[26].mxu1 }
 0x126   :  { %14881 = vst [vmem:[#allocation22_spill] sm:$0xff] %v7820_v0  ;;  %v945_v4 = vadd.f32 %v944_v54, %v943_v49  ;;  %v7824_v30 = vpop.f32.mrb[27].mxu0  ;;  %v749_v39 = vadd.f32 %v748_v57, %v747_v45  ;;  %v860_v13 = vmul.f32 %v7820_v0, %v7820_v0  ;;  %14884 = vst [vmem:[#allocation25_spill] sm:$0xff] %v7833_v12  ;;  %v752_v49 = vsel %vm698_vm1, %v7820_v0, 0.0  ;;  %v7840_v25 = vpop.f32.mrb[27].mxu1 }
 0x127   :  { %14883 = vst [vmem:[#allocation24_spill] sm:$0xff] %v7824_v30  ;;  %v750_v18 = vsel %vm698_vm1, %v7824_v30, 0.0  ;;  %v859_v21 = vmul.f32 %v7824_v30, %v7824_v30  ;;  %14886 = vst [vmem:[#allocation27_spill] sm:$0xff] %v7840_v25 }
 0x128   :  { %v751_v37 = vadd.f32 %v750_v18, %v749_v39  ;;  %v947_v40 = vadd.f32 %v946_v59, %v945_v4  ;;  %v950_v33 = vsel %vm698_vm1, %v860_v13, 0.0 }
 0x129   :  { %v948_v45 = vsel %vm698_vm1, %v859_v21, 0.0  ;;  %v7838_v57 = vpop.f32.mrb[28].mxu0  ;;  %v7851_v0 = vpop.f32.mrb[28].mxu1 }
 0x12a   :  { %14885 = vst [vmem:[#allocation26_spill] sm:$0xff] %v7838_v57  ;;  %v949_v54 = vadd.f32 %v948_v45, %v947_v40  ;;  %v7842_v15 = vpop.f32.mrb[29].mxu0  ;;  %v753_v63 = vadd.f32 %v752_v49, %v751_v37  ;;  %v862_v59 = vmul.f32 %v7838_v57, %v7838_v57  ;;  %14888 = vst [vmem:[#allocation29_spill] sm:$0xff] %v7851_v0  ;;  %v756_v40 = vsel %vm698_vm1, %v7838_v57, 0.0  ;;  %v7858_v13 = vpop.f32.mrb[29].mxu1 }
 0x12b   :  { %14887 = vst [vmem:[#allocation28_spill] sm:$0xff] %v7842_v15  ;;  %v754_v39 = vsel %vm698_vm1, %v7842_v15, 0.0  ;;  %v861_v4 = vmul.f32 %v7842_v15, %v7842_v15  ;;  %14890 = vst [vmem:[#allocation31_spill] sm:$0xff] %v7858_v13  ;;  %v865_v15 = vmul.f32 %v7607_v17, %v7607_v17 }
 0x12c   :  { %v755_v18 = vadd.f32 %v754_v39, %v753_v63  ;;  %v951_v21 = vadd.f32 %v950_v33, %v949_v54  ;;  %v954_v33 = vsel %vm698_vm1, %v862_v59, 0.0  ;;  %v762_v59 = vsel %vm698_vm1, %v7607_v17, 0.0 }
 0x12d   :  { %v952_v37 = vsel %vm698_vm1, %v861_v4, 0.0  ;;  %v7856_v49 = vpop.f32.mrb[30].mxu0  ;;  %v766_v17 = vsel %vm698_vm1, %v7624_v28, 0.0 }
 0x12e   :  { %14889 = vst [vmem:[#allocation30_spill] sm:$0xff] %v7856_v49  ;;  %v953_v45 = vadd.f32 %v952_v37, %v951_v21  ;;  %v7860_v30 = vpop.f32.mrb[31].mxu0  ;;  %v757_v36 = vadd.f32 %v756_v40, %v755_v18  ;;  %v864_v63 = vmul.f32 %v7856_v49, %v7856_v49  ;;  %v7871_v21 = vpop.f32.mrb[30].mxu1  ;;  %v760_v18 = vsel %vm698_vm1, %v7856_v49, 0.0 }
 0x12f   :  { %v758_v54 = vsel %vm698_vm1, %v7860_v30, 0.0  ;;  %v863_v39 = vmul.f32 %v7860_v30, %v7860_v30  ;;  %14891 = vst [vmem:[#allocation32_spill] sm:$0xff] %v7871_v21  ;;  %v7878_v37 = vpop.f32.mrb[31].mxu1 }
 0x130   :  { %v759_v4 = vadd.f32 %v758_v54, %v757_v36  ;;  %v955_v57 = vadd.f32 %v954_v33, %v953_v45  ;;  %v958_v47 = vsel %vm698_vm1, %v864_v63, 0.0  ;;  %v866_v36 = vmul.f32 %v7602_v14, %v7602_v14 }
 0x131   :  { %v956_v40 = vsel %vm698_vm1, %v863_v39, 0.0  ;;  %v960_v45 = vsel %vm698_vm1, %v865_v15, 0.0  ;;  %v867_v33 = vmul.f32 %v7624_v28, %v7624_v28  ;;  %v764_v39 = vsel %vm698_vm1, %v7602_v14, 0.0 }
 0x132   :  { %v957_v1 = vadd.f32 %v956_v40, %v955_v57  ;;  %v761_v8 = vadd.f32 %v760_v18, %v759_v4  ;;  %v962_v63 = vsel %vm698_vm1, %v866_v36, 0.0  ;;  %v868_v18 = vmul.f32 %v7617_v24, %v7617_v24 }
 0x133   :  { %v964_v15 = vsel %vm698_vm1, %v867_v33, 0.0  ;;  %v869_v40 = vmul.f32 %v7642_v42, %v7642_v42 }
 0x134   :  { %v763_v54 = vadd.f32 %v762_v59, %v761_v8  ;;  %v959_v49 = vadd.f32 %v958_v47, %v957_v1  ;;  %v768_v1 = vsel %vm698_vm1, %v7617_v24, 0.0  ;;  %v770_v59 = vsel %vm698_vm1, %v7642_v42, 0.0 }
 0x135   :  { %v966_v36 = vsel %vm698_vm1, %v868_v18, 0.0  ;;  %v968_v33 = vsel %vm698_vm1, %v869_v40, 0.0 }
 0x136   :  { %v961_v57 = vadd.f32 %v960_v45, %v959_v49  ;;  %v765_v4 = vadd.f32 %v764_v39, %v763_v54  ;;  %v870_v54 = vmul.f32 %v7635_v38, %v7635_v38  ;;  %v871_v39 = vmul.f32 %v7660_v56, %v7660_v56 }
 0x138   :  { %v767_v8 = vadd.f32 %v766_v17, %v765_v4  ;;  %v963_v47 = vadd.f32 %v962_v63, %v961_v57  ;;  %v772_v4 = vsel %vm698_vm1, %v7635_v38, 0.0  ;;  %v774_v63 = vsel %vm698_vm1, %v7660_v56, 0.0 }
 0x139   :  { %v970_v18 = vsel %vm698_vm1, %v870_v54, 0.0  ;;  %v972_v40 = vsel %vm698_vm1, %v871_v39, 0.0 }
 0x13a   :  { %v965_v49 = vadd.f32 %v964_v15, %v963_v47  ;;  %v769_v45 = vadd.f32 %v768_v1, %v767_v8  ;;  %v872_v47 = vmul.f32 %v7653_v52, %v7653_v52  ;;  %v873_v1 = vmul.f32 %v7678_v7, %v7678_v7 }
 0x13c   :  { %v771_v17 = vadd.f32 %v770_v59, %v769_v45  ;;  %v967_v57 = vadd.f32 %v966_v36, %v965_v49  ;;  %v776_v45 = vsel %vm698_vm1, %v7653_v52, 0.0  ;;  %v778_v36 = vsel %vm698_vm1, %v7678_v7, 0.0 }
 0x13d   :  { %v974_v54 = vsel %vm698_vm1, %v872_v47, 0.0  ;;  %v976_v39 = vsel %vm698_vm1, %v873_v1, 0.0 }
 0x13e   :  { %v969_v15 = vadd.f32 %v968_v33, %v967_v57  ;;  %v773_v8 = vadd.f32 %v772_v4, %v771_v17  ;;  %v874_v57 = vmul.f32 %v7671_v2, %v7671_v2  ;;  %v875_v4 = vmul.f32 %v7696_v29, %v7696_v29 }
 0x140   :  { %v775_v59 = vadd.f32 %v774_v63, %v773_v8  ;;  %v971_v49 = vadd.f32 %v970_v18, %v969_v15  ;;  %v780_v8 = vsel %vm698_vm1, %v7671_v2, 0.0  ;;  %v782_v18 = vsel %vm698_vm1, %v7696_v29, 0.0 }
 0x141   :  { %v978_v47 = vsel %vm698_vm1, %v874_v57, 0.0  ;;  %v980_v1 = vsel %vm698_vm1, %v875_v4, 0.0 }
 0x142   :  { %v973_v33 = vadd.f32 %v972_v40, %v971_v49  ;;  %v777_v17 = vadd.f32 %v776_v45, %v775_v59  ;;  %v876_v49 = vmul.f32 %v7689_v22, %v7689_v22  ;;  %v877_v45 = vmul.f32 %v7714_v48, %v7714_v48 }
 0x144   :  { %v779_v63 = vadd.f32 %v778_v36, %v777_v17  ;;  %v975_v15 = vadd.f32 %v974_v54, %v973_v33  ;;  %v784_v17 = vsel %vm698_vm1, %v7689_v22, 0.0  ;;  %v786_v54 = vsel %vm698_vm1, %v7714_v48, 0.0 }
 0x145   :  { %v982_v57 = vsel %vm698_vm1, %v876_v49, 0.0  ;;  %v984_v4 = vsel %vm698_vm1, %v877_v45, 0.0 }
 0x146   :  { %v977_v40 = vadd.f32 %v976_v39, %v975_v15  ;;  %v781_v59 = vadd.f32 %v780_v8, %v779_v63  ;;  %v878_v15 = vmul.f32 %v7707_v43, %v7707_v43  ;;  %v879_v8 = vmul.f32 %v7732_v3, %v7732_v3 }
 0x148   :  { %v783_v36 = vadd.f32 %v782_v18, %v781_v59  ;;  %v979_v33 = vadd.f32 %v978_v47, %v977_v40  ;;  %v788_v59 = vsel %vm698_vm1, %v7707_v43, 0.0  ;;  %v790_v47 = vsel %vm698_vm1, %v7732_v3, 0.0 }
 0x149   :  { %v986_v49 = vsel %vm698_vm1, %v878_v15, 0.0  ;;  %v988_v45 = vsel %vm698_vm1, %v879_v8, 0.0 }
 0x14a   :  { %v981_v39 = vadd.f32 %v980_v1, %v979_v33  ;;  %v785_v63 = vadd.f32 %v784_v17, %v783_v36  ;;  %v880_v33 = vmul.f32 %v7725_v62, %v7725_v62  ;;  %v881_v17 = vmul.f32 %v7750_v34, %v7750_v34 }
 0x14c   :  { %v787_v18 = vadd.f32 %v786_v54, %v785_v63  ;;  %v983_v40 = vadd.f32 %v982_v57, %v981_v39  ;;  %v792_v63 = vsel %vm698_vm1, %v7725_v62, 0.0  ;;  %v794_v57 = vsel %vm698_vm1, %v7750_v34, 0.0 }
 0x14d   :  { %v990_v15 = vsel %vm698_vm1, %v880_v33, 0.0  ;;  %v992_v8 = vsel %vm698_vm1, %v881_v17, 0.0 }
 0x14e   :  { %v985_v1 = vadd.f32 %v984_v4, %v983_v40  ;;  %v789_v36 = vadd.f32 %v788_v59, %v787_v18  ;;  %v882_v40 = vmul.f32 %v7743_v23, %v7743_v23  ;;  %v883_v59 = vmul.f32 %v7768_v60, %v7768_v60 }
 0x150   :  { %v791_v54 = vadd.f32 %v790_v47, %v789_v36  ;;  %v987_v39 = vadd.f32 %v986_v49, %v985_v1  ;;  %v796_v36 = vsel %vm698_vm1, %v7743_v23, 0.0  ;;  %v798_v49 = vsel %vm698_vm1, %v7768_v60, 0.0 }
 0x151   :  { %v994_v33 = vsel %vm698_vm1, %v882_v40, 0.0  ;;  %v996_v17 = vsel %vm698_vm1, %v883_v59, 0.0 }
 0x152   :  { %v989_v4 = vadd.f32 %v988_v45, %v987_v39  ;;  %v793_v18 = vadd.f32 %v792_v63, %v791_v54  ;;  %v884_v39 = vmul.f32 %v7761_v53, %v7761_v53  ;;  %v885_v63 = vmul.f32 %v7786_v35, %v7786_v35 }
 0x154   :  { %v795_v47 = vadd.f32 %v794_v57, %v793_v18  ;;  %v991_v1 = vadd.f32 %v990_v15, %v989_v4  ;;  %v800_v18 = vsel %vm698_vm1, %v7761_v53, 0.0  ;;  %v802_v15 = vsel %vm698_vm1, %v7786_v35, 0.0 }
 0x155   :  { %v998_v40 = vsel %vm698_vm1, %v884_v39, 0.0  ;;  %v1000_v59 = vsel %vm698_vm1, %v885_v63, 0.0 }
 0x156   :  { %v993_v45 = vadd.f32 %v992_v8, %v991_v1  ;;  %v797_v54 = vadd.f32 %v796_v36, %v795_v47  ;;  %v886_v1 = vmul.f32 %v7779_v20, %v7779_v20  ;;  %v887_v36 = vmul.f32 %v7804_v11, %v7804_v11 }
 0x158   :  { %v799_v57 = vadd.f32 %v798_v49, %v797_v54  ;;  %v995_v4 = vadd.f32 %v994_v33, %v993_v45  ;;  %v804_v54 = vsel %vm698_vm1, %v7779_v20, 0.0  ;;  %v806_v33 = vsel %vm698_vm1, %v7804_v11, 0.0 }
 0x159   :  { %v1002_v39 = vsel %vm698_vm1, %v886_v1, 0.0  ;;  %v1004_v63 = vsel %vm698_vm1, %v887_v36, 0.0 }
 0x15a   :  { %v997_v8 = vadd.f32 %v996_v17, %v995_v4  ;;  %v801_v47 = vadd.f32 %v800_v18, %v799_v57  ;;  %v888_v4 = vmul.f32 %v7797_v61, %v7797_v61  ;;  %v889_v18 = vmul.f32 %v7822_v46, %v7822_v46 }
 0x15c   :  { %v803_v49 = vadd.f32 %v802_v15, %v801_v47  ;;  %v999_v45 = vadd.f32 %v998_v40, %v997_v8  ;;  %v808_v47 = vsel %vm698_vm1, %v7797_v61, 0.0  ;;  %v810_v40 = vsel %vm698_vm1, %v7822_v46, 0.0 }
 0x15d   :  { %v1006_v1 = vsel %vm698_vm1, %v888_v4, 0.0  ;;  %v1008_v36 = vsel %vm698_vm1, %v889_v18, 0.0 }
 0x15e   :  { %v1001_v17 = vadd.f32 %v1000_v59, %v999_v45  ;;  %v805_v57 = vadd.f32 %v804_v54, %v803_v49  ;;  %v890_v45 = vmul.f32 %v7815_v51, %v7815_v51  ;;  %v891_v54 = vmul.f32 %v7840_v25, %v7840_v25 }
 0x160   :  { %v807_v15 = vadd.f32 %v806_v33, %v805_v57  ;;  %v1003_v8 = vadd.f32 %v1002_v39, %v1001_v17  ;;  %v812_v57 = vsel %vm698_vm1, %v7815_v51, 0.0  ;;  %v814_v39 = vsel %vm698_vm1, %v7840_v25, 0.0 }
 0x161   :  { %v1010_v4 = vsel %vm698_vm1, %v890_v45, 0.0  ;;  %v1012_v18 = vsel %vm698_vm1, %v891_v54, 0.0 }
 0x162   :  { %v1005_v59 = vadd.f32 %v1004_v63, %v1003_v8  ;;  %v809_v49 = vadd.f32 %v808_v47, %v807_v15  ;;  %v892_v8 = vmul.f32 %v7833_v12, %v7833_v12  ;;  %v893_v47 = vmul.f32 %v7858_v13, %v7858_v13 }
 0x164   :  { %v811_v33 = vadd.f32 %v810_v40, %v809_v49  ;;  %v1007_v17 = vadd.f32 %v1006_v1, %v1005_v59  ;;  %v816_v49 = vsel %vm698_vm1, %v7833_v12, 0.0  ;;  %v818_v1 = vsel %vm698_vm1, %v7858_v13, 0.0 }
 0x165   :  { %v1014_v45 = vsel %vm698_vm1, %v892_v8, 0.0  ;;  %v1016_v54 = vsel %vm698_vm1, %v893_v47, 0.0 }
 0x166   :  { %v1009_v63 = vadd.f32 %v1008_v36, %v1007_v17  ;;  %v813_v15 = vadd.f32 %v812_v57, %v811_v33  ;;  %v894_v17 = vmul.f32 %v7851_v0, %v7851_v0  ;;  %v895_v57 = vmul.f32 %v7878_v37, %v7878_v37 }
 0x168   :  { %v815_v40 = vadd.f32 %v814_v39, %v813_v15  ;;  %v1011_v59 = vadd.f32 %v1010_v4, %v1009_v63  ;;  %v820_v15 = vsel %vm698_vm1, %v7851_v0, 0.0  ;;  %v822_v4 = vsel %vm698_vm1, %v7878_v37, 0.0 }
 0x169   :  { %v1018_v8 = vsel %vm698_vm1, %v894_v17, 0.0  ;;  %v1020_v47 = vsel %vm698_vm1, %v895_v57, 0.0 }
 0x16a   :  { %v1013_v36 = vadd.f32 %v1012_v18, %v1011_v59  ;;  %v817_v33 = vadd.f32 %v816_v49, %v815_v40  ;;  %v896_v59 = vmul.f32 %v7871_v21, %v7871_v21 }
 0x16c   :  { %v819_v39 = vadd.f32 %v818_v1, %v817_v33  ;;  %v1015_v63 = vadd.f32 %v1014_v45, %v1013_v36  ;;  %v824_v1 = vsel %vm698_vm1, %v7871_v21, 0.0  ;;  %v1022_v45 = vsel %vm698_vm1, %v896_v59, 0.0 }
 0x16d   :  { %v1039_v59 = vlaneseq }
 0x16e   :  { %v1017_v18 = vadd.f32 %v1016_v54, %v1015_v63  ;;  %v821_v40 = vadd.f32 %v820_v15, %v819_v39 }
 0x170   :  { %v823_v49 = vadd.f32 %v822_v4, %v821_v40  ;;  %v1019_v13 = vadd.f32 %v1018_v8, %v1017_v18 }
 0x172   :  { %v825_v36 = vadd.f32 %v824_v1, %v823_v49  ;;  %v1021_v33 = vadd.f32 %v1020_v47, %v1019_v13  ;;  %v1040_v47 = vshrl.u32 %v1039_v59, 7 }
 0x174   :  { %v826_v0 = vrot.slane %v825_v36, 4  ;;  %v1023_v12 = vadd.f32 %v1022_v45, %v1021_v33 }
 0x176   :  { %v827_v54 = vadd.f32 %v826_v0, %v825_v36  ;;  %v1024_v39 = vrot.slane %v1023_v12, 4  ;;  %v696_v0 = vld [vmem:[%s14564_s2] sm:$0x1]  ;;  %s7435_s2 = smov 48  }
 0x178   :  { %v828_v63 = vrot.slane %v827_v54, 2  ;;  %v1025_v17 = vadd.f32 %v1024_v39, %v1023_v12  ;;  %v8040_v12 = vsub.s32 0, %v1040_v47  ;;  %v14899_v47 = vld [vmem:[#allocation15_spill] sm:$0xff] }
 0x17a   :  { %v829_v15 = vadd.f32 %v828_v63, %v827_v54  ;;  %v1026_v25 = vrot.slane %v1025_v17, 2  ;;  %14892 = vst [vmem:[#allocation33_spill] sm:$0xff] %v8040_v12 }
 0x17c   :  { %v830_v51 = vrot.slane %v829_v15, 1  ;;  %v1027_v46 = vadd.f32 %v1026_v25, %v1025_v17 }
 0x17e   :  { %v831_v57 = vadd.f32 %v830_v51, %v829_v15  ;;  %v1028_v4 = vrot.slane %v1027_v46, 1  ;;  %v697_v51 = vld [vmem:[%s14565_s3] sm:$0x1]  ;;  %s7436_s3 = smov 24  }
 0x180   :  { %v832_v18 = vmul.f32 0.001953125, %v831_v57  ;;  %v1029_v40 = vadd.f32 %v1028_v4, %v1027_v46 }
 0x182   :  { %v1030_v8 = vmul.f32 0.001953125, %v1029_v40  ;;  %v1031_v21 = vmul.f32 %v832_v18, %v832_v18  ;;  %v14896_v40 = vld [vmem:[#allocation14_spill] sm:$0xff] }
 0x184   :  { %v1032_v49 = vsub.f32 %v1030_v8, %v1031_v21  ;;  %v14897_v8 = vld [vmem:[#allocation13_spill] sm:$0xff] }
 0x186   :  { %v1033_v13 = vadd.f32 1e-05, %v1032_v49 }
 0x188   :  { %7246 = vrsqrt.f32 %v1033_v13  ;;  %v14898_v13 = vld [vmem:[#allocation16_spill] sm:$0xff] }
 0x192   :  { %v7247_v1 = vpop.eup %7246 }
 0x193   :  { %v1035_v36 = vmul.f32 %v7247_v1, %v696_v0  ;;  %v14900_v1 = vld [vmem:[#allocation18_spill] sm:$0xff] }
 0x195   :  { %v1036_v46 = vmul.f32 %v1035_v36, %v832_v18  ;;  %v8046_v25 = vrot.slane %v1035_v36, %v8040_v12 }
 0x197   :  { %v1037_v21 = vsub.f32 %v697_v51, %v1036_v46  ;;  %v1106_v33 = vmul.f32 %v8046_v25, %v7878_v37  ;;  %v8052_v45 = vmul.f32 %v8046_v25, %v7595_v9  ;;  %v8056_v54 = vmul.f32 %v7589_v6, %v8046_v25  ;;  %v14901_v51 = vld [vmem:[#allocation17_spill] sm:$0xff] }
 0x198   :  { %v8060_v39 = vmul.f32 %v8046_v25, %v7609_v19  ;;  %v8064_v63 = vmul.f32 %v7605_v16, %v8046_v25  ;;  %v8068_v17 = vmul.f32 %v8046_v25, %v7626_v31  ;;  %v8072_v9 = vmul.f32 %v7622_v27, %v8046_v25 }
 0x199   :  { %v8075_v37 = vrot.slane %v1037_v21, %v8040_v12  ;;  %v8079_v6 = vmul.f32 %v8046_v25, %v7644_v44  ;;  %v8083_v19 = vmul.f32 %v7640_v41, %v8046_v25  ;;  %v8087_v16 = vmul.f32 %v8046_v25, %v7662_v58  ;;  %v14902_v21 = vld [vmem:[#allocation20_spill] sm:$0xff]  ;;  %v14915_v12 = vld [vmem:[#allocation23_spill] sm:$0xff] }
 0x19a   :  { %v8091_v31 = vmul.f32 %v7658_v55, %v8046_v25  ;;  %v8095_v27 = vmul.f32 %v8046_v25, %v7680_v10  ;;  %v8099_v44 = vmul.f32 %v7676_v5, %v8046_v25  ;;  %v8103_v41 = vmul.f32 %v8046_v25, %v7698_v32  ;;  %v14893_v10 = vld [vmem:[#allocation10_spill] sm:$0xff]  ;;  %v14894_v5 = vld [vmem:[#allocation12_spill] sm:$0xff]  ;;  %v14895_v32 = vld [vmem:[#allocation11_spill] sm:$0xff] }
 0x19b   :  { %v1176_v15 = vadd.f32 %v8075_v37, %v1106_v33  ;;  %v8108_v58 = vmul.f32 %v7694_v26, %v8046_v25  ;;  %v8112_v55 = vmul.f32 %v8046_v25, %v7716_v50  ;;  %v8116_v57 = vmul.f32 %v14893_v10, %v8046_v25 }
 0x19c   :  { %v8120_v4 = vmul.f32 %v8046_v25, %v14894_v5  ;;  %v8124_v18 = vmul.f32 %v14895_v32, %v8046_v25  ;;  %v8128_v26 = vmul.f32 %v8046_v25, %v14896_v40  ;;  %v8132_v50 = vmul.f32 %v14897_v8, %v8046_v25  ;;  %v14904_v5 = vld [vmem:[#allocation24_spill] sm:$0xff]  ;;  %v14905_v40 = vld [vmem:[#allocation22_spill] sm:$0xff] }
 0x19d   :  { %v1240_v49 = vmax.f32 %v1176_v15, 0.0  ;;  %v8136_v59 = vmul.f32 %v8046_v25, %v14898_v13  ;;  %v8140_v0 = vmul.f32 %v14899_v47, %v8046_v25  ;;  %v8144_v36 = vmul.f32 %v8046_v25, %v14900_v1  ;;  %v14903_v15 = vld [vmem:[#allocation19_spill] sm:$0xff]  ;;  %v14906_v13 = vld [vmem:[#allocation28_spill] sm:$0xff]  ;;  %v14907_v1 = vld [vmem:[#allocation26_spill] sm:$0xff] }
 0x19e   :  { %v8148_v46 = vmul.f32 %v14901_v51, %v8046_v25  ;;  %v8152_v33 = vmul.f32 %v8046_v25, %v14902_v21  ;;  %v8156_v10 = vmul.f32 %v14903_v15, %v8046_v25  ;;  %v8160_v32 = vmul.f32 %v8046_v25, %v14904_v5  ;;  %v14908_v15 = vld [vmem:[#allocation30_spill] sm:$0xff] }
 0x19f   :  { %1305 = vst.msk [vmem:[#allocation2 + $0x331] sm:$0xff] %vm698_vm1, %v1240_v49  ;;  %v8165_v8 = vmul.f32 %v14905_v40, %v8046_v25  ;;  %v8169_v47 = vmul.f32 %v8046_v25, %v14906_v13  ;;  %v8173_v51 = vmul.f32 %v14907_v1, %v8046_v25  ;;  %v8177_v21 = vmul.f32 %v8046_v25, %v7860_v30  ;;  %v14909_v49 = vld [vmem:[#allocation9_spill] sm:$0xff] }
 0x1a0   :  { %v8181_v5 = vmul.f32 %v14908_v15, %v8046_v25  ;;  %v8185_v40 = vmul.f32 %v8046_v25, %v14909_v49  ;;  %v8189_v13 = vmul.f32 %v7602_v14, %v8046_v25  ;;  %v8193_v1 = vmul.f32 %v8046_v25, %v7624_v28 }
 0x1a1   :  { %v8197_v30 = vmul.f32 %v7617_v24, %v8046_v25  ;;  %v8201_v15 = vmul.f32 %v8046_v25, %v7642_v42  ;;  %v8205_v49 = vmul.f32 %v7635_v38, %v8046_v25  ;;  %v8209_v14 = vmul.f32 %v8046_v25, %v7660_v56 }
 0x1a2   :  { %v8213_v28 = vmul.f32 %v7653_v52, %v8046_v25  ;;  %v8217_v24 = vmul.f32 %v8046_v25, %v7678_v7  ;;  %v8221_v42 = vmul.f32 %v7671_v2, %v8046_v25  ;;  %v8225_v38 = vmul.f32 %v8046_v25, %v7696_v29 }
 0x1a3   :  { %v8229_v56 = vmul.f32 %v7689_v22, %v8046_v25  ;;  %v8233_v52 = vmul.f32 %v8046_v25, %v7714_v48  ;;  %v8237_v7 = vmul.f32 %v7707_v43, %v8046_v25  ;;  %v8241_v2 = vmul.f32 %v8046_v25, %v7732_v3 }
 0x1a4   :  { %v8245_v29 = vmul.f32 %v7725_v62, %v8046_v25  ;;  %v8249_v22 = vmul.f32 %v8046_v25, %v7750_v34  ;;  %v8253_v48 = vmul.f32 %v7743_v23, %v8046_v25  ;;  %v8257_v43 = vmul.f32 %v8046_v25, %v7768_v60 }
 0x1a5   :  { %v8261_v3 = vmul.f32 %v7761_v53, %v8046_v25  ;;  %v8265_v62 = vmul.f32 %v8046_v25, %v7786_v35  ;;  %v8269_v34 = vmul.f32 %v7779_v20, %v8046_v25  ;;  %v8273_v23 = vmul.f32 %v8046_v25, %v7804_v11  ;;  %v14920_v11 = vld [vmem:[#allocation25_spill] sm:$0xff] }
 0x1a6   :  { %14910 = vst [vmem:[#allocation10_spill] sm:$0xff] %v8257_v43  ;;  %v8277_v60 = vmul.f32 %v7797_v61, %v8046_v25  ;;  %v8281_v53 = vmul.f32 %v8046_v25, %v14915_v12  ;;  %v14921_v43 = vld [vmem:[#allocation31_spill] sm:$0xff]  ;;  %v14922_v12 = vld [vmem:[#allocation29_spill] sm:$0xff] }
 0x1a7   :  { %14911 = vst [vmem:[#allocation12_spill] sm:$0xff] %v8261_v3  ;;  %14912 = vst [vmem:[#allocation11_spill] sm:$0xff] %v8265_v62  ;;  %v14917_v3 = vld [vmem:[#allocation21_spill] sm:$0xff]  ;;  %v14919_v62 = vld [vmem:[#allocation27_spill] sm:$0xff]  ;;  %v8297_v61 = vmul.f32 %v8046_v25, %v14921_v43  ;;  %v8314_v43 = vadd.f32 %v8075_v37, %v8052_v45  ;;  %v8334_v45 = vadd.f32 %v8075_v37, %v8083_v19 }
 0x1a8   :  { %14913 = vst [vmem:[#allocation14_spill] sm:$0xff] %v8269_v34  ;;  %14914 = vst [vmem:[#allocation13_spill] sm:$0xff] %v8273_v23  ;;  %v8285_v35 = vmul.f32 %v14917_v3, %v8046_v25  ;;  %v8289_v20 = vmul.f32 %v8046_v25, %v14919_v62  ;;  %v1350_v34 = vld [vmem:[#allocation2 + $0x332] sm:$0x1]  ;;  %v8293_v23 = vmul.f32 %v14920_v11, %v8046_v25  ;;  %v14923_v3 = vld [vmem:[#allocation32_spill] sm:$0xff] }
 0x1a9   :  { %14916 = vst [vmem:[#allocation16_spill] sm:$0xff] %v8281_v53  ;;  %v8301_v53 = vmul.f32 %v14922_v12, %v8046_v25  ;;  %1387 = vst.msk [vmem:[#allocation2 + $0x330] sm:$0x1] %vm1352_vm2, %v1350_v34  ;;  %v1116_v62 = vadd.f32 %v8075_v37, %v8060_v39  ;;  %v1117_v11 = vadd.f32 %v8075_v37, %v8064_v63 }
 0x1aa   :  { %14918 = vst [vmem:[#allocation15_spill] sm:$0xff] %v8285_v35  ;;  %v8305_v35 = vmul.f32 %v14923_v3, %v8046_v25  ;;  %v8318_v12 = vadd.f32 %v8075_v37, %v8056_v54  ;;  %v8322_v25 = vadd.f32 %v8075_v37, %v8068_v17  ;;  %v8326_v34 = vadd.f32 %v8075_v37, %v8072_v9 }
 0x1ab   :  { %v8330_v39 = vadd.f32 %v8075_v37, %v8079_v6  ;;  %v1180_v63 = vmax.f32 %v1116_v62, 0.0  ;;  %v1181_v3 = vmax.f32 %v1117_v11, 0.0  ;;  %v8338_v54 = vadd.f32 %v8075_v37, %v8087_v16 }
 0x1ac   :  { %v8342_v17 = vadd.f32 %v8075_v37, %v8091_v31  ;;  %v8346_v9 = vadd.f32 %v8075_v37, %v8095_v27  ;;  %v8350_v6 = vadd.f32 %v8075_v37, %v8099_v44  ;;  %v8354_v19 = vadd.f32 %v8075_v37, %v8103_v41 }
 0x1ad   :  { %v8358_v16 = vadd.f32 %v8075_v37, %v8108_v58  ;;  %1245 = vst.msk [vmem:[#allocation2 + $0x31] sm:$0xff] %vm698_vm1, %v1180_v63  ;;  %1246 = vst.msk [vmem:[#allocation2 + $0x39] sm:$0xff] %vm698_vm1, %v1181_v3  ;;  %v8364_v31 = vadd.f32 %v8075_v37, %v8112_v55  ;;  %v8368_v27 = vadd.f32 %v8075_v37, %v8116_v57 }
 0x1ae   :  { %v8372_v44 = vadd.f32 %v8075_v37, %v8120_v4  ;;  %v8376_v41 = vadd.f32 %v8075_v37, %v8124_v18  ;;  %1307 = vst.msk [vmem:[#allocation2 + $0x1] sm:$0xff] %vm698_vm1, %v1180_v63  ;;  %1308 = vst.msk [vmem:[#allocation2 + $0x9] sm:$0xff] %vm698_vm1, %v1181_v3  ;;  %v8382_v58 = vadd.f32 %v8075_v37, %v8128_v26 }
 0x1af   :  { %v8386_v55 = vadd.f32 %v8075_v37, %v8132_v50  ;;  %v8390_v57 = vadd.f32 %v8075_v37, %v8136_v59  ;;  %v8394_v4 = vadd.f32 %v8075_v37, %v8140_v0  ;;  %v8398_v18 = vadd.f32 %v8075_v37, %v8144_v36 }
 0x1b0   :  { %v8402_v26 = vadd.f32 %v8075_v37, %v8148_v46  ;;  %v8406_v50 = vadd.f32 %v8075_v37, %v8152_v33  ;;  %v8410_v59 = vadd.f32 %v8075_v37, %v8156_v10  ;;  %v8414_v0 = vadd.f32 %v8075_v37, %v8160_v32 }
 0x1b1   :  { %v8418_v36 = vadd.f32 %v8075_v37, %v8165_v8  ;;  %v8422_v46 = vadd.f32 %v8075_v37, %v8169_v47  ;;  %v8426_v33 = vadd.f32 %v8075_v37, %v8173_v51  ;;  %v8430_v10 = vadd.f32 %v8075_v37, %v8177_v21 }
 0x1b2   :  { %v8434_v32 = vadd.f32 %v8075_v37, %v8181_v5  ;;  %v8438_v8 = vadd.f32 %v8075_v37, %v8185_v40  ;;  %v8442_v47 = vadd.f32 %v8075_v37, %v8189_v13  ;;  %v8446_v51 = vadd.f32 %v8075_v37, %v8193_v1 }
 0x1b3   :  { %v8450_v21 = vadd.f32 %v8075_v37, %v8197_v30  ;;  %v8454_v5 = vadd.f32 %v8075_v37, %v8201_v15  ;;  %v8458_v40 = vadd.f32 %v8075_v37, %v8205_v49  ;;  %v8462_v13 = vadd.f32 %v8075_v37, %v8209_v14 }
 0x1b4   :  { %v8466_v1 = vadd.f32 %v8075_v37, %v8213_v28  ;;  %v8470_v30 = vadd.f32 %v8075_v37, %v8217_v24  ;;  %v8474_v15 = vadd.f32 %v8075_v37, %v8221_v42  ;;  %v8476_v62 = vld [vmem:[#allocation2 + $0x38] sm:$0xff]  ;;  %v8480_v49 = vadd.f32 %v8075_v37, %v8225_v38  ;;  %v1318_v42 = vld [vmem:[#allocation2 + $0x32] sm:$0x1] }
 0x1b5   :  { %v8484_v14 = vadd.f32 %v8075_v37, %v8229_v56  ;;  %v8488_v28 = vadd.f32 %v8075_v37, %v8233_v52  ;;  %v8492_v24 = vadd.f32 %v8075_v37, %v8237_v7  ;;  %v1316_v11 = vld [vmem:[#allocation2 + $0x2] sm:$0x1]  ;;  %3001 = vrot.lane.b32.xlu1 %v8476_v62, %s7435_s2  ;;  %v8498_v38 = vadd.f32 %v8075_v37, %v8241_v2  ;;  %v1389_v63 = vld [vmem:[#allocation2 + $0xf] sm:$0x1]  ;;  %v1391_v3 = vld [vmem:[#allocation2 + $0x3f] sm:$0x1] }
 0x1b6   :  { %v8502_v56 = vadd.f32 %v8075_v37, %v8245_v29  ;;  %v8506_v52 = vadd.f32 %v8075_v37, %v8249_v22  ;;  %v8510_v7 = vadd.f32 %v8075_v37, %v8253_v48  ;;  %1355 = vst.msk [vmem:[#allocation2 + $0x30] sm:$0x1] %vm1352_vm2, %v1318_v42  ;;  %1353 = vst.msk [vmem:[#allocation2] sm:$0x1] %vm1352_vm2, %v1316_v11  ;;  %v14928_v2 = vld [vmem:[#allocation10_spill] sm:$0xff]  ;;  %v14929_v29 = vld [vmem:[#allocation12_spill] sm:$0xff] }
 0x1b7   :  { %14924 = vst [vmem:[#allocation18_spill] sm:$0xff] %v8498_v38  ;;  %v8516_v38 = vadd.f32 %v8075_v37, %v14928_v2  ;;  %v14930_v22 = vld [vmem:[#allocation11_spill] sm:$0xff]  ;;  %v14932_v48 = vld [vmem:[#allocation14_spill] sm:$0xff]  ;;  %1425 = vst.msk [vmem:[#allocation2 + $0x11] sm:$0x1] %vm1352_vm2, %v1389_v63  ;;  %v8538_v2 = vadd.f32 %v8075_v37, %v8277_v60  ;;  %v8550_v63 = vadd.f32 %v8075_v37, %v8289_v20  ;;  %v1179_v20 = vmax.f32 %v8318_v12, 0.0 }
 0x1b8   :  { %14925 = vst [vmem:[#allocation17_spill] sm:$0xff] %v8502_v56  ;;  %14926 = vst [vmem:[#allocation20_spill] sm:$0xff] %v8506_v52  ;;  %v8520_v56 = vadd.f32 %v8075_v37, %v14929_v29  ;;  %v8524_v52 = vadd.f32 %v8075_v37, %v14930_v22  ;;  %v14933_v42 = vld [vmem:[#allocation13_spill] sm:$0xff]  ;;  %v14934_v29 = vld [vmem:[#allocation16_spill] sm:$0xff]  ;;  %v8558_v60 = vadd.f32 %v8075_v37, %v8297_v61  ;;  %v1184_v61 = vmax.f32 %v8330_v39, 0.0 }
 0x1b9   :  { %14927 = vst [vmem:[#allocation19_spill] sm:$0xff] %v8510_v7  ;;  %v8528_v7 = vadd.f32 %v8075_v37, %v14932_v48  ;;  %1427 = vst.msk [vmem:[#allocation2 + $0x41] sm:$0x1] %vm1352_vm2, %v1391_v3  ;;  %v8534_v11 = vadd.f32 %v8075_v37, %v14933_v42  ;;  %v8542_v22 = vadd.f32 %v8075_v37, %v14934_v29  ;;  %v1178_v29 = vmax.f32 %v8314_v43, 0.0 }
 0x1ba   :  { %14931 = vst [vmem:[#allocation24_spill] sm:$0xff] %v8524_v52  ;;  %v14935_v52 = vld [vmem:[#allocation15_spill] sm:$0xff]  ;;  %14936 = vst [vmem:[#allocation22_spill] sm:$0xff] %v8550_v63  ;;  %v8554_v3 = vadd.f32 %v8075_v37, %v8293_v23  ;;  %v8562_v42 = vadd.f32 %v8075_v37, %v8301_v53  ;;  %v1182_v63 = vmax.f32 %v8322_v25, 0.0  ;;  %2429 = vrot.lane.b32.xlu1 %v8476_v62, %s7436_s3  ;;  %v1183_v23 = vmax.f32 %v8326_v34, 0.0 }
 0x1bb   :  { %v8546_v48 = vadd.f32 %v8075_v37, %v14935_v52  ;;  %v8566_v52 = vadd.f32 %v8075_v37, %v8305_v35  ;;  %v1185_v53 = vmax.f32 %v8334_v45, 0.0  ;;  %1243 = vst.msk [vmem:[#allocation2 + $0x19] sm:$0xff] %vm698_vm1, %v1178_v29  ;;  %1244 = vst.msk [vmem:[#allocation2 + $0x21] sm:$0xff] %vm698_vm1, %v1179_v20  ;;  %v1187_v37 = vmax.f32 %v8342_v17, 0.0 }
 0x1bc   :  { %14937 = vst [vmem:[#allocation28_spill] sm:$0xff] %v8562_v42  ;;  %v1186_v42 = vmax.f32 %v8338_v54, 0.0  ;;  %v1188_v35 = vmax.f32 %v8346_v9, 0.0  ;;  %v1189_v43 = vmax.f32 %v8350_v6, 0.0  ;;  %v1190_v12 = vmax.f32 %v8354_v19, 0.0  ;;  %1247 = vst.msk [vmem:[#allocation2 + $0x49] sm:$0xff] %vm698_vm1, %v1182_v63 }
 0x1bd   :  { %v1191_v25 = vmax.f32 %v8358_v16, 0.0  ;;  %v1192_v34 = vmax.f32 %v8364_v31, 0.0  ;;  %v1193_v39 = vmax.f32 %v8368_v27, 0.0  ;;  %v1194_v45 = vmax.f32 %v8372_v44, 0.0  ;;  %1248 = vst.msk [vmem:[#allocation2 + $0x51] sm:$0xff] %vm698_vm1, %v1183_v23  ;;  %1249 = vst.msk [vmem:[#allocation2 + $0x61] sm:$0xff] %vm698_vm1, %v1184_v61 }
 0x1be   :  { %1250 = vst.msk [vmem:[#allocation2 + $0x69] sm:$0xff] %vm698_vm1, %v1185_v53  ;;  %1251 = vst.msk [vmem:[#allocation2 + $0x79] sm:$0xff] %vm698_vm1, %v1186_v42  ;;  %v1195_v54 = vmax.f32 %v8376_v41, 0.0  ;;  %v1196_v17 = vmax.f32 %v8382_v58, 0.0  ;;  %v1197_v9 = vmax.f32 %v8386_v55, 0.0  ;;  %v1198_v6 = vmax.f32 %v8390_v57, 0.0 }
 0x1bf   :  { %1252 = vst.msk [vmem:[#allocation2 + $0x81] sm:$0xff] %vm698_vm1, %v1187_v37  ;;  %1253 = vst.msk [vmem:[#allocation2 + $0x91] sm:$0xff] %vm698_vm1, %v1188_v35  ;;  %v1199_v19 = vmax.f32 %v8394_v4, 0.0  ;;  %v1200_v16 = vmax.f32 %v8398_v18, 0.0  ;;  %v1201_v31 = vmax.f32 %v8402_v26, 0.0  ;;  %v1202_v27 = vmax.f32 %v8406_v50, 0.0 }
 0x1c0   :  { %1254 = vst.msk [vmem:[#allocation2 + $0x99] sm:$0xff] %vm698_vm1, %v1189_v43  ;;  %1255 = vst.msk [vmem:[#allocation2 + $0xa9] sm:$0xff] %vm698_vm1, %v1190_v12  ;;  %v1203_v44 = vmax.f32 %v8410_v59, 0.0  ;;  %v1204_v41 = vmax.f32 %v8414_v0, 0.0  ;;  %v1205_v58 = vmax.f32 %v8418_v36, 0.0  ;;  %v1206_v55 = vmax.f32 %v8422_v46, 0.0 }
 0x1c1   :  { %1256 = vst.msk [vmem:[#allocation2 + $0xb1] sm:$0xff] %vm698_vm1, %v1191_v25  ;;  %1257 = vst.msk [vmem:[#allocation2 + $0xc1] sm:$0xff] %vm698_vm1, %v1192_v34  ;;  %v1207_v57 = vmax.f32 %v8426_v33, 0.0  ;;  %v1208_v4 = vmax.f32 %v8430_v10, 0.0  ;;  %v1209_v18 = vmax.f32 %v8434_v32, 0.0  ;;  %v1210_v26 = vmax.f32 %v8438_v8, 0.0 }
 0x1c2   :  { %1258 = vst.msk [vmem:[#allocation2 + $0xc9] sm:$0xff] %vm698_vm1, %v1193_v39  ;;  %1259 = vst.msk [vmem:[#allocation2 + $0xd9] sm:$0xff] %vm698_vm1, %v1194_v45  ;;  %v1211_v50 = vmax.f32 %v8442_v47, 0.0  ;;  %v1212_v59 = vmax.f32 %v8446_v51, 0.0  ;;  %v1213_v0 = vmax.f32 %v8450_v21, 0.0  ;;  %v1214_v36 = vmax.f32 %v8454_v5, 0.0 }
 0x1c3   :  { %1260 = vst.msk [vmem:[#allocation2 + $0xe1] sm:$0xff] %vm698_vm1, %v1195_v54  ;;  %1261 = vst.msk [vmem:[#allocation2 + $0xf1] sm:$0xff] %vm698_vm1, %v1196_v17  ;;  %v8633_v46 = vld [vmem:[#allocation2 + $0x20] sm:$0xff]  ;;  %v1215_v33 = vmax.f32 %v8458_v40, 0.0  ;;  %v1216_v10 = vmax.f32 %v8462_v13, 0.0  ;;  %v1217_v32 = vmax.f32 %v8466_v1, 0.0 }
 0x1c4   :  { %1262 = vst.msk [vmem:[#allocation2 + $0xf9] sm:$0xff] %vm698_vm1, %v1197_v9  ;;  %1263 = vst.msk [vmem:[#allocation2 + $0x109] sm:$0xff] %vm698_vm1, %v1198_v6  ;;  %v1218_v8 = vmax.f32 %v8470_v30, 0.0  ;;  %2425 = vrot.lane.b32.xlu0 %v8633_v46, %s7436_s3  ;;  %v1219_v47 = vmax.f32 %v8474_v15, 0.0  ;;  %v1220_v51 = vmax.f32 %v8480_v49, 0.0  ;;  %v1221_v21 = vmax.f32 %v8484_v14, 0.0 }
 0x1c5   :  { %1264 = vst.msk [vmem:[#allocation2 + $0x111] sm:$0xff] %vm698_vm1, %v1199_v19  ;;  %1265 = vst.msk [vmem:[#allocation2 + $0x121] sm:$0xff] %vm698_vm1, %v1200_v16  ;;  %v1222_v5 = vmax.f32 %v8488_v28, 0.0  ;;  %v8656_v40 = vld [vmem:[#allocation2 + $0x50] sm:$0xff]  ;;  %v1223_v1 = vmax.f32 %v8492_v24, 0.0  ;;  %v14938_v30 = vld [vmem:[#allocation18_spill] sm:$0xff] }
 0x1c6   :  { %1266 = vst.msk [vmem:[#allocation2 + $0x129] sm:$0xff] %vm698_vm1, %v1201_v31  ;;  %1267 = vst.msk [vmem:[#allocation2 + $0x139] sm:$0xff] %vm698_vm1, %v1202_v27  ;;  %v8658_v13 = vld [vmem:[#allocation2 + $0x30] sm:$0xff]  ;;  %v1224_v15 = vmax.f32 %v14938_v30, 0.0  ;;  %v14939_v49 = vld [vmem:[#allocation17_spill] sm:$0xff]  ;;  %3005 = vrot.lane.b32.xlu1 %v8656_v40, %s7435_s2  ;;  %v1228_v20 = vmax.f32 %v8516_v38, 0.0 }
 0x1c7   :  { %1268 = vst.msk [vmem:[#allocation2 + $0x141] sm:$0xff] %vm698_vm1, %v1203_v44  ;;  %1269 = vst.msk [vmem:[#allocation2 + $0x151] sm:$0xff] %vm698_vm1, %v1204_v41  ;;  %v1225_v14 = vmax.f32 %v14939_v49, 0.0  ;;  %v14940_v28 = vld [vmem:[#allocation20_spill] sm:$0xff]  ;;  %v1319_v42 = vld [vmem:[#allocation2 + $0x4a] sm:$0x1] }
 0x1c8   :  { %1270 = vst.msk [vmem:[#allocation2 + $0x159] sm:$0xff] %vm698_vm1, %v1205_v58  ;;  %1271 = vst.msk [vmem:[#allocation2 + $0x169] sm:$0xff] %vm698_vm1, %v1206_v55  ;;  %v1226_v63 = vmax.f32 %v14940_v28, 0.0  ;;  %v14941_v29 = vld [vmem:[#allocation19_spill] sm:$0xff]  ;;  %v1229_v23 = vmax.f32 %v8520_v56, 0.0  ;;  %v14942_v61 = vld [vmem:[#allocation24_spill] sm:$0xff]  ;;  %2427 = vrot.lane.b32.xlu0 %v8658_v13, %s7436_s3 }
 0x1c9   :  { %1312 = vst.msk [vmem:[#allocation2 + $0x199] sm:$0xff] %vm698_vm1, %v1206_v55  ;;  %1272 = vst.msk [vmem:[#allocation2 + $0x171] sm:$0xff] %vm698_vm1, %v1207_v57  ;;  %v1227_v24 = vmax.f32 %v14941_v29, 0.0  ;;  %v1230_v53 = vmax.f32 %v14942_v61, 0.0  ;;  %v1320_v37 = vld [vmem:[#allocation2 + $0x62] sm:$0x1] }
 0x1ca   :  { %1273 = vst.msk [vmem:[#allocation2 + $0x181] sm:$0xff] %vm698_vm1, %v1208_v4  ;;  %1274 = vst.msk [vmem:[#allocation2 + $0x189] sm:$0xff] %vm698_vm1, %v1209_v18  ;;  %v1231_v35 = vmax.f32 %v8528_v7, 0.0  ;;  %v1232_v43 = vmax.f32 %v8534_v11, 0.0  ;;  %v1233_v38 = vmax.f32 %v8538_v2, 0.0  ;;  %v1234_v56 = vmax.f32 %v8542_v22, 0.0  ;;  %2433 = vrot.lane.b32.xlu1 %v8656_v40, %s7436_s3 }
 0x1cb   :  { %1275 = vst.msk [vmem:[#allocation2 + $0x1c9] sm:$0xff] %vm698_vm1, %v1210_v26  ;;  %1313 = vst.msk [vmem:[#allocation2 + $0x1a1] sm:$0xff] %vm698_vm1, %v1207_v57  ;;  %v1321_v12 = vld [vmem:[#allocation2 + $0x7a] sm:$0x1]  ;;  %v1235_v25 = vmax.f32 %v8546_v48, 0.0  ;;  %v14943_v7 = vld [vmem:[#allocation22_spill] sm:$0xff] }
 0x1cc   :  { %1276 = vst.msk [vmem:[#allocation2 + $0x1d1] sm:$0xff] %vm698_vm1, %v1211_v50  ;;  %1277 = vst.msk [vmem:[#allocation2 + $0x1e1] sm:$0xff] %vm698_vm1, %v1212_v59  ;;  %v1236_v34 = vmax.f32 %v14943_v7, 0.0  ;;  %v1237_v11 = vmax.f32 %v8554_v3, 0.0  ;;  %v1238_v2 = vmax.f32 %v8558_v60, 0.0  ;;  %v14944_v48 = vld [vmem:[#allocation28_spill] sm:$0xff] }
 0x1cd   :  { %1278 = vst.msk [vmem:[#allocation2 + $0x1e9] sm:$0xff] %vm698_vm1, %v1213_v0  ;;  %1279 = vst.msk [vmem:[#allocation2 + $0x1f9] sm:$0xff] %vm698_vm1, %v1214_v36  ;;  %v1328_v22 = vld [vmem:[#allocation2 + $0x122] sm:$0x1]  ;;  %v1239_v39 = vmax.f32 %v14944_v48, 0.0  ;;  %v1241_v3 = vmax.f32 %v8566_v52, 0.0 }
 0x1ce   :  { %1309 = vst.msk [vmem:[#allocation2 + $0x1b1] sm:$0xff] %vm698_vm1, %v1212_v59  ;;  %1310 = vst.msk [vmem:[#allocation2 + $0x1b9] sm:$0xff] %vm698_vm1, %v1213_v0  ;;  %v1329_v60 = vld [vmem:[#allocation2 + $0x13a] sm:$0x1]  ;;  %v1330_v45 = vld [vmem:[#allocation2 + $0x152] sm:$0x1] }
 0x1cf   :  { %1280 = vst.msk [vmem:[#allocation2 + $0x201] sm:$0xff] %vm698_vm1, %v1215_v33  ;;  %1281 = vst.msk [vmem:[#allocation2 + $0x211] sm:$0xff] %vm698_vm1, %v1216_v10  ;;  %v1331_v52 = vld [vmem:[#allocation2 + $0x16a] sm:$0x1]  ;;  %v1322_v0 = vld [vmem:[#allocation2 + $0x92] sm:$0x1] }
 0x1d0   :  { %1282 = vst.msk [vmem:[#allocation2 + $0x219] sm:$0xff] %vm698_vm1, %v1217_v32  ;;  %1283 = vst.msk [vmem:[#allocation2 + $0x229] sm:$0xff] %vm698_vm1, %v1218_v8  ;;  %v8724_v27 = vld [vmem:[#allocation2 + $0x68] sm:$0xff]  ;;  %v8773_v28 = vld [vmem:[#allocation2 + $0x98] sm:$0xff] }
 0x1d1   :  { %1284 = vst.msk [vmem:[#allocation2 + $0x231] sm:$0xff] %vm698_vm1, %v1219_v47  ;;  %1285 = vst.msk [vmem:[#allocation2 + $0x241] sm:$0xff] %vm698_vm1, %v1220_v51  ;;  %v1405_v17 = vld [vmem:[#allocation2 + $0x18f] sm:$0x1]  ;;  %3009 = vrot.lane.b32.xlu1 %v8724_v27, %s7435_s2  ;;  %v1323_v10 = vld [vmem:[#allocation2 + $0xaa] sm:$0x1] }
 0x1d2   :  { %1286 = vst.msk [vmem:[#allocation2 + $0x249] sm:$0xff] %vm698_vm1, %v1221_v21  ;;  %1287 = vst.msk [vmem:[#allocation2 + $0x259] sm:$0xff] %vm698_vm1, %v1222_v5  ;;  %v1335_v54 = vld [vmem:[#allocation2 + $0x1ca] sm:$0x1]  ;;  %v1406_v19 = vld [vmem:[#allocation2 + $0x1a7] sm:$0x1] }
 0x1d3   :  { %1356 = vst.msk [vmem:[#allocation2 + $0x48] sm:$0x1] %vm1352_vm2, %v1319_v42  ;;  %1357 = vst.msk [vmem:[#allocation2 + $0x60] sm:$0x1] %vm1352_vm2, %v1320_v37  ;;  %v1336_v9 = vld [vmem:[#allocation2 + $0x1e2] sm:$0x1] }
 0x1d4   :  { %1288 = vst.msk [vmem:[#allocation2 + $0x261] sm:$0xff] %vm698_vm1, %v1223_v1  ;;  %1289 = vst.msk [vmem:[#allocation2 + $0x271] sm:$0xff] %vm698_vm1, %v1224_v15  ;;  %v1337_v6 = vld [vmem:[#allocation2 + $0x1fa] sm:$0x1]  ;;  %v1324_v47 = vld [vmem:[#allocation2 + $0xc2] sm:$0x1] }
 0x1d5   :  { %1290 = vst.msk [vmem:[#allocation2 + $0x279] sm:$0xff] %vm698_vm1, %v1225_v14  ;;  %1291 = vst.msk [vmem:[#allocation2 + $0x289] sm:$0xff] %vm698_vm1, %v1226_v63  ;;  %2437 = vrot.lane.b32.xlu1 %v8724_v27, %s7436_s3  ;;  %v1325_v51 = vld [vmem:[#allocation2 + $0xda] sm:$0x1]  ;;  %v8754_v21 = vld [vmem:[#allocation2 + $0x80] sm:$0xff] }
 0x1d6   :  { %1292 = vst.msk [vmem:[#allocation2 + $0x291] sm:$0xff] %vm698_vm1, %v1227_v24  ;;  %1293 = vst.msk [vmem:[#allocation2 + $0x2a1] sm:$0xff] %vm698_vm1, %v1228_v20  ;;  %v1338_v16 = vld [vmem:[#allocation2 + $0x212] sm:$0x1]  ;;  %v1327_v1 = vld [vmem:[#allocation2 + $0x10a] sm:$0x1] }
 0x1d7   :  { %1294 = vst.msk [vmem:[#allocation2 + $0x2a9] sm:$0xff] %vm698_vm1, %v1229_v23  ;;  %1295 = vst.msk [vmem:[#allocation2 + $0x2b9] sm:$0xff] %vm698_vm1, %v1230_v53  ;;  %v1339_v31 = vld [vmem:[#allocation2 + $0x22a] sm:$0x1]  ;;  %v1326_v5 = vld [vmem:[#allocation2 + $0xf2] sm:$0x1] }
 0x1d8   :  { %1358 = vst.msk [vmem:[#allocation2 + $0x78] sm:$0x1] %vm1352_vm2, %v1321_v12  ;;  %1365 = vst.msk [vmem:[#allocation2 + $0x120] sm:$0x1] %vm1352_vm2, %v1328_v22  ;;  %v1340_v44 = vld [vmem:[#allocation2 + $0x242] sm:$0x1] }
 0x1d9   :  { %1296 = vst.msk [vmem:[#allocation2 + $0x2c1] sm:$0xff] %vm698_vm1, %v1231_v35  ;;  %1297 = vst.msk [vmem:[#allocation2 + $0x2d1] sm:$0xff] %vm698_vm1, %v1232_v43  ;;  %v1341_v41 = vld [vmem:[#allocation2 + $0x25a] sm:$0x1]  ;;  %3013 = vrot.lane.b32.xlu1 %v8754_v21, %s7435_s2  ;;  %v1334_v14 = vld [vmem:[#allocation2 + $0x1b2] sm:$0x1] }
 0x1da   :  { %1298 = vst.msk [vmem:[#allocation2 + $0x2d9] sm:$0xff] %vm698_vm1, %v1233_v38  ;;  %1299 = vst.msk [vmem:[#allocation2 + $0x2e9] sm:$0xff] %vm698_vm1, %v1234_v56  ;;  %v8728_v58 = vld [vmem:[#allocation2 + $0x48] sm:$0xff]  ;;  %v8738_v26 = vld [vmem:[#allocation2 + $0x60] sm:$0xff] }
 0x1db   :  { %1300 = vst.msk [vmem:[#allocation2 + $0x2f1] sm:$0xff] %vm698_vm1, %v1235_v25  ;;  %1301 = vst.msk [vmem:[#allocation2 + $0x301] sm:$0xff] %vm698_vm1, %v1236_v34  ;;  %v1342_v55 = vld [vmem:[#allocation2 + $0x272] sm:$0x1]  ;;  %2431 = vrot.lane.b32.xlu0 %v8728_v58, %s7436_s3  ;;  %v1317_v15 = vld [vmem:[#allocation2 + $0x1a] sm:$0x1] }
 0x1dc   :  { %1302 = vst.msk [vmem:[#allocation2 + $0x309] sm:$0xff] %vm698_vm1, %v1237_v11  ;;  %1303 = vst.msk [vmem:[#allocation2 + $0x319] sm:$0xff] %vm698_vm1, %v1238_v2  ;;  %v1343_v57 = vld [vmem:[#allocation2 + $0x28a] sm:$0x1]  ;;  %v1390_v42 = vld [vmem:[#allocation2 + $0x27] sm:$0x1] }
 0x1dd   :  { %1314 = vst.msk [vmem:[#allocation2 + $0x349] sm:$0xff] %vm698_vm1, %v1238_v2  ;;  %1304 = vst.msk [vmem:[#allocation2 + $0x321] sm:$0xff] %vm698_vm1, %v1239_v39  ;;  %v1344_v4 = vld [vmem:[#allocation2 + $0x2a2] sm:$0x1]  ;;  %2441 = vrot.lane.b32.xlu1 %v8754_v21, %s7436_s3  ;;  %v1392_v24 = vld [vmem:[#allocation2 + $0x57] sm:$0x1] }
 0x1de   :  { %1366 = vst.msk [vmem:[#allocation2 + $0x138] sm:$0x1] %vm1352_vm2, %v1329_v60  ;;  %1367 = vst.msk [vmem:[#allocation2 + $0x150] sm:$0x1] %vm1352_vm2, %v1330_v45  ;;  %v1345_v18 = vld [vmem:[#allocation2 + $0x2ba] sm:$0x1] }
 0x1df   :  { %1306 = vst.msk [vmem:[#allocation2 + $0x339] sm:$0xff] %vm698_vm1, %v1241_v3  ;;  %1315 = vst.msk [vmem:[#allocation2 + $0x351] sm:$0xff] %vm698_vm1, %v1239_v39  ;;  %2435 = vrot.lane.b32.xlu0 %v8738_v26, %s7436_s3  ;;  %v8758_v30 = vld [vmem:[#allocation2 + $0x78] sm:$0xff]  ;;  %v1393_v20 = vld [vmem:[#allocation2 + $0x6f] sm:$0x1] }
 0x1e0   :  { %1368 = vst.msk [vmem:[#allocation2 + $0x168] sm:$0x1] %vm1352_vm2, %v1331_v52  ;;  %1372 = vst.msk [vmem:[#allocation2 + $0x1c8] sm:$0x1] %vm1352_vm2, %v1335_v54  ;;  %v1346_v50 = vld [vmem:[#allocation2 + $0x2d2] sm:$0x1] }
 0x1e1   :  { %1441 = vst.msk [vmem:[#allocation2 + $0x191] sm:$0x1] %vm1352_vm2, %v1405_v17  ;;  %1373 = vst.msk [vmem:[#allocation2 + $0x1e0] sm:$0x1] %vm1352_vm2, %v1336_v9  ;;  %v1347_v59 = vld [vmem:[#allocation2 + $0x2ea] sm:$0x1]  ;;  %3017 = vrot.lane.b32.xlu1 %v8773_v28, %s7435_s2 }
 0x1e2   :  { %1374 = vst.msk [vmem:[#allocation2 + $0x1f8] sm:$0x1] %vm1352_vm2, %v1337_v6  ;;  %1442 = vst.msk [vmem:[#allocation2 + $0x1a9] sm:$0x1] %vm1352_vm2, %v1406_v19  ;;  %v1348_v36 = vld [vmem:[#allocation2 + $0x302] sm:$0x1] }
 0x1e3   :  { %1375 = vst.msk [vmem:[#allocation2 + $0x210] sm:$0x1] %vm1352_vm2, %v1338_v16  ;;  %1376 = vst.msk [vmem:[#allocation2 + $0x228] sm:$0x1] %vm1352_vm2, %v1339_v31  ;;  %v1349_v33 = vld [vmem:[#allocation2 + $0x31a] sm:$0x1]  ;;  %2439 = vrot.lane.b32.xlu0 %v8758_v30, %s7436_s3 }
 0x1e4   :  { %1377 = vst.msk [vmem:[#allocation2 + $0x240] sm:$0x1] %vm1352_vm2, %v1340_v44  ;;  %1378 = vst.msk [vmem:[#allocation2 + $0x258] sm:$0x1] %vm1352_vm2, %v1341_v41  ;;  %v8790_v23 = vld [vmem:[#allocation2 + $0xb0] sm:$0xff]  ;;  %v8809_v12 = vld [vmem:[#allocation2] sm:$0xff] }
 0x1e5   :  { %1379 = vst.msk [vmem:[#allocation2 + $0x270] sm:$0x1] %vm1352_vm2, %v1342_v55  ;;  %1380 = vst.msk [vmem:[#allocation2 + $0x288] sm:$0x1] %vm1352_vm2, %v1343_v57  ;;  %2445 = vrot.lane.b32.xlu1 %v8773_v28, %s7436_s3  ;;  %v1394_v53 = vld [vmem:[#allocation2 + $0x87] sm:$0x1] }
 0x1e6   :  { %1381 = vst.msk [vmem:[#allocation2 + $0x2a0] sm:$0x1] %vm1352_vm2, %v1344_v4  ;;  %1382 = vst.msk [vmem:[#allocation2 + $0x2b8] sm:$0x1] %vm1352_vm2, %v1345_v18  ;;  %v1423_v32 = vld [vmem:[#allocation2 + $0x33f] sm:$0x1] }
 0x1e7   :  { %1383 = vst.msk [vmem:[#allocation2 + $0x2d0] sm:$0x1] %vm1352_vm2, %v1346_v50  ;;  %1384 = vst.msk [vmem:[#allocation2 + $0x2e8] sm:$0x1] %vm1352_vm2, %v1347_v59  ;;  %v1424_v8 = vld [vmem:[#allocation2 + $0x357] sm:$0x1] }
 0x1e8   :  { %1359 = vst.msk [vmem:[#allocation2 + $0x90] sm:$0x1] %vm1352_vm2, %v1322_v0  ;;  %1385 = vst.msk [vmem:[#allocation2 + $0x300] sm:$0x1] %vm1352_vm2, %v1348_v36  ;;  %v1395_v37 = vld [vmem:[#allocation2 + $0x9f] sm:$0x1] }
 0x1e9   :  { %1386 = vst.msk [vmem:[#allocation2 + $0x318] sm:$0x1] %vm1352_vm2, %v1349_v33  ;;  %1360 = vst.msk [vmem:[#allocation2 + $0xa8] sm:$0x1] %vm1352_vm2, %v1323_v10  ;;  %3021 = vrot.lane.b32.xlu1 %v8790_v23, %s7435_s2  ;;  %v1396_v35 = vld [vmem:[#allocation2 + $0xb7] sm:$0x1] }
 0x1ea   :  { %1459 = vst.msk [vmem:[#allocation2 + $0x341] sm:$0x1] %vm1352_vm2, %v1423_v32  ;;  %1460 = vst.msk [vmem:[#allocation2 + $0x359] sm:$0x1] %vm1352_vm2, %v1424_v8  ;;  %v1397_v43 = vld [vmem:[#allocation2 + $0xcf] sm:$0x1] }
 0x1eb   :  { %1361 = vst.msk [vmem:[#allocation2 + $0xc0] sm:$0x1] %vm1352_vm2, %v1324_v47  ;;  %1362 = vst.msk [vmem:[#allocation2 + $0xd8] sm:$0x1] %vm1352_vm2, %v1325_v51  ;;  %v1398_v56 = vld [vmem:[#allocation2 + $0xe7] sm:$0x1] }
 0x1ec   :  { %1363 = vst.msk [vmem:[#allocation2 + $0xf0] sm:$0x1] %vm1352_vm2, %v1326_v5  ;;  %1364 = vst.msk [vmem:[#allocation2 + $0x108] sm:$0x1] %vm1352_vm2, %v1327_v1  ;;  %v8812_v25 = vld [vmem:[#allocation2 + $0xc8] sm:$0xff]  ;;  %v1666_v2 = vrot.slane %v8809_v12, 1 }
 0x1ed   :  { %1354 = vst.msk [vmem:[#allocation2 + $0x18] sm:$0x1] %vm1352_vm2, %v1317_v15  ;;  %1371 = vst.msk [vmem:[#allocation2 + $0x1b0] sm:$0x1] %vm1352_vm2, %v1334_v14  ;;  %2449 = vrot.lane.b32.xlu1 %v8790_v23, %s7436_s3  ;;  %v8814_v7 = vld [vmem:[#allocation2 + $0x8] sm:$0xff]  ;;  %v8837_v19 = vld [vmem:[#allocation2 + $0xe0] sm:$0xff] }
 0x1ee   :  { %1426 = vst.msk [vmem:[#allocation2 + $0x29] sm:$0x1] %vm1352_vm2, %v1390_v42  ;;  %1428 = vst.msk [vmem:[#allocation2 + $0x59] sm:$0x1] %vm1352_vm2, %v1392_v24  ;;  %v1399_v34 = vld [vmem:[#allocation2 + $0xff] sm:$0x1] }
 0x1ef   :  { %v8767_v49 = vld [vmem:[#allocation2 + $0x90] sm:$0xff]  ;;  %1429 = vst.msk [vmem:[#allocation2 + $0x71] sm:$0x1] %vm1352_vm2, %v1393_v20  ;;  %1430 = vst.msk [vmem:[#allocation2 + $0x89] sm:$0x1] %vm1352_vm2, %v1394_v53  ;;  %v1667_v39 = vrot.slane %v8814_v7, 1 }
 0x1f0   :  { %2443 = vrot.lane.b32.xlu0 %v8767_v49, %s7436_s3  ;;  %v8776_v63 = vld [vmem:[#allocation2 + $0xa8] sm:$0xff]  ;;  %1431 = vst.msk [vmem:[#allocation2 + $0xa1] sm:$0x1] %vm1352_vm2, %v1395_v37  ;;  %1432 = vst.msk [vmem:[#allocation2 + $0xb9] sm:$0x1] %vm1352_vm2, %v1396_v35  ;;  %v1676_v31 = vrot.slane %v8658_v13, 1 }
 0x1f1   :  { %1433 = vst.msk [vmem:[#allocation2 + $0xd1] sm:$0x1] %vm1352_vm2, %v1397_v43  ;;  %14945 = vst [vmem:[#allocation26_spill] sm:$0xff] %v8809_v12  ;;  %3025 = vrot.lane.b32.xlu1 %v8812_v25, %s7435_s2  ;;  %v1400_v22 = vld [vmem:[#allocation2 + $0x117] sm:$0x1]  ;;  %v1668_v45 = vsel %vm1665_vm3, %v1666_v2, %v1667_v39  ;;  %v14612_v55 = vrot.slane %v8476_v62, 1 }
 0x1f2   :  { %v8782_v29 = vld [vmem:[#allocation2 + $0xc0] sm:$0xff]  ;;  %v8793_v61 = vld [vmem:[#allocation2 + $0xd8] sm:$0xff]  ;;  %1434 = vst.msk [vmem:[#allocation2 + $0xe9] sm:$0x1] %vm1352_vm2, %v1398_v56  ;;  %14946 = vst [vmem:[#allocation30_spill] sm:$0xff] %v8814_v7  ;;  %v1681_v18 = vrot.slane %v8728_v58, 1 }
 0x1f3   :  { %v8802_v38 = vld [vmem:[#allocation2 + $0xf0] sm:$0xff]  ;;  %v8816_v11 = vld [vmem:[#allocation2 + $0x108] sm:$0xff]  ;;  %1435 = vst.msk [vmem:[#allocation2 + $0x101] sm:$0x1] %vm1352_vm2, %v1399_v34  ;;  %1436 = vst.msk [vmem:[#allocation2 + $0x119] sm:$0x1] %vm1352_vm2, %v1400_v22  ;;  %v8853_v4 = vsel %vm1665_vm3, %v1676_v31, %v14612_v55 }
 0x1f4   :  { %2447 = vrot.lane.b32.xlu0 %v8776_v63, %s7436_s3  ;;  %v8824_v48 = vld [vmem:[#allocation2 + $0x10] sm:$0x3]  ;;  %v1401_v3 = vld [vmem:[#allocation2 + $0x12f] sm:$0x1]  ;;  %v1402_v60 = vld [vmem:[#allocation2 + $0x147] sm:$0x1] }
 0x1f5   :  { %1437 = vst.msk [vmem:[#allocation2 + $0x131] sm:$0x1] %vm1352_vm2, %v1401_v3  ;;  %2453 = vrot.lane.b32.xlu1 %v8812_v25, %s7436_s3  ;;  %v1669_v52 = vrot.slane %v8824_v48, 1  ;;  %1438 = vst.msk [vmem:[#allocation2 + $0x149] sm:$0x1] %vm1352_vm2, %v1402_v60  ;;  %v14610_v59 = vrot.slane %v8656_v40, 1 }
 0x1f6   :  { %v1403_v54 = vld [vmem:[#allocation2 + $0x15f] sm:$0x1]  ;;  %v1404_v17 = vld [vmem:[#allocation2 + $0x177] sm:$0x1]  ;;  %v1409_v44 = vld [vmem:[#allocation2 + $0x1ef] sm:$0x1] }
 0x1f7   :  { %1439 = vst.msk [vmem:[#allocation2 + $0x161] sm:$0x1] %vm1352_vm2, %v1403_v54  ;;  %1440 = vst.msk [vmem:[#allocation2 + $0x179] sm:$0x1] %vm1352_vm2, %v1404_v17  ;;  %v1407_v9 = vld [vmem:[#allocation2 + $0x1bf] sm:$0x1]  ;;  %v1670_v16 = vsel %vm1665_vm3, %v1667_v39, %v1669_v52  ;;  %v8869_v10 = vsel %vm1665_vm3, %v1681_v18, %v14610_v59 }
 0x1f8   :  { %2451 = vrot.lane.b32.xlu0 %v8782_v29, %s7436_s3  ;;  %v1408_v6 = vld [vmem:[#allocation2 + $0x1d7] sm:$0x1]  ;;  %1443 = vst.msk [vmem:[#allocation2 + $0x1c1] sm:$0x1] %vm1352_vm2, %v1407_v9  ;;  %v1410_v41 = vld [vmem:[#allocation2 + $0x207] sm:$0x1] }
 0x1f9   :  { %1444 = vst.msk [vmem:[#allocation2 + $0x1d9] sm:$0x1] %vm1352_vm2, %v1408_v6  ;;  %3029 = vrot.lane.b32.xlu1 %v8837_v19, %s7435_s2  ;;  %1445 = vst.msk [vmem:[#allocation2 + $0x1f1] sm:$0x1] %vm1352_vm2, %v1409_v44  ;;  %v1411_v57 = vld [vmem:[#allocation2 + $0x21f] sm:$0x1] }
 0x1fa   :  { %1446 = vst.msk [vmem:[#allocation2 + $0x209] sm:$0x1] %vm1352_vm2, %v1410_v41  ;;  %1447 = vst.msk [vmem:[#allocation2 + $0x221] sm:$0x1] %vm1352_vm2, %v1411_v57  ;;  %v1412_v50 = vld [vmem:[#allocation2 + $0x237] sm:$0x1] }
 0x1fb   :  { %14947 = vst [vmem:[#allocation9_spill] sm:$0xff] %v8853_v4  ;;  %1448 = vst.msk [vmem:[#allocation2 + $0x239] sm:$0x1] %vm1352_vm2, %v1412_v50  ;;  %v8862_v0 = vld [vmem:[#allocation2 + $0xf8] sm:$0xff]  ;;  %v8864_v36 = vld [vmem:[#allocation2 + $0x28] sm:$0x3] }
 0x1fc   :  { %2455 = vrot.lane.b32.xlu0 %v8793_v61, %s7436_s3  ;;  %v1413_v33 = vld [vmem:[#allocation2 + $0x24f] sm:$0x1]  ;;  %14948 = vst [vmem:[#allocation23_spill] sm:$0xff] %v8869_v10  ;;  %v1686_v32 = vrot.slane %v8738_v26, 1  ;;  %v1414_v8 = vld [vmem:[#allocation2 + $0x267] sm:$0x1] }
 0x1fd   :  { %2457 = vrot.lane.b32.xlu1 %v8837_v19, %s7436_s3  ;;  %1449 = vst.msk [vmem:[#allocation2 + $0x251] sm:$0x1] %vm1352_vm2, %v1413_v33  ;;  %v1415_v47 = vld [vmem:[#allocation2 + $0x27f] sm:$0x1]  ;;  %v1830_v51 = vrot.slane %v8824_v48, 2  ;;  %v14608_v5 = vrot.slane %v8724_v27, 1 }
 0x1fe   :  { %1450 = vst.msk [vmem:[#allocation2 + $0x269] sm:$0x1] %vm1352_vm2, %v1414_v8  ;;  %1451 = vst.msk [vmem:[#allocation2 + $0x281] sm:$0x1] %vm1352_vm2, %v1415_v47  ;;  %v1691_v1 = vrot.slane %v8758_v30, 1  ;;  %v14607_v15 = vrot.slane %v8754_v21, 1 }
 0x1ff   :  { %v14604_v14 = vrot.slane %v8773_v28, 1  ;;  %v1835_v42 = vrot.slane %v8864_v36, 2  ;;  %v8885_v24 = vld [vmem:[#allocation2 + $0x40] sm:$0x3]  ;;  %v1696_v20 = vrot.slane %v8767_v49, 1  ;;  %v1701_v53 = vrot.slane %v8776_v63, 1 }
 0x200   :  { %2459 = vrot.lane.b32.xlu0 %v8802_v38, %s7436_s3  ;;  %v8889_v37 = vld [vmem:[#allocation2 + $0x58] sm:$0x3]  ;;  %v1416_v35 = vld [vmem:[#allocation2 + $0x297] sm:$0x1]  ;;  %v8894_v43 = vsel %vm1665_vm3, %v1686_v32, %v14608_v5  ;;  %v8898_v56 = vld [vmem:[#allocation2 + $0x70] sm:$0x3]  ;;  %v8934_v18 = vsel %vm1665_vm3, %v1691_v1, %v14607_v15 }
 0x201   :  { %3033 = vrot.lane.b32.xlu1 %v8862_v0, %s7435_s2  ;;  %14949 = vst [vmem:[#allocation21_spill] sm:$0xff] %v8894_v43  ;;  %v14603_v34 = vrot.slane %v8814_v7, 2  ;;  %v14602_v2 = vrot.slane %v8633_v46, 2  ;;  %1452 = vst.msk [vmem:[#allocation2 + $0x299] sm:$0x1] %vm1352_vm2, %v1416_v35  ;;  %v8905_v48 = vld [vmem:[#allocation2 + $0x110] sm:$0xff]  ;;  %v8950_v47 = vsel %vm1665_vm3, %v1696_v20, %v14604_v14 }
 0x202   :  { %v1417_v22 = vld [vmem:[#allocation2 + $0x2af] sm:$0x1]  ;;  %v8907_v39 = vld [vmem:[#allocation2 + $0x88] sm:$0x3]  ;;  %v8909_v3 = vld [vmem:[#allocation2 + $0xa0] sm:$0x3] }
 0x203   :  { %1453 = vst.msk [vmem:[#allocation2 + $0x2b1] sm:$0x1] %vm1352_vm2, %v1417_v22  ;;  %v1418_v60 = vld [vmem:[#allocation2 + $0x2c7] sm:$0x1]  ;;  %v8917_v52 = vsel %vm1826_vm4, %v14602_v2, %v1835_v42  ;;  %v1420_v54 = vld [vmem:[#allocation2 + $0x2f7] sm:$0x1]  ;;  %v8922_v6 = vsel %vm1826_vm4, %v14603_v34, %v1830_v51 }
 0x204   :  { %2463 = vrot.lane.b32.xlu0 %v8816_v11, %s7436_s3  ;;  %1454 = vst.msk [vmem:[#allocation2 + $0x2c9] sm:$0x1] %vm1352_vm2, %v1418_v60  ;;  %14950 = vst [vmem:[#allocation27_spill] sm:$0xff] %v8917_v52  ;;  %v1421_v17 = vld [vmem:[#allocation2 + $0x30f] sm:$0x1]  ;;  %v14599_v31 = vrot.slane %v8656_v40, 2 }
 0x205   :  { %2461 = vrot.lane.b32.xlu1 %v8862_v0, %s7436_s3  ;;  %v1422_v9 = vld [vmem:[#allocation2 + $0x327] sm:$0x1]  ;;  %14951 = vst [vmem:[#allocation25_spill] sm:$0xff] %v8922_v6  ;;  %1456 = vst.msk [vmem:[#allocation2 + $0x2f9] sm:$0x1] %vm1352_vm2, %v1420_v54  ;;  %v1840_v44 = vrot.slane %v8885_v24, 2 }
 0x206   :  { %1457 = vst.msk [vmem:[#allocation2 + $0x311] sm:$0x1] %vm1352_vm2, %v1421_v17  ;;  %1458 = vst.msk [vmem:[#allocation2 + $0x329] sm:$0x1] %vm1352_vm2, %v1422_v9  ;;  %v1845_v41 = vrot.slane %v8889_v37, 2  ;;  %v14600_v32 = vrot.slane %v8724_v27, 2 }
 0x207   :  { %v1332_v57 = vld [vmem:[#allocation2 + $0x182] sm:$0x1]  ;;  %14952 = vst [vmem:[#allocation31_spill] sm:$0xff] %v8934_v18  ;;  %v8938_v50 = vld [vmem:[#allocation2 + $0xb8] sm:$0x3]  ;;  %v1850_v8 = vrot.slane %v8898_v56, 2 }
 0x208   :  { %2039 = vrot.lane.b32.xlu0 %v1668_v45, %s7434_s24  ;;  %v1419_v45 = vld [vmem:[#allocation2 + $0x2df] sm:$0x1]  ;;  %v8940_v33 = vld [vmem:[#allocation2 + $0xd0] sm:$0x3]  ;;  %1369 = vst.msk [vmem:[#allocation2 + $0x180] sm:$0x1] %vm1352_vm2, %v1332_v57  ;;  %v8963_v35 = vsel %vm1826_vm4, %v14599_v31, %v1845_v41 }
 0x209   :  { %1455 = vst.msk [vmem:[#allocation2 + $0x2e1] sm:$0x1] %vm1352_vm2, %v1419_v45  ;;  %3037 = vrot.lane.b32.xlu1 %v8905_v48, %s7435_s2  ;;  %14953 = vst [vmem:[#allocation29_spill] sm:$0xff] %v8950_v47  ;;  %v8952_v51 = vld [vmem:[#allocation2 + $0xe8] sm:$0x3]  ;;  %v14606_v1 = vrot.slane %v8754_v21, 2  ;;  %v8971_v45 = vsel %vm1826_vm4, %v14600_v32, %v1850_v8 }
 0x20a   :  { %14955 = vst [vmem:[#allocation10_spill] sm:$0xff] %v8963_v35  ;;  %v1333_v22 = vld [vmem:[#allocation2 + $0x19a] sm:$0x1]  ;;  %v8965_v60 = vld [vmem:[#allocation2 + $0x100] sm:$0x3]  ;;  %v14605_v20 = vrot.slane %v8773_v28, 2 }
 0x20b   :  { %14956 = vst [vmem:[#allocation12_spill] sm:$0xff] %v8971_v45  ;;  %v1855_v54 = vrot.slane %v8907_v39, 2  ;;  %v1860_v17 = vrot.slane %v8909_v3, 2  ;;  %1370 = vst.msk [vmem:[#allocation2 + $0x198] sm:$0x1] %vm1352_vm2, %v1333_v22  ;;  %v14609_v9 = vrot.slane %v8790_v23, 2 }
 0x20c   :  { %2041 = vrot.lane.b32.xlu0 %v1670_v16, %s7434_s24  ;;  %v14601_v16 = vrot.slane %v8476_v62, 2  ;;  %v1865_v41 = vrot.slane %v8938_v50, 2  ;;  %v1870_v57 = vrot.slane %v8940_v33, 2  ;;  %v1351_v31 = vld [vmem:[#allocation2 + $0x34a] sm:$0x1]  ;;  %v14613_v8 = vrot.slane %v8837_v19, 2 }
 0x20d   :  { %2465 = vrot.lane.b32.xlu1 %v8905_v48, %s7436_s3  ;;  %v8986_v32 = vsel %vm1826_vm4, %v14606_v1, %v1855_v54  ;;  %v8991_v22 = vsel %vm1826_vm4, %v14605_v20, %v1860_v17  ;;  %1388 = vst.msk [vmem:[#allocation2 + $0x348] sm:$0x1] %vm1352_vm2, %v1351_v31  ;;  %v8997_v2 = vld [vmem:[#allocation2 + $0x128] sm:$0xff]  ;;  %v8999_v34 = vld [vmem:[#allocation2 + $0x118] sm:$0x3]  ;;  %v14618_v14 = vrot.slane %v8862_v0, 2 }
 0x20e   :  { %v8958_v42 = vsel %vm1826_vm4, %v14601_v16, %v1840_v44  ;;  %v14611_v44 = vrot.slane %v8812_v25, 2  ;;  %14957 = vst [vmem:[#allocation11_spill] sm:$0xff] %v8986_v32  ;;  %14958 = vst [vmem:[#allocation14_spill] sm:$0xff] %v8991_v22  ;;  %v1875_v16 = vrot.slane %v8952_v51, 2  ;;  %v9005_v54 = vsel %vm1826_vm4, %v14609_v9, %v1865_v41  ;;  %v9014_v1 = vld [vmem:[#allocation2 + $0x140] sm:$0xff]  ;;  %v9025_v9 = vld [vmem:[#allocation2 + $0x18] sm:$0xff] }
 0x20f   :  { %14954 = vst [vmem:[#allocation32_spill] sm:$0xff] %v8958_v42  ;;  %14959 = vst [vmem:[#allocation13_spill] sm:$0xff] %v9005_v54  ;;  %v1880_v31 = vrot.slane %v8965_v60, 2  ;;  %v14619_v20 = vrot.slane %v8790_v23, 1  ;;  %v9016_v15 = vld [vmem:[#allocation2 + $0x130] sm:$0x3] }
 0x210   :  { %2047 = vrot.lane.b32.xlu0 %v8853_v4, %s7434_s24  ;;  %v9010_v17 = vsel %vm1826_vm4, %v14611_v44, %v1870_v57  ;;  %14961 = vst [vmem:[#allocation15_spill] sm:$0xff] %v9014_v1  ;;  %v9018_v5 = vld [vmem:[#allocation2 + $0x148] sm:$0x3]  ;;  %v9023_v41 = vsel %vm1826_vm4, %v14613_v8, %v1875_v16  ;;  %v9027_v59 = vld [vmem:[#allocation2 + $0x158] sm:$0xff]  ;;  %v9029_v57 = vld [vmem:[#allocation2 + $0x160] sm:$0x3] }
 0x211   :  { %14960 = vst [vmem:[#allocation16_spill] sm:$0xff] %v9010_v17  ;;  %14962 = vst [vmem:[#allocation18_spill] sm:$0xff] %v9018_v5  ;;  %v9034_v44 = vsel %vm1826_vm4, %v14618_v14, %v1880_v31  ;;  %v9041_v55 = vsel %vm1665_vm3, %v1701_v53, %v14619_v20  ;;  %v1706_v16 = vrot.slane %v8782_v29, 1  ;;  %2423 = vrot.lane.b32.xlu1 %v9025_v9, %s7436_s3  ;;  %v9046_v8 = vld [vmem:[#allocation2 + $0x170] sm:$0xff]  ;;  %v1885_v31 = vrot.slane %v8999_v34, 2  ;;  %v9068_v22 = vld [vmem:[#allocation2 + $0x1b8] sm:$0xff] }
 0x212   :  { %14963 = vst [vmem:[#allocation17_spill] sm:$0xff] %v9023_v41  ;;  %14964 = vst [vmem:[#allocation20_spill] sm:$0xff] %v9029_v57  ;;  %v9054_v14 = vld [vmem:[#allocation2 + $0x1c0] sm:$0x3]  ;;  %v14634_v53 = vrot.slane %v8997_v2, 2  ;;  %v14973_v32 = vrot.slane %v9014_v1, 2 }
 0x213   :  { %14965 = vst [vmem:[#allocation19_spill] sm:$0xff] %v9034_v44  ;;  %14966 = vst [vmem:[#allocation24_spill] sm:$0xff] %v9041_v55  ;;  %v1890_v44 = vrot.slane %v9016_v15, 2  ;;  %v14637_v17 = vrot.slane %v9046_v8, 2  ;;  %v9137_v45 = vld [vmem:[#allocation2 + $0x220] sm:$0x3] }
 0x214   :  { %2051 = vrot.lane.b32.xlu0 %v8869_v10, %s7434_s24  ;;  %14967 = vst [vmem:[#allocation22_spill] sm:$0xff] %v9046_v8  ;;  %14969 = vst [vmem:[#allocation34_spill] sm:$0xff] %v9054_v14  ;;  %v9154_v35 = vld [vmem:[#allocation2 + $0x238] sm:$0x3]  ;;  %v14677_v7 = vrot.slane %v8997_v2, 1 }
 0x215   :  { %14971 = vst [vmem:[#allocation36_spill] sm:$0xff] %v9068_v22  ;;  %v9073_v20 = vsel %vm1826_vm4, %v14634_v53, %v1890_v44  ;;  %2999 = vrot.lane.b32.xlu1 %v8658_v13, %s7435_s2  ;;  %v1910_v44 = vrot.slane %v9054_v14, 2  ;;  %v9091_v53 = vld [vmem:[#allocation2 + $0x1d8] sm:$0x3]  ;;  %v9106_v13 = vld [vmem:[#allocation2 + $0x1d0] sm:$0xff]  ;;  %14989 = vst [vmem:[#allocation51_spill] sm:$0xff] %v9137_v45 }
 0x216   :  { %14972 = vst [vmem:[#allocation37_spill] sm:$0xff] %v9073_v20  ;;  %14977 = vst [vmem:[#allocation40_spill] sm:$0xff] %v9091_v53  ;;  %v1915_v20 = vrot.slane %v9091_v53, 2  ;;  %v1935_v14 = vrot.slane %v9154_v35, 2 }
 0x217   :  { %14981 = vst [vmem:[#allocation43_spill] sm:$0xff] %v9106_v13  ;;  %14993 = vst [vmem:[#allocation55_spill] sm:$0xff] %v9154_v35 }
 0x218   :  { %2055 = vrot.lane.b32.xlu0 %v8894_v43, %s7434_s24  ;;  %v1895_v43 = vrot.slane %v9018_v5, 2  ;;  %v9279_v5 = vld [vmem:[#allocation2 + $0x310] sm:$0x3] }
 0x219   :  { %3003 = vrot.lane.b32.xlu1 %v8728_v58, %s7435_s2  ;;  %v9135_v58 = vld [vmem:[#allocation2 + $0x218] sm:$0xff] }
 0x21a   :  { %v9078_v41 = vsel %vm1826_vm4, %v14973_v32, %v1895_v43  ;;  %v14978_v43 = vrot.slane %v9027_v59, 2  ;;  %14988 = vst [vmem:[#allocation50_spill] sm:$0xff] %v9135_v58 }
 0x21b   :  { %14974 = vst [vmem:[#allocation38_spill] sm:$0xff] %v9078_v41  ;;  %v14644_v41 = vrot.slane %v9068_v22, 2 }
 0x21c   :  { %2059 = vrot.lane.b32.xlu0 %v8934_v18, %s7434_s24  ;;  %v14632_v18 = vrot.slane %v8905_v48, 2 }
 0x21d   :  { %3007 = vrot.lane.b32.xlu1 %v8738_v26, %s7435_s2  ;;  %v9165_v26 = vld [vmem:[#allocation2 + $0x248] sm:$0xff] }
 0x21e   :  { %v9065_v54 = vsel %vm1826_vm4, %v14632_v18, %v1885_v31  ;;  %v14975_v31 = vrot.slane %v8812_v25, 1  ;;  %14995 = vst [vmem:[#allocation57_spill] sm:$0xff] %v9165_v26 }
 0x21f   :  { %14970 = vst [vmem:[#allocation35_spill] sm:$0xff] %v9065_v54  ;;  %v1711_v54 = vrot.slane %v8793_v61, 1 }
 0x220   :  { %2063 = vrot.lane.b32.xlu0 %v8950_v47, %s7434_s24  ;;  %v9048_v47 = vld [vmem:[#allocation2 + $0x178] sm:$0x3]  ;;  %v9085_v18 = vsel %vm1665_vm3, %v1706_v16, %v14975_v31  ;;  %v14639_v31 = vrot.slane %v8837_v19, 1 }
 0x221   :  { %14968 = vst [vmem:[#allocation28_spill] sm:$0xff] %v9048_v47  ;;  %v1905_v10 = vrot.slane %v9048_v47, 2  ;;  %14976 = vst [vmem:[#allocation39_spill] sm:$0xff] %v9085_v18  ;;  %3011 = vrot.lane.b32.xlu1 %v8758_v30, %s7435_s2 }
 0x223   :  { %v9103_v16 = vsel %vm1826_vm4, %v14637_v17, %v1905_v10  ;;  %v9121_v10 = vsel %vm1826_vm4, %v14644_v41, %v1910_v44  ;;  %v9125_v17 = vld [vmem:[#allocation2 + $0x1e8] sm:$0xff] }
 0x224   :  { %2067 = vrot.lane.b32.xlu0 %v9041_v55, %s7434_s24  ;;  %v1900_v55 = vrot.slane %v9029_v57, 2  ;;  %14980 = vst [vmem:[#allocation42_spill] sm:$0xff] %v9103_v16  ;;  %14983 = vst [vmem:[#allocation45_spill] sm:$0xff] %v9121_v10  ;;  %v9127_v16 = vld [vmem:[#allocation2 + $0x1f0] sm:$0x3]  ;;  %v1721_v10 = vrot.slane %v8816_v11, 1 }
 0x225   :  { %14984 = vst [vmem:[#allocation46_spill] sm:$0xff] %v9125_v17  ;;  %14985 = vst [vmem:[#allocation47_spill] sm:$0xff] %v9127_v16  ;;  %v14661_v42 = vrot.slane %v9125_v17, 2  ;;  %v1920_v6 = vrot.slane %v9127_v16, 2  ;;  %v9176_v16 = vld [vmem:[#allocation2 + $0x260] sm:$0xff]  ;;  %3015 = vrot.lane.b32.xlu1 %v8767_v49, %s7435_s2  ;;  %v9277_v57 = vld [vmem:[#allocation2 + $0x308] sm:$0xff] }
 0x226   :  { %v9096_v32 = vsel %vm1826_vm4, %v14978_v43, %v1900_v55  ;;  %v9113_v55 = vsel %vm1665_vm3, %v1711_v54, %v14639_v31  ;;  %v1716_v43 = vrot.slane %v8802_v38, 1  ;;  %v14649_v54 = vrot.slane %v9106_v13, 2  ;;  %14998 = vst [vmem:[#allocation60_spill] sm:$0xff] %v9176_v16  ;;  %v9258_v49 = vld [vmem:[#allocation2 + $0x2e0] sm:$0x3]  ;;  %15029 = vst [vmem:[#allocation84_spill] sm:$0xff] %v9277_v57 }
 0x227   :  { %14979 = vst [vmem:[#allocation41_spill] sm:$0xff] %v9096_v32  ;;  %14982 = vst [vmem:[#allocation44_spill] sm:$0xff] %v9113_v55  ;;  %v14650_v31 = vrot.slane %v8862_v0, 1  ;;  %v9131_v32 = vld [vmem:[#allocation2 + $0x200] sm:$0xff]  ;;  %v9172_v4 = vsel %vm1826_vm4, %v14661_v42, %v1920_v6  ;;  %v15002_v6 = vrot.slane %v8905_v48, 1 }
 0x228   :  { %2071 = vrot.lane.b32.xlu0 %v9085_v18, %s7434_s24  ;;  %14986 = vst [vmem:[#allocation48_spill] sm:$0xff] %v9131_v32  ;;  %v9133_v18 = vld [vmem:[#allocation2 + $0x208] sm:$0x3]  ;;  %v9142_v44 = vsel %vm1826_vm4, %v14649_v54, %v1915_v20  ;;  %v9160_v20 = vld [vmem:[#allocation2 + $0x120] sm:$0xff]  ;;  %14997 = vst [vmem:[#allocation59_spill] sm:$0xff] %v9172_v4 }
 0x229   :  { %14987 = vst [vmem:[#allocation49_spill] sm:$0xff] %v9133_v18  ;;  %14990 = vst [vmem:[#allocation52_spill] sm:$0xff] %v9142_v44  ;;  %v9147_v41 = vsel %vm1665_vm3, %v1716_v43, %v14650_v31  ;;  %v1925_v54 = vrot.slane %v9133_v18, 2  ;;  %v9167_v44 = vld [vmem:[#allocation2 + $0x250] sm:$0x3]  ;;  %v15000_v18 = vrot.slane %v9131_v32, 2  ;;  %v9190_v42 = vsel %vm1665_vm3, %v1721_v10, %v15002_v6  ;;  %3019 = vrot.lane.b32.xlu1 %v8776_v63, %s7435_s2 }
 0x22a   :  { %14991 = vst [vmem:[#allocation53_spill] sm:$0xff] %v9147_v41  ;;  %14994 = vst [vmem:[#allocation56_spill] sm:$0xff] %v9160_v20  ;;  %v9178_v43 = vld [vmem:[#allocation2 + $0x268] sm:$0x3]  ;;  %v1726_v52 = vrot.slane %v9160_v20, 1  ;;  %v9195_v4 = vld [vmem:[#allocation2 + $0x138] sm:$0xff] }
 0x22b   :  { %14996 = vst [vmem:[#allocation58_spill] sm:$0xff] %v9167_v44  ;;  %14999 = vst [vmem:[#allocation61_spill] sm:$0xff] %v9178_v43  ;;  %v9183_v31 = vsel %vm1826_vm4, %v15000_v18, %v1925_v54  ;;  %v9199_v18 = vld [vmem:[#allocation2 + $0x280] sm:$0x3]  ;;  %v15007_v54 = vrot.slane %v9135_v58, 2  ;;  %v9208_v10 = vld [vmem:[#allocation2 + $0x290] sm:$0xff] }
 0x22c   :  { %2075 = vrot.lane.b32.xlu0 %v9113_v55, %s7434_s24  ;;  %v9152_v55 = vld [vmem:[#allocation2 + $0x230] sm:$0xff]  ;;  %15001 = vst [vmem:[#allocation62_spill] sm:$0xff] %v9183_v31  ;;  %15003 = vst [vmem:[#allocation63_spill] sm:$0xff] %v9190_v42  ;;  %v9210_v6 = vld [vmem:[#allocation2 + $0x298] sm:$0x3]  ;;  %v14676_v20 = vrot.slane %v9165_v26, 2 }
 0x22d   :  { %14992 = vst [vmem:[#allocation54_spill] sm:$0xff] %v9152_v55  ;;  %15004 = vst [vmem:[#allocation64_spill] sm:$0xff] %v9195_v4  ;;  %v15011_v30 = vrot.slane %v9152_v55, 2  ;;  %v1940_v35 = vrot.slane %v9167_v44, 2  ;;  %v1731_v47 = vrot.slane %v9195_v4, 1  ;;  %v9237_v44 = vsel %vm1665_vm3, %v1726_v52, %v14677_v7  ;;  %v9254_v52 = vld [vmem:[#allocation2 + $0x150] sm:$0xff]  ;;  %3023 = vrot.lane.b32.xlu1 %v8782_v29, %s7435_s2 }
 0x22e   :  { %15006 = vst [vmem:[#allocation66_spill] sm:$0xff] %v9199_v18  ;;  %15009 = vst [vmem:[#allocation68_spill] sm:$0xff] %v9208_v10  ;;  %v9243_v4 = vld [vmem:[#allocation2 + $0x2c8] sm:$0x3]  ;;  %v9256_v7 = vld [vmem:[#allocation2 + $0x2d8] sm:$0xff] }
 0x22f   :  { %15010 = vst [vmem:[#allocation69_spill] sm:$0xff] %v9210_v6  ;;  %v9215_v31 = vsel %vm1826_vm4, %v15011_v30, %v1935_v14  ;;  %v9230_v14 = vsel %vm1826_vm4, %v14676_v20, %v1940_v35  ;;  %15016 = vst [vmem:[#allocation74_spill] sm:$0xff] %v9237_v44  ;;  %v1955_v30 = vrot.slane %v9210_v6, 2  ;;  %v15027_v6 = vrot.slane %v9208_v10, 2 }
 0x230   :  { %2079 = vrot.lane.b32.xlu0 %v9147_v41, %s7434_s24  ;;  %v1930_v41 = vrot.slane %v9137_v45, 2  ;;  %v9197_v45 = vld [vmem:[#allocation2 + $0x278] sm:$0xff]  ;;  %15012 = vst [vmem:[#allocation70_spill] sm:$0xff] %v9215_v31  ;;  %15015 = vst [vmem:[#allocation73_spill] sm:$0xff] %v9230_v14  ;;  %v1950_v31 = vrot.slane %v9199_v18, 2  ;;  %v1965_v20 = vrot.slane %v9243_v4, 2 }
 0x231   :  { %15005 = vst [vmem:[#allocation65_spill] sm:$0xff] %v9197_v45  ;;  %15018 = vst [vmem:[#allocation76_spill] sm:$0xff] %v9243_v4  ;;  %v15024_v14 = vrot.slane %v9197_v45, 2  ;;  %v9275_v12 = vsel %vm1826_vm4, %v15027_v6, %v1955_v30  ;;  %v1736_v6 = vrot.slane %v9254_v52, 1  ;;  %v1506_v30 = vld [vmem:[#allocation2 + $0x168] sm:$0xff]  ;;  %v1980_v4 = vrot.slane %v9279_v5, 2  ;;  %3027 = vrot.lane.b32.xlu1 %v8793_v61, %s7435_s2 }
 0x232   :  { %v9204_v53 = vsel %vm1826_vm4, %v15007_v54, %v1930_v41  ;;  %v9220_v41 = vld [vmem:[#allocation2 + $0x2a8] sm:$0xff]  ;;  %v9222_v54 = vld [vmem:[#allocation2 + $0x2b0] sm:$0x3]  ;;  %15021 = vst [vmem:[#allocation78_spill] sm:$0xff] %v9254_v52  ;;  %15022 = vst [vmem:[#allocation79_spill] sm:$0xff] %v9256_v7  ;;  %v15036_v52 = vrot.slane %v9256_v7, 2 }
 0x233   :  { %15008 = vst [vmem:[#allocation67_spill] sm:$0xff] %v9204_v53  ;;  %15013 = vst [vmem:[#allocation71_spill] sm:$0xff] %v9220_v41  ;;  %v9241_v53 = vld [vmem:[#allocation2 + $0x2c0] sm:$0xff]  ;;  %v9263_v18 = vsel %vm1826_vm4, %v15024_v14, %v1950_v31  ;;  %v9302_v14 = vld [vmem:[#allocation2 + $0x328] sm:$0x3]  ;;  %v14709_v61 = vrot.slane %v9106_v13, 1 }
 0x234   :  { %2083 = vrot.lane.b32.xlu0 %v9190_v42, %s7434_s24  ;;  %15014 = vst [vmem:[#allocation72_spill] sm:$0xff] %v9222_v54  ;;  %v1945_v42 = vrot.slane %v9178_v43, 2  ;;  %15017 = vst [vmem:[#allocation75_spill] sm:$0xff] %v9241_v53  ;;  %v15019_v43 = vrot.slane %v9176_v16, 2 }
 0x235   :  { %15023 = vst [vmem:[#allocation80_spill] sm:$0xff] %v9258_v49  ;;  %15025 = vst [vmem:[#allocation81_spill] sm:$0xff] %v9263_v18  ;;  %v15031_v18 = vrot.slane %v9014_v1, 1  ;;  %v1741_v1 = vrot.slane %v1506_v30, 1  ;;  %3031 = vrot.lane.b32.xlu1 %v8802_v38, %s7435_s2  ;;  %v1524_v38 = vld [vmem:[#allocation2 + $0x1f8] sm:$0xff] }
 0x236   :  { %v9248_v35 = vsel %vm1826_vm4, %v15019_v43, %v1945_v42  ;;  %v14690_v42 = vrot.slane %v9220_v41, 2  ;;  %v1960_v43 = vrot.slane %v9222_v54, 2  ;;  %15028 = vst [vmem:[#allocation83_spill] sm:$0xff] %v9275_v12  ;;  %v14701_v12 = vrot.slane %v9027_v59, 1 }
 0x237   :  { %15020 = vst [vmem:[#allocation77_spill] sm:$0xff] %v9248_v35  ;;  %v9268_v35 = vld [vmem:[#allocation2 + $0x2f0] sm:$0xff]  ;;  %v9291_v54 = vsel %vm1665_vm3, %v1731_v47, %v15031_v18  ;;  %v15034_v47 = vrot.slane %v9241_v53, 2 }
 0x238   :  { %2087 = vrot.lane.b32.xlu0 %v9237_v44, %s7434_s24  ;;  %15026 = vst [vmem:[#allocation82_spill] sm:$0xff] %v9268_v35  ;;  %v9270_v44 = vld [vmem:[#allocation2 + $0x2f8] sm:$0x3]  ;;  %v9284_v31 = vsel %vm1826_vm4, %v14690_v42, %v1960_v43  ;;  %15032 = vst [vmem:[#allocation86_spill] sm:$0xff] %v9291_v54  ;;  %v1970_v43 = vrot.slane %v9258_v49, 2  ;;  %v9300_v42 = vld [vmem:[#allocation2 + $0x320] sm:$0xff] }
 0x239   :  { %15030 = vst [vmem:[#allocation85_spill] sm:$0xff] %v9284_v31  ;;  %15033 = vst [vmem:[#allocation87_spill] sm:$0xff] %v9300_v42  ;;  %v9307_v18 = vsel %vm1826_vm4, %v15034_v47, %v1965_v20  ;;  %v14699_v31 = vrot.slane %v9268_v35, 2  ;;  %v1975_v63 = vrot.slane %v9270_v44, 2  ;;  %v9327_v47 = vsel %vm1665_vm3, %v1736_v6, %v14701_v12  ;;  %v9341_v6 = vpop.permute.xlu1 %3001  ;;  %v1518_v12 = vld [vmem:[#allocation2 + $0x1c8] sm:$0xff]  ;;  %3035 = vrot.lane.b32.xlu1 %v8816_v11, %s7435_s2 }
 0x23a   :  { %15035 = vst [vmem:[#allocation88_spill] sm:$0xff] %v9307_v18  ;;  %v9315_v49 = vsel %vm1826_vm4, %v15036_v52, %v1970_v43  ;;  %15039 = vst [vmem:[#allocation91_spill] sm:$0xff] %v9327_v47  ;;  %v14703_v30 = vrot.slane %v9300_v42, 2  ;;  %v1985_v43 = vrot.slane %v9302_v14, 2  ;;  %v1527_v18 = vld [vmem:[#allocation2 + $0x210] sm:$0xff] }
 0x23b   :  { %15037 = vst [vmem:[#allocation89_spill] sm:$0xff] %v9315_v49  ;;  %v9322_v20 = vsel %vm1826_vm4, %v14699_v31, %v1975_v63  ;;  %v1515_v63 = vld [vmem:[#allocation2 + $0x1b0] sm:$0xff]  ;;  %v14704_v31 = vrot.slane %v9046_v8, 1  ;;  %15041 = vst [vmem:[#allocation93_spill] sm:$0xff] %v9341_v6 }
 0x23c   :  { %2091 = vrot.lane.b32.xlu0 %v9291_v54, %s7434_s24  ;;  %v14700_v54 = vrot.slane %v9277_v57, 2  ;;  %15038 = vst [vmem:[#allocation90_spill] sm:$0xff] %v9322_v20  ;;  %v9346_v29 = vsel %vm1826_vm4, %v14703_v30, %v1985_v43  ;;  %v1751_v30 = vrot.slane %v1518_v12, 1  ;;  %v9375_v12 = vpop.permute.xlu0 %2425 }
 0x23d   :  { %15042 = vst [vmem:[#allocation94_spill] sm:$0xff] %v9346_v29 }
 0x23e   :  { %v9334_v52 = vsel %vm1826_vm4, %v14700_v54, %v1980_v4  ;;  %v9351_v4 = vsel %vm1665_vm3, %v1741_v1, %v14704_v31  ;;  %v1746_v54 = vrot.slane %v1515_v63, 1  ;;  %v9363_v1 = vpop.permute.xlu1 %2429  ;;  %v1521_v63 = vld [vmem:[#allocation2 + $0x1e0] sm:$0xff]  ;;  %v1671_v31 = vrot.slane %v9025_v9, 1 }
 0x23f   :  { %15040 = vst [vmem:[#allocation92_spill] sm:$0xff] %v9334_v52  ;;  %15043 = vst [vmem:[#allocation95_spill] sm:$0xff] %v9351_v4  ;;  %v14707_v52 = vrot.slane %v9068_v22, 1  ;;  %v9371_v29 = vsel %vm1665_vm3, %v1751_v30, %v14709_v61  ;;  %v1756_v20 = vrot.slane %v1521_v63, 1  ;;  %v1674_v30 = vrot.slane %v8864_v36, 1 }
 0x240   :  { %2095 = vrot.lane.b32.xlu0 %v9327_v47, %s7434_s24  ;;  %15044 = vst [vmem:[#allocation96_spill] sm:$0xff] %v9363_v1  ;;  %15045 = vst [vmem:[#allocation97_spill] sm:$0xff] %v9371_v29  ;;  %v1761_v63 = vrot.slane %v1524_v38, 1  ;;  %v9396_v61 = vpop.permute.xlu0 %2427 }
 0x241   :  { %v1748_v43 = vsel %vm1665_vm3, %v1746_v54, %v14707_v52  ;;  %v1672_v54 = vrot.slane %v8633_v46, 1 }
 0x242   :  { %v9381_v52 = vpop.permute.xlu1 %3005 }
 0x243   :  { %15046 = vst [vmem:[#allocation98_spill] sm:$0xff] %v9381_v52  ;;  %v9384_v49 = vsel %vm1665_vm3, %v1671_v31, %v1672_v54  ;;  %v14719_v31 = vrot.slane %v9131_v32, 1  ;;  %v9402_v36 = vsel %vm1665_vm3, %v1672_v54, %v1674_v30 }
 0x244   :  { %2099 = vrot.lane.b32.xlu0 %v9351_v4, %s7434_s24  ;;  %2043 = vrot.lane.b32.xlu1 %v9384_v49, %s7434_s24  ;;  %v14722_v4 = vrot.slane %v9135_v58, 1 }
 0x245   :  { %v9408_v38 = vsel %vm1665_vm3, %v1761_v63, %v14719_v31 }
 0x246   :  { %15049 = vst [vmem:[#allocation101_spill] sm:$0xff] %v9408_v38 }
 0x248   :  { %2103 = vrot.lane.b32.xlu0 %v1748_v43, %s7434_s24  ;;  %v14712_v43 = vrot.slane %v9125_v17, 1  ;;  %2045 = vrot.lane.b32.xlu1 %v9402_v36, %s7434_s24 }
 0x24a   :  { %v9390_v11 = vsel %vm1665_vm3, %v1756_v20, %v14712_v43  ;;  %v1679_v20 = vrot.slane %v8885_v24, 1  ;;  %v1766_v43 = vrot.slane %v1527_v18, 1  ;;  %v15052_v24 = vrot.slane %v8476_v62, 1 }
 0x24b   :  { %15047 = vst [vmem:[#allocation99_spill] sm:$0xff] %v9390_v11  ;;  %v1684_v18 = vrot.slane %v8889_v37, 1  ;;  %v15056_v37 = vrot.slane %v8656_v40, 1 }
 0x24c   :  { %2107 = vrot.lane.b32.xlu0 %v9371_v29, %s7434_s24  ;;  %v9399_v29 = vpop.permute.xlu1 %2433  ;;  %v9422_v30 = vsel %vm1665_vm3, %v15052_v24, %v1679_v20  ;;  %v9428_v63 = vsel %vm1665_vm3, %v1766_v43, %v14722_v4  ;;  %v1689_v43 = vrot.slane %v8898_v56, 1  ;;  %v15060_v56 = vrot.slane %v8724_v27, 1 }
 0x24d   :  { %15048 = vst [vmem:[#allocation100_spill] sm:$0xff] %v9399_v29  ;;  %v9417_v54 = vpop.permute.xlu0 %2431  ;;  %15053 = vst [vmem:[#allocation104_spill] sm:$0xff] %v9428_v63  ;;  %2049 = vrot.lane.b32.xlu1 %v9422_v30, %s7434_s24  ;;  %v9442_v24 = vsel %vm1665_vm3, %v15056_v37, %v1684_v18 }
 0x24e   :  { %15051 = vst [vmem:[#allocation103_spill] sm:$0xff] %v9417_v54  ;;  %v9462_v37 = vsel %vm1665_vm3, %v15060_v56, %v1689_v43 }
 0x250   :  { %2111 = vrot.lane.b32.xlu0 %v9390_v11, %s7434_s24  ;;  %v1530_v11 = vld [vmem:[#allocation2 + $0x228] sm:$0xff]  ;;  %v9415_v47 = vpop.permute.xlu1 %3009 }
 0x251   :  { %15050 = vst [vmem:[#allocation102_spill] sm:$0xff] %v9415_v47  ;;  %v1771_v31 = vrot.slane %v1530_v11, 1  ;;  %v14725_v47 = vrot.slane %v9152_v55, 1  ;;  %v9437_v20 = vpop.permute.xlu0 %2435  ;;  %2053 = vrot.lane.b32.xlu1 %v9442_v24, %s7434_s24 }
 0x252   :  { %15055 = vst [vmem:[#allocation106_spill] sm:$0xff] %v9437_v20 }
 0x253   :  { %v9448_v11 = vsel %vm1665_vm3, %v1771_v31, %v14725_v47  ;;  %v1694_v31 = vrot.slane %v8907_v39, 1  ;;  %v15064_v39 = vrot.slane %v8754_v21, 1 }
 0x254   :  { %2115 = vrot.lane.b32.xlu0 %v9408_v38, %s7434_s24  ;;  %v1533_v38 = vld [vmem:[#allocation2 + $0x240] sm:$0xff]  ;;  %v9435_v29 = vpop.permute.xlu1 %2437  ;;  %15057 = vst [vmem:[#allocation107_spill] sm:$0xff] %v9448_v11 }
 0x255   :  { %15054 = vst [vmem:[#allocation105_spill] sm:$0xff] %v9435_v29  ;;  %v1776_v4 = vrot.slane %v1533_v38, 1  ;;  %v14728_v29 = vrot.slane %v9165_v26, 1  ;;  %v9457_v18 = vpop.permute.xlu0 %2439  ;;  %2057 = vrot.lane.b32.xlu1 %v9462_v37, %s7434_s24  ;;  %v9482_v56 = vsel %vm1665_vm3, %v15064_v39, %v1694_v31 }
 0x256   :  { %15059 = vst [vmem:[#allocation109_spill] sm:$0xff] %v9457_v18 }
 0x257   :  { %v9468_v38 = vsel %vm1665_vm3, %v1776_v4, %v14728_v29  ;;  %v1699_v4 = vrot.slane %v8909_v3, 1  ;;  %v15068_v3 = vrot.slane %v8773_v28, 1 }
 0x258   :  { %2119 = vrot.lane.b32.xlu0 %v9428_v63, %s7434_s24  ;;  %v1536_v63 = vld [vmem:[#allocation2 + $0x258] sm:$0xff]  ;;  %v9455_v20 = vpop.permute.xlu1 %3013  ;;  %15061 = vst [vmem:[#allocation110_spill] sm:$0xff] %v9468_v38 }
 0x259   :  { %15058 = vst [vmem:[#allocation108_spill] sm:$0xff] %v9455_v20  ;;  %v1781_v47 = vrot.slane %v1536_v63, 1  ;;  %v14731_v20 = vrot.slane %v9176_v16, 1  ;;  %2061 = vrot.lane.b32.xlu1 %v9482_v56, %s7434_s24  ;;  %v9502_v39 = vsel %vm1665_vm3, %v15068_v3, %v1699_v4 }
 0x25b   :  { %v9488_v63 = vsel %vm1665_vm3, %v1781_v47, %v14731_v20  ;;  %v1704_v47 = vrot.slane %v8938_v50, 1  ;;  %v15072_v50 = vrot.slane %v8790_v23, 1 }
 0x25c   :  { %2123 = vrot.lane.b32.xlu0 %v9448_v11, %s7434_s24  ;;  %v1539_v11 = vld [vmem:[#allocation2 + $0x270] sm:$0xff]  ;;  %v9475_v18 = vpop.permute.xlu1 %2441  ;;  %15065 = vst [vmem:[#allocation113_spill] sm:$0xff] %v9488_v63 }
 0x25d   :  { %15062 = vst [vmem:[#allocation111_spill] sm:$0xff] %v9475_v18  ;;  %v1786_v29 = vrot.slane %v1539_v11, 1  ;;  %2065 = vrot.lane.b32.xlu1 %v9502_v39, %s7434_s24  ;;  %v9522_v3 = vsel %vm1665_vm3, %v15072_v50, %v1704_v47 }
 0x260   :  { %2127 = vrot.lane.b32.xlu0 %v9468_v38, %s7434_s24  ;;  %v1542_v38 = vld [vmem:[#allocation2 + $0x288] sm:$0xff]  ;;  %v9495_v18 = vpop.permute.xlu1 %3017 }
 0x261   :  { %15066 = vst [vmem:[#allocation114_spill] sm:$0xff] %v9495_v18  ;;  %v1791_v20 = vrot.slane %v1542_v38, 1  ;;  %2069 = vrot.lane.b32.xlu1 %v9522_v3, %s7434_s24 }
 0x262   :  { %v9477_v43 = vpop.permute.xlu0 %2443 }
 0x263   :  { %15063 = vst [vmem:[#allocation112_spill] sm:$0xff] %v9477_v43  ;;  %v14734_v43 = vrot.slane %v9197_v45, 1 }
 0x264   :  { %2131 = vrot.lane.b32.xlu0 %v9488_v63, %s7434_s24  ;;  %v1545_v63 = vld [vmem:[#allocation2 + $0x2a0] sm:$0xff]  ;;  %v9515_v18 = vpop.permute.xlu1 %2445 }
 0x265   :  { %v9508_v11 = vsel %vm1665_vm3, %v1786_v29, %v14734_v43  ;;  %15070 = vst [vmem:[#allocation117_spill] sm:$0xff] %v9515_v18  ;;  %v1709_v29 = vrot.slane %v8940_v33, 1  ;;  %v1796_v43 = vrot.slane %v1545_v63, 1  ;;  %v15076_v33 = vrot.slane %v8812_v25, 1 }
 0x266   :  { %v9497_v31 = vpop.permute.xlu0 %2447  ;;  %15069 = vst [vmem:[#allocation116_spill] sm:$0xff] %v9508_v11 }
 0x267   :  { %15067 = vst [vmem:[#allocation115_spill] sm:$0xff] %v9497_v31  ;;  %v14737_v31 = vrot.slane %v9208_v10, 1  ;;  %v9542_v50 = vsel %vm1665_vm3, %v15076_v33, %v1709_v29 }
 0x268   :  { %2135 = vrot.lane.b32.xlu0 %v9508_v11, %s7434_s24  ;;  %v1548_v11 = vld [vmem:[#allocation2 + $0x2b8] sm:$0xff]  ;;  %v9535_v18 = vpop.permute.xlu1 %3021  ;;  %2073 = vrot.lane.b32.xlu1 %v9542_v50, %s7434_s24 }
 0x269   :  { %v9528_v38 = vsel %vm1665_vm3, %v1791_v20, %v14737_v31  ;;  %15074 = vst [vmem:[#allocation120_spill] sm:$0xff] %v9535_v18  ;;  %v1714_v20 = vrot.slane %v8952_v51, 1  ;;  %v1801_v31 = vrot.slane %v1548_v11, 1  ;;  %v15080_v51 = vrot.slane %v8837_v19, 1 }
 0x26a   :  { %v9517_v4 = vpop.permute.xlu0 %2451  ;;  %15073 = vst [vmem:[#allocation119_spill] sm:$0xff] %v9528_v38 }
 0x26b   :  { %15071 = vst [vmem:[#allocation118_spill] sm:$0xff] %v9517_v4  ;;  %v14740_v4 = vrot.slane %v9220_v41, 1  ;;  %v9562_v33 = vsel %vm1665_vm3, %v15080_v51, %v1714_v20 }
 0x26c   :  { %2139 = vrot.lane.b32.xlu0 %v9528_v38, %s7434_s24  ;;  %v1551_v38 = vld [vmem:[#allocation2 + $0x2d0] sm:$0xff]  ;;  %v9555_v18 = vpop.permute.xlu1 %2449  ;;  %2077 = vrot.lane.b32.xlu1 %v9562_v33, %s7434_s24 }
 0x26d   :  { %v9548_v63 = vsel %vm1665_vm3, %v1796_v43, %v14740_v4  ;;  %15078 = vst [vmem:[#allocation123_spill] sm:$0xff] %v9555_v18  ;;  %v1719_v43 = vrot.slane %v8965_v60, 1  ;;  %v1806_v4 = vrot.slane %v1551_v38, 1  ;;  %v15084_v60 = vrot.slane %v8862_v0, 1 }
 0x26e   :  { %v9537_v47 = vpop.permute.xlu0 %2455  ;;  %15077 = vst [vmem:[#allocation122_spill] sm:$0xff] %v9548_v63 }
 0x26f   :  { %15075 = vst [vmem:[#allocation121_spill] sm:$0xff] %v9537_v47  ;;  %v14743_v47 = vrot.slane %v9241_v53, 1  ;;  %v9582_v51 = vsel %vm1665_vm3, %v15084_v60, %v1719_v43 }
 0x270   :  { %2143 = vrot.lane.b32.xlu0 %v9548_v63, %s7434_s24  ;;  %v1554_v63 = vld [vmem:[#allocation2 + $0x2e8] sm:$0xff]  ;;  %v9575_v18 = vpop.permute.xlu1 %3025  ;;  %2081 = vrot.lane.b32.xlu1 %v9582_v51, %s7434_s24 }
 0x271   :  { %v9568_v11 = vsel %vm1665_vm3, %v1801_v31, %v14743_v47  ;;  %15082 = vst [vmem:[#allocation126_spill] sm:$0xff] %v9575_v18  ;;  %v1724_v31 = vrot.slane %v8999_v34, 1  ;;  %v1811_v47 = vrot.slane %v1554_v63, 1  ;;  %v15087_v34 = vrot.slane %v8905_v48, 1 }
 0x272   :  { %v9557_v29 = vpop.permute.xlu0 %2459  ;;  %15081 = vst [vmem:[#allocation125_spill] sm:$0xff] %v9568_v11 }
 0x273   :  { %15079 = vst [vmem:[#allocation124_spill] sm:$0xff] %v9557_v29  ;;  %v14746_v29 = vrot.slane %v9256_v7, 1  ;;  %v9602_v60 = vsel %vm1665_vm3, %v15087_v34, %v1724_v31 }
 0x274   :  { %2147 = vrot.lane.b32.xlu0 %v9568_v11, %s7434_s24  ;;  %v1557_v11 = vld [vmem:[#allocation2 + $0x300] sm:$0xff]  ;;  %v9595_v18 = vpop.permute.xlu1 %2453  ;;  %2085 = vrot.lane.b32.xlu1 %v9602_v60, %s7434_s24 }
 0x275   :  { %v9588_v38 = vsel %vm1665_vm3, %v1806_v4, %v14746_v29  ;;  %15086 = vst [vmem:[#allocation129_spill] sm:$0xff] %v9595_v18  ;;  %v1729_v4 = vrot.slane %v9016_v15, 1  ;;  %v1816_v29 = vrot.slane %v1557_v11, 1  ;;  %v14752_v18 = vrot.slane %v9277_v57, 1 }
 0x276   :  { %v9577_v20 = vpop.permute.xlu0 %2463  ;;  %15085 = vst [vmem:[#allocation128_spill] sm:$0xff] %v9588_v38  ;;  %v15090_v15 = vrot.slane %v8997_v2, 1 }
 0x277   :  { %15083 = vst [vmem:[#allocation127_spill] sm:$0xff] %v9577_v20  ;;  %v14749_v20 = vrot.slane %v9268_v35, 1 }
 0x278   :  { %2151 = vrot.lane.b32.xlu0 %v9588_v38, %s7434_s24  ;;  %v1560_v38 = vld [vmem:[#allocation2 + $0x318] sm:$0xff]  ;;  %v9615_v52 = vpop.permute.xlu1 %3029  ;;  %v9622_v34 = vsel %vm1665_vm3, %v15090_v15, %v1729_v4  ;;  %v15096_v15 = vld [vmem:[#allocation15_spill] sm:$0xff] }
 0x279   :  { %v9608_v63 = vsel %vm1665_vm3, %v1811_v47, %v14749_v20  ;;  %15089 = vst [vmem:[#allocation131_spill] sm:$0xff] %v9615_v52  ;;  %15091 = vst [vmem:[#allocation132_spill] sm:$0xff] %v9622_v34  ;;  %v15092_v47 = vld [vmem:[#allocation18_spill] sm:$0xff]  ;;  %v9628_v20 = vsel %vm1665_vm3, %v1816_v29, %v14752_v18  ;;  %2089 = vrot.lane.b32.xlu1 %v9622_v34, %s7434_s24  ;;  %v14757_v52 = vrot.slane %v9300_v42, 1  ;;  %v15099_v29 = vld [vmem:[#allocation20_spill] sm:$0xff] }
 0x27a   :  { %v9597_v43 = vpop.permute.xlu0 %2039  ;;  %15088 = vst [vmem:[#allocation130_spill] sm:$0xff] %v9608_v63  ;;  %v1734_v11 = vrot.slane %v15092_v47, 1  ;;  %15093 = vst [vmem:[#allocation18_spill] sm:$0xff] %v9628_v20  ;;  %v15097_v47 = vrot.slane %v15096_v15, 1  ;;  %v1739_v18 = vrot.slane %v15099_v29, 1  ;;  %v15101_v34 = vld [vmem:[#allocation26_spill] sm:$0xff] }
 0x27b   :  { %v15105_v29 = vld [vmem:[#allocation28_spill] sm:$0xff] }
 0x27c   :  { %2155 = vrot.lane.b32.xlu0 %v9608_v63, %s7434_s24  ;;  %v1821_v63 = vrot.slane %v1560_v38, 1  ;;  %v9635_v54 = vpop.permute.xlu1 %2457  ;;  %v9642_v1 = vsel %vm1665_vm3, %v15097_v47, %v1734_v11  ;;  %v15103_v11 = vrot.slane %v9027_v59, 1 }
 0x27d   :  { %15094 = vst [vmem:[#allocation133_spill] sm:$0xff] %v9635_v54  ;;  %15098 = vst [vmem:[#allocation15_spill] sm:$0xff] %v9642_v1  ;;  %2093 = vrot.lane.b32.xlu1 %v9642_v1, %s7434_s24  ;;  %v1832_v1 = vrot.slane %v9025_v9, 2 }
 0x27e   :  { %v9617_v31 = vpop.permute.xlu0 %2041  ;;  %v9648_v38 = vsel %vm1665_vm3, %v1821_v63, %v14757_v52  ;;  %v9662_v47 = vsel %vm1665_vm3, %v15103_v11, %v1739_v18  ;;  %v1744_v63 = vrot.slane %v15105_v29, 1  ;;  %v15106_v52 = vld [vmem:[#allocation30_spill] sm:$0xff]  ;;  %v15109_v18 = vrot.slane %v9046_v8, 1 }
 0x27f   :  { %15100 = vst [vmem:[#allocation20_spill] sm:$0xff] %v9648_v38  ;;  %15104 = vst [vmem:[#allocation135_spill] sm:$0xff] %v9662_v47  ;;  %v15107_v6 = vrot.slane %v15106_v52, 2  ;;  %v15111_v52 = vld [vmem:[#allocation34_spill] sm:$0xff] }
 0x280   :  { %2159 = vrot.lane.b32.xlu0 %v9628_v20, %s7434_s24  ;;  %v1827_v20 = vrot.slane %v15101_v34, 2  ;;  %v9655_v54 = vpop.permute.xlu1 %3033  ;;  %v9679_v11 = vsel %vm1665_vm3, %v15109_v18, %v1744_v63  ;;  %v1749_v29 = vrot.slane %v15111_v52, 1  ;;  %v15115_v18 = vrot.slane %v9068_v22, 1 }
 0x281   :  { %15102 = vst [vmem:[#allocation26_spill] sm:$0xff] %v9655_v54  ;;  %2097 = vrot.lane.b32.xlu1 %v9662_v47, %s7434_s24  ;;  %15110 = vst [vmem:[#allocation30_spill] sm:$0xff] %v9679_v11  ;;  %v9707_v47 = vld [vmem:[#allocation2 + $0x48] sm:$0xff] }
 0x282   :  { %v9637_v4 = vpop.permute.xlu0 %2047  ;;  %v1829_v34 = vsel %vm1826_vm4, %v1827_v20, %v15107_v6  ;;  %v15112_v6 = vrot.slane %v8633_v46, 2  ;;  %v9687_v20 = vld [vmem:[#allocation2 + $0x30] sm:$0xff]  ;;  %v1750_v46 = vsel %vm1665_vm3, %v15115_v18, %v1749_v29  ;;  %v15120_v29 = vrot.slane %v9106_v13, 1 }
 0x283   :  { %15095 = vst [vmem:[#allocation134_spill] sm:$0xff] %v9637_v4 }
 0x284   :  { %2163 = vrot.lane.b32.xlu0 %v9648_v38, %s7434_s24  ;;  %v9672_v38 = vpop.permute.xlu1 %2461  ;;  %v9685_v9 = vsel %vm1826_vm4, %v1832_v1, %v15112_v6  ;;  %v15116_v1 = vld [vmem:[#allocation40_spill] sm:$0xff]  ;;  %v15117_v6 = vrot.slane %v8476_v62, 2 }
 0x285   :  { %15108 = vst [vmem:[#allocation28_spill] sm:$0xff] %v9672_v38  ;;  %2101 = vrot.lane.b32.xlu1 %v9679_v11, %s7434_s24  ;;  %v1754_v52 = vrot.slane %v15116_v1, 1  ;;  %v1842_v11 = vrot.slane %v9707_v47, 2  ;;  %v15123_v1 = vrot.slane %v8656_v40, 2 }
 0x286   :  { %v9657_v4 = vpop.permute.xlu0 %2051 }
 0x287   :  { %v9720_v62 = vsel %vm1665_vm3, %v15120_v29, %v1754_v52  ;;  %v15125_v29 = vrot.slane %v9125_v17, 1 }
 0x288   :  { %2231 = vrot.lane.b32.xlu0 %v1829_v34, %s7437_s17  ;;  %v1837_v34 = vrot.slane %v9687_v20, 2  ;;  %v9694_v38 = vpop.permute.xlu1 %3037  ;;  %15121 = vst [vmem:[#allocation138_spill] sm:$0xff] %v9720_v62 }
 0x289   :  { %15113 = vst [vmem:[#allocation34_spill] sm:$0xff] %v9694_v38  ;;  %2105 = vrot.lane.b32.xlu1 %v1750_v46, %s7434_s24  ;;  %v9728_v46 = vld [vmem:[#allocation2 + $0x60] sm:$0xff] }
 0x28a   :  { %v9674_v54 = vpop.permute.xlu0 %2055  ;;  %v9705_v8 = vsel %vm1826_vm4, %v1837_v34, %v15117_v6  ;;  %v15122_v34 = vld [vmem:[#allocation47_spill] sm:$0xff]  ;;  %v9726_v6 = vsel %vm1826_vm4, %v1842_v11, %v15123_v1  ;;  %v15127_v11 = vld [vmem:[#allocation49_spill] sm:$0xff]  ;;  %v15128_v1 = vrot.slane %v8724_v27, 2 }
 0x28b   :  { %v1759_v18 = vrot.slane %v15122_v34, 1  ;;  %v1764_v34 = vrot.slane %v15127_v11, 1 }
 0x28c   :  { %2235 = vrot.lane.b32.xlu0 %v9685_v9, %s7437_s17  ;;  %v9713_v38 = vpop.permute.xlu1 %2465 }
 0x28d   :  { %15118 = vst [vmem:[#allocation40_spill] sm:$0xff] %v9713_v38  ;;  %2109 = vrot.lane.b32.xlu1 %v9720_v62, %s7434_s24  ;;  %v9742_v40 = vsel %vm1665_vm3, %v15125_v29, %v1759_v18  ;;  %v9750_v62 = vld [vmem:[#allocation2 + $0x78] sm:$0xff]  ;;  %v15131_v29 = vrot.slane %v9131_v32, 1 }
 0x28e   :  { %v9696_v63 = vpop.permute.xlu0 %2059  ;;  %15126 = vst [vmem:[#allocation139_spill] sm:$0xff] %v9742_v40  ;;  %15129 = vst [vmem:[#allocation49_spill] sm:$0xff] %v9750_v62 }
 0x28f   :  { %15114 = vst [vmem:[#allocation136_spill] sm:$0xff] %v9696_v63  ;;  %v1847_v63 = vrot.slane %v9728_v46, 2  ;;  %v9764_v27 = vsel %vm1665_vm3, %v15131_v29, %v1764_v34  ;;  %v15137_v29 = vrot.slane %v9135_v58, 1 }
 0x290   :  { %2239 = vrot.lane.b32.xlu0 %v9705_v8, %s7437_s17  ;;  %v9735_v13 = vpop.permute.xlu1 %2423  ;;  %15132 = vst [vmem:[#allocation141_spill] sm:$0xff] %v9764_v27 }
 0x291   :  { %v9748_v38 = vsel %vm1826_vm4, %v1847_v63, %v15128_v1  ;;  %2113 = vrot.lane.b32.xlu1 %v9742_v40, %s7434_s24  ;;  %v15133_v63 = vld [vmem:[#allocation51_spill] sm:$0xff]  ;;  %v15134_v1 = vrot.slane %v8754_v21, 2 }
 0x292   :  { %v9715_v22 = vpop.permute.xlu0 %2063  ;;  %v1769_v11 = vrot.slane %v15133_v63, 1  ;;  %v9772_v40 = vld [vmem:[#allocation2 + $0x90] sm:$0xff] }
 0x293   :  { %15119 = vst [vmem:[#allocation137_spill] sm:$0xff] %v9715_v22  ;;  %v1852_v22 = vrot.slane %v9750_v62, 2  ;;  %15135 = vst [vmem:[#allocation51_spill] sm:$0xff] %v9772_v40  ;;  %v1857_v62 = vrot.slane %v9772_v40, 2 }
 0x294   :  { %2243 = vrot.lane.b32.xlu0 %v9726_v6, %s7437_s17  ;;  %v9757_v17 = vpop.permute.xlu1 %2999  ;;  %v9786_v21 = vsel %vm1665_vm3, %v15137_v29, %v1769_v11  ;;  %v15143_v29 = vrot.slane %v9152_v55, 1 }
 0x295   :  { %2117 = vrot.lane.b32.xlu1 %v9764_v27, %s7434_s24  ;;  %15138 = vst [vmem:[#allocation143_spill] sm:$0xff] %v9786_v21  ;;  %v9794_v27 = vld [vmem:[#allocation2 + $0xa8] sm:$0xff] }
 0x296   :  { %v9737_v52 = vpop.permute.xlu0 %2067  ;;  %v1862_v40 = vrot.slane %v9794_v27, 2 }
 0x297   :  { %15124 = vst [vmem:[#allocation47_spill] sm:$0xff] %v9737_v52  ;;  %v9770_v52 = vsel %vm1826_vm4, %v1852_v22, %v15134_v1  ;;  %v15139_v22 = vld [vmem:[#allocation55_spill] sm:$0xff]  ;;  %v15140_v1 = vrot.slane %v8773_v28, 2 }
 0x298   :  { %2247 = vrot.lane.b32.xlu0 %v9748_v38, %s7437_s17  ;;  %v9779_v32 = vpop.permute.xlu1 %3003  ;;  %v1774_v63 = vrot.slane %v15139_v22, 1  ;;  %15141 = vst [vmem:[#allocation55_spill] sm:$0xff] %v9794_v27 }
 0x299   :  { %2121 = vrot.lane.b32.xlu1 %v9786_v21, %s7434_s24  ;;  %v7258_v21 = vld [vmem:[#allocation2 + $0xc0] sm:$0xff] }
 0x29a   :  { %v9759_v18 = vpop.permute.xlu0 %2071  ;;  %v9808_v28 = vsel %vm1665_vm3, %v15143_v29, %v1774_v63  ;;  %v1867_v27 = vrot.slane %v7258_v21, 2  ;;  %v15148_v63 = vrot.slane %v9165_v26, 1 }
 0x29b   :  { %15130 = vst [vmem:[#allocation140_spill] sm:$0xff] %v9759_v18  ;;  %v9792_v18 = vsel %vm1826_vm4, %v1857_v62, %v15140_v1  ;;  %15144 = vst [vmem:[#allocation145_spill] sm:$0xff] %v9808_v28  ;;  %v15145_v62 = vld [vmem:[#allocation58_spill] sm:$0xff]  ;;  %v15146_v1 = vrot.slane %v8790_v23, 2  ;;  %v15150_v23 = vld [vmem:[#allocation61_spill] sm:$0xff] }
 0x29c   :  { %2251 = vrot.lane.b32.xlu0 %v9770_v52, %s7437_s17  ;;  %v9801_v58 = vpop.permute.xlu1 %3007  ;;  %v1779_v22 = vrot.slane %v15145_v62, 1  ;;  %v15151_v62 = vrot.slane %v8812_v25, 2  ;;  %v15155_v25 = vld [vmem:[#allocation66_spill] sm:$0xff] }
 0x29d   :  { %2125 = vrot.lane.b32.xlu1 %v9808_v28, %s7434_s24 }
 0x29e   :  { %v9781_v34 = vpop.permute.xlu0 %2075  ;;  %v9827_v29 = vsel %vm1665_vm3, %v15148_v63, %v1779_v22  ;;  %v9833_v21 = vsel %vm1826_vm4, %v1867_v27, %v15151_v62  ;;  %v15153_v22 = vrot.slane %v9176_v16, 1  ;;  %v1789_v27 = vrot.slane %v15155_v25, 1 }
 0x29f   :  { %15136 = vst [vmem:[#allocation142_spill] sm:$0xff] %v9781_v34  ;;  %v9814_v34 = vsel %vm1826_vm4, %v1862_v40, %v15146_v1  ;;  %15149 = vst [vmem:[#allocation146_spill] sm:$0xff] %v9827_v29  ;;  %v1784_v40 = vrot.slane %v15150_v23, 1  ;;  %v7259_v1 = vld [vmem:[#allocation2 + $0xd8] sm:$0xff]  ;;  %v15156_v23 = vrot.slane %v8837_v19, 2  ;;  %v15161_v19 = vld [vmem:[#allocation69_spill] sm:$0xff] }
 0x2a0   :  { %2255 = vrot.lane.b32.xlu0 %v9792_v18, %s7437_s17  ;;  %v1872_v28 = vrot.slane %v7259_v1, 2  ;;  %v7260_v1 = vld [vmem:[#allocation2 + $0xf0] sm:$0xff]  ;;  %v15162_v25 = vrot.slane %v8862_v0, 2  ;;  %v15167_v0 = vld [vmem:[#allocation72_spill] sm:$0xff] }
 0x2a1   :  { %2129 = vrot.lane.b32.xlu1 %v9827_v29, %s7434_s24  ;;  %v9846_v63 = vsel %vm1665_vm3, %v15153_v22, %v1784_v40  ;;  %v1877_v29 = vrot.slane %v7260_v1, 2  ;;  %v15159_v40 = vrot.slane %v9197_v45, 1  ;;  %v7261_v1 = vld [vmem:[#allocation2 + $0x108] sm:$0xff] }
 0x2a2   :  { %v9803_v11 = vpop.permute.xlu0 %2079  ;;  %15154 = vst [vmem:[#allocation147_spill] sm:$0xff] %v9846_v63  ;;  %v9852_v62 = vsel %vm1826_vm4, %v1872_v28, %v15156_v23  ;;  %v1794_v28 = vrot.slane %v15161_v19, 1  ;;  %v15168_v19 = vrot.slane %v8905_v48, 2  ;;  %v15174_v48 = vld [vmem:[#allocation76_spill] sm:$0xff] }
 0x2a3   :  { %15142 = vst [vmem:[#allocation144_spill] sm:$0xff] %v9803_v11  ;;  %v9820_v11 = vpop.permute.xlu1 %3011  ;;  %v9865_v22 = vsel %vm1665_vm3, %v15159_v40, %v1789_v27  ;;  %v9871_v23 = vsel %vm1826_vm4, %v1877_v29, %v15162_v25  ;;  %v15165_v27 = vrot.slane %v9208_v10, 1  ;;  %v1799_v29 = vrot.slane %v15167_v0, 1 }
 0x2a4   :  { %2259 = vrot.lane.b32.xlu0 %v9814_v34, %s7437_s17  ;;  %15160 = vst [vmem:[#allocation149_spill] sm:$0xff] %v9865_v22  ;;  %v15175_v0 = vrot.slane %v8997_v2, 2  ;;  %v15181_v2 = vld [vmem:[#allocation80_spill] sm:$0xff] }
 0x2a5   :  { %2133 = vrot.lane.b32.xlu1 %v9846_v63, %s7434_s24  ;;  %v1882_v63 = vrot.slane %v7261_v1, 2  ;;  %v9884_v40 = vsel %vm1665_vm3, %v15165_v27, %v1794_v28  ;;  %v15169_v1 = vld [vmem:[#allocation56_spill] sm:$0xff]  ;;  %v15172_v28 = vrot.slane %v9220_v41, 1 }
 0x2a6   :  { %v9822_v55 = vpop.permute.xlu0 %2083  ;;  %15166 = vst [vmem:[#allocation151_spill] sm:$0xff] %v9884_v40 }
 0x2a7   :  { %15147 = vst [vmem:[#allocation58_spill] sm:$0xff] %v9822_v55  ;;  %v9839_v55 = vpop.permute.xlu1 %3015  ;;  %v9890_v25 = vsel %vm1826_vm4, %v1882_v63, %v15168_v19  ;;  %v9904_v27 = vsel %vm1665_vm3, %v15172_v28, %v1799_v29  ;;  %v1804_v63 = vrot.slane %v15174_v48, 1  ;;  %v15179_v29 = vrot.slane %v9241_v53, 1 }
 0x2a8   :  { %2263 = vrot.lane.b32.xlu0 %v9833_v21, %s7437_s17  ;;  %15173 = vst [vmem:[#allocation152_spill] sm:$0xff] %v9904_v27  ;;  %v15182_v48 = vrot.slane %v15096_v15, 2  ;;  %v1814_v15 = vrot.slane %v9270_v44, 1 }
 0x2a9   :  { %2137 = vrot.lane.b32.xlu1 %v9865_v22, %s7434_s24  ;;  %v1887_v22 = vrot.slane %v15169_v1, 2  ;;  %v15176_v1 = vld [vmem:[#allocation64_spill] sm:$0xff]  ;;  %v9924_v28 = vsel %vm1665_vm3, %v15179_v29, %v1804_v63  ;;  %v15187_v63 = vrot.slane %v9256_v7, 1 }
 0x2aa   :  { %v9841_v26 = vpop.permute.xlu0 %2087  ;;  %15180 = vst [vmem:[#allocation153_spill] sm:$0xff] %v9924_v28 }
 0x2ab   :  { %15152 = vst [vmem:[#allocation61_spill] sm:$0xff] %v9841_v26  ;;  %v9858_v26 = vpop.permute.xlu1 %3019  ;;  %v9910_v19 = vsel %vm1826_vm4, %v1887_v22, %v15175_v0  ;;  %v1809_v22 = vrot.slane %v15181_v2, 1 }
 0x2ac   :  { %2267 = vrot.lane.b32.xlu0 %v9852_v62, %s7437_s17  ;;  %15157 = vst [vmem:[#allocation66_spill] sm:$0xff] %v9858_v26  ;;  %v15241_v26 = vld [vmem:[#allocation31_spill] sm:$0xff] }
 0x2ad   :  { %2141 = vrot.lane.b32.xlu1 %v9884_v40, %s7434_s24  ;;  %v1892_v40 = vrot.slane %v15176_v1, 2  ;;  %v15184_v1 = vld [vmem:[#allocation78_spill] sm:$0xff]  ;;  %v9944_v29 = vsel %vm1665_vm3, %v15187_v63, %v1809_v22  ;;  %v15192_v22 = vrot.slane %v9268_v35, 1 }
 0x2ae   :  { %v9860_v16 = vpop.permute.xlu0 %2091  ;;  %15188 = vst [vmem:[#allocation155_spill] sm:$0xff] %v9944_v29 }
 0x2af   :  { %15158 = vst [vmem:[#allocation148_spill] sm:$0xff] %v9860_v16  ;;  %v9877_v16 = vpop.permute.xlu1 %3023  ;;  %v9930_v0 = vsel %vm1826_vm4, %v1892_v40, %v15182_v48  ;;  %v15189_v40 = vrot.slane %v9027_v59, 2  ;;  %v9963_v63 = vsel %vm1665_vm3, %v15192_v22, %v1814_v15  ;;  %v1819_v59 = vrot.slane %v9279_v5, 1  ;;  %v15197_v5 = vld [vmem:[#allocation27_spill] sm:$0xff] }
 0x2b0   :  { %2271 = vrot.lane.b32.xlu0 %v9871_v23, %s7437_s17  ;;  %15163 = vst [vmem:[#allocation69_spill] sm:$0xff] %v9877_v16  ;;  %15183 = vst [vmem:[#allocation80_spill] sm:$0xff] %v9930_v0  ;;  %v1824_v15 = vrot.slane %v9302_v14, 1  ;;  %v15201_v14 = vld [vmem:[#allocation9_spill] sm:$0xff]  ;;  %v4096_v16 = vld [vmem:[%s14566_s4 + $0x18] sm:$0xff] }
 0x2b1   :  { %2145 = vrot.lane.b32.xlu1 %v9904_v27, %s7434_s24  ;;  %v1897_v27 = vrot.slane %v15184_v1, 2  ;;  %15193 = vst [vmem:[#allocation158_spill] sm:$0xff] %v9963_v63 }
 0x2b2   :  { %v9879_v45 = vpop.permute.xlu0 %2095 }
 0x2b3   :  { %15164 = vst [vmem:[#allocation150_spill] sm:$0xff] %v9879_v45  ;;  %v9897_v45 = vpop.permute.xlu1 %3027  ;;  %v9950_v2 = vsel %vm1826_vm4, %v1897_v27, %v15189_v40  ;;  %v15195_v40 = vrot.slane %v9277_v57, 1 }
 0x2b4   :  { %2275 = vrot.lane.b32.xlu0 %v9890_v25, %s7437_s17  ;;  %15170 = vst [vmem:[#allocation72_spill] sm:$0xff] %v9897_v45  ;;  %15190 = vst [vmem:[#allocation156_spill] sm:$0xff] %v9950_v2 }
 0x2b5   :  { %2149 = vrot.lane.b32.xlu1 %v9924_v28, %s7434_s24  ;;  %v9977_v35 = vsel %vm1665_vm3, %v15195_v40, %v1819_v59  ;;  %v15214_v28 = vld [vmem:[#allocation23_spill] sm:$0xff] }
 0x2b6   :  { %v9899_v10 = vpop.permute.xlu0 %2099  ;;  %15196 = vst [vmem:[#allocation160_spill] sm:$0xff] %v9977_v35 }
 0x2b7   :  { %15171 = vst [vmem:[#allocation56_spill] sm:$0xff] %v9899_v10  ;;  %v9917_v10 = vpop.permute.xlu1 %3031 }
 0x2b8   :  { %2279 = vrot.lane.b32.xlu0 %v9910_v19, %s7437_s17  ;;  %15177 = vst [vmem:[#allocation76_spill] sm:$0xff] %v9917_v10  ;;  %v15230_v10 = vld [vmem:[#allocation21_spill] sm:$0xff] }
 0x2b9   :  { %2153 = vrot.lane.b32.xlu1 %v9944_v29, %s7434_s24 }
 0x2ba   :  { %v9919_v41 = vpop.permute.xlu0 %2103 }
 0x2bb   :  { %15178 = vst [vmem:[#allocation64_spill] sm:$0xff] %v9919_v41  ;;  %v9937_v41 = vpop.permute.xlu1 %3035 }
 0x2bc   :  { %2283 = vrot.lane.b32.xlu0 %v9930_v0, %s7437_s17  ;;  %15185 = vst [vmem:[#allocation78_spill] sm:$0xff] %v9937_v41 }
 0x2bd   :  { %2157 = vrot.lane.b32.xlu1 %v9963_v63, %s7434_s24  ;;  %v15199_v63 = vrot.slane %v9300_v42, 1 }
 0x2be   :  { %v9939_v53 = vpop.permute.xlu0 %2107 }
 0x2bf   :  { %15186 = vst [vmem:[#allocation154_spill] sm:$0xff] %v9939_v53  ;;  %v9956_v48 = vpop.permute.xlu1 %2043  ;;  %v9991_v57 = vsel %vm1665_vm3, %v15199_v63, %v1824_v15 }
 0x2c0   :  { %2287 = vrot.lane.b32.xlu0 %v9950_v2, %s7437_s17  ;;  %15200 = vst [vmem:[#allocation161_spill] sm:$0xff] %v9991_v57  ;;  %v4095_v2 = vld [vmem:[%s14566_s4 + $0x10] sm:$0xff] }
 0x2c1   :  { %2161 = vrot.lane.b32.xlu1 %v9977_v35, %s7434_s24  ;;  %v15203_v35 = vld [vmem:[#allocation25_spill] sm:$0xff] }
 0x2c2   :  { %v9958_v1 = vpop.permute.xlu0 %2111 }
 0x2c3   :  { %15191 = vst [vmem:[#allocation157_spill] sm:$0xff] %v9958_v1  ;;  %v9970_v44 = vpop.permute.xlu1 %2045 }
 0x2c4   :  { %2617 = vrot.lane.b32.xlu0 %v9402_v36, %s7438_s18 }
 0x2c5   :  { %2165 = vrot.lane.b32.xlu1 %v9991_v57, %s7434_s24 }
 0x2c6   :  { %v9972_v27 = vpop.permute.xlu0 %2115 }
 0x2c7   :  { %15194 = vst [vmem:[#allocation159_spill] sm:$0xff] %v9972_v27  ;;  %v9984_v22 = vpop.permute.xlu1 %2049 }
 0x2c8   :  { %2809 = vrot.lane.b32.xlu0 %v15197_v5, %s7439_s19 }
 0x2c9   :  { %2233 = vrot.lane.b32.xlu1 %v15203_v35, %s7437_s17  ;;  %v15207_v35 = vld [vmem:[#allocation32_spill] sm:$0xff] }
 0x2ca   :  { %v9986_v36 = vpop.permute.xlu0 %2119 }
 0x2cb   :  { %15198 = vst [vmem:[#allocation27_spill] sm:$0xff] %v9986_v36  ;;  %v9997_v59 = vpop.permute.xlu1 %2053 }
 0x2cc   :  { %3191 = vrot.lane.b32.xlu0 %v15201_v14, %s7440_s20 }
 0x2cd   :  { %2237 = vrot.lane.b32.xlu1 %v15197_v5, %s7437_s17  ;;  %v15210_v5 = vld [vmem:[#allocation10_spill] sm:$0xff] }
 0x2ce   :  { %v9999_v40 = vpop.permute.xlu0 %2123 }
 0x2cf   :  { %15202 = vst [vmem:[#allocation9_spill] sm:$0xff] %v9999_v40  ;;  %v10005_v42 = vpop.permute.xlu1 %2057 }
 0x2d0   :  { %2619 = vrot.lane.b32.xlu0 %v15201_v14, %s7438_s18 }
 0x2d1   :  { %2241 = vrot.lane.b32.xlu1 %v15207_v35, %s7437_s17 }
 0x2d2   :  { %v10007_v63 = vpop.permute.xlu0 %2127 }
 0x2d3   :  { %15204 = vst [vmem:[#allocation25_spill] sm:$0xff] %v10007_v63  ;;  %v10013_v15 = vpop.permute.xlu1 %2061 }
 0x2d4   :  { %3383 = vrot.lane.b32.xlu0 %v9705_v8, %s7441_s21  ;;  %15205 = vst [vmem:[#allocation162_spill] sm:$0xff] %v10013_v15  ;;  %v4100_v15 = vld [vmem:[%s14566_s4 + $0x38] sm:$0xff] }
 0x2d5   :  { %2245 = vrot.lane.b32.xlu1 %v15210_v5, %s7437_s17 }
 0x2d6   :  { %v10015_v57 = vpop.permute.xlu0 %2131 }
 0x2d7   :  { %15206 = vst [vmem:[#allocation163_spill] sm:$0xff] %v10015_v57  ;;  %v10021_v14 = vpop.permute.xlu1 %2065  ;;  %v15213_v57 = vld [vmem:[#allocation12_spill] sm:$0xff] }
 0x2d8   :  { %2811 = vrot.lane.b32.xlu0 %v9705_v8, %s7439_s19  ;;  %15208 = vst [vmem:[#allocation32_spill] sm:$0xff] %v10021_v14  ;;  %v15239_v14 = vld [vmem:[#allocation38_spill] sm:$0xff] }
 0x2d9   :  { %2249 = vrot.lane.b32.xlu1 %v15213_v57, %s7437_s17 }
 0x2da   :  { %v10023_v29 = vpop.permute.xlu0 %2135 }
 0x2db   :  { %15209 = vst [vmem:[#allocation164_spill] sm:$0xff] %v10023_v29  ;;  %v10029_v7 = vpop.permute.xlu1 %2069  ;;  %v15217_v29 = vld [vmem:[#allocation11_spill] sm:$0xff] }
 0x2dc   :  { %2813 = vrot.lane.b32.xlu0 %v15207_v35, %s7439_s19  ;;  %15211 = vst [vmem:[#allocation10_spill] sm:$0xff] %v10029_v7  ;;  %v15237_v7 = vld [vmem:[#allocation37_spill] sm:$0xff] }
 0x2dd   :  { %2253 = vrot.lane.b32.xlu1 %v15217_v29, %s7437_s17 }
 0x2de   :  { %v10031_v63 = vpop.permute.xlu0 %2139 }
 0x2df   :  { %15212 = vst [vmem:[#allocation165_spill] sm:$0xff] %v10031_v63  ;;  %v10037_v8 = vpop.permute.xlu1 %2073  ;;  %v15220_v63 = vld [vmem:[#allocation14_spill] sm:$0xff] }
 0x2e0   :  { %3195 = vrot.lane.b32.xlu0 %v15214_v28, %s7440_s20  ;;  %15215 = vst [vmem:[#allocation12_spill] sm:$0xff] %v10037_v8 }
 0x2e1   :  { %2257 = vrot.lane.b32.xlu1 %v15220_v63, %s7437_s17 }
 0x2e2   :  { %v10039_v40 = vpop.permute.xlu0 %2143 }
 0x2e3   :  { %15216 = vst [vmem:[#allocation23_spill] sm:$0xff] %v10039_v40  ;;  %v10045_v36 = vpop.permute.xlu1 %2077  ;;  %v15223_v40 = vld [vmem:[#allocation13_spill] sm:$0xff] }
 0x2e4   :  { %2623 = vrot.lane.b32.xlu0 %v15214_v28, %s7438_s18  ;;  %15218 = vst [vmem:[#allocation11_spill] sm:$0xff] %v10045_v36 }
 0x2e5   :  { %2261 = vrot.lane.b32.xlu1 %v15223_v40, %s7437_s17 }
 0x2e6   :  { %v10047_v27 = vpop.permute.xlu0 %2147 }
 0x2e7   :  { %15219 = vst [vmem:[#allocation166_spill] sm:$0xff] %v10047_v27  ;;  %v10053_v1 = vpop.permute.xlu1 %2081  ;;  %v15226_v27 = vld [vmem:[#allocation16_spill] sm:$0xff] }
 0x2e8   :  { %3387 = vrot.lane.b32.xlu0 %v9726_v6, %s7441_s21  ;;  %15221 = vst [vmem:[#allocation14_spill] sm:$0xff] %v10053_v1 }
 0x2e9   :  { %2265 = vrot.lane.b32.xlu1 %v15226_v27, %s7437_s17 }
 0x2ea   :  { %v10055_v53 = vpop.permute.xlu0 %2151 }
 0x2eb   :  { %15222 = vst [vmem:[#allocation167_spill] sm:$0xff] %v10055_v53  ;;  %v10061_v28 = vpop.permute.xlu1 %2085  ;;  %v15229_v53 = vld [vmem:[#allocation17_spill] sm:$0xff] }
 0x2ec   :  { %2815 = vrot.lane.b32.xlu0 %v9726_v6, %s7439_s19  ;;  %15224 = vst [vmem:[#allocation13_spill] sm:$0xff] %v10061_v28 }
 0x2ed   :  { %2269 = vrot.lane.b32.xlu1 %v15229_v53, %s7437_s17 }
 0x2ee   :  { %v10063_v41 = vpop.permute.xlu0 %2155 }
 0x2ef   :  { %15225 = vst [vmem:[#allocation168_spill] sm:$0xff] %v10063_v41  ;;  %v10069_v36 = vpop.permute.xlu1 %2089  ;;  %v15233_v41 = vld [vmem:[#allocation19_spill] sm:$0xff] }
 0x2f0   :  { %2817 = vrot.lane.b32.xlu0 %v15210_v5, %s7439_s19  ;;  %15227 = vst [vmem:[#allocation16_spill] sm:$0xff] %v10069_v36 }
 0x2f1   :  { %2273 = vrot.lane.b32.xlu1 %v15233_v41, %s7437_s17 }
 0x2f2   :  { %v10071_v1 = vpop.permute.xlu0 %2159 }
 0x2f3   :  { %15228 = vst [vmem:[#allocation169_spill] sm:$0xff] %v10071_v1  ;;  %v10077_v6 = vpop.permute.xlu1 %2093  ;;  %v15235_v1 = vld [vmem:[#allocation35_spill] sm:$0xff] }
 0x2f4   :  { %3199 = vrot.lane.b32.xlu0 %v15230_v10, %s7440_s20  ;;  %15231 = vst [vmem:[#allocation17_spill] sm:$0xff] %v10077_v6  ;;  %v4094_v6 = vld [vmem:[%s14566_s4 + $0x8] sm:$0xff] }
 0x2f5   :  { %2277 = vrot.lane.b32.xlu1 %v15235_v1, %s7437_s17 }
 0x2f6   :  { %v10079_v28 = vpop.permute.xlu0 %2163 }
 0x2f7   :  { %15232 = vst [vmem:[#allocation21_spill] sm:$0xff] %v10079_v28  ;;  %v10085_v8 = vpop.permute.xlu1 %2097  ;;  %v4093_v28 = vld [vmem:[%s14566_s4] sm:$0xff] }
 0x2f8   :  { %2627 = vrot.lane.b32.xlu0 %v15230_v10, %s7438_s18  ;;  %15234 = vst [vmem:[#allocation19_spill] sm:$0xff] %v10085_v8  ;;  %v7215_v10 = vpack.c.bf16 %v4094_v6, %v4093_v28  ;;  %v7219_v28 = vpack.c.bf16 %v4096_v16, %v4095_v2 }
 0x2f9   :  { %2281 = vrot.lane.b32.xlu1 %v15237_v7, %s7437_s17 }
 0x2fa   :  { %v10087_v36 = vpop.permute.xlu0 %2231  ;;  %7216 = vmatprep.subr.bf16.mxu1 %v7215_v10 }
 0x2fb   :  { %v10099_v45 = vpop.permute.xlu1 %2101  ;;  %7218 = vmatpush3.bf16.msra.mxu1 %v7215_v10  ;;  %v4098_v10 = vld [vmem:[%s14566_s4 + $0x28] sm:$0xff] }
 0x2fc   :  { %3391 = vrot.lane.b32.xlu0 %v9748_v38, %s7441_s21  ;;  %15236 = vst [vmem:[#allocation35_spill] sm:$0xff] %v10099_v45  ;;  %7220 = vmatprep.subr.bf16.mxu1 %v7219_v28 }
 0x2fd   :  { %2285 = vrot.lane.b32.xlu1 %v15239_v14, %s7437_s17 }
 0x2fe   :  { %v10101_v8 = vpop.permute.xlu0 %2235 }
 0x2ff   :  { %v10113_v45 = vpop.permute.xlu1 %2105  ;;  %7222 = vmatpush3.bf16.msra.mxu1 %v7219_v28  ;;  %v4099_v28 = vld [vmem:[%s14566_s4 + $0x30] sm:$0xff] }
 0x300   :  { %2819 = vrot.lane.b32.xlu0 %v9748_v38, %s7439_s19  ;;  %15238 = vst [vmem:[#allocation37_spill] sm:$0xff] %v10113_v45  ;;  %v4097_v38 = vld [vmem:[%s14566_s4 + $0x20] sm:$0xff] }
 0x301   :  { %v7223_v16 = vpack.c.bf16 %v4098_v10, %v4097_v38  ;;  %2615 = vrot.lane.b32.xlu1 %v9384_v49, %s7438_s18  ;;  %v7227_v38 = vpack.c.bf16 %v4100_v15, %v4099_v28  ;;  %v4101_v49 = vld [vmem:[%s14566_s4 + $0x40] sm:$0xff] }
 0x302   :  { %v10115_v6 = vpop.permute.xlu0 %2239 }
 0x303   :  { %v10127_v45 = vpop.permute.xlu1 %2109  ;;  %7224 = vmatprep.subr.bf16.mxu1 %v7223_v16 }
 0x304   :  { %2821 = vrot.lane.b32.xlu0 %v15213_v57, %s7439_s19  ;;  %15240 = vst [vmem:[#allocation38_spill] sm:$0xff] %v10127_v45  ;;  %7226 = vmatpush3.bf16.msra.mxu1 %v7223_v16 }
 0x305   :  { %2807 = vrot.lane.b32.xlu1 %v9685_v9, %s7439_s19  ;;  %7228 = vmatprep.subr.bf16.mxu1 %v7227_v38 }
 0x306   :  { %v10129_v2 = vpop.permute.xlu0 %2243 }
 0x307   :  { %v10141_v45 = vpop.permute.xlu1 %2113 }
 0x308   :  { %3203 = vrot.lane.b32.xlu0 %v15241_v26, %s7440_s20  ;;  %15242 = vst [vmem:[#allocation31_spill] sm:$0xff] %v10141_v45  ;;  %7230 = vmatpush3.bf16.msra.mxu1 %v7227_v38 }
 0x309   :  { %7011 = vmatprep.subr.mxu1 %v4101_v49  ;;  %3193 = vrot.lane.b32.xlu1 %v9422_v30, %s7440_s20 }
 0x30a   :  { %v10143_v10 = vpop.permute.xlu0 %2247 }
 0x30b   :  { %v10152_v16 = vpop.permute.xlu1 %2117 }
 0x30c   :  { %2631 = vrot.lane.b32.xlu0 %v15241_v26, %s7438_s18  ;;  %15243 = vst [vmem:[#allocation170_spill] sm:$0xff] %v10152_v16  ;;  %7012 = vmatpush3.msra.mxu1 %v4101_v49 }
 0x30d   :  { %2621 = vrot.lane.b32.xlu1 %v9422_v30, %s7438_s18  ;;  %v15250_v30 = vld [vmem:[#allocation29_spill] sm:$0xff] }
 0x30e   :  { %v10154_v0 = vpop.permute.xlu0 %2251 }
 0x30f   :  { %v10160_v9 = vpop.permute.xlu1 %2121 }
 0x310   :  { %3395 = vrot.lane.b32.xlu0 %v9770_v52, %s7441_s21  ;;  %15244 = vst [vmem:[#allocation171_spill] sm:$0xff] %v10160_v9 }
 0x311   :  { %3385 = vrot.lane.b32.xlu1 %v15207_v35, %s7441_s21 }
 0x312   :  { %v10162_v26 = vpop.permute.xlu0 %2255 }
 0x313   :  { %15245 = vst [vmem:[#allocation172_spill] sm:$0xff] %v10162_v26  ;;  %v10168_v15 = vpop.permute.xlu1 %2125 }
 0x314   :  { %2823 = vrot.lane.b32.xlu0 %v9770_v52, %s7439_s19  ;;  %15246 = vst [vmem:[#allocation173_spill] sm:$0xff] %v10168_v15 }
 0x315   :  { %3197 = vrot.lane.b32.xlu1 %v9442_v24, %s7440_s20 }
 0x316   :  { %v10170_v28 = vpop.permute.xlu0 %2259 }
 0x317   :  { %15247 = vst [vmem:[#allocation174_spill] sm:$0xff] %v10170_v28  ;;  %v10176_v38 = vpop.permute.xlu1 %2129  ;;  %v7262_v28 = vld [vmem:[#allocation2] sm:$0xff] }
 0x318   :  { %2825 = vrot.lane.b32.xlu0 %v15217_v29, %s7439_s19  ;;  %15248 = vst [vmem:[#allocation175_spill] sm:$0xff] %v10176_v38 }
 0x319   :  { %2625 = vrot.lane.b32.xlu1 %v9442_v24, %s7438_s18 }
 0x31a   :  { %v10178_v49 = vpop.permute.xlu0 %2263 }
 0x31b   :  { %15249 = vst [vmem:[#allocation176_spill] sm:$0xff] %v10178_v49  ;;  %v10184_v52 = vpop.permute.xlu1 %2133 }
 0x31c   :  { %3207 = vrot.lane.b32.xlu0 %v15250_v30, %s7440_s20  ;;  %15251 = vst [vmem:[#allocation29_spill] sm:$0xff] %v10184_v52 }
 0x31d   :  { %3389 = vrot.lane.b32.xlu1 %v15210_v5, %s7441_s21 }
 0x31e   :  { %v10186_v15 = vpop.permute.xlu0 %2267 }
 0x31f   :  { %15252 = vst [vmem:[#allocation177_spill] sm:$0xff] %v10186_v15  ;;  %v10192_v35 = vpop.permute.xlu1 %2137 }
 0x320   :  { %2635 = vrot.lane.b32.xlu0 %v15250_v30, %s7438_s18  ;;  %15253 = vst [vmem:[#allocation178_spill] sm:$0xff] %v10192_v35  ;;  %v15261_v35 = vld [vmem:[#allocation24_spill] sm:$0xff] }
 0x321   :  { %3201 = vrot.lane.b32.xlu1 %v9462_v37, %s7440_s20 }
 0x322   :  { %v10194_v38 = vpop.permute.xlu0 %2271 }
 0x323   :  { %15254 = vst [vmem:[#allocation179_spill] sm:$0xff] %v10194_v38  ;;  %v10200_v9 = vpop.permute.xlu1 %2141 }
 0x324   :  { %3399 = vrot.lane.b32.xlu0 %v9792_v18, %s7441_s21  ;;  %15255 = vst [vmem:[#allocation180_spill] sm:$0xff] %v10200_v9 }
 0x325   :  { %2629 = vrot.lane.b32.xlu1 %v9462_v37, %s7438_s18 }
 0x326   :  { %v10202_v52 = vpop.permute.xlu0 %2275 }
 0x327   :  { %15256 = vst [vmem:[#allocation181_spill] sm:$0xff] %v10202_v52  ;;  %v10208_v24 = vpop.permute.xlu1 %2145 }
 0x328   :  { %2827 = vrot.lane.b32.xlu0 %v9792_v18, %s7439_s19  ;;  %15257 = vst [vmem:[#allocation182_spill] sm:$0xff] %v10208_v24 }
 0x329   :  { %3393 = vrot.lane.b32.xlu1 %v15213_v57, %s7441_s21 }
 0x32a   :  { %v10210_v30 = vpop.permute.xlu0 %2279 }
 0x32b   :  { %15258 = vst [vmem:[#allocation183_spill] sm:$0xff] %v10210_v30  ;;  %v10216_v5 = vpop.permute.xlu1 %2149 }
 0x32c   :  { %2829 = vrot.lane.b32.xlu0 %v15220_v63, %s7439_s19  ;;  %15259 = vst [vmem:[#allocation184_spill] sm:$0xff] %v10216_v5 }
 0x32d   :  { %3205 = vrot.lane.b32.xlu1 %v9482_v56, %s7440_s20 }
 0x32e   :  { %v10218_v9 = vpop.permute.xlu0 %2283 }
 0x32f   :  { %15260 = vst [vmem:[#allocation185_spill] sm:$0xff] %v10218_v9  ;;  %v10224_v18 = vpop.permute.xlu1 %2153 }
 0x330   :  { %3211 = vrot.lane.b32.xlu0 %v15261_v35, %s7440_s20  ;;  %15262 = vst [vmem:[#allocation24_spill] sm:$0xff] %v10224_v18 }
 0x331   :  { %2633 = vrot.lane.b32.xlu1 %v9482_v56, %s7438_s18 }
 0x332   :  { %v10226_v24 = vpop.permute.xlu0 %2287 }
 0x333   :  { %15263 = vst [vmem:[#allocation186_spill] sm:$0xff] %v10226_v24  ;;  %v10232_v37 = vpop.permute.xlu1 %2157 }
 0x334   :  { %2639 = vrot.lane.b32.xlu0 %v15261_v35, %s7438_s18  ;;  %15264 = vst [vmem:[#allocation187_spill] sm:$0xff] %v10232_v37 }
 0x335   :  { %3397 = vrot.lane.b32.xlu1 %v15217_v29, %s7441_s21  ;;  %v15267_v29 = vld [vmem:[#allocation39_spill] sm:$0xff] }
 0x336   :  { %v10234_v5 = vpop.permute.xlu0 %2617 }
 0x337   :  { %v10240_v57 = vpop.permute.xlu1 %2161 }
 0x338   :  { %3403 = vrot.lane.b32.xlu0 %v9814_v34, %s7441_s21  ;;  %15265 = vst [vmem:[#allocation188_spill] sm:$0xff] %v10240_v57 }
 0x339   :  { %3209 = vrot.lane.b32.xlu1 %v9502_v39, %s7440_s20 }
 0x33a   :  { %v10242_v18 = vpop.permute.xlu0 %2809 }
 0x33b   :  { %v10248_v35 = vpop.permute.xlu1 %2165 }
 0x33c   :  { %2831 = vrot.lane.b32.xlu0 %v9814_v34, %s7439_s19  ;;  %15266 = vst [vmem:[#allocation189_spill] sm:$0xff] %v10248_v35 }
 0x33d   :  { %2637 = vrot.lane.b32.xlu1 %v9502_v39, %s7438_s18 }
 0x33e   :  { %v10250_v37 = vpop.permute.xlu0 %3191 }
 0x33f   :  { %v10256_v56 = vpop.permute.xlu1 %2233 }
 0x340   :  { %2833 = vrot.lane.b32.xlu0 %v15223_v40, %s7439_s19 }
 0x341   :  { %3401 = vrot.lane.b32.xlu1 %v15220_v63, %s7441_s21 }
 0x342   :  { %v10258_v57 = vpop.permute.xlu0 %2619 }
 0x343   :  { %v10264_v34 = vpop.permute.xlu1 %2237 }
 0x344   :  { %3215 = vrot.lane.b32.xlu0 %v15267_v29, %s7440_s20 }
 0x345   :  { %3213 = vrot.lane.b32.xlu1 %v9522_v3, %s7440_s20 }
 0x346   :  { %v10266_v35 = vpop.permute.xlu0 %3383 }
 0x347   :  { %v10272_v16 = vpop.permute.xlu1 %2241 }
 0x348   :  { %2643 = vrot.lane.b32.xlu0 %v15267_v29, %s7438_s18 }
 0x349   :  { %2641 = vrot.lane.b32.xlu1 %v9522_v3, %s7438_s18  ;;  %v15268_v3 = vld [vmem:[#allocation44_spill] sm:$0xff] }
 0x34a   :  { %v10274_v45 = vpop.permute.xlu0 %2811 }
 0x34b   :  { %v10280_v39 = vpop.permute.xlu1 %2245 }
 0x34c   :  { %3407 = vrot.lane.b32.xlu0 %v9833_v21, %s7441_s21 }
 0x34d   :  { %3405 = vrot.lane.b32.xlu1 %v15223_v40, %s7441_s21 }
 0x34e   :  { %v10282_v24 = vpop.permute.xlu0 %2813 }
 0x34f   :  { %v10288_v63 = vpop.permute.xlu1 %2249 }
 0x350   :  { %2835 = vrot.lane.b32.xlu0 %v9833_v21, %s7439_s19 }
 0x351   :  { %3217 = vrot.lane.b32.xlu1 %v9542_v50, %s7440_s20 }
 0x352   :  { %v10290_v29 = vpop.permute.xlu0 %3195 }
 0x353   :  { %v10296_v9 = vpop.permute.xlu1 %2253 }
 0x354   :  { %2837 = vrot.lane.b32.xlu0 %v15226_v27, %s7439_s19 }
 0x355   :  { %2645 = vrot.lane.b32.xlu1 %v9542_v50, %s7438_s18 }
 0x356   :  { %v10298_v30 = vpop.permute.xlu0 %2623 }
 0x357   :  { %v10304_v21 = vpop.permute.xlu1 %2257 }
 0x358   :  { %3219 = vrot.lane.b32.xlu0 %v15268_v3, %s7440_s20  ;;  %15269 = vst [vmem:[#allocation39_spill] sm:$0xff] %v10304_v21 }
 0x359   :  { %3409 = vrot.lane.b32.xlu1 %v15226_v27, %s7441_s21 }
 0x35a   :  { %v10306_v52 = vpop.permute.xlu0 %3387 }
 0x35b   :  { %v10312_v40 = vpop.permute.xlu1 %2261 }
 0x35c   :  { %2647 = vrot.lane.b32.xlu0 %v15268_v3, %s7438_s18  ;;  %15270 = vst [vmem:[#allocation44_spill] sm:$0xff] %v10312_v40  ;;  %v15274_v40 = vld [vmem:[#allocation53_spill] sm:$0xff] }
 0x35d   :  { %3221 = vrot.lane.b32.xlu1 %v9562_v33, %s7440_s20 }
 0x35e   :  { %v10314_v38 = vpop.permute.xlu0 %2815 }
 0x35f   :  { %v10320_v15 = vpop.permute.xlu1 %2265 }
 0x360   :  { %3411 = vrot.lane.b32.xlu0 %v9852_v62, %s7441_s21  ;;  %15271 = vst [vmem:[#allocation190_spill] sm:$0xff] %v10320_v15 }
 0x361   :  { %2649 = vrot.lane.b32.xlu1 %v9562_v33, %s7438_s18 }
 0x362   :  { %v10322_v49 = vpop.permute.xlu0 %2817 }
 0x363   :  { %v10328_v50 = vpop.permute.xlu1 %2269 }
 0x364   :  { %2839 = vrot.lane.b32.xlu0 %v9852_v62, %s7439_s19  ;;  %15272 = vst [vmem:[#allocation191_spill] sm:$0xff] %v10328_v50 }
 0x365   :  { %3413 = vrot.lane.b32.xlu1 %v15229_v53, %s7441_s21 }
 0x366   :  { %v10330_v3 = vpop.permute.xlu0 %3199 }
 0x367   :  { %v10336_v27 = vpop.permute.xlu1 %2273 }
 0x368   :  { %2841 = vrot.lane.b32.xlu0 %v15229_v53, %s7439_s19  ;;  %15273 = vst [vmem:[#allocation192_spill] sm:$0xff] %v10336_v27 }
 0x369   :  { %3225 = vrot.lane.b32.xlu1 %v9582_v51, %s7440_s20 }
 0x36a   :  { %v10338_v15 = vpop.permute.xlu0 %2627 }
 0x36b   :  { %v10344_v62 = vpop.permute.xlu1 %2277 }
 0x36c   :  { %3223 = vrot.lane.b32.xlu0 %v15274_v40, %s7440_s20  ;;  %15275 = vst [vmem:[#allocation53_spill] sm:$0xff] %v10344_v62 }
 0x36d   :  { %2653 = vrot.lane.b32.xlu1 %v9582_v51, %s7438_s18 }
 0x36e   :  { %v10346_v50 = vpop.permute.xlu0 %3391 }
 0x36f   :  { %v10352_v33 = vpop.permute.xlu1 %2281 }
 0x370   :  { %2651 = vrot.lane.b32.xlu0 %v15274_v40, %s7438_s18  ;;  %15276 = vst [vmem:[#allocation193_spill] sm:$0xff] %v10352_v33  ;;  %v3575_v40 = vsel %vm698_vm1, %v7262_v28, %v9597_v43 }
 0x371   :  { %3417 = vrot.lane.b32.xlu1 %v15233_v41, %s7441_s21  ;;  %v3640_v51 = vsel %vm3639_vm5, %v3575_v40, %v10087_v36 }
 0x372   :  { %v10354_v27 = vpop.permute.xlu0 %2819 }
 0x373   :  { %v10360_v53 = vpop.permute.xlu1 %2285 }
 0x374   :  { %3415 = vrot.lane.b32.xlu0 %v9871_v23, %s7441_s21  ;;  %15277 = vst [vmem:[#allocation194_spill] sm:$0xff] %v10360_v53  ;;  %v7263_v53 = vld [vmem:[#allocation2 + $0x8] sm:$0xff] }
 0x375   :  { %v3576_v26 = vsel %vm698_vm1, %v7263_v53, %v9617_v31  ;;  %3229 = vrot.lane.b32.xlu1 %v9602_v60, %s7440_s20 }
 0x376   :  { %v10362_v62 = vpop.permute.xlu0 %2821  ;;  %v3641_v43 = vsel %vm3639_vm5, %v3576_v26, %v10256_v56  ;;  %v15278_v56 = vld [vmem:[#allocation63_spill] sm:$0xff] }
 0x377   :  { %v2616_v33 = vpop.permute.xlu1 %2615  ;;  %v3706_v53 = vsel %vm3704_vm6, %v3641_v43, %v9375_v12 }
 0x378   :  { %2843 = vrot.lane.b32.xlu0 %v9871_v23, %s7439_s19  ;;  %v3705_v23 = vsel %vm3704_vm6, %v3640_v51, %v9735_v13  ;;  %v7264_v13 = vld [vmem:[#allocation2 + $0x18] sm:$0xff] }
 0x379   :  { %v3769_v36 = vsel %vm118_vm0, %v3705_v23, %v2616_v33  ;;  %2657 = vrot.lane.b32.xlu1 %v9602_v60, %s7438_s18  ;;  %v3770_v60 = vsel %vm118_vm0, %v3706_v53, %v10234_v5 }
 0x37a   :  { %v10372_v21 = vpop.permute.xlu0 %3203 }
 0x37b   :  { %v2808_v28 = vpop.permute.xlu1 %2807 }
 0x37c   :  { %2845 = vrot.lane.b32.xlu0 %v15233_v41, %s7439_s19  ;;  %v3834_v31 = vsel %vm3833_vm7, %v3769_v36, %v2808_v28  ;;  %v3577_v41 = vsel %vm698_vm1, %v7264_v13, %v9956_v48  ;;  %v10423_v36 = vld [vmem:[#allocation2 + $0x120] sm:$0xff] }
 0x37d   :  { %v3899_v26 = vsel %vm3898_vm8, %v3834_v31, %v9757_v17  ;;  %v3642_v12 = vsel %vm3639_vm5, %v3577_v41, %v10101_v8  ;;  %3421 = vrot.lane.b32.xlu1 %v15235_v1, %s7441_s21 }
 0x37e   :  { %v10385_v40 = vpop.permute.xlu0 %2631  ;;  %v3964_v33 = vsel %vm3963_vm9, %v3899_v26, %v10250_v37  ;;  %v3707_v48 = vsel %vm3704_vm6, %v3642_v12, %v9396_v61  ;;  %v3835_v37 = vsel %vm3833_vm7, %v3770_v60, %v10242_v18  ;;  %v15279_v61 = vld [vmem:[#allocation93_spill] sm:$0xff] }
 0x37f   :  { %v3194_v51 = vpop.permute.xlu1 %3193  ;;  %v4029_v17 = vsel %vm4028_vm11, %v3964_v33, %v10266_v35  ;;  %v3771_v8 = vsel %vm118_vm0, %v3707_v48, %v10258_v57  ;;  %v3900_v28 = vsel %vm3898_vm8, %v3835_v37, %v15279_v61  ;;  %v7266_v57 = vld [vmem:[#allocation2 + $0x20] sm:$0xff]  ;;  %v15284_v61 = vld [vmem:[#allocation98_spill] sm:$0xff] }
 0x380   :  { %3227 = vrot.lane.b32.xlu0 %v15278_v56, %s7440_s20  ;;  %7013 = vmatprep.mubr.msk.f32.mxu1 %vm4102_vm10, %v4029_v17  ;;  %v3836_v35 = vsel %vm3833_vm7, %v3771_v8, %v10274_v45  ;;  %v3578_v18 = vsel %vm698_vm1, %v7266_v57, %v9970_v44  ;;  %v3965_v31 = vsel %vm3963_vm9, %v3900_v28, %v3194_v51  ;;  %v10445_v44 = vld [vmem:[#allocation2 + $0x128] sm:$0xff] }
 0x381   :  { %3039 = vrot.lane.b32.xlu1 %v10423_v36, %s7435_s2  ;;  %v3901_v45 = vsel %vm3898_vm8, %v3836_v35, %v9779_v32  ;;  %v3643_v26 = vsel %vm3639_vm5, %v3578_v18, %v10264_v34  ;;  %v15280_v32 = vld [vmem:[#allocation134_spill] sm:$0xff]  ;;  %v15283_v35 = vld [vmem:[#allocation132_spill] sm:$0xff] }
 0x382   :  { %v10406_v43 = vpop.permute.xlu0 %3395  ;;  %v3966_v13 = vsel %vm3963_vm9, %v3901_v45, %v10290_v29  ;;  %v3579_v34 = vsel %vm698_vm1, %v9687_v20, %v15280_v32  ;;  %v15282_v20 = vld [vmem:[#allocation103_spill] sm:$0xff] }
 0x383   :  { %v2622_v5 = vpop.permute.xlu1 %2621  ;;  %v4031_v33 = vsel %vm4028_vm11, %v3966_v13, %v10306_v52  ;;  %v3644_v29 = vsel %vm3639_vm5, %v3579_v34, %v10115_v6  ;;  %v15281_v52 = vld [vmem:[#allocation96_spill] sm:$0xff] }
 0x384   :  { %2655 = vrot.lane.b32.xlu0 %v15278_v56, %s7438_s18  ;;  %v3708_v12 = vsel %vm3704_vm6, %v3643_v26, %v15281_v52  ;;  %v3709_v48 = vsel %vm3704_vm6, %v3644_v29, %v15282_v20 }
 0x385   :  { %3041 = vrot.lane.b32.xlu1 %v10445_v44, %s7435_s2  ;;  %v3772_v17 = vsel %vm118_vm0, %v3708_v12, %v2622_v5  ;;  %v10527_v12 = vld [vmem:[#allocation2 + $0x138] sm:$0xff] }
 0x386   :  { %v10421_v23 = vpop.permute.xlu0 %2823  ;;  %v3837_v6 = vsel %vm3833_vm7, %v3772_v17, %v10282_v24 }
 0x387   :  { %v3386_v53 = vpop.permute.xlu1 %3385  ;;  %v3902_v28 = vsel %vm3898_vm8, %v3837_v6, %v15284_v61 }
 0x388   :  { %3419 = vrot.lane.b32.xlu0 %v9890_v25, %s7441_s21  ;;  %v4030_v56 = vsel %vm4028_vm11, %v3965_v31, %v3386_v53 }
 0x389   :  { %7014 = vmatmul.mubr.msk.f32.vlgmr.msra.gmra.mrb[32].mxu1 %vm4102_vm10, %v4030_v56  ;;  %2469 = vrot.lane.b32.xlu1 %v10445_v44, %s7436_s3 }
 0x38a   :  { %v10440_v41 = vpop.permute.xlu0 %2825  ;;  %7016 = vmatprep.mubr.msk.f32.mxu1 %vm4102_vm10, %v4031_v33 }
 0x38b   :  { %v3198_v51 = vpop.permute.xlu1 %3197 }
 0x38c   :  { %2847 = vrot.lane.b32.xlu0 %v9890_v25, %s7439_s19  ;;  %v3773_v25 = vsel %vm118_vm0, %v3709_v48, %v10298_v30 }
 0x38d   :  { %v3838_v37 = vsel %vm3833_vm7, %v3773_v25, %v10314_v38  ;;  %3233 = vrot.lane.b32.xlu1 %v15283_v35, %s7440_s20  ;;  %v3967_v38 = vsel %vm3963_vm9, %v3902_v28, %v3198_v51  ;;  %v15288_v51 = vld [vmem:[#allocation102_spill] sm:$0xff] }
 0x38e   :  { %v10461_v60 = vpop.permute.xlu0 %3207  ;;  %v3903_v24 = vsel %vm3898_vm8, %v3838_v37, %v9801_v58  ;;  %v3581_v58 = vsel %vm698_vm1, %v9707_v47, %v9657_v4  ;;  %v15287_v4 = vld [vmem:[#allocation106_spill] sm:$0xff] }
 0x38f   :  { %v2626_v8 = vpop.permute.xlu1 %2625  ;;  %v3968_v45 = vsel %vm3963_vm9, %v3903_v24, %v10330_v3  ;;  %v15286_v3 = vld [vmem:[#allocation100_spill] sm:$0xff] }
 0x390   :  { %2849 = vrot.lane.b32.xlu0 %v15235_v1, %s7439_s19  ;;  %v7268_v1 = vld [vmem:[#allocation2 + $0x38] sm:$0xff]  ;;  %v4033_v26 = vsel %vm4028_vm11, %v3968_v45, %v10346_v50 }
 0x391   :  { %v3580_v30 = vsel %vm698_vm1, %v7268_v1, %v9984_v22  ;;  %2661 = vrot.lane.b32.xlu1 %v15283_v35, %s7438_s18  ;;  %v15285_v22 = vld [vmem:[#allocation74_spill] sm:$0xff] }
 0x392   :  { %v10475_v5 = vpop.permute.xlu0 %2635  ;;  %v3645_v18 = vsel %vm3639_vm5, %v3580_v30, %v10272_v16  ;;  %v3646_v16 = vsel %vm3639_vm5, %v3581_v58, %v10129_v2 }
 0x393   :  { %v3390_v57 = vpop.permute.xlu1 %3389  ;;  %v3710_v50 = vsel %vm3704_vm6, %v3645_v18, %v15286_v3  ;;  %v3711_v47 = vsel %vm3704_vm6, %v3646_v16, %v15287_v4  ;;  %v15292_v18 = vld [vmem:[#allocation108_spill] sm:$0xff] }
 0x394   :  { %2467 = vrot.lane.b32.xlu0 %v10423_v36, %s7436_s3  ;;  %v4032_v53 = vsel %vm4028_vm11, %v3967_v38, %v3390_v57  ;;  %v3774_v56 = vsel %vm118_vm0, %v3710_v50, %v2626_v8  ;;  %v3775_v2 = vsel %vm118_vm0, %v3711_v47, %v10338_v15  ;;  %v7270_v15 = vld [vmem:[#allocation2 + $0x50] sm:$0xff] }
 0x395   :  { %7017 = vmatmul.mubr.msk.f32.gmra.mrb[34].mxu1 %vm4102_vm10, %v4032_v53  ;;  %3425 = vrot.lane.b32.xlu1 %v15237_v7, %s7441_s21  ;;  %v3839_v32 = vsel %vm3833_vm7, %v3774_v56, %v10322_v49  ;;  %v3840_v29 = vsel %vm3833_vm7, %v3775_v2, %v10354_v27  ;;  %v3582_v49 = vsel %vm698_vm1, %v7270_v15, %v9997_v59  ;;  %v10549_v59 = vld [vmem:[#allocation2 + $0x140] sm:$0xff]  ;;  %v15291_v57 = vld [vmem:[#allocation15_spill] sm:$0xff]  ;;  %v15297_v2 = vld [vmem:[#allocation112_spill] sm:$0xff] }
 0x396   :  { %v10492_v31 = vpop.permute.xlu0 %3399  ;;  %7019 = vmatprep.mubr.msk.f32.mxu1 %vm4102_vm10, %v4033_v26  ;;  %v3904_v17 = vsel %vm3898_vm8, %v3839_v32, %v15288_v51  ;;  %v3905_v27 = vsel %vm3898_vm8, %v3840_v29, %v9820_v11  ;;  %v3647_v25 = vsel %vm3639_vm5, %v3582_v49, %v10280_v39  ;;  %v3583_v11 = vsel %vm698_vm1, %v9728_v46, %v9674_v54  ;;  %v15290_v54 = vld [vmem:[#allocation109_spill] sm:$0xff]  ;;  %v10625_v15 = vld [vmem:[#allocation2 + $0x150] sm:$0xff]  ;;  %v15298_v49 = vld [vmem:[#allocation114_spill] sm:$0xff] }
 0x397   :  { %v3202_v13 = vpop.permute.xlu1 %3201  ;;  %v3970_v6 = vsel %vm3963_vm9, %v3905_v27, %v10372_v21  ;;  %v3648_v39 = vsel %vm3639_vm5, %v3583_v11, %v10143_v10  ;;  %v15289_v21 = vld [vmem:[#allocation105_spill] sm:$0xff] }
 0x398   :  { %3231 = vrot.lane.b32.xlu0 %v15285_v22, %s7440_s20  ;;  %v3969_v20 = vsel %vm3963_vm9, %v3904_v17, %v3202_v13  ;;  %v4035_v35 = vsel %vm4028_vm11, %v3970_v6, %v10406_v43  ;;  %v3712_v43 = vsel %vm3704_vm6, %v3647_v25, %v15289_v21  ;;  %v3713_v46 = vsel %vm3704_vm6, %v3648_v39, %v15290_v54  ;;  %v15296_v13 = vld [vmem:[#allocation111_spill] sm:$0xff]  ;;  %v15301_v25 = vld [vmem:[#allocation66_spill] sm:$0xff] }
 0x399   :  { %3043 = vrot.lane.b32.xlu1 %v10527_v12, %s7435_s2  ;;  %v15303_v54 = vld [vmem:[#allocation51_spill] sm:$0xff] }
 0x39a   :  { %v10511_v33 = vpop.permute.xlu0 %2827 }
 0x39b   :  { %v2630_v34 = vpop.permute.xlu1 %2629 }
 0x39c   :  { %2659 = vrot.lane.b32.xlu0 %v15285_v22, %s7438_s18  ;;  %v3776_v28 = vsel %vm118_vm0, %v3712_v43, %v2630_v34 }
 0x39d   :  { %3045 = vrot.lane.b32.xlu1 %v10549_v59, %s7435_s2  ;;  %v3841_v10 = vsel %vm3833_vm7, %v3776_v28, %v10362_v62  ;;  %v15302_v28 = vld [vmem:[#allocation137_spill] sm:$0xff] }
 0x39e   :  { %v10525_v52 = vpop.permute.xlu0 %2829  ;;  %v3906_v45 = vsel %vm3898_vm8, %v3841_v10, %v15292_v18 }
 0x39f   :  { %v3394_v48 = vpop.permute.xlu1 %3393 }
 0x3a0   :  { %3423 = vrot.lane.b32.xlu0 %v9910_v19, %s7441_s21  ;;  %v4034_v37 = vsel %vm4028_vm11, %v3969_v20, %v3394_v48  ;;  %v15299_v20 = vld [vmem:[#allocation80_spill] sm:$0xff]  ;;  %v15300_v48 = vld [vmem:[#allocation162_spill] sm:$0xff] }
 0x3a1   :  { %7020 = vmatmul.mubr.msk.f32.gmra.mrb[36].mxu1 %vm4102_vm10, %v4034_v37  ;;  %2473 = vrot.lane.b32.xlu1 %v10549_v59, %s7436_s3 }
 0x3a2   :  { %v10544_v8 = vpop.permute.xlu0 %3211  ;;  %7022 = vmatprep.mubr.msk.f32.mxu1 %vm4102_vm10, %v4035_v35 }
 0x3a3   :  { %v3206_v61 = vpop.permute.xlu1 %3205 }
 0x3a4   :  { %2851 = vrot.lane.b32.xlu0 %v9910_v19, %s7439_s19  ;;  %v3777_v19 = vsel %vm118_vm0, %v3713_v46, %v10385_v40  ;;  %v3971_v53 = vsel %vm3963_vm9, %v3906_v45, %v3206_v61  ;;  %v10644_v61 = vld [vmem:[#allocation2 + $0x158] sm:$0xff]  ;;  %v3587_v46 = vsel %vm698_vm1, %v15303_v54, %v15302_v28  ;;  %v7278_v28 = vld [vmem:[#allocation2 + $0xb0] sm:$0xff] }
 0x3a5   :  { %v3842_v24 = vsel %vm3833_vm7, %v3777_v19, %v10421_v23  ;;  %3237 = vrot.lane.b32.xlu1 %v15291_v57, %s7440_s20  ;;  %v15305_v19 = vld [vmem:[#allocation117_spill] sm:$0xff] }
 0x3a6   :  { %v10565_v1 = vpop.permute.xlu0 %2639  ;;  %v3907_v62 = vsel %vm3898_vm8, %v3842_v24, %v9839_v55  ;;  %v15293_v55 = vld [vmem:[#allocation136_spill] sm:$0xff] }
 0x3a7   :  { %v2634_v30 = vpop.permute.xlu1 %2633  ;;  %v3972_v58 = vsel %vm3963_vm9, %v3907_v62, %v10461_v60 }
 0x3a8   :  { %2853 = vrot.lane.b32.xlu0 %v15237_v7, %s7439_s19  ;;  %v7272_v7 = vld [vmem:[#allocation2 + $0x68] sm:$0xff]  ;;  %v4037_v3 = vsel %vm4028_vm11, %v3972_v58, %v10492_v31 }
 0x3a9   :  { %v3584_v40 = vsel %vm698_vm1, %v7272_v7, %v10005_v42  ;;  %2665 = vrot.lane.b32.xlu1 %v15291_v57, %s7438_s18  ;;  %v15294_v42 = vld [vmem:[#allocation49_spill] sm:$0xff]  ;;  %v15306_v57 = vld [vmem:[#allocation115_spill] sm:$0xff] }
 0x3aa   :  { %v3404_v38 = vpop.permute.xlu0 %3403  ;;  %v3649_v26 = vsel %vm3639_vm5, %v3584_v40, %v10288_v63  ;;  %v3585_v50 = vsel %vm698_vm1, %v15294_v42, %v15293_v55  ;;  %v15295_v63 = vld [vmem:[#allocation86_spill] sm:$0xff]  ;;  %v15311_v42 = vld [vmem:[#allocation39_spill] sm:$0xff] }
 0x3ab   :  { %v3398_v23 = vpop.permute.xlu1 %3397  ;;  %v3650_v60 = vsel %vm3639_vm5, %v3585_v50, %v10154_v0  ;;  %v3714_v31 = vsel %vm3704_vm6, %v3649_v26, %v15296_v13  ;;  %v15308_v26 = vld [vmem:[#allocation120_spill] sm:$0xff] }
 0x3ac   :  { %2471 = vrot.lane.b32.xlu0 %v10527_v12, %s7436_s3  ;;  %v4036_v16 = vsel %vm4028_vm11, %v3971_v53, %v3398_v23  ;;  %v3778_v4 = vsel %vm118_vm0, %v3714_v31, %v2634_v30  ;;  %v3715_v32 = vsel %vm3704_vm6, %v3650_v60, %v15297_v2  ;;  %v15307_v23 = vld [vmem:[#allocation135_spill] sm:$0xff] }
 0x3ad   :  { %7023 = vmatmul.mubr.msk.f32.gmra.mrb[38].mxu1 %vm4102_vm10, %v4036_v16  ;;  %3429 = vrot.lane.b32.xlu1 %v15239_v14, %s7441_s21  ;;  %v3779_v0 = vsel %vm118_vm0, %v3715_v32, %v10475_v5  ;;  %v3843_v34 = vsel %vm3833_vm7, %v3778_v4, %v10440_v41  ;;  %v7274_v5 = vld [vmem:[#allocation2 + $0x80] sm:$0xff]  ;;  %v15309_v16 = vld [vmem:[#allocation32_spill] sm:$0xff]  ;;  %v15313_v4 = vld [vmem:[#allocation55_spill] sm:$0xff] }
 0x3ae   :  { %v2832_v22 = vpop.permute.xlu0 %2831  ;;  %7025 = vmatprep.mubr.msk.f32.mxu1 %vm4102_vm10, %v4037_v3  ;;  %v3844_v51 = vsel %vm3833_vm7, %v3779_v0, %v10511_v33  ;;  %v3908_v27 = vsel %vm3898_vm8, %v3843_v34, %v15298_v49  ;;  %v3586_v41 = vsel %vm698_vm1, %v7274_v5, %v15300_v48  ;;  %v15310_v3 = vld [vmem:[#allocation69_spill] sm:$0xff]  ;;  %v15314_v32 = vld [vmem:[#allocation91_spill] sm:$0xff]  ;;  %v15315_v0 = vld [vmem:[#allocation174_spill] sm:$0xff] }
 0x3af   :  { %v3210_v56 = vpop.permute.xlu1 %3209  ;;  %v3909_v6 = vsel %vm3898_vm8, %v3844_v51, %v15301_v25  ;;  %v3651_v35 = vsel %vm3639_vm5, %v3586_v41, %v10296_v9  ;;  %v15304_v9 = vld [vmem:[#allocation172_spill] sm:$0xff]  ;;  %v15318_v5 = vld [vmem:[#allocation118_spill] sm:$0xff] }
 0x3b0   :  { %3235 = vrot.lane.b32.xlu0 %v15295_v63, %s7440_s20  ;;  %v3973_v33 = vsel %vm3963_vm9, %v3908_v27, %v3210_v56  ;;  %v3974_v11 = vsel %vm3963_vm9, %v3909_v6, %v10544_v8  ;;  %v3652_v8 = vsel %vm3639_vm5, %v3587_v46, %v15304_v9  ;;  %v3716_v10 = vsel %vm3704_vm6, %v3651_v35, %v15305_v19  ;;  %v15312_v56 = vld [vmem:[#allocation47_spill] sm:$0xff]  ;;  %v10711_v35 = vld [vmem:[#allocation2 + $0x168] sm:$0xff]  ;;  %v15323_v19 = vld [vmem:[#allocation44_spill] sm:$0xff] }
 0x3b1   :  { %3047 = vrot.lane.b32.xlu1 %v10625_v15, %s7435_s2  ;;  %v4039_v43 = vsel %vm4028_vm11, %v3974_v11, %v3404_v38  ;;  %v3717_v18 = vsel %vm3704_vm6, %v3652_v8, %v15306_v57  ;;  %v3589_v2 = vsel %vm698_vm1, %v15313_v4, %v15312_v56  ;;  %v15319_v11 = vld [vmem:[#allocation126_spill] sm:$0xff] }
 0x3b2   :  { %v10611_v47 = vpop.permute.xlu0 %2833  ;;  %v3781_v45 = vsel %vm118_vm0, %v3717_v18, %v10565_v1  ;;  %v3654_v34 = vsel %vm3639_vm5, %v3589_v2, %v15315_v0  ;;  %v15324_v18 = vld [vmem:[#allocation129_spill] sm:$0xff]  ;;  %v15330_v56 = vld [vmem:[#allocation190_spill] sm:$0xff] }
 0x3b3   :  { %v2638_v29 = vpop.permute.xlu1 %2637  ;;  %v3846_v62 = vsel %vm3833_vm7, %v3781_v45, %v2832_v22  ;;  %v3719_v48 = vsel %vm3704_vm6, %v3654_v34, %v15318_v5  ;;  %v15331_v0 = vld [vmem:[#allocation22_spill] sm:$0xff] }
 0x3b4   :  { %2663 = vrot.lane.b32.xlu0 %v15295_v63, %s7438_s18  ;;  %v3780_v24 = vsel %vm118_vm0, %v3716_v10, %v2638_v29  ;;  %v15316_v29 = vld [vmem:[#allocation123_spill] sm:$0xff]  ;;  %v15332_v34 = vrot.slane %v15331_v0, 2 }
 0x3b5   :  { %3049 = vrot.lane.b32.xlu1 %v10644_v61, %s7435_s2  ;;  %v3845_v7 = vsel %vm3833_vm7, %v3780_v24, %v10525_v52  ;;  %v3911_v52 = vsel %vm3898_vm8, %v3846_v62, %v15310_v3 }
 0x3b6   :  { %v3216_v17 = vpop.permute.xlu0 %3215  ;;  %v3910_v58 = vsel %vm3898_vm8, %v3845_v7, %v15308_v26 }
 0x3b7   :  { %v3402_v37 = vpop.permute.xlu1 %3401  ;;  %v3976_v63 = vsel %vm3963_vm9, %v3911_v52, %v3216_v17  ;;  %v15327_v52 = vld [vmem:[#allocation131_spill] sm:$0xff] }
 0x3b8   :  { %3427 = vrot.lane.b32.xlu0 %v15299_v20, %s7441_s21  ;;  %v4038_v21 = vsel %vm4028_vm11, %v3973_v33, %v3402_v37 }
 0x3b9   :  { %7026 = vmatmul.mubr.msk.f32.gmra.mrb[40].mxu1 %vm4102_vm10, %v4038_v21  ;;  %2477 = vrot.lane.b32.xlu1 %v10644_v61, %s7436_s3 }
 0x3ba   :  { %v2644_v39 = vpop.permute.xlu0 %2643  ;;  %7028 = vmatprep.mubr.msk.f32.mxu1 %vm4102_vm10, %v4039_v43  ;;  %v15320_v43 = vld [vmem:[#allocation156_spill] sm:$0xff] }
 0x3bb   :  { %v3214_v30 = vpop.permute.xlu1 %3213  ;;  %v3783_v41 = vsel %vm118_vm0, %v3719_v48, %v2644_v39  ;;  %v15321_v39 = vld [vmem:[#allocation10_spill] sm:$0xff] }
 0x3bc   :  { %2855 = vrot.lane.b32.xlu0 %v15299_v20, %s7439_s19  ;;  %v3975_v55 = vsel %vm3963_vm9, %v3910_v58, %v3214_v30  ;;  %v15317_v20 = vld [vmem:[#allocation41_spill] sm:$0xff]  ;;  %v3590_v54 = vsel %vm698_vm1, %v7278_v28, %v15321_v39 }
 0x3bd   :  { %3241 = vrot.lane.b32.xlu1 %v15307_v23, %s7440_s20  ;;  %v3655_v10 = vsel %vm3639_vm5, %v3590_v54, %v15323_v19  ;;  %v15336_v54 = vld [vmem:[#allocation26_spill] sm:$0xff] }
 0x3be   :  { %v3408_v38 = vpop.permute.xlu0 %3407  ;;  %v3720_v45 = vsel %vm3704_vm6, %v3655_v10, %v15324_v18 }
 0x3bf   :  { %v2642_v40 = vpop.permute.xlu1 %2641  ;;  %v4041_v31 = vsel %vm4028_vm11, %v3976_v63, %v3408_v38  ;;  %v15329_v63 = vld [vmem:[#allocation176_spill] sm:$0xff] }
 0x3c0   :  { %2857 = vrot.lane.b32.xlu0 %v15239_v14, %s7439_s19  ;;  %v7276_v14 = vld [vmem:[#allocation2 + $0x98] sm:$0xff] }
 0x3c1   :  { %v3588_v1 = vsel %vm698_vm1, %v7276_v14, %v15309_v16  ;;  %2669 = vrot.lane.b32.xlu1 %v15307_v23, %s7438_s18  ;;  %v1902_v14 = vrot.slane %v10711_v35, 2  ;;  %v7279_v16 = vld [vmem:[#allocation2 + $0xc0] sm:$0xff] }
 0x3c2   :  { %v2836_v53 = vpop.permute.xlu0 %2835  ;;  %v3653_v50 = vsel %vm3639_vm5, %v3588_v1, %v15311_v42  ;;  %v15326_v1 = vld [vmem:[#allocation140_spill] sm:$0xff] }
 0x3c3   :  { %v3406_v22 = vpop.permute.xlu1 %3405  ;;  %v3718_v51 = vsel %vm3704_vm6, %v3653_v50, %v15316_v29  ;;  %v3848_v33 = vsel %vm3833_vm7, %v3783_v41, %v2836_v53  ;;  %v15325_v53 = vld [vmem:[#allocation95_spill] sm:$0xff]  ;;  %v3591_v3 = vsel %vm698_vm1, %v7279_v16, %v15326_v1  ;;  %v15328_v42 = vld [vmem:[#allocation12_spill] sm:$0xff]  ;;  %v1904_v29 = vsel %vm1826_vm4, %v1902_v14, %v15332_v34  ;;  %v15341_v14 = vld [vmem:[#allocation42_spill] sm:$0xff] }
 0x3c4   :  { %2475 = vrot.lane.b32.xlu0 %v10625_v15, %s7436_s3  ;;  %v4040_v13 = vsel %vm4028_vm11, %v3975_v55, %v3406_v22  ;;  %v3782_v49 = vsel %vm118_vm0, %v3718_v51, %v2642_v40  ;;  %v7280_v22 = vld [vmem:[#allocation2 + $0xc8] sm:$0xff]  ;;  %v15333_v51 = vld [vmem:[#allocation121_spill] sm:$0xff] }
 0x3c5   :  { %7029 = vmatmul.mubr.msk.f32.gmra.mrb[42].mxu1 %vm4102_vm10, %v4040_v13  ;;  %3433 = vrot.lane.b32.xlu1 %v15317_v20, %s7441_s21  ;;  %v3847_v25 = vsel %vm3833_vm7, %v3782_v49, %v10611_v47  ;;  %v15322_v47 = vld [vmem:[#allocation72_spill] sm:$0xff]  ;;  %v3592_v50 = vsel %vm698_vm1, %v7280_v22, %v15328_v42  ;;  %v10767_v49 = vld [vmem:[#allocation2 + $0x170] sm:$0xff]  ;;  %v15342_v1 = vld [vmem:[#allocation177_spill] sm:$0xff] }
 0x3c6   :  { %v2838_v60 = vpop.permute.xlu0 %2837  ;;  %7031 = vmatprep.mubr.msk.f32.mxu1 %vm4102_vm10, %v4041_v31  ;;  %v3912_v21 = vsel %vm3898_vm8, %v3847_v25, %v15319_v11  ;;  %v3913_v46 = vsel %vm3898_vm8, %v3848_v33, %v15322_v47  ;;  %v3657_v4 = vsel %vm3639_vm5, %v3592_v50, %v15330_v56  ;;  %v15335_v33 = vld [vmem:[#allocation76_spill] sm:$0xff]  ;;  %v15345_v34 = vld [vmem:[#allocation34_spill] sm:$0xff] }
 0x3c7   :  { %v3218_v17 = vpop.permute.xlu1 %3217  ;;  %v15343_v42 = vld [vmem:[#allocation28_spill] sm:$0xff] }
 0x3c8   :  { %3239 = vrot.lane.b32.xlu0 %v15314_v32, %s7440_s20  ;;  %v3977_v9 = vsel %vm3963_vm9, %v3912_v21, %v3218_v17 }
 0x3c9   :  { %3051 = vrot.lane.b32.xlu1 %v10711_v35, %s7435_s2 }
 0x3ca   :  { %v3220_v27 = vpop.permute.xlu0 %3219 }
 0x3cb   :  { %v2646_v6 = vpop.permute.xlu1 %2645  ;;  %v3978_v30 = vsel %vm3963_vm9, %v3913_v46, %v3220_v27  ;;  %v15337_v46 = vld [vmem:[#allocation30_spill] sm:$0xff] }
 0x3cc   :  { %2667 = vrot.lane.b32.xlu0 %v15314_v32, %s7438_s18  ;;  %v3784_v40 = vsel %vm118_vm0, %v3720_v45, %v2646_v6  ;;  %v7282_v45 = vld [vmem:[#allocation2 + $0xe0] sm:$0xff] }
 0x3cd   :  { %2479 = vrot.lane.b32.xlu1 %v10711_v35, %s7436_s3  ;;  %v3849_v23 = vsel %vm3833_vm7, %v3784_v40, %v2838_v60  ;;  %v3656_v60 = vsel %vm3639_vm5, %v3591_v3, %v15329_v63  ;;  %v15344_v63 = vld [vmem:[#allocation124_spill] sm:$0xff] }
 0x3ce   :  { %v2648_v37 = vpop.permute.xlu0 %2647  ;;  %v3914_v55 = vsel %vm3898_vm8, %v3849_v23, %v15327_v52  ;;  %v3721_v17 = vsel %vm3704_vm6, %v3656_v60, %v15333_v51 }
 0x3cf   :  { %v3410_v8 = vpop.permute.xlu1 %3409  ;;  %v3785_v27 = vsel %vm118_vm0, %v3721_v17, %v2648_v37  ;;  %v15346_v17 = vld [vmem:[#allocation78_spill] sm:$0xff] }
 0x3d0   :  { %3431 = vrot.lane.b32.xlu0 %v15320_v43, %s7441_s21  ;;  %v4042_v38 = vsel %vm4028_vm11, %v3977_v9, %v3410_v8 }
 0x3d1   :  { %7032 = vmatmul.mubr.msk.f32.gmra.mrb[44].mxu1 %vm4102_vm10, %v4042_v38  ;;  %3243 = vrot.lane.b32.xlu1 %v15325_v53, %s7440_s20  ;;  %v10796_v38 = vld [vmem:[#allocation2 + $0x188] sm:$0xff] }
 0x3d2   :  { %v3412_v24 = vpop.permute.xlu0 %3411  ;;  %v1994_v16 = vrot.slane %v10796_v38, 1  ;;  %v2004_v51 = vrot.slane %v10796_v38, 2 }
 0x3d3   :  { %v4043_v57 = vsel %vm4028_vm11, %v3978_v30, %v3412_v24  ;;  %v3222_v7 = vpop.permute.xlu1 %3221  ;;  %v1509_v30 = vld [vmem:[#allocation2 + $0x180] sm:$0xff] }
 0x3d4   :  { %2859 = vrot.lane.b32.xlu0 %v15320_v43, %s7439_s19  ;;  %7034 = vmatprep.mubr.msk.f32.mxu1 %vm4102_vm10, %v4043_v57  ;;  %v3979_v13 = vsel %vm3963_vm9, %v3914_v55, %v3222_v7  ;;  %v1993_v18 = vrot.slane %v1509_v30, 1  ;;  %v15338_v7 = vld [vmem:[#allocation11_spill] sm:$0xff] }
 0x3d5   :  { %2671 = vrot.lane.b32.xlu1 %v15325_v53, %s7438_s18  ;;  %v3594_v40 = vsel %vm698_vm1, %v7282_v45, %v15338_v7  ;;  %v15339_v53 = vld [vmem:[#allocation142_spill] sm:$0xff]  ;;  %v7286_v7 = vld [vmem:[#allocation2 + $0xf0] sm:$0xff] }
 0x3d6   :  { %v2840_v62 = vpop.permute.xlu0 %2839  ;;  %v1995_v22 = vsel %vm1665_vm3, %v1993_v18, %v1994_v16  ;;  %v15349_v18 = vld [vmem:[#allocation14_spill] sm:$0xff] }
 0x3d7   :  { %v2650_v26 = vpop.permute.xlu1 %2649  ;;  %v3850_v41 = vsel %vm3833_vm7, %v3785_v27, %v2840_v62  ;;  %v7283_v62 = vld [vmem:[#allocation2 + $0xd8] sm:$0xff] }
 0x3d8   :  { %2861 = vrot.lane.b32.xlu0 %v15317_v20, %s7439_s19  ;;  %v3915_v11 = vsel %vm3898_vm8, %v3850_v41, %v15335_v33  ;;  %v3593_v23 = vsel %vm698_vm1, %v7283_v62, %v15339_v53  ;;  %v15351_v53 = vld [vmem:[#allocation192_spill] sm:$0xff] }
 0x3d9   :  { %3435 = vrot.lane.b32.xlu1 %v1904_v29, %s7441_s21  ;;  %v3658_v3 = vsel %vm3639_vm5, %v3593_v23, %v15342_v1 }
 0x3da   :  { %v2842_v58 = vpop.permute.xlu0 %2841  ;;  %v3723_v60 = vsel %vm3704_vm6, %v3658_v3, %v15344_v63  ;;  %v15354_v63 = vld [vmem:[#allocation127_spill] sm:$0xff] }
 0x3db   :  { %v3414_v31 = vpop.permute.xlu1 %3413 }
 0x3dc   :  { %2289 = vrot.lane.b32.xlu0 %v15317_v20, %s7437_s17  ;;  %v4044_v32 = vsel %vm4028_vm11, %v3979_v13, %v3414_v31  ;;  %v15334_v20 = vld [vmem:[#allocation133_spill] sm:$0xff] }
 0x3dd   :  { %7035 = vmatmul.mubr.msk.f32.gmra.mrb[46].mxu1 %vm4102_vm10, %v4044_v32  ;;  %v3722_v5 = vsel %vm3704_vm6, %v3657_v4, %v15334_v20  ;;  %2863 = vrot.lane.b32.xlu1 %v1904_v29, %s7439_s19  ;;  %v2003_v32 = vrot.slane %v1509_v30, 2 }
 0x3de   :  { %v3224_v2 = vpop.permute.xlu0 %3223  ;;  %v3786_v25 = vsel %vm118_vm0, %v3722_v5, %v2650_v26  ;;  %v15340_v26 = vld [vmem:[#allocation191_spill] sm:$0xff] }
 0x3df   :  { %v3226_v48 = vpop.permute.xlu1 %3225  ;;  %v3851_v21 = vsel %vm3833_vm7, %v3786_v25, %v2842_v58  ;;  %v3980_v43 = vsel %vm3963_vm9, %v3915_v11, %v3224_v2  ;;  %v3659_v58 = vsel %vm3639_vm5, %v3594_v40, %v15340_v26  ;;  %v1511_v11 = vld [vmem:[#allocation2 + $0x190] sm:$0x3]  ;;  %v15350_v40 = vld [vmem:[#allocation144_spill] sm:$0xff] }
 0x3e0   :  { %3053 = vrot.lane.b32.xlu0 %v10767_v49, %s7435_s2  ;;  %v3916_v47 = vsel %vm3898_vm8, %v3851_v21, %v15336_v54  ;;  %v3724_v50 = vsel %vm3704_vm6, %v3659_v58, %v15343_v42  ;;  %v2006_v45 = vrot.slane %v1511_v11, 2  ;;  %v3595_v62 = vsel %vm698_vm1, %v7286_v7, %v15350_v40  ;;  %v15352_v26 = vld [vmem:[#allocation179_spill] sm:$0xff]  ;;  %v15359_v7 = vld [vmem:[#allocation13_spill] sm:$0xff] }
 0x3e1   :  { %2291 = vrot.lane.b32.xlu1 %v1904_v29, %s7437_s17  ;;  %v3981_v9 = vsel %vm3963_vm9, %v3916_v47, %v3226_v48  ;;  %v3660_v58 = vsel %vm3639_vm5, %v3595_v62, %v15352_v26 }
 0x3e2   :  { %v2652_v6 = vpop.permute.xlu0 %2651  ;;  %v2007_v42 = vsel %vm1826_vm4, %v2004_v51, %v2006_v45  ;;  %v7289_v45 = vld [vmem:[#allocation2 + $0x110] sm:$0xff] }
 0x3e3   :  { %v2654_v37 = vpop.permute.xlu1 %2653  ;;  %v3787_v31 = vsel %vm118_vm0, %v3723_v60, %v2652_v6  ;;  %v2005_v6 = vsel %vm1826_vm4, %v2003_v32, %v2004_v51  ;;  %v3725_v60 = vsel %vm3704_vm6, %v3660_v58, %v15354_v63  ;;  %v3598_v40 = vsel %vm698_vm1, %v7289_v45, %v15359_v7  ;;  %v15361_v58 = vld [vmem:[#allocation53_spill] sm:$0xff] }
 0x3e4   :  { %2481 = vrot.lane.b32.xlu0 %v10767_v49, %s7436_s3  ;;  %v3788_v13 = vsel %vm118_vm0, %v3724_v50, %v2654_v37  ;;  %v10875_v50 = vld [vmem:[#allocation2 + $0x1c8] sm:$0xff]  ;;  %v10934_v63 = vld [vmem:[#allocation2 + $0x1e0] sm:$0xff] }
 0x3e5   :  { %3055 = vrot.lane.b32.xlu1 %v1509_v30, %s7435_s2 }
 0x3e6   :  { %v3416_v28 = vpop.permute.xlu0 %3415 }
 0x3e7   :  { %v4045_v39 = vsel %vm4028_vm11, %v3980_v43, %v3416_v28  ;;  %v3418_v8 = vpop.permute.xlu1 %3417  ;;  %v10842_v43 = vld [vmem:[#allocation2 + $0x1b0] sm:$0xff] }
 0x3e8   :  { %3245 = vrot.lane.b32.xlu0 %v15337_v46, %s7440_s20  ;;  %7037 = vmatprep.mubr.msk.f32.mxu1 %vm4102_vm10, %v4045_v39  ;;  %v4046_v10 = vsel %vm4028_vm11, %v3981_v9, %v3418_v8  ;;  %v1907_v28 = vrot.slane %v10842_v43, 2  ;;  %v1996_v39 = vrot.slane %v1511_v11, 1 }
 0x3e9   :  { %7038 = vmatmul.mubr.msk.f32.gmra.mrb[48].mxu1 %vm4102_vm10, %v4046_v10  ;;  %2483 = vrot.lane.b32.xlu1 %v1509_v30, %s7436_s3 }
 0x3ea   :  { %v2844_v19 = vpop.permute.xlu0 %2843 }
 0x3eb   :  { %v3230_v24 = vpop.permute.xlu1 %3229  ;;  %v3852_v2 = vsel %vm3833_vm7, %v3787_v31, %v2844_v19  ;;  %v1997_v19 = vsel %vm1665_vm3, %v1994_v16, %v1996_v39  ;;  %v10870_v16 = vld [vmem:[#allocation2 + $0x1a0] sm:$0xff]  ;;  %v1514_v39 = vld [vmem:[#allocation2 + $0x1a8] sm:$0x3] }
 0x3ec   :  { %2673 = vrot.lane.b32.xlu0 %v15337_v46, %s7438_s18  ;;  %v3917_v27 = vsel %vm3898_vm8, %v3852_v2, %v15346_v17  ;;  %v15347_v46 = vld [vmem:[#allocation36_spill] sm:$0xff]  ;;  %v2020_v31 = vrot.slane %v10870_v16, 1 }
 0x3ed   :  { %3247 = vrot.lane.b32.xlu1 %v1995_v22, %s7440_s20  ;;  %v15348_v9 = vrot.slane %v15347_v46, 2 }
 0x3ee   :  { %v2846_v57 = vpop.permute.xlu0 %2845 }
 0x3ef   :  { %v10810_v52 = vpop.permute.xlu1 %2657  ;;  %v3853_v56 = vsel %vm3833_vm7, %v3788_v13, %v2846_v57  ;;  %v1909_v8 = vsel %vm1826_vm4, %v1907_v28, %v15348_v9  ;;  %v7285_v57 = vld [vmem:[#allocation2 + $0xf8] sm:$0xff]  ;;  %v1912_v28 = vrot.slane %v10875_v50, 2  ;;  %v15357_v9 = vld [vmem:[#allocation43_spill] sm:$0xff] }
 0x3f0   :  { %3437 = vrot.lane.b32.xlu0 %v15341_v14, %s7441_s21  ;;  %v3918_v29 = vsel %vm3898_vm8, %v3853_v56, %v15345_v34 }
 0x3f1   :  { %2675 = vrot.lane.b32.xlu1 %v1995_v22, %s7438_s18  ;;  %v3983_v20 = vsel %vm3963_vm9, %v3918_v29, %v3230_v24  ;;  %v1512_v24 = vld [vmem:[#allocation2 + $0x198] sm:$0xff] }
 0x3f2   :  { %v3228_v55 = vpop.permute.xlu0 %3227  ;;  %v2019_v3 = vrot.slane %v1512_v24, 1 }
 0x3f3   :  { %v3422_v4 = vpop.permute.xlu1 %3421  ;;  %v3982_v48 = vsel %vm3963_vm9, %v3917_v27, %v3228_v55  ;;  %v15353_v55 = vld [vmem:[#allocation40_spill] sm:$0xff] }
 0x3f4   :  { %2865 = vrot.lane.b32.xlu0 %v15341_v14, %s7439_s19  ;;  %v4048_v25 = vsel %vm4028_vm11, %v3983_v20, %v3422_v4  ;;  %v2021_v29 = vsel %vm1665_vm3, %v2019_v3, %v2020_v31  ;;  %v2029_v20 = vrot.slane %v1512_v24, 2  ;;  %v15362_v3 = vld [vmem:[#allocation181_spill] sm:$0xff] }
 0x3f5   :  { %3439 = vrot.lane.b32.xlu1 %v2005_v6, %s7441_s21 }
 0x3f6   :  { %v2656_v0 = vpop.permute.xlu0 %2655 }
 0x3f7   :  { %v3040_v5 = vpop.permute.xlu1 %3039  ;;  %v3789_v56 = vsel %vm118_vm0, %v3725_v60, %v2656_v0 }
 0x3f8   :  { %2293 = vrot.lane.b32.xlu0 %v15341_v14, %s7437_s17 }
 0x3f9   :  { %2867 = vrot.lane.b32.xlu1 %v2005_v6, %s7439_s19  ;;  %v15355_v6 = vld [vmem:[#allocation97_spill] sm:$0xff] }
 0x3fa   :  { %v3420_v41 = vpop.permute.xlu0 %3419 }
 0x3fb   :  { %v4047_v33 = vsel %vm4028_vm11, %v3982_v48, %v3420_v41  ;;  %v3042_v21 = vpop.permute.xlu1 %3041 }
 0x3fc   :  { %3057 = vrot.lane.b32.xlu0 %v10796_v38, %s7435_s2  ;;  %7040 = vmatprep.mubr.msk.f32.mxu1 %vm4102_vm10, %v4047_v33  ;;  %v15356_v33 = vld [vmem:[#allocation45_spill] sm:$0xff] }
 0x3fd   :  { %7041 = vmatmul.mubr.msk.f32.gmra.mrb[50].mxu1 %vm4102_vm10, %v4048_v25  ;;  %2295 = vrot.lane.b32.xlu1 %v1909_v8, %s7437_s17  ;;  %v15358_v8 = vrot.slane %v15357_v9, 2  ;;  %v15368_v9 = vld [vmem:[#allocation16_spill] sm:$0xff] }
 0x3fe   :  { %v2848_v37 = vpop.permute.xlu0 %2847 }
 0x3ff   :  { %v10848_v54 = vpop.permute.xlu1 %2469  ;;  %v3854_v32 = vsel %vm3833_vm7, %v3789_v56, %v2848_v37 }
 0x400   :  { %2485 = vrot.lane.b32.xlu0 %v10796_v38, %s7436_s3  ;;  %v3596_v38 = vsel %vm698_vm1, %v7285_v57, %v15349_v18 }
 0x401   :  { %3059 = vrot.lane.b32.xlu1 %v1512_v24, %s7435_s2  ;;  %v3661_v23 = vsel %vm3639_vm5, %v3596_v38, %v15351_v53  ;;  %v10915_v24 = vld [vmem:[#allocation2 + $0x1d0] sm:$0xff]  ;;  %v7290_v53 = vld [vmem:[#allocation2 + $0x108] sm:$0xff] }
 0x402   :  { %v2850_v47 = vpop.permute.xlu0 %2849  ;;  %v3726_v22 = vsel %vm3704_vm6, %v3661_v23, %v15353_v55  ;;  %v15360_v23 = vld [vmem:[#allocation58_spill] sm:$0xff] }
 0x403   :  { %v3234_v10 = vpop.permute.xlu1 %3233  ;;  %v3790_v13 = vsel %vm118_vm0, %v3726_v22, %v10810_v52  ;;  %v3919_v52 = vsel %vm3898_vm8, %v3854_v32, %v3040_v5  ;;  %v2030_v5 = vrot.slane %v10870_v16, 2  ;;  %v3597_v26 = vsel %vm698_vm1, %v7290_v53, %v15360_v23 }
 0x404   :  { %3249 = vrot.lane.b32.xlu0 %v1997_v19, %s7440_s20  ;;  %v3855_v4 = vsel %vm3833_vm7, %v3790_v13, %v2850_v47  ;;  %v3662_v55 = vsel %vm3639_vm5, %v3597_v26, %v15362_v3 }
 0x405   :  { %2487 = vrot.lane.b32.xlu1 %v10875_v50, %s7436_s3  ;;  %v3920_v51 = vsel %vm3898_vm8, %v3855_v4, %v3042_v21  ;;  %v2031_v37 = vsel %vm1826_vm4, %v2029_v20, %v2030_v5 }
 0x406   :  { %v10856_v30 = vpop.permute.xlu0 %2467  ;;  %v3985_v17 = vsel %vm3963_vm9, %v3920_v51, %v3234_v10  ;;  %v2022_v10 = vrot.slane %v1514_v39, 1 }
 0x407   :  { %v10868_v14 = vpop.permute.xlu1 %2661  ;;  %v3727_v60 = vsel %vm3704_vm6, %v3662_v55, %v10856_v30 }
 0x408   :  { %2677 = vrot.lane.b32.xlu0 %v1997_v19, %s7438_s18  ;;  %v1914_v19 = vsel %vm1826_vm4, %v1912_v28, %v15358_v8  ;;  %v2023_v38 = vsel %vm1665_vm3, %v2020_v31, %v2022_v10  ;;  %v15363_v31 = vld [vmem:[#allocation138_spill] sm:$0xff]  ;;  %v3600_v8 = vsel %vm698_vm1, %v10445_v44, %v15368_v9  ;;  %v15369_v10 = vld [vmem:[#allocation61_spill] sm:$0xff] }
 0x409   :  { %3251 = vrot.lane.b32.xlu1 %v2021_v29, %s7440_s20  ;;  %v10974_v28 = vld [vmem:[#allocation2 + $0x1e8] sm:$0xff] }
 0x40a   :  { %v3232_v1 = vpop.permute.xlu0 %3231 }
 0x40b   :  { %v3426_v2 = vpop.permute.xlu1 %3425  ;;  %v3984_v0 = vsel %vm3963_vm9, %v3919_v52, %v3232_v1 }
 0x40c   :  { %3441 = vrot.lane.b32.xlu0 %v2007_v42, %s7441_s21  ;;  %v4050_v41 = vsel %vm4028_vm11, %v3985_v17, %v3426_v2 }
 0x40d   :  { %2679 = vrot.lane.b32.xlu1 %v15355_v6, %s7438_s18  ;;  %v1917_v6 = vrot.slane %v10934_v63, 2 }
 0x40e   :  { %v2660_v34 = vpop.permute.xlu0 %2659 }
 0x40f   :  { %v3044_v27 = vpop.permute.xlu1 %3043  ;;  %v3791_v56 = vsel %vm118_vm0, %v3727_v60, %v2660_v34 }
 0x410   :  { %2869 = vrot.lane.b32.xlu0 %v2007_v42, %s7439_s19  ;;  %v2032_v42 = vrot.slane %v1514_v39, 2 }
 0x411   :  { %3443 = vrot.lane.b32.xlu1 %v2031_v37, %s7441_s21 }
 0x412   :  { %v3424_v48 = vpop.permute.xlu0 %3423  ;;  %v2033_v29 = vsel %vm1826_vm4, %v2030_v5, %v2032_v42 }
 0x413   :  { %v4049_v25 = vsel %vm4028_vm11, %v3984_v0, %v3424_v48  ;;  %v3046_v11 = vpop.permute.xlu1 %3045  ;;  %v15364_v48 = vld [vmem:[#allocation99_spill] sm:$0xff] }
 0x414   :  { %2297 = vrot.lane.b32.xlu0 %v15356_v33, %s7437_s17  ;;  %7043 = vmatprep.mubr.msk.f32.mxu1 %vm4102_vm10, %v4049_v25 }
 0x415   :  { %7044 = vmatmul.mubr.msk.f32.gmra.mrb[52].mxu1 %vm4102_vm10, %v4050_v41  ;;  %2871 = vrot.lane.b32.xlu1 %v1914_v19, %s7439_s19  ;;  %v15365_v41 = vld [vmem:[#allocation52_spill] sm:$0xff] }
 0x416   :  { %v2852_v21 = vpop.permute.xlu0 %2851 }
 0x417   :  { %v10909_v47 = vpop.permute.xlu1 %2473  ;;  %v3856_v2 = vsel %vm3833_vm7, %v3791_v56, %v2852_v21 }
 0x418   :  { %3061 = vrot.lane.b32.xlu0 %v10870_v16, %s7435_s2  ;;  %v3663_v16 = vsel %vm3639_vm5, %v3598_v40, %v15361_v58  ;;  %v15371_v40 = vld [vmem:[#allocation183_spill] sm:$0xff] }
 0x419   :  { %2299 = vrot.lane.b32.xlu1 %v1914_v19, %s7437_s17  ;;  %v3728_v22 = vsel %vm3704_vm6, %v3663_v16, %v10848_v54  ;;  %v15372_v58 = vld [vmem:[#allocation139_spill] sm:$0xff] }
 0x41a   :  { %v2854_v46 = vpop.permute.xlu0 %2853  ;;  %v3792_v13 = vsel %vm118_vm0, %v3728_v22, %v10868_v14  ;;  %v3921_v14 = vsel %vm3898_vm8, %v3856_v2, %v3044_v27  ;;  %v11004_v22 = vld [vmem:[#allocation2 + $0x1f8] sm:$0xff] }
 0x41b   :  { %v3238_v57 = vpop.permute.xlu1 %3237  ;;  %v3857_v4 = vsel %vm3833_vm7, %v3792_v13, %v2854_v46 }
 0x41c   :  { %2489 = vrot.lane.b32.xlu0 %v10915_v24, %s7436_s3  ;;  %v3922_v30 = vsel %vm3898_vm8, %v3857_v4, %v3046_v11  ;;  %v15366_v11 = vld [vmem:[#allocation46_spill] sm:$0xff]  ;;  %v15373_v4 = vld [vmem:[#allocation59_spill] sm:$0xff] }
 0x41d   :  { %3063 = vrot.lane.b32.xlu1 %v10934_v63, %s7435_s2  ;;  %v3987_v51 = vsel %vm3963_vm9, %v3922_v30, %v3238_v57  ;;  %v15367_v21 = vrot.slane %v15366_v11, 2  ;;  %v3599_v57 = vsel %vm698_vm1, %v10423_v36, %v15369_v10  ;;  %v11048_v11 = vld [vmem:[#allocation2 + $0x200] sm:$0xff] }
 0x41e   :  { %v10919_v18 = vpop.permute.xlu0 %2471  ;;  %v3664_v53 = vsel %vm3639_vm5, %v3599_v57, %v15371_v40  ;;  %v15379_v10 = vld [vmem:[#allocation141_spill] sm:$0xff] }
 0x41f   :  { %v2666_v62 = vpop.permute.xlu1 %2665  ;;  %v1919_v37 = vsel %vm1826_vm4, %v1917_v6, %v15367_v21  ;;  %v3729_v44 = vsel %vm3704_vm6, %v3664_v53, %v10919_v18  ;;  %v15381_v53 = vld [vmem:[#allocation194_spill] sm:$0xff] }
 0x420   :  { %3253 = vrot.lane.b32.xlu0 %v2023_v38, %s7440_s20  ;;  %v15370_v38 = vld [vmem:[#allocation193_spill] sm:$0xff] }
 0x421   :  { %2491 = vrot.lane.b32.xlu1 %v10934_v63, %s7436_s3  ;;  %v3665_v45 = vsel %vm3639_vm5, %v3600_v8, %v15370_v38 }
 0x422   :  { %v3236_v1 = vpop.permute.xlu0 %3235  ;;  %v3730_v23 = vsel %vm3704_vm6, %v3665_v45, %v10909_v47  ;;  %v11065_v45 = vld [vmem:[#allocation2 + $0x210] sm:$0xff] }
 0x423   :  { %v3430_v54 = vpop.permute.xlu1 %3429  ;;  %v3986_v52 = vsel %vm3963_vm9, %v3921_v14, %v3236_v1  ;;  %v3794_v26 = vsel %vm118_vm0, %v3730_v23, %v2666_v62 }
 0x424   :  { %2681 = vrot.lane.b32.xlu0 %v15363_v31, %s7438_s18  ;;  %v4052_v0 = vsel %vm4028_vm11, %v3987_v51, %v3430_v54  ;;  %v15376_v51 = vld [vmem:[#allocation185_spill] sm:$0xff] }
 0x425   :  { %3255 = vrot.lane.b32.xlu1 %v15364_v48, %s7440_s20 }
 0x426   :  { %v2664_v32 = vpop.permute.xlu0 %2663 }
 0x427   :  { %v3048_v34 = vpop.permute.xlu1 %3047  ;;  %v3793_v36 = vsel %vm118_vm0, %v3729_v44, %v2664_v32  ;;  %v15374_v32 = vld [vmem:[#allocation101_spill] sm:$0xff] }
 0x428   :  { %3445 = vrot.lane.b32.xlu0 %v2033_v29, %s7441_s21  ;;  %v15375_v29 = vld [vmem:[#allocation148_spill] sm:$0xff] }
 0x429   :  { %2683 = vrot.lane.b32.xlu1 %v15364_v48, %s7438_s18  ;;  %v3601_v30 = vsel %vm698_vm1, %v10527_v12, %v15375_v29 }
 0x42a   :  { %v3428_v17 = vpop.permute.xlu0 %3427 }
 0x42b   :  { %v4051_v20 = vsel %vm4028_vm11, %v3986_v52, %v3428_v17  ;;  %v3050_v27 = vpop.permute.xlu1 %3049  ;;  %v1922_v17 = vrot.slane %v11004_v22, 2 }
 0x42c   :  { %2873 = vrot.lane.b32.xlu0 %v15365_v41, %s7439_s19  ;;  %7046 = vmatprep.mubr.msk.f32.mxu1 %vm4102_vm10, %v4051_v20 }
 0x42d   :  { %7047 = vmatmul.mubr.msk.f32.gmra.mrb[54].mxu1 %vm4102_vm10, %v4052_v0  ;;  %3447 = vrot.lane.b32.xlu1 %v1919_v37, %s7441_s21 }
 0x42e   :  { %v2856_v25 = vpop.permute.xlu0 %2855 }
 0x42f   :  { %v10968_v33 = vpop.permute.xlu1 %2477  ;;  %v3858_v3 = vsel %vm3833_vm7, %v3793_v36, %v2856_v25 }
 0x430   :  { %2301 = vrot.lane.b32.xlu0 %v15365_v41, %s7437_s17  ;;  %v3923_v18 = vsel %vm3898_vm8, %v3858_v3, %v3048_v34  ;;  %v3666_v34 = vsel %vm3639_vm5, %v3601_v30, %v15376_v51  ;;  %v15384_v51 = vld [vmem:[#allocation150_spill] sm:$0xff] }
 0x431   :  { %2875 = vrot.lane.b32.xlu1 %v1919_v37, %s7439_s19 }
 0x432   :  { %v2858_v5 = vpop.permute.xlu0 %2857 }
 0x433   :  { %v3242_v39 = vpop.permute.xlu1 %3241  ;;  %v3859_v16 = vsel %vm3833_vm7, %v3794_v26, %v2858_v5 }
 0x434   :  { %3065 = vrot.lane.b32.xlu0 %v10974_v28, %s7435_s2  ;;  %v3924_v47 = vsel %vm3898_vm8, %v3859_v16, %v3050_v27  ;;  %v15377_v27 = vld [vmem:[#allocation48_spill] sm:$0xff] }
 0x435   :  { %2303 = vrot.lane.b32.xlu1 %v1919_v37, %s7437_s17  ;;  %v3989_v62 = vsel %vm3963_vm9, %v3924_v47, %v3242_v39  ;;  %v15378_v25 = vrot.slane %v15377_v27, 2 }
 0x436   :  { %v2476_v46 = vpop.permute.xlu0 %2475 }
 0x437   :  { %v10984_v19 = vpop.permute.xlu1 %2669  ;;  %v3731_v0 = vsel %vm3704_vm6, %v3666_v34, %v2476_v46  ;;  %v1924_v6 = vsel %vm1826_vm4, %v1922_v17, %v15378_v25  ;;  %v3603_v34 = vsel %vm698_vm1, %v10625_v15, %v15384_v51  ;;  %v15386_v15 = vld [vmem:[#allocation50_spill] sm:$0xff] }
 0x438   :  { %2493 = vrot.lane.b32.xlu0 %v10974_v28, %s7436_s3 }
 0x439   :  { %3067 = vrot.lane.b32.xlu1 %v11004_v22, %s7435_s2 }
 0x43a   :  { %v3240_v7 = vpop.permute.xlu0 %3239 }
 0x43b   :  { %v3434_v1 = vpop.permute.xlu1 %3433  ;;  %v3988_v60 = vsel %vm3963_vm9, %v3923_v18, %v3240_v7  ;;  %v15380_v7 = vld [vmem:[#allocation17_spill] sm:$0xff] }
 0x43c   :  { %3257 = vrot.lane.b32.xlu0 %v15372_v58, %s7440_s20  ;;  %v4054_v31 = vsel %vm4028_vm11, %v3989_v62, %v3434_v1  ;;  %v3602_v40 = vsel %vm698_vm1, %v10549_v59, %v15380_v7 }
 0x43d   :  { %2495 = vrot.lane.b32.xlu1 %v11004_v22, %s7436_s3  ;;  %v3667_v23 = vsel %vm3639_vm5, %v3602_v40, %v15381_v53 }
 0x43e   :  { %v2668_v55 = vpop.permute.xlu0 %2667  ;;  %v3732_v26 = vsel %vm3704_vm6, %v3667_v23, %v10968_v33 }
 0x43f   :  { %v3052_v42 = vpop.permute.xlu1 %3051  ;;  %v3795_v20 = vsel %vm118_vm0, %v3731_v0, %v2668_v55  ;;  %v3796_v16 = vsel %vm118_vm0, %v3732_v26, %v10984_v19  ;;  %v15382_v55 = vld [vmem:[#allocation62_spill] sm:$0xff] }
 0x440   :  { %2685 = vrot.lane.b32.xlu0 %v15372_v58, %s7438_s18 }
 0x441   :  { %3259 = vrot.lane.b32.xlu1 %v15374_v32, %s7440_s20 }
 0x442   :  { %v3432_v13 = vpop.permute.xlu0 %3431 }
 0x443   :  { %v4053_v56 = vsel %vm4028_vm11, %v3988_v60, %v3432_v13  ;;  %v11022_v54 = vpop.permute.xlu1 %2479 }
 0x444   :  { %3449 = vrot.lane.b32.xlu0 %v15373_v4, %s7441_s21  ;;  %7049 = vmatprep.mubr.msk.f32.mxu1 %vm4102_vm10, %v4053_v56 }
 0x445   :  { %7050 = vmatmul.mubr.msk.f32.gmra.mrb[56].mxu1 %vm4102_vm10, %v4054_v31  ;;  %2687 = vrot.lane.b32.xlu1 %v15374_v32, %s7438_s18  ;;  %v15383_v32 = vld [vmem:[#allocation104_spill] sm:$0xff] }
 0x446   :  { %v2860_v2 = vpop.permute.xlu0 %2859 }
 0x447   :  { %v3244_v14 = vpop.permute.xlu1 %3243  ;;  %v3860_v48 = vsel %vm3833_vm7, %v3795_v20, %v2860_v2 }
 0x448   :  { %2877 = vrot.lane.b32.xlu0 %v15373_v4, %s7439_s19  ;;  %v3925_v5 = vsel %vm3898_vm8, %v3860_v48, %v3052_v42 }
 0x449   :  { %3451 = vrot.lane.b32.xlu1 %v1924_v6, %s7441_s21  ;;  %v3990_v21 = vsel %vm3963_vm9, %v3925_v5, %v3244_v14  ;;  %v1927_v14 = vrot.slane %v11065_v45, 2 }
 0x44a   :  { %v2862_v52 = vpop.permute.xlu0 %2861 }
 0x44b   :  { %v2672_v12 = vpop.permute.xlu1 %2671  ;;  %v3861_v33 = vsel %vm3833_vm7, %v3796_v16, %v2862_v52  ;;  %v15385_v52 = vld [vmem:[#allocation186_spill] sm:$0xff] }
 0x44c   :  { %2305 = vrot.lane.b32.xlu0 %v15373_v4, %s7437_s17  ;;  %v3668_v17 = vsel %vm3639_vm5, %v3603_v34, %v15385_v52 }
 0x44d   :  { %2879 = vrot.lane.b32.xlu1 %v1924_v6, %s7439_s19  ;;  %v3733_v0 = vsel %vm3704_vm6, %v3668_v17, %v11022_v54 }
 0x44e   :  { %v11041_v41 = vpop.permute.xlu0 %2289  ;;  %v3797_v48 = vsel %vm118_vm0, %v3733_v0, %v2672_v12 }
 0x44f   :  { %v3436_v37 = vpop.permute.xlu1 %3435 }
 0x450   :  { %3069 = vrot.lane.b32.xlu0 %v11048_v11, %s7435_s2  ;;  %v4055_v46 = vsel %vm4028_vm11, %v3990_v21, %v3436_v37 }
 0x451   :  { %7052 = vmatprep.mubr.msk.f32.mxu1 %vm4102_vm10, %v4055_v46  ;;  %2307 = vrot.lane.b32.xlu1 %v1924_v6, %s7437_s17  ;;  %v15387_v6 = vrot.slane %v15386_v15, 2 }
 0x452   :  { %v3054_v39 = vpop.permute.xlu0 %3053 }
 0x453   :  { %v2864_v9 = vpop.permute.xlu1 %2863  ;;  %v3926_v18 = vsel %vm3898_vm8, %v3861_v33, %v3054_v39  ;;  %v1929_v5 = vsel %vm1826_vm4, %v1927_v14, %v15387_v6  ;;  %v11138_v39 = vld [vmem:[#allocation2 + $0x218] sm:$0xff] }
 0x454   :  { %2497 = vrot.lane.b32.xlu0 %v11048_v11, %s7436_s3  ;;  %v3862_v21 = vsel %vm3833_vm7, %v3797_v48, %v2864_v9 }
 0x455   :  { %3071 = vrot.lane.b32.xlu1 %v11065_v45, %s7435_s2 }
 0x456   :  { %v11058_v8 = vpop.permute.xlu0 %2481 }
 0x457   :  { %v11063_v57 = vpop.permute.xlu1 %2291 }
 0x458   :  { %3261 = vrot.lane.b32.xlu0 %v15379_v10, %s7440_s20 }
 0x459   :  { %2499 = vrot.lane.b32.xlu1 %v11065_v45, %s7436_s3 }
 0x45a   :  { %v3246_v38 = vpop.permute.xlu0 %3245 }
 0x45b   :  { %v3056_v44 = vpop.permute.xlu1 %3055  ;;  %v3991_v13 = vsel %vm3963_vm9, %v3926_v18, %v3246_v38 }
 0x45c   :  { %2689 = vrot.lane.b32.xlu0 %v15379_v10, %s7438_s18  ;;  %v11080_v36 = vpop.f32.mrb[32].mxu1  ;;  %v3927_v54 = vsel %vm3898_vm8, %v3862_v21, %v3056_v44 }
 0x45d   :  { %v4683_v59 = vsel %vm698_vm1, %v11080_v36, 0.0  ;;  %v4817_v1 = vmul.f32 %v11080_v36, %v11080_v36  ;;  %v11088_v3 = vpop.f32.mrb[33].mxu1  ;;  %3263 = vrot.lane.b32.xlu1 %v15383_v32, %s7440_s20 }
 0x45e   :  { %v11078_v58 = vpop.permute.xlu0 %2673  ;;  %v4682_v47 = vsel %vm698_vm1, %v11088_v3, 0.0  ;;  %v4816_v19 = vmul.f32 %v11088_v3, %v11088_v3 }
 0x45f   :  { %v4881_v62 = vsel %vm698_vm1, %v4817_v1, 0.0  ;;  %v4684_v42 = vadd.f32 %v4683_v59, %v4682_v47  ;;  %v11101_v60 = vpop.permute.xlu1 %2483  ;;  %v15388_v47 = vld [vmem:[#allocation143_spill] sm:$0xff] }
 0x460   :  { %3453 = vrot.lane.b32.xlu0 %v15382_v55, %s7441_s21  ;;  %v4880_v56 = vsel %vm698_vm1, %v4816_v19, 0.0 }
 0x461   :  { %v4882_v2 = vadd.f32 %v4881_v62, %v4880_v56  ;;  %2691 = vrot.lane.b32.xlu1 %v15383_v32, %s7438_s18 }
 0x462   :  { %v3438_v31 = vpop.permute.xlu0 %3437 }
 0x463   :  { %v4056_v4 = vsel %vm4028_vm11, %v3991_v13, %v3438_v31  ;;  %v3248_v29 = vpop.permute.xlu1 %3247  ;;  %v11169_v13 = vld [vmem:[#allocation2 + $0x228] sm:$0xff]  ;;  %v15389_v31 = vld [vmem:[#allocation19_spill] sm:$0xff] }
 0x464   :  { %2881 = vrot.lane.b32.xlu0 %v15382_v55, %s7439_s19  ;;  %7053 = vmatmul.mubr.msk.f32.gmra.mrb[58].mxu1 %vm4102_vm10, %v4056_v4  ;;  %v3992_v10 = vsel %vm3963_vm9, %v3927_v54, %v3248_v29  ;;  %v3604_v56 = vsel %vm698_vm1, %v10644_v61, %v15389_v31 }
 0x465   :  { %3455 = vrot.lane.b32.xlu1 %v1929_v5, %s7441_s21  ;;  %v3669_v29 = vsel %vm3639_vm5, %v3604_v56, %v11041_v41 }
 0x466   :  { %v2866_v30 = vpop.permute.xlu0 %2865  ;;  %v3734_v61 = vsel %vm3704_vm6, %v3669_v29, %v11058_v8  ;;  %v15390_v8 = vld [vmem:[#allocation67_spill] sm:$0xff] }
 0x467   :  { %v11123_v20 = vpop.permute.xlu1 %2675  ;;  %v3798_v0 = vsel %vm118_vm0, %v3734_v61, %v11078_v58 }
 0x468   :  { %2309 = vrot.lane.b32.xlu0 %v15382_v55, %s7437_s17  ;;  %v11128_v25 = vpop.f32.mrb[34].mxu1  ;;  %v3863_v15 = vsel %vm3833_vm7, %v3798_v0, %v2866_v30 }
 0x469   :  { %v11134_v37 = vpop.f32.mrb[35].mxu1  ;;  %v4819_v12 = vmul.f32 %v11128_v25, %v11128_v25  ;;  %v4687_v53 = vsel %vm698_vm1, %v11128_v25, 0.0  ;;  %2883 = vrot.lane.b32.xlu1 %v1929_v5, %s7439_s19 }
 0x46a   :  { %v11126_v27 = vpop.permute.xlu0 %2293  ;;  %v4685_v46 = vsel %vm698_vm1, %v11134_v37, 0.0  ;;  %v4818_v9 = vmul.f32 %v11134_v37, %v11134_v37 }
 0x46b   :  { %v4686_v38 = vadd.f32 %v4685_v46, %v4684_v42  ;;  %v3440_v7 = vpop.permute.xlu1 %3439  ;;  %v4885_v59 = vsel %vm698_vm1, %v4819_v12, 0.0 }
 0x46c   :  { %3073 = vrot.lane.b32.xlu0 %v11138_v39, %s7435_s2  ;;  %v4883_v23 = vsel %vm698_vm1, %v4818_v9, 0.0  ;;  %v4057_v44 = vsel %vm4028_vm11, %v3992_v10, %v3440_v7  ;;  %v15391_v9 = vld [vmem:[#allocation107_spill] sm:$0xff]  ;;  %v1932_v7 = vrot.slane %v11169_v13, 2 }
 0x46d   :  { %v4688_v26 = vadd.f32 %v4687_v53, %v4686_v38  ;;  %v4884_v16 = vadd.f32 %v4883_v23, %v4882_v2  ;;  %7055 = vmatprep.mubr.msk.f32.mxu1 %vm4102_vm10, %v4057_v44  ;;  %2311 = vrot.lane.b32.xlu1 %v1929_v5, %s7437_s17 }
 0x46e   :  { %v3058_v40 = vpop.permute.xlu0 %3057 }
 0x46f   :  { %v4886_v1 = vadd.f32 %v4885_v59, %v4884_v16  ;;  %v2868_v33 = vpop.permute.xlu1 %2867  ;;  %v3928_v5 = vsel %vm3898_vm8, %v3863_v15, %v3058_v40  ;;  %v15392_v40 = vld [vmem:[#allocation56_spill] sm:$0xff] }
 0x470   :  { %2501 = vrot.lane.b32.xlu0 %v11138_v39, %s7436_s3  ;;  %v3605_v53 = vsel %vm698_vm1, %v10711_v35, %v15392_v40 }
 0x471   :  { %3075 = vrot.lane.b32.xlu1 %v11169_v13, %s7435_s2  ;;  %v3670_v44 = vsel %vm3639_vm5, %v3605_v53, %v11063_v57 }
 0x472   :  { %v11158_v55 = vpop.permute.xlu0 %2485  ;;  %v3735_v59 = vsel %vm3704_vm6, %v3670_v44, %v11101_v60  ;;  %v11283_v44 = vld [vmem:[#allocation2 + $0x240] sm:$0xff] }
 0x473   :  { %v11163_v19 = vpop.permute.xlu1 %2295  ;;  %v3799_v57 = vsel %vm118_vm0, %v3735_v59, %v11123_v20 }
 0x474   :  { %3265 = vrot.lane.b32.xlu0 %v15388_v47, %s7440_s20  ;;  %v11165_v62 = vpop.f32.mrb[36].mxu1  ;;  %v3864_v29 = vsel %vm3833_vm7, %v3799_v57, %v2868_v33 }
 0x475   :  { %v11167_v42 = vpop.f32.mrb[37].mxu1  ;;  %v4821_v4 = vmul.f32 %v11165_v62, %v11165_v62  ;;  %v4691_v52 = vsel %vm698_vm1, %v11165_v62, 0.0  ;;  %2503 = vrot.lane.b32.xlu1 %v11169_v13, %s7436_s3 }
 0x476   :  { %v3250_v18 = vpop.permute.xlu0 %3249  ;;  %v4689_v2 = vsel %vm698_vm1, %v11167_v42, 0.0  ;;  %v4820_v32 = vmul.f32 %v11167_v42, %v11167_v42 }
 0x477   :  { %v4690_v14 = vadd.f32 %v4689_v2, %v4688_v26  ;;  %v3060_v51 = vpop.permute.xlu1 %3059  ;;  %v4889_v6 = vsel %vm698_vm1, %v4821_v4, 0.0  ;;  %v3993_v12 = vsel %vm3963_vm9, %v3928_v5, %v3250_v18  ;;  %v15393_v4 = vld [vmem:[#allocation54_spill] sm:$0xff]  ;;  %v15395_v5 = vld [vmem:[#allocation145_spill] sm:$0xff] }
 0x478   :  { %2693 = vrot.lane.b32.xlu0 %v15388_v47, %s7438_s18  ;;  %v4887_v17 = vsel %vm698_vm1, %v4820_v32, 0.0  ;;  %v15394_v2 = vrot.slane %v15393_v4, 2  ;;  %v3929_v61 = vsel %vm3898_vm8, %v3864_v29, %v3060_v51 }
 0x479   :  { %v4888_v48 = vadd.f32 %v4887_v17, %v4886_v1  ;;  %v4692_v41 = vadd.f32 %v4691_v52, %v4690_v14  ;;  %3267 = vrot.lane.b32.xlu1 %v15391_v9, %s7440_s20  ;;  %v11251_v52 = vld [vmem:[#allocation2 + $0x230] sm:$0xff] }
 0x47a   :  { %v11188_v34 = vpop.permute.xlu0 %2677  ;;  %v1934_v32 = vsel %vm1826_vm4, %v1932_v7, %v15394_v2 }
 0x47b   :  { %v11202_v21 = vpop.permute.xlu1 %2487  ;;  %v4890_v54 = vadd.f32 %v4889_v6, %v4888_v48 }
 0x47c   :  { %3457 = vrot.lane.b32.xlu0 %v15390_v8, %s7441_s21 }
 0x47d   :  { %2695 = vrot.lane.b32.xlu1 %v15391_v9, %s7438_s18 }
 0x47e   :  { %v3442_v58 = vpop.permute.xlu0 %3441 }
 0x47f   :  { %v4058_v46 = vsel %vm4028_vm11, %v3993_v12, %v3442_v58  ;;  %v3252_v30 = vpop.permute.xlu1 %3251 }
 0x480   :  { %2885 = vrot.lane.b32.xlu0 %v15390_v8, %s7439_s19  ;;  %7056 = vmatmul.mubr.msk.f32.gmra.mrb[60].mxu1 %vm4102_vm10, %v4058_v46  ;;  %v11213_v38 = vpop.f32.mrb[38].mxu1  ;;  %v3994_v17 = vsel %vm3963_vm9, %v3929_v61, %v3252_v30 }
 0x481   :  { %v11219_v23 = vpop.f32.mrb[39].mxu1  ;;  %v4823_v26 = vmul.f32 %v11213_v38, %v11213_v38  ;;  %v4695_v31 = vsel %vm698_vm1, %v11213_v38, 0.0  ;;  %3459 = vrot.lane.b32.xlu1 %v1934_v32, %s7441_s21 }
 0x482   :  { %v11211_v10 = vpop.permute.xlu0 %2869  ;;  %v4693_v16 = vsel %vm698_vm1, %v11219_v23, 0.0  ;;  %v4822_v35 = vmul.f32 %v11219_v23, %v11219_v23 }
 0x483   :  { %v4694_v1 = vadd.f32 %v4693_v16, %v4692_v41  ;;  %v11235_v47 = vpop.permute.xlu1 %2679  ;;  %v4893_v20 = vsel %vm698_vm1, %v4823_v26, 0.0  ;;  %v15396_v16 = vld [vmem:[#allocation35_spill] sm:$0xff] }
 0x484   :  { %2313 = vrot.lane.b32.xlu0 %v15390_v8, %s7437_s17  ;;  %v4891_v56 = vsel %vm698_vm1, %v4822_v35, 0.0  ;;  %v3606_v35 = vsel %vm698_vm1, %v10767_v49, %v15396_v16 }
 0x485   :  { %v4892_v60 = vadd.f32 %v4891_v56, %v4890_v54  ;;  %v4696_v14 = vadd.f32 %v4695_v31, %v4694_v1  ;;  %2887 = vrot.lane.b32.xlu1 %v1934_v32, %s7439_s19  ;;  %v3671_v1 = vsel %vm3639_vm5, %v3606_v35, %v11126_v27 }
 0x486   :  { %v11239_v18 = vpop.permute.xlu0 %2297  ;;  %v3736_v56 = vsel %vm3704_vm6, %v3671_v1, %v11158_v55  ;;  %v15400_v1 = vld [vmem:[#allocation57_spill] sm:$0xff] }
 0x487   :  { %v3444_v0 = vpop.permute.xlu1 %3443  ;;  %v4894_v48 = vadd.f32 %v4893_v20, %v4892_v60  ;;  %v3800_v2 = vsel %vm118_vm0, %v3736_v56, %v11188_v34  ;;  %v15398_v20 = vld [vmem:[#allocation110_spill] sm:$0xff] }
 0x488   :  { %3077 = vrot.lane.b32.xlu0 %v11251_v52, %s7435_s2  ;;  %v4059_v33 = vsel %vm4028_vm11, %v3994_v17, %v3444_v0  ;;  %v3865_v49 = vsel %vm3833_vm7, %v3800_v2, %v11211_v10 }
 0x489   :  { %7058 = vmatprep.mubr.msk.f32.mxu1 %vm4102_vm10, %v4059_v33  ;;  %2315 = vrot.lane.b32.xlu1 %v1934_v32, %s7437_s17  ;;  %v15397_v32 = vld [vmem:[#allocation70_spill] sm:$0xff] }
 0x48a   :  { %v3062_v41 = vpop.permute.xlu0 %3061 }
 0x48b   :  { %v11261_v51 = vpop.permute.xlu1 %2871  ;;  %v3930_v27 = vsel %vm3898_vm8, %v3865_v49, %v3062_v41 }
 0x48c   :  { %2505 = vrot.lane.b32.xlu0 %v11251_v52, %s7436_s3  ;;  %v11265_v6 = vpop.f32.mrb[40].mxu1 }
 0x48d   :  { %v11267_v8 = vpop.f32.mrb[41].mxu1  ;;  %v4825_v54 = vmul.f32 %v11265_v6, %v11265_v6  ;;  %v4699_v7 = vsel %vm698_vm1, %v11265_v6, 0.0  ;;  %3079 = vrot.lane.b32.xlu1 %v11283_v44, %s7435_s2 }
 0x48e   :  { %v11263_v15 = vpop.permute.xlu0 %2489  ;;  %v4697_v12 = vsel %vm698_vm1, %v11267_v8, 0.0  ;;  %v4824_v58 = vmul.f32 %v11267_v8, %v11267_v8 }
 0x48f   :  { %v4698_v46 = vadd.f32 %v4697_v12, %v4696_v14  ;;  %v11278_v9 = vpop.permute.xlu1 %2299  ;;  %v4897_v59 = vsel %vm698_vm1, %v4825_v54, 0.0  ;;  %v1937_v12 = vrot.slane %v11283_v44, 2 }
 0x490   :  { %3269 = vrot.lane.b32.xlu0 %v15395_v5, %s7440_s20  ;;  %v4895_v40 = vsel %vm698_vm1, %v4824_v58, 0.0  ;;  %v15399_v58 = vld [vmem:[#allocation64_spill] sm:$0xff] }
 0x491   :  { %v4896_v53 = vadd.f32 %v4895_v40, %v4894_v48  ;;  %v4700_v26 = vadd.f32 %v4699_v7, %v4698_v46  ;;  %2507 = vrot.lane.b32.xlu1 %v11283_v44, %s7436_s3  ;;  %v3607_v46 = vsel %vm698_vm1, %v10842_v43, %v15399_v58 }
 0x492   :  { %v3254_v30 = vpop.permute.xlu0 %3253  ;;  %v3672_v40 = vsel %vm3639_vm5, %v3607_v46, %v11163_v19 }
 0x493   :  { %v3064_v57 = vpop.permute.xlu1 %3063  ;;  %v4898_v31 = vadd.f32 %v4897_v59, %v4896_v53  ;;  %v3995_v55 = vsel %vm3963_vm9, %v3930_v27, %v3254_v30 }
 0x494   :  { %2697 = vrot.lane.b32.xlu0 %v15395_v5, %s7438_s18 }
 0x495   :  { %3271 = vrot.lane.b32.xlu1 %v15398_v20, %s7440_s20 }
 0x496   :  { %v11297_v4 = vpop.permute.xlu0 %2681 }
 0x497   :  { %v11308_v29 = vpop.permute.xlu1 %2491 }
 0x498   :  { %3461 = vrot.lane.b32.xlu0 %v15397_v32, %s7441_s21  ;;  %v11311_v14 = vpop.f32.mrb[42].mxu1 }
 0x499   :  { %v11314_v61 = vpop.f32.mrb[43].mxu1  ;;  %v4827_v10 = vmul.f32 %v11311_v14, %v11311_v14  ;;  %v4703_v5 = vsel %vm698_vm1, %v11311_v14, 0.0  ;;  %2699 = vrot.lane.b32.xlu1 %v15398_v20, %s7438_s18 }
 0x49a   :  { %v3446_v60 = vpop.permute.xlu0 %3445  ;;  %v4701_v17 = vsel %vm698_vm1, %v11314_v61, 0.0  ;;  %v4826_v0 = vmul.f32 %v11314_v61, %v11314_v61 }
 0x49b   :  { %v4060_v34 = vsel %vm4028_vm11, %v3995_v55, %v3446_v60  ;;  %v4702_v48 = vadd.f32 %v4701_v17, %v4700_v26  ;;  %v3256_v41 = vpop.permute.xlu1 %3255  ;;  %v4901_v53 = vsel %vm698_vm1, %v4827_v10, 0.0  ;;  %v3737_v26 = vsel %vm3704_vm6, %v3672_v40, %v11202_v21  ;;  %v11356_v21 = vld [vmem:[#allocation2 + $0x248] sm:$0xff]  ;;  %v7302_v40 = vld [vmem:[#allocation2 + $0x1b8] sm:$0xff] }
 0x49c   :  { %2889 = vrot.lane.b32.xlu0 %v15397_v32, %s7439_s19  ;;  %7059 = vmatmul.mubr.msk.f32.gmra.mrb[62].mxu1 %vm4102_vm10, %v4060_v34  ;;  %v4899_v54 = vsel %vm698_vm1, %v4826_v0, 0.0  ;;  %v3801_v43 = vsel %vm118_vm0, %v3737_v26, %v11235_v47 }
 0x49d   :  { %v4900_v30 = vadd.f32 %v4899_v54, %v4898_v31  ;;  %v4704_v7 = vadd.f32 %v4703_v5, %v4702_v48  ;;  %v15401_v31 = vrot.slane %v15400_v1, 2  ;;  %v3866_v56 = vsel %vm3833_vm7, %v3801_v43, %v11261_v51 }
 0x49e   :  { %v2874_v33 = vpop.permute.xlu0 %2873  ;;  %v3931_v2 = vsel %vm3898_vm8, %v3866_v56, %v3064_v57 }
 0x49f   :  { %v11343_v16 = vpop.permute.xlu1 %2683  ;;  %v4902_v35 = vadd.f32 %v4901_v53, %v4900_v30  ;;  %v1939_v19 = vsel %vm1826_vm4, %v1937_v12, %v15401_v31  ;;  %v3996_v47 = vsel %vm3963_vm9, %v3931_v2, %v3256_v41  ;;  %v15402_v12 = vld [vmem:[#allocation146_spill] sm:$0xff]  ;;  %v15403_v53 = vld [vmem:[#allocation37_spill] sm:$0xff] }
 0x4a0   :  { %2317 = vrot.lane.b32.xlu0 %v15397_v32, %s7437_s17  ;;  %3463 = vrot.lane.b32.xlu1 %v1939_v19, %s7441_s21  ;;  %v3608_v26 = vsel %vm698_vm1, %v7302_v40, %v15403_v53 }
 0x4a2   :  { %v11347_v59 = vpop.permute.xlu0 %2301 }
 0x4a3   :  { %v3448_v49 = vpop.permute.xlu1 %3447 }
 0x4a4   :  { %3081 = vrot.lane.b32.xlu0 %v11356_v21, %s7435_s2  ;;  %v4061_v27 = vsel %vm4028_vm11, %v3996_v47, %v3448_v49  ;;  %v11362_v55 = vpop.f32.mrb[44].mxu1  ;;  %2891 = vrot.lane.b32.xlu1 %v1939_v19, %s7439_s19 }
 0x4a5   :  { %v11364_v60 = vpop.f32.mrb[45].mxu1  ;;  %7061 = vmatprep.mubr.msk.f32.mxu1 %vm4102_vm10, %v4061_v27  ;;  %v4829_v51 = vmul.f32 %v11362_v55, %v11362_v55  ;;  %v4707_v0 = vsel %vm698_vm1, %v11362_v55, 0.0 }
 0x4a6   :  { %v3066_v32 = vpop.permute.xlu0 %3065  ;;  %v4705_v57 = vsel %vm698_vm1, %v11364_v60, 0.0  ;;  %v4828_v34 = vmul.f32 %v11364_v60, %v11364_v60 }
 0x4a7   :  { %v4706_v20 = vadd.f32 %v4705_v57, %v4704_v7  ;;  %v2876_v10 = vpop.permute.xlu1 %2875  ;;  %v4905_v54 = vsel %vm698_vm1, %v4829_v51, 0.0  ;;  %v11387_v7 = vld [vmem:[#allocation2 + $0x258] sm:$0xff] }
 0x4a8   :  { %2509 = vrot.lane.b32.xlu0 %v11356_v21, %s7436_s3  ;;  %v4903_v48 = vsel %vm698_vm1, %v4828_v34, 0.0  ;;  %2319 = vrot.lane.b32.xlu1 %v1939_v19, %s7437_s17  ;;  %v1942_v53 = vrot.slane %v11387_v7, 2 }
 0x4a9   :  { %v4904_v41 = vadd.f32 %v4903_v48, %v4902_v35  ;;  %v4708_v5 = vadd.f32 %v4707_v0, %v4706_v20  ;;  %v3673_v35 = vsel %vm3639_vm5, %v3608_v26, %v11239_v18  ;;  %v15404_v18 = vld [vmem:[#allocation73_spill] sm:$0xff]  ;;  %v15406_v26 = vld [vmem:[#allocation154_spill] sm:$0xff] }
 0x4aa   :  { %v11376_v17 = vpop.permute.xlu0 %2493  ;;  %v3738_v1 = vsel %vm3704_vm6, %v3673_v35, %v11263_v15 }
 0x4ab   :  { %v11385_v58 = vpop.permute.xlu1 %2303  ;;  %v4906_v46 = vadd.f32 %v4905_v54, %v4904_v41  ;;  %v3802_v56 = vsel %vm118_vm0, %v3738_v1, %v11297_v4  ;;  %v15405_v54 = vld [vmem:[#allocation113_spill] sm:$0xff] }
 0x4ac   :  { %3273 = vrot.lane.b32.xlu0 %v15402_v12, %s7440_s20  ;;  %3083 = vrot.lane.b32.xlu1 %v11387_v7, %s7435_s2  ;;  %v3867_v47 = vsel %vm3833_vm7, %v3802_v56, %v2874_v33 }
 0x4ad   :  { %v3932_v4 = vsel %vm3898_vm8, %v3867_v47, %v3066_v32 }
 0x4ae   :  { %v3258_v30 = vpop.permute.xlu0 %3257 }
 0x4af   :  { %v3068_v43 = vpop.permute.xlu1 %3067  ;;  %v3997_v34 = vsel %vm3963_vm9, %v3932_v4, %v3258_v30 }
 0x4b0   :  { %2701 = vrot.lane.b32.xlu0 %v15402_v12, %s7438_s18  ;;  %v11401_v19 = vpop.f32.mrb[46].mxu1  ;;  %2511 = vrot.lane.b32.xlu1 %v11387_v7, %s7436_s3 }
 0x4b1   :  { %v11405_v2 = vpop.f32.mrb[47].mxu1  ;;  %v4831_v15 = vmul.f32 %v11401_v19, %v11401_v19  ;;  %v4711_v20 = vsel %vm698_vm1, %v11401_v19, 0.0 }
 0x4b2   :  { %v11399_v31 = vpop.permute.xlu0 %2685  ;;  %v4709_v49 = vsel %vm698_vm1, %v11405_v2, 0.0  ;;  %v4830_v27 = vmul.f32 %v11405_v2, %v11405_v2 }
 0x4b3   :  { %v4710_v51 = vadd.f32 %v4709_v49, %v4708_v5  ;;  %v11419_v57 = vpop.permute.xlu1 %2495  ;;  %v4909_v32 = vsel %vm698_vm1, %v4831_v15, 0.0  ;;  %v15407_v49 = vld [vmem:[#allocation60_spill] sm:$0xff] }
 0x4b4   :  { %3465 = vrot.lane.b32.xlu0 %v15404_v18, %s7441_s21  ;;  %v4907_v0 = vsel %vm698_vm1, %v4830_v27, 0.0  ;;  %3275 = vrot.lane.b32.xlu1 %v15405_v54, %s7440_s20  ;;  %v15408_v27 = vrot.slane %v15407_v49, 2  ;;  %v15410_v49 = vld [vmem:[#allocation38_spill] sm:$0xff] }
 0x4b5   :  { %v4908_v41 = vadd.f32 %v4907_v0, %v4906_v46  ;;  %v4712_v12 = vadd.f32 %v4711_v20, %v4710_v51  ;;  %v3609_v46 = vsel %vm698_vm1, %v10875_v50, %v15406_v26 }
 0x4b6   :  { %v3450_v33 = vpop.permute.xlu0 %3449  ;;  %v3674_v35 = vsel %vm3639_vm5, %v3609_v46, %v11278_v9  ;;  %v1944_v4 = vsel %vm1826_vm4, %v1942_v53, %v15408_v27  ;;  %v3610_v27 = vsel %vm698_vm1, %v10915_v24, %v15410_v49 }
 0x4b7   :  { %v4062_v48 = vsel %vm4028_vm11, %v3997_v34, %v3450_v33  ;;  %v3260_v5 = vpop.permute.xlu1 %3259  ;;  %v4910_v30 = vadd.f32 %v4909_v32, %v4908_v41  ;;  %v3739_v1 = vsel %vm3704_vm6, %v3674_v35, %v11308_v29  ;;  %v15409_v35 = vld [vmem:[#allocation147_spill] sm:$0xff] }
 0x4b8   :  { %2893 = vrot.lane.b32.xlu0 %v15404_v18, %s7439_s19  ;;  %7062 = vmatmul.mubr.msk.f32.gmra.mrb[64].mxu1 %vm4102_vm10, %v4062_v48  ;;  %v3803_v47 = vsel %vm118_vm0, %v3739_v1, %v11343_v16 }
 0x4b9   :  { %2703 = vrot.lane.b32.xlu1 %v15405_v54, %s7438_s18  ;;  %v3868_v9 = vsel %vm3833_vm7, %v3803_v47, %v2876_v10  ;;  %v11487_v47 = vld [vmem:[#allocation2 + $0x270] sm:$0xff] }
 0x4ba   :  { %v2878_v40 = vpop.permute.xlu0 %2877  ;;  %v3933_v29 = vsel %vm3898_vm8, %v3868_v9, %v3068_v43 }
 0x4bb   :  { %v11444_v56 = vpop.permute.xlu1 %2687  ;;  %v3998_v33 = vsel %vm3963_vm9, %v3933_v29, %v3260_v5 }
 0x4bc   :  { %2321 = vrot.lane.b32.xlu0 %v15404_v18, %s7437_s17  ;;  %v11450_v50 = vpop.f32.mrb[48].mxu1  ;;  %v11460_v18 = vld [vmem:[#allocation2 + $0x260] sm:$0xff] }
 0x4bd   :  { %v11456_v51 = vpop.f32.mrb[49].mxu1  ;;  %3467 = vrot.lane.b32.xlu1 %v1944_v4, %s7441_s21  ;;  %v4833_v16 = vmul.f32 %v11450_v50, %v11450_v50  ;;  %v4715_v43 = vsel %vm698_vm1, %v11450_v50, 0.0 }
 0x4be   :  { %v11448_v15 = vpop.permute.xlu0 %2305  ;;  %v4713_v34 = vsel %vm698_vm1, %v11456_v51, 0.0  ;;  %v4832_v10 = vmul.f32 %v11456_v51, %v11456_v51 }
 0x4bf   :  { %v4714_v20 = vadd.f32 %v4713_v34, %v4712_v12  ;;  %v3452_v0 = vpop.permute.xlu1 %3451  ;;  %v4913_v26 = vsel %vm698_vm1, %v4833_v16, 0.0 }
 0x4c0   :  { %3085 = vrot.lane.b32.xlu0 %v11460_v18, %s7435_s2  ;;  %v4911_v41 = vsel %vm698_vm1, %v4832_v10, 0.0  ;;  %v4063_v54 = vsel %vm4028_vm11, %v3998_v33, %v3452_v0  ;;  %v15411_v10 = vld [vmem:[#allocation77_spill] sm:$0xff] }
 0x4c1   :  { %v4912_v32 = vadd.f32 %v4911_v41, %v4910_v30  ;;  %2895 = vrot.lane.b32.xlu1 %v1944_v4, %s7439_s19  ;;  %7064 = vmatprep.mubr.msk.f32.mxu1 %vm4102_vm10, %v4063_v54  ;;  %v4716_v53 = vadd.f32 %v4715_v43, %v4714_v20 }
 0x4c2   :  { %v3070_v48 = vpop.permute.xlu0 %3069 }
 0x4c3   :  { %v2880_v12 = vpop.permute.xlu1 %2879  ;;  %v4914_v5 = vadd.f32 %v4913_v26, %v4912_v32 }
 0x4c4   :  { %2513 = vrot.lane.b32.xlu0 %v11460_v18, %s7436_s3 }
 0x4c5   :  { %2323 = vrot.lane.b32.xlu1 %v1944_v4, %s7437_s17  ;;  %v3675_v4 = vsel %vm3639_vm5, %v3610_v27, %v11347_v59 }
 0x4c6   :  { %v11480_v46 = vpop.permute.xlu0 %2497  ;;  %v3740_v29 = vsel %vm3704_vm6, %v3675_v4, %v11376_v17 }
 0x4c7   :  { %v11485_v30 = vpop.permute.xlu1 %2307  ;;  %v3804_v34 = vsel %vm118_vm0, %v3740_v29, %v11399_v31  ;;  %v1947_v29 = vrot.slane %v11487_v47, 2 }
 0x4c8   :  { %3277 = vrot.lane.b32.xlu0 %v15409_v35, %s7440_s20  ;;  %v3869_v24 = vsel %vm3833_vm7, %v3804_v34, %v2878_v40  ;;  %v15415_v34 = vld [vmem:[#allocation157_spill] sm:$0xff] }
 0x4c9   :  { %3087 = vrot.lane.b32.xlu1 %v11487_v47, %s7435_s2  ;;  %v3934_v59 = vsel %vm3898_vm8, %v3869_v24, %v3070_v48  ;;  %v15414_v48 = vld [vmem:[#allocation116_spill] sm:$0xff]  ;;  %v3611_v24 = vsel %vm698_vm1, %v10934_v63, %v15415_v34  ;;  %v15416_v63 = vld [vmem:[#allocation65_spill] sm:$0xff] }
 0x4ca   :  { %v3262_v1 = vpop.permute.xlu0 %3261 }
 0x4cb   :  { %v3072_v9 = vpop.permute.xlu1 %3071  ;;  %v3999_v0 = vsel %vm3963_vm9, %v3934_v59, %v3262_v1 }
 0x4cc   :  { %2705 = vrot.lane.b32.xlu0 %v15409_v35, %s7438_s18 }
 0x4cd   :  { %2515 = vrot.lane.b32.xlu1 %v11487_v47, %s7436_s3 }
 0x4ce   :  { %v11500_v16 = vpop.permute.xlu0 %2689 }
 0x4cf   :  { %v11514_v17 = vpop.permute.xlu1 %2499 }
 0x4d0   :  { %3469 = vrot.lane.b32.xlu0 %v15411_v10, %s7441_s21  ;;  %v11509_v33 = vpop.f32.mrb[50].mxu1 }
 0x4d1   :  { %15412 = vst [vmem:[#allocation63_spill] sm:$0xff] %v11509_v33  ;;  %v11512_v20 = vpop.f32.mrb[51].mxu1  ;;  %v4835_v31 = vmul.f32 %v11509_v33, %v11509_v33  ;;  %3279 = vrot.lane.b32.xlu1 %v15414_v48, %s7440_s20  ;;  %v4719_v26 = vsel %vm698_vm1, %v11509_v33, 0.0 }
 0x4d2   :  { %15413 = vst [vmem:[#allocation93_spill] sm:$0xff] %v11512_v20  ;;  %v4717_v43 = vsel %vm698_vm1, %v11512_v20, 0.0  ;;  %v4834_v40 = vmul.f32 %v11512_v20, %v11512_v20  ;;  %v3454_v41 = vpop.permute.xlu0 %3453 }
 0x4d3   :  { %v4718_v54 = vadd.f32 %v4717_v43, %v4716_v53  ;;  %v4064_v32 = vsel %vm4028_vm11, %v3999_v0, %v3454_v41  ;;  %v3264_v49 = vpop.permute.xlu1 %3263  ;;  %v4917_v53 = vsel %vm698_vm1, %v4835_v31, 0.0  ;;  %v3676_v0 = vsel %vm3639_vm5, %v3611_v24, %v11385_v58 }
 0x4d4   :  { %v4915_v35 = vsel %vm698_vm1, %v4834_v40, 0.0  ;;  %2897 = vrot.lane.b32.xlu0 %v15411_v10, %s7439_s19  ;;  %7065 = vmatmul.mubr.msk.f32.gmra.mrb[66].mxu1 %vm4102_vm10, %v4064_v32  ;;  %v15417_v41 = vrot.slane %v15416_v63, 2 }
 0x4d5   :  { %v4916_v1 = vadd.f32 %v4915_v35, %v4914_v5  ;;  %v4720_v27 = vadd.f32 %v4719_v26, %v4718_v54  ;;  %2707 = vrot.lane.b32.xlu1 %v15414_v48, %s7438_s18  ;;  %v3741_v5 = vsel %vm3704_vm6, %v3676_v0, %v11419_v57  ;;  %v15418_v35 = vld [vmem:[#allocation149_spill] sm:$0xff] }
 0x4d6   :  { %v2882_v4 = vpop.permute.xlu0 %2881  ;;  %v3805_v43 = vsel %vm118_vm0, %v3741_v5, %v11444_v56  ;;  %v1949_v54 = vsel %vm1826_vm4, %v1947_v29, %v15417_v41  ;;  %v15419_v29 = vld [vmem:[#allocation31_spill] sm:$0xff] }
 0x4d7   :  { %v4918_v59 = vadd.f32 %v4917_v53, %v4916_v1  ;;  %v11545_v31 = vpop.permute.xlu1 %2691  ;;  %v3870_v32 = vsel %vm3833_vm7, %v3805_v43, %v2880_v12  ;;  %v11574_v53 = vld [vmem:[#allocation2 + $0x288] sm:$0xff]  ;;  %v3612_v34 = vsel %vm698_vm1, %v10974_v28, %v15419_v29 }
 0x4d8   :  { %2325 = vrot.lane.b32.xlu0 %v15411_v10, %s7437_s17  ;;  %v3935_v58 = vsel %vm3898_vm8, %v3870_v32, %v3072_v9  ;;  %v11557_v10 = vld [vmem:[#allocation2 + $0x278] sm:$0xff]  ;;  %v3677_v0 = vsel %vm3639_vm5, %v3612_v34, %v11448_v15 }
 0x4d9   :  { %3471 = vrot.lane.b32.xlu1 %v1949_v54, %s7441_s21  ;;  %v4000_v57 = vsel %vm3963_vm9, %v3935_v58, %v3264_v49  ;;  %v3742_v63 = vsel %vm3704_vm6, %v3677_v0, %v11480_v46 }
 0x4da   :  { %v11549_v40 = vpop.permute.xlu0 %2309  ;;  %v3806_v15 = vsel %vm118_vm0, %v3742_v63, %v11500_v16 }
 0x4db   :  { %v3456_v56 = vpop.permute.xlu1 %3455  ;;  %v3871_v46 = vsel %vm3833_vm7, %v3806_v15, %v2882_v4  ;;  %v1952_v15 = vrot.slane %v11574_v53, 2 }
 0x4dc   :  { %3089 = vrot.lane.b32.xlu0 %v11557_v10, %s7435_s2  ;;  %v4065_v26 = vsel %vm4028_vm11, %v4000_v57, %v3456_v56 }
 0x4dd   :  { %2899 = vrot.lane.b32.xlu1 %v1949_v54, %s7439_s19  ;;  %7067 = vmatprep.mubr.msk.f32.mxu1 %vm4102_vm10, %v4065_v26  ;;  %v15422_v26 = vld [vmem:[#allocation81_spill] sm:$0xff] }
 0x4de   :  { %v3074_v48 = vpop.permute.xlu0 %3073 }
 0x4df   :  { %v2884_v12 = vpop.permute.xlu1 %2883 }
 0x4e0   :  { %2517 = vrot.lane.b32.xlu0 %v11557_v10, %s7436_s3 }
 0x4e1   :  { %2327 = vrot.lane.b32.xlu1 %v1949_v54, %s7437_s17 }
 0x4e2   :  { %v11567_v9 = vpop.permute.xlu0 %2501 }
 0x4e3   :  { %v11572_v1 = vpop.permute.xlu1 %2311 }
 0x4e4   :  { %3281 = vrot.lane.b32.xlu0 %v15418_v35, %s7440_s20 }
 0x4e5   :  { %3091 = vrot.lane.b32.xlu1 %v11574_v53, %s7435_s2 }
 0x4e6   :  { %v3266_v49 = vpop.permute.xlu0 %3265 }
 0x4e7   :  { %v3076_v43 = vpop.permute.xlu1 %3075 }
 0x4e8   :  { %2709 = vrot.lane.b32.xlu0 %v15418_v35, %s7438_s18  ;;  %v11583_v24 = vpop.f32.mrb[52].mxu1  ;;  %v3936_v35 = vsel %vm3898_vm8, %v3871_v46, %v3074_v48 }
 0x4e9   :  { %15420 = vst [vmem:[#allocation134_spill] sm:$0xff] %v11583_v24  ;;  %v11587_v5 = vpop.f32.mrb[53].mxu1  ;;  %v4837_v41 = vmul.f32 %v11583_v24, %v11583_v24  ;;  %2519 = vrot.lane.b32.xlu1 %v11574_v53, %s7436_s3  ;;  %v4723_v57 = vsel %vm698_vm1, %v11583_v24, 0.0 }
 0x4ea   :  { %15421 = vst [vmem:[#allocation96_spill] sm:$0xff] %v11587_v5  ;;  %v4721_v28 = vsel %vm698_vm1, %v11587_v5, 0.0  ;;  %v4836_v54 = vmul.f32 %v11587_v5, %v11587_v5  ;;  %v11597_v32 = vpop.permute.xlu0 %2693 }
 0x4eb   :  { %v4722_v58 = vadd.f32 %v4721_v28, %v4720_v27  ;;  %v11610_v34 = vpop.permute.xlu1 %2503  ;;  %v4001_v27 = vsel %vm3963_vm9, %v3936_v35, %v3266_v49  ;;  %v4921_v0 = vsel %vm698_vm1, %v4837_v41, 0.0  ;;  %v15423_v28 = vld [vmem:[#allocation119_spill] sm:$0xff] }
 0x4ec   :  { %v4919_v56 = vsel %vm698_vm1, %v4836_v54, 0.0  ;;  %3473 = vrot.lane.b32.xlu0 %v15422_v26, %s7441_s21 }
 0x4ed   :  { %v4920_v29 = vadd.f32 %v4919_v56, %v4918_v59  ;;  %v4724_v16 = vadd.f32 %v4723_v57, %v4722_v58  ;;  %3283 = vrot.lane.b32.xlu1 %v15423_v28, %s7440_s20  ;;  %v15424_v58 = vld [vmem:[#allocation159_spill] sm:$0xff] }
 0x4ee   :  { %v3458_v63 = vpop.permute.xlu0 %3457  ;;  %v3613_v49 = vsel %vm698_vm1, %v11004_v22, %v15424_v58  ;;  %v15425_v22 = vld [vmem:[#allocation68_spill] sm:$0xff] }
 0x4ef   :  { %v4066_v4 = vsel %vm4028_vm11, %v4001_v27, %v3458_v63  ;;  %v4922_v54 = vadd.f32 %v4921_v0, %v4920_v29  ;;  %v3268_v59 = vpop.permute.xlu1 %3267  ;;  %v3678_v41 = vsel %vm3639_vm5, %v3613_v49, %v11485_v30  ;;  %v15426_v29 = vrot.slane %v15425_v22, 2 }
 0x4f0   :  { %2901 = vrot.lane.b32.xlu0 %v15422_v26, %s7439_s19  ;;  %7068 = vmatmul.mubr.msk.f32.gmra.mrb[68].mxu1 %vm4102_vm10, %v4066_v4  ;;  %v3743_v46 = vsel %vm3704_vm6, %v3678_v41, %v11514_v17 }
 0x4f1   :  { %2711 = vrot.lane.b32.xlu1 %v15423_v28, %s7438_s18  ;;  %v3807_v56 = vsel %vm118_vm0, %v3743_v46, %v11545_v31  ;;  %v1954_v27 = vsel %vm1826_vm4, %v1952_v15, %v15426_v29  ;;  %v15427_v28 = vld [vmem:[#allocation151_spill] sm:$0xff]  ;;  %v11671_v29 = vld [vmem:[#allocation2 + $0x2a0] sm:$0xff] }
 0x4f2   :  { %v2886_v48 = vpop.permute.xlu0 %2885  ;;  %v3872_v0 = vsel %vm3833_vm7, %v3807_v56, %v2884_v12 }
 0x4f3   :  { %v11632_v57 = vpop.permute.xlu1 %2695  ;;  %v3937_v30 = vsel %vm3898_vm8, %v3872_v0, %v3076_v43 }
 0x4f4   :  { %2329 = vrot.lane.b32.xlu0 %v15422_v26, %s7437_s17  ;;  %v11644_v26 = vld [vmem:[#allocation2 + $0x290] sm:$0xff]  ;;  %v4002_v17 = vsel %vm3963_vm9, %v3937_v30, %v3268_v59 }
 0x4f5   :  { %3475 = vrot.lane.b32.xlu1 %v1954_v27, %s7441_s21 }
 0x4f6   :  { %v11636_v35 = vpop.permute.xlu0 %2313 }
 0x4f7   :  { %v3460_v31 = vpop.permute.xlu1 %3459 }
 0x4f8   :  { %3093 = vrot.lane.b32.xlu0 %v11644_v26, %s7435_s2  ;;  %v4067_v4 = vsel %vm4028_vm11, %v4002_v17, %v3460_v31 }
 0x4f9   :  { %2903 = vrot.lane.b32.xlu1 %v1954_v27, %s7439_s19  ;;  %7070 = vmatprep.mubr.msk.f32.mxu1 %vm4102_vm10, %v4067_v4 }
 0x4fa   :  { %v3078_v63 = vpop.permute.xlu0 %3077 }
 0x4fb   :  { %v2888_v12 = vpop.permute.xlu1 %2887 }
 0x4fc   :  { %2521 = vrot.lane.b32.xlu0 %v11644_v26, %s7436_s3 }
 0x4fd   :  { %2331 = vrot.lane.b32.xlu1 %v1954_v27, %s7437_s17  ;;  %v15430_v27 = vld [vmem:[#allocation170_spill] sm:$0xff] }
 0x4fe   :  { %v11654_v43 = vpop.permute.xlu0 %2505  ;;  %v3614_v0 = vsel %vm698_vm1, %v11048_v11, %v15430_v27 }
 0x4ff   :  { %v11663_v58 = vpop.permute.xlu1 %2315 }
 0x500   :  { %3285 = vrot.lane.b32.xlu0 %v15427_v28, %s7440_s20  ;;  %v11659_v59 = vpop.f32.mrb[54].mxu1 }
 0x501   :  { %15428 = vst [vmem:[#allocation103_spill] sm:$0xff] %v11659_v59  ;;  %v11661_v15 = vpop.f32.mrb[55].mxu1  ;;  %v4839_v49 = vmul.f32 %v11659_v59, %v11659_v59  ;;  %3095 = vrot.lane.b32.xlu1 %v11671_v29, %s7435_s2  ;;  %v4727_v30 = vsel %vm698_vm1, %v11659_v59, 0.0 }
 0x502   :  { %15429 = vst [vmem:[#allocation132_spill] sm:$0xff] %v11661_v15  ;;  %v4725_v41 = vsel %vm698_vm1, %v11661_v15, 0.0  ;;  %v4838_v46 = vmul.f32 %v11661_v15, %v11661_v15  ;;  %v3270_v56 = vpop.permute.xlu0 %3269 }
 0x503   :  { %v4726_v22 = vadd.f32 %v4725_v41, %v4724_v16  ;;  %v3679_v16 = vsel %vm3639_vm5, %v3614_v0, %v11549_v40  ;;  %v3080_v4 = vpop.permute.xlu1 %3079  ;;  %v4925_v24 = vsel %vm698_vm1, %v4839_v49, 0.0  ;;  %v15431_v40 = vld [vmem:[#allocation83_spill] sm:$0xff] }
 0x504   :  { %v4923_v17 = vsel %vm698_vm1, %v4838_v46, 0.0  ;;  %2713 = vrot.lane.b32.xlu0 %v15427_v28, %s7438_s18  ;;  %v3744_v15 = vsel %vm3704_vm6, %v3679_v16, %v11567_v9 }
 0x505   :  { %v4924_v31 = vadd.f32 %v4923_v17, %v4922_v54  ;;  %v4728_v41 = vadd.f32 %v4727_v30, %v4726_v22  ;;  %v3808_v27 = vsel %vm118_vm0, %v3744_v15, %v11597_v32  ;;  %2523 = vrot.lane.b32.xlu1 %v11671_v29, %s7436_s3  ;;  %v15432_v32 = vld [vmem:[#allocation122_spill] sm:$0xff]  ;;  %v1957_v15 = vrot.slane %v11671_v29, 2 }
 0x506   :  { %v11688_v11 = vpop.permute.xlu0 %2697  ;;  %v3873_v46 = vsel %vm3833_vm7, %v3808_v27, %v2886_v48 }
 0x507   :  { %v4926_v28 = vadd.f32 %v4925_v24, %v4924_v31  ;;  %v3938_v54 = vsel %vm3898_vm8, %v3873_v46, %v3078_v63  ;;  %v11698_v22 = vpop.permute.xlu1 %2507  ;;  %v15433_v63 = vld [vmem:[#allocation27_spill] sm:$0xff] }
 0x508   :  { %3477 = vrot.lane.b32.xlu0 %v15431_v40, %s7441_s21  ;;  %v4003_v9 = vsel %vm3963_vm9, %v3938_v54, %v3270_v56  ;;  %v3615_v30 = vsel %vm698_vm1, %v11065_v45, %v15433_v63  ;;  %v15434_v45 = vld [vmem:[#allocation71_spill] sm:$0xff] }
 0x509   :  { %3287 = vrot.lane.b32.xlu1 %v15432_v32, %s7440_s20  ;;  %v3680_v56 = vsel %vm3639_vm5, %v3615_v30, %v11572_v1  ;;  %v15435_v46 = vrot.slane %v15434_v45, 2  ;;  %v15438_v45 = vld [vmem:[#allocation152_spill] sm:$0xff] }
 0x50a   :  { %v3462_v49 = vpop.permute.xlu0 %3461  ;;  %v3745_v17 = vsel %vm3704_vm6, %v3680_v56, %v11610_v34 }
 0x50b   :  { %v4068_v0 = vsel %vm4028_vm11, %v4003_v9, %v3462_v49  ;;  %v3272_v24 = vpop.permute.xlu1 %3271  ;;  %v3809_v31 = vsel %vm118_vm0, %v3745_v17, %v11632_v57  ;;  %v1959_v54 = vsel %vm1826_vm4, %v1957_v15, %v15435_v46 }
 0x50c   :  { %2905 = vrot.lane.b32.xlu0 %v15431_v40, %s7439_s19  ;;  %7071 = vmatmul.mubr.msk.f32.gmra.mrb[70].mxu1 %vm4102_vm10, %v4068_v0  ;;  %v3874_v9 = vsel %vm3833_vm7, %v3809_v31, %v2888_v12 }
 0x50d   :  { %2715 = vrot.lane.b32.xlu1 %v15432_v32, %s7438_s18  ;;  %v3939_v1 = vsel %vm3898_vm8, %v3874_v9, %v3080_v4 }
 0x50e   :  { %v2890_v48 = vpop.permute.xlu0 %2889  ;;  %v4004_v34 = vsel %vm3963_vm9, %v3939_v1, %v3272_v24 }
 0x50f   :  { %v11719_v16 = vpop.permute.xlu1 %2699 }
 0x510   :  { %2333 = vrot.lane.b32.xlu0 %v15431_v40, %s7437_s17  ;;  %v11731_v40 = vld [vmem:[#allocation2 + $0x2a8] sm:$0xff] }
 0x511   :  { %3479 = vrot.lane.b32.xlu1 %v1959_v54, %s7441_s21 }
 0x512   :  { %v11723_v27 = vpop.permute.xlu0 %2317 }
 0x513   :  { %v3464_v57 = vpop.permute.xlu1 %3463 }
 0x514   :  { %3097 = vrot.lane.b32.xlu0 %v11731_v40, %s7435_s2  ;;  %v4069_v0 = vsel %vm4028_vm11, %v4004_v34, %v3464_v57 }
 0x515   :  { %2907 = vrot.lane.b32.xlu1 %v1959_v54, %s7439_s19  ;;  %7073 = vmatprep.mubr.msk.f32.mxu1 %vm4102_vm10, %v4069_v0  ;;  %v11762_v0 = vld [vmem:[#allocation2 + $0x2b8] sm:$0xff] }
 0x516   :  { %v3082_v49 = vpop.permute.xlu0 %3081 }
 0x517   :  { %v2892_v32 = vpop.permute.xlu1 %2891 }
 0x518   :  { %2525 = vrot.lane.b32.xlu0 %v11731_v40, %s7436_s3  ;;  %v11741_v12 = vpop.f32.mrb[56].mxu1 }
 0x519   :  { %15436 = vst [vmem:[#allocation98_spill] sm:$0xff] %v11741_v12  ;;  %v11743_v4 = vpop.f32.mrb[57].mxu1  ;;  %v4841_v15 = vmul.f32 %v11741_v12, %v11741_v12  ;;  %2335 = vrot.lane.b32.xlu1 %v1959_v54, %s7437_s17  ;;  %v4731_v17 = vsel %vm698_vm1, %v11741_v12, 0.0  ;;  %v15439_v54 = vld [vmem:[#allocation171_spill] sm:$0xff] }
 0x51a   :  { %15437 = vst [vmem:[#allocation74_spill] sm:$0xff] %v11743_v4  ;;  %v4729_v24 = vsel %vm698_vm1, %v11743_v4, 0.0  ;;  %v4840_v63 = vmul.f32 %v11743_v4, %v11743_v4  ;;  %v11751_v30 = vpop.permute.xlu0 %2509 }
 0x51b   :  { %v4730_v56 = vadd.f32 %v4729_v24, %v4728_v41  ;;  %v11759_v9 = vpop.permute.xlu1 %2319  ;;  %v4929_v34 = vsel %vm698_vm1, %v4841_v15, 0.0  ;;  %v3616_v24 = vsel %vm698_vm1, %v11138_v39, %v15439_v54  ;;  %v15441_v54 = vld [vmem:[#allocation125_spill] sm:$0xff] }
 0x51c   :  { %v4927_v31 = vsel %vm698_vm1, %v4840_v63, 0.0  ;;  %3289 = vrot.lane.b32.xlu0 %v15438_v45, %s7440_s20 }
 0x51d   :  { %v4928_v46 = vadd.f32 %v4927_v31, %v4926_v28  ;;  %v4732_v1 = vadd.f32 %v4731_v17, %v4730_v56  ;;  %3099 = vrot.lane.b32.xlu1 %v11762_v0, %s7435_s2  ;;  %v3681_v28 = vsel %vm3639_vm5, %v3616_v24, %v11636_v35  ;;  %v15440_v31 = vld [vmem:[#allocation85_spill] sm:$0xff]  ;;  %v1962_v24 = vrot.slane %v11762_v0, 2 }
 0x51e   :  { %v3274_v57 = vpop.permute.xlu0 %3273  ;;  %v3746_v15 = vsel %vm3704_vm6, %v3681_v28, %v11654_v43 }
 0x51f   :  { %v4930_v41 = vadd.f32 %v4929_v34, %v4928_v46  ;;  %v3084_v63 = vpop.permute.xlu1 %3083  ;;  %v3810_v17 = vsel %vm118_vm0, %v3746_v15, %v11688_v11 }
 0x520   :  { %2717 = vrot.lane.b32.xlu0 %v15438_v45, %s7438_s18  ;;  %v3875_v39 = vsel %vm3833_vm7, %v3810_v17, %v2890_v48 }
 0x521   :  { %2527 = vrot.lane.b32.xlu1 %v11762_v0, %s7436_s3  ;;  %v3940_v45 = vsel %vm3898_vm8, %v3875_v39, %v3082_v49  ;;  %v15442_v49 = vld [vmem:[#allocation9_spill] sm:$0xff] }
 0x522   :  { %v11775_v56 = vpop.permute.xlu0 %2701  ;;  %v4005_v46 = vsel %vm3963_vm9, %v3940_v45, %v3274_v57  ;;  %v3617_v28 = vsel %vm698_vm1, %v11169_v13, %v15442_v49  ;;  %v15443_v13 = vld [vmem:[#allocation75_spill] sm:$0xff] }
 0x523   :  { %v11785_v35 = vpop.permute.xlu1 %2511  ;;  %v3682_v57 = vsel %vm3639_vm5, %v3617_v28, %v11663_v58 }
 0x524   :  { %3481 = vrot.lane.b32.xlu0 %v15440_v31, %s7441_s21  ;;  %v3747_v15 = vsel %vm3704_vm6, %v3682_v57, %v11698_v22 }
 0x525   :  { %3291 = vrot.lane.b32.xlu1 %v15441_v54, %s7440_s20  ;;  %v3811_v39 = vsel %vm118_vm0, %v3747_v15, %v11719_v16 }
 0x526   :  { %v3466_v43 = vpop.permute.xlu0 %3465 }
 0x527   :  { %v4070_v34 = vsel %vm4028_vm11, %v4005_v46, %v3466_v43  ;;  %v3276_v11 = vpop.permute.xlu1 %3275  ;;  %v15444_v46 = vrot.slane %v15443_v13, 2 }
 0x528   :  { %2909 = vrot.lane.b32.xlu0 %v15440_v31, %s7439_s19  ;;  %7074 = vmatmul.mubr.msk.f32.gmra.mrb[72].mxu1 %vm4102_vm10, %v4070_v34  ;;  %v3876_v34 = vsel %vm3833_vm7, %v3811_v39, %v2892_v32 }
 0x529   :  { %2719 = vrot.lane.b32.xlu1 %v15441_v54, %s7438_s18  ;;  %v1964_v43 = vsel %vm1826_vm4, %v1962_v24, %v15444_v46  ;;  %v3941_v58 = vsel %vm3898_vm8, %v3876_v34, %v3084_v63 }
 0x52a   :  { %v2894_v48 = vpop.permute.xlu0 %2893  ;;  %v4006_v22 = vsel %vm3963_vm9, %v3941_v58, %v3276_v11  ;;  %v15446_v11 = vld [vmem:[#allocation153_spill] sm:$0xff] }
 0x52b   :  { %v11806_v17 = vpop.permute.xlu1 %2703 }
 0x52c   :  { %2337 = vrot.lane.b32.xlu0 %v15440_v31, %s7437_s17  ;;  %v11818_v31 = vld [vmem:[#allocation2 + $0x2c0] sm:$0xff] }
 0x52d   :  { %3483 = vrot.lane.b32.xlu1 %v1964_v43, %s7441_s21 }
 0x52e   :  { %v11810_v45 = vpop.permute.xlu0 %2321 }
 0x52f   :  { %v3468_v16 = vpop.permute.xlu1 %3467 }
 0x530   :  { %3101 = vrot.lane.b32.xlu0 %v11818_v31, %s7435_s2  ;;  %v4071_v49 = vsel %vm4028_vm11, %v4006_v22, %v3468_v16  ;;  %v11848_v22 = vld [vmem:[#allocation2 + $0x2d0] sm:$0xff]  ;;  %v15448_v16 = vld [vmem:[#allocation173_spill] sm:$0xff] }
 0x531   :  { %2911 = vrot.lane.b32.xlu1 %v1964_v43, %s7439_s19  ;;  %7076 = vmatprep.mubr.msk.f32.mxu1 %vm4102_vm10, %v4071_v49  ;;  %v3618_v49 = vsel %vm698_vm1, %v11251_v52, %v15448_v16 }
 0x532   :  { %v3086_v54 = vpop.permute.xlu0 %3085 }
 0x533   :  { %v2896_v32 = vpop.permute.xlu1 %2895 }
 0x534   :  { %2529 = vrot.lane.b32.xlu0 %v11818_v31, %s7436_s3 }
 0x535   :  { %2339 = vrot.lane.b32.xlu1 %v1964_v43, %s7437_s17 }
 0x536   :  { %v11828_v63 = vpop.permute.xlu0 %2513 }
 0x537   :  { %v11830_v24 = vpop.f32.mrb[58].mxu1  ;;  %v11843_v13 = vpop.permute.xlu1 %2323 }
 0x538   :  { %15445 = vst [vmem:[#allocation100_spill] sm:$0xff] %v11830_v24  ;;  %3293 = vrot.lane.b32.xlu0 %v15446_v11, %s7440_s20  ;;  %v11835_v28 = vpop.f32.mrb[59].mxu1  ;;  %v4843_v57 = vmul.f32 %v11830_v24, %v11830_v24  ;;  %v4735_v43 = vsel %vm698_vm1, %v11830_v24, 0.0 }
 0x539   :  { %15447 = vst [vmem:[#allocation106_spill] sm:$0xff] %v11835_v28  ;;  %v4733_v15 = vsel %vm698_vm1, %v11835_v28, 0.0  ;;  %v4842_v39 = vmul.f32 %v11835_v28, %v11835_v28  ;;  %3103 = vrot.lane.b32.xlu1 %v11848_v22, %s7435_s2 }
 0x53a   :  { %v4734_v46 = vadd.f32 %v4733_v15, %v4732_v1  ;;  %v3278_v34 = vpop.permute.xlu0 %3277  ;;  %v3683_v15 = vsel %vm3639_vm5, %v3618_v49, %v11723_v27  ;;  %v4933_v24 = vsel %vm698_vm1, %v4843_v57, 0.0 }
 0x53b   :  { %v4931_v58 = vsel %vm698_vm1, %v4842_v39, 0.0  ;;  %v3088_v39 = vpop.permute.xlu1 %3087  ;;  %v3748_v28 = vsel %vm3704_vm6, %v3683_v15, %v11751_v30 }
 0x53c   :  { %v4932_v12 = vadd.f32 %v4931_v58, %v4930_v41  ;;  %2721 = vrot.lane.b32.xlu0 %v15446_v11, %s7438_s18  ;;  %v4736_v1 = vadd.f32 %v4735_v43, %v4734_v46  ;;  %v3812_v52 = vsel %vm118_vm0, %v3748_v28, %v11775_v56  ;;  %v15449_v11 = vld [vmem:[#allocation88_spill] sm:$0xff]  ;;  %v1967_v28 = vrot.slane %v11848_v22, 2 }
 0x53d   :  { %2531 = vrot.lane.b32.xlu1 %v11848_v22, %s7436_s3  ;;  %v3877_v41 = vsel %vm3833_vm7, %v3812_v52, %v2894_v48 }
 0x53e   :  { %v11862_v4 = vpop.permute.xlu0 %2705  ;;  %v4934_v59 = vadd.f32 %v4933_v24, %v4932_v12  ;;  %v3942_v27 = vsel %vm3898_vm8, %v3877_v41, %v3086_v54  ;;  %v15450_v24 = vld [vmem:[#allocation128_spill] sm:$0xff]  ;;  %v15451_v54 = vld [vmem:[#allocation25_spill] sm:$0xff] }
 0x53f   :  { %v11872_v57 = vpop.permute.xlu1 %2515  ;;  %v4007_v30 = vsel %vm3963_vm9, %v3942_v27, %v3278_v34  ;;  %v3619_v43 = vsel %vm698_vm1, %v11283_v44, %v15451_v54  ;;  %v15452_v44 = vld [vmem:[#allocation79_spill] sm:$0xff] }
 0x540   :  { %3485 = vrot.lane.b32.xlu0 %v15449_v11, %s7441_s21  ;;  %v3684_v34 = vsel %vm3639_vm5, %v3619_v43, %v11759_v9  ;;  %v15453_v52 = vrot.slane %v15452_v44, 2 }
 0x541   :  { %3295 = vrot.lane.b32.xlu1 %v15450_v24, %s7440_s20  ;;  %v3749_v58 = vsel %vm3704_vm6, %v3684_v34, %v11785_v35 }
 0x542   :  { %v3470_v46 = vpop.permute.xlu0 %3469  ;;  %v3813_v49 = vsel %vm118_vm0, %v3749_v58, %v11806_v17  ;;  %v1969_v41 = vsel %vm1826_vm4, %v1967_v28, %v15453_v52 }
 0x543   :  { %v4072_v12 = vsel %vm4028_vm11, %v4007_v30, %v3470_v46  ;;  %v3280_v56 = vpop.permute.xlu1 %3279  ;;  %v3878_v27 = vsel %vm3833_vm7, %v3813_v49, %v2896_v32 }
 0x544   :  { %2913 = vrot.lane.b32.xlu0 %v15449_v11, %s7439_s19  ;;  %7077 = vmatmul.mubr.msk.f32.gmra.mrb[74].mxu1 %vm4102_vm10, %v4072_v12  ;;  %v3943_v9 = vsel %vm3898_vm8, %v3878_v27, %v3088_v39  ;;  %v15457_v27 = vld [vmem:[#allocation175_spill] sm:$0xff] }
 0x545   :  { %2723 = vrot.lane.b32.xlu1 %v15450_v24, %s7438_s18  ;;  %v4008_v35 = vsel %vm3963_vm9, %v3943_v9, %v3280_v56  ;;  %v15455_v24 = vld [vmem:[#allocation155_spill] sm:$0xff]  ;;  %v3620_v9 = vsel %vm698_vm1, %v11356_v21, %v15457_v27 }
 0x546   :  { %v2898_v48 = vpop.permute.xlu0 %2897 }
 0x547   :  { %v11893_v16 = vpop.permute.xlu1 %2707 }
 0x548   :  { %2341 = vrot.lane.b32.xlu0 %v15449_v11, %s7437_s17  ;;  %v11905_v11 = vld [vmem:[#allocation2 + $0x2d8] sm:$0xff] }
 0x549   :  { %3487 = vrot.lane.b32.xlu1 %v1969_v41, %s7441_s21 }
 0x54a   :  { %v11897_v15 = vpop.permute.xlu0 %2325 }
 0x54b   :  { %v3472_v17 = vpop.permute.xlu1 %3471 }
 0x54c   :  { %3105 = vrot.lane.b32.xlu0 %v11905_v11, %s7435_s2  ;;  %v4073_v46 = vsel %vm4028_vm11, %v4008_v35, %v3472_v17  ;;  %v3685_v17 = vsel %vm3639_vm5, %v3620_v9, %v11810_v45 }
 0x54d   :  { %2915 = vrot.lane.b32.xlu1 %v1969_v41, %s7439_s19  ;;  %7079 = vmatprep.mubr.msk.f32.mxu1 %vm4102_vm10, %v4073_v46 }
 0x54e   :  { %v3090_v30 = vpop.permute.xlu0 %3089 }
 0x54f   :  { %v2900_v32 = vpop.permute.xlu1 %2899 }
 0x550   :  { %2533 = vrot.lane.b32.xlu0 %v11905_v11, %s7436_s3 }
 0x551   :  { %2343 = vrot.lane.b32.xlu1 %v1969_v41, %s7437_s17  ;;  %v11935_v41 = vld [vmem:[#allocation2 + $0x2e8] sm:$0xff] }
 0x552   :  { %v11915_v39 = vpop.permute.xlu0 %2517  ;;  %v1972_v27 = vrot.slane %v11935_v41, 2 }
 0x553   :  { %v11917_v12 = vpop.f32.mrb[60].mxu1  ;;  %v11930_v34 = vpop.permute.xlu1 %2327 }
 0x554   :  { %15454 = vst [vmem:[#allocation102_spill] sm:$0xff] %v11917_v12  ;;  %3297 = vrot.lane.b32.xlu0 %v15455_v24, %s7440_s20  ;;  %v11922_v56 = vpop.f32.mrb[61].mxu1  ;;  %v4845_v28 = vmul.f32 %v11917_v12, %v11917_v12  ;;  %v4739_v44 = vsel %vm698_vm1, %v11917_v12, 0.0 }
 0x555   :  { %15456 = vst [vmem:[#allocation105_spill] sm:$0xff] %v11922_v56  ;;  %v4737_v54 = vsel %vm698_vm1, %v11922_v56, 0.0  ;;  %v4844_v43 = vmul.f32 %v11922_v56, %v11922_v56  ;;  %3107 = vrot.lane.b32.xlu1 %v11935_v41, %s7435_s2 }
 0x556   :  { %v4738_v58 = vadd.f32 %v4737_v54, %v4736_v1  ;;  %v3282_v49 = vpop.permute.xlu0 %3281  ;;  %v4937_v46 = vsel %vm698_vm1, %v4845_v28, 0.0 }
 0x557   :  { %v4935_v52 = vsel %vm698_vm1, %v4844_v43, 0.0  ;;  %v3092_v54 = vpop.permute.xlu1 %3091  ;;  %v3750_v43 = vsel %vm3704_vm6, %v3685_v17, %v11828_v63 }
 0x558   :  { %v4936_v35 = vadd.f32 %v4935_v52, %v4934_v59  ;;  %2725 = vrot.lane.b32.xlu0 %v15455_v24, %s7438_s18  ;;  %v4740_v1 = vadd.f32 %v4739_v44, %v4738_v58  ;;  %v3814_v21 = vsel %vm118_vm0, %v3750_v43, %v11862_v4  ;;  %v15458_v24 = vld [vmem:[#allocation89_spill] sm:$0xff]  ;;  %v15459_v52 = vld [vmem:[#allocation130_spill] sm:$0xff] }
 0x559   :  { %2535 = vrot.lane.b32.xlu1 %v11935_v41, %s7436_s3  ;;  %v3879_v59 = vsel %vm3833_vm7, %v3814_v21, %v2898_v48 }
 0x55a   :  { %v11949_v12 = vpop.permute.xlu0 %2709  ;;  %v4938_v56 = vadd.f32 %v4937_v46, %v4936_v35  ;;  %v3944_v45 = vsel %vm3898_vm8, %v3879_v59, %v3090_v30  ;;  %v15460_v30 = vld [vmem:[#allocation163_spill] sm:$0xff] }
 0x55b   :  { %v11959_v28 = vpop.permute.xlu1 %2519  ;;  %v4009_v63 = vsel %vm3963_vm9, %v3944_v45, %v3282_v49  ;;  %v3621_v9 = vsel %vm698_vm1, %v11387_v7, %v15460_v30  ;;  %v15461_v7 = vld [vmem:[#allocation82_spill] sm:$0xff] }
 0x55c   :  { %3489 = vrot.lane.b32.xlu0 %v15458_v24, %s7441_s21  ;;  %v3686_v49 = vsel %vm3639_vm5, %v3621_v9, %v11843_v13  ;;  %v15462_v21 = vrot.slane %v15461_v7, 2 }
 0x55d   :  { %3299 = vrot.lane.b32.xlu1 %v15459_v52, %s7440_s20  ;;  %v3751_v35 = vsel %vm3704_vm6, %v3686_v49, %v11872_v57 }
 0x55e   :  { %v3474_v58 = vpop.permute.xlu0 %3473  ;;  %v3815_v46 = vsel %vm118_vm0, %v3751_v35, %v11893_v16  ;;  %v1974_v59 = vsel %vm1826_vm4, %v1972_v27, %v15462_v21 }
 0x55f   :  { %v4074_v44 = vsel %vm4028_vm11, %v4009_v63, %v3474_v58  ;;  %v3284_v4 = vpop.permute.xlu1 %3283  ;;  %v3880_v45 = vsel %vm3833_vm7, %v3815_v46, %v2900_v32 }
 0x560   :  { %2917 = vrot.lane.b32.xlu0 %v15458_v24, %s7439_s19  ;;  %7080 = vmatmul.mubr.msk.f32.gmra.mrb[76].mxu1 %vm4102_vm10, %v4074_v44  ;;  %v3945_v13 = vsel %vm3898_vm8, %v3880_v45, %v3092_v54  ;;  %v15466_v45 = vld [vmem:[#allocation29_spill] sm:$0xff] }
 0x561   :  { %2727 = vrot.lane.b32.xlu1 %v15459_v52, %s7438_s18  ;;  %v4010_v57 = vsel %vm3963_vm9, %v3945_v13, %v3284_v4  ;;  %v15464_v52 = vld [vmem:[#allocation158_spill] sm:$0xff]  ;;  %v3622_v13 = vsel %vm698_vm1, %v11460_v18, %v15466_v45 }
 0x562   :  { %v2902_v48 = vpop.permute.xlu0 %2901 }
 0x563   :  { %v11980_v17 = vpop.permute.xlu1 %2711 }
 0x564   :  { %2345 = vrot.lane.b32.xlu0 %v15458_v24, %s7437_s17  ;;  %v11992_v24 = vld [vmem:[#allocation2 + $0x2f0] sm:$0xff] }
 0x565   :  { %3491 = vrot.lane.b32.xlu1 %v1974_v59, %s7441_s21 }
 0x566   :  { %v11984_v43 = vpop.permute.xlu0 %2329 }
 0x567   :  { %v3476_v16 = vpop.permute.xlu1 %3475 }
 0x568   :  { %3109 = vrot.lane.b32.xlu0 %v11992_v24, %s7435_s2  ;;  %v4075_v58 = vsel %vm4028_vm11, %v4010_v57, %v3476_v16  ;;  %v3687_v16 = vsel %vm3639_vm5, %v3622_v13, %v11897_v15 }
 0x569   :  { %2919 = vrot.lane.b32.xlu1 %v1974_v59, %s7439_s19  ;;  %7082 = vmatprep.mubr.msk.f32.mxu1 %vm4102_vm10, %v4075_v58 }
 0x56a   :  { %v3094_v63 = vpop.permute.xlu0 %3093 }
 0x56b   :  { %v2904_v32 = vpop.permute.xlu1 %2903 }
 0x56c   :  { %2537 = vrot.lane.b32.xlu0 %v11992_v24, %s7436_s3 }
 0x56d   :  { %2347 = vrot.lane.b32.xlu1 %v1974_v59, %s7437_s17  ;;  %v12022_v59 = vld [vmem:[#allocation2 + $0x300] sm:$0xff] }
 0x56e   :  { %v12002_v54 = vpop.permute.xlu0 %2521  ;;  %v1977_v45 = vrot.slane %v12022_v59, 2 }
 0x56f   :  { %v12004_v44 = vpop.f32.mrb[62].mxu1  ;;  %v12017_v49 = vpop.permute.xlu1 %2331 }
 0x570   :  { %15463 = vst [vmem:[#allocation109_spill] sm:$0xff] %v12004_v44  ;;  %3301 = vrot.lane.b32.xlu0 %v15464_v52, %s7440_s20  ;;  %v12009_v4 = vpop.f32.mrb[63].mxu1  ;;  %v4847_v27 = vmul.f32 %v12004_v44, %v12004_v44  ;;  %v4743_v7 = vsel %vm698_vm1, %v12004_v44, 0.0 }
 0x571   :  { %15465 = vst [vmem:[#allocation15_spill] sm:$0xff] %v12009_v4  ;;  %v4741_v30 = vsel %vm698_vm1, %v12009_v4, 0.0  ;;  %v4846_v9 = vmul.f32 %v12009_v4, %v12009_v4  ;;  %3111 = vrot.lane.b32.xlu1 %v12022_v59, %s7435_s2 }
 0x572   :  { %v4742_v35 = vadd.f32 %v4741_v30, %v4740_v1  ;;  %v3286_v46 = vpop.permute.xlu0 %3285  ;;  %v4941_v58 = vsel %vm698_vm1, %v4847_v27, 0.0 }
 0x573   :  { %v4939_v21 = vsel %vm698_vm1, %v4846_v9, 0.0  ;;  %v3096_v30 = vpop.permute.xlu1 %3095  ;;  %v3752_v9 = vsel %vm3704_vm6, %v3687_v16, %v11915_v39 }
 0x574   :  { %v4940_v57 = vadd.f32 %v4939_v21, %v4938_v56  ;;  %2729 = vrot.lane.b32.xlu0 %v15464_v52, %s7438_s18  ;;  %v4744_v1 = vadd.f32 %v4743_v7, %v4742_v35  ;;  %v3816_v18 = vsel %vm118_vm0, %v3752_v9, %v11949_v12  ;;  %v15467_v52 = vld [vmem:[#allocation90_spill] sm:$0xff] }
 0x575   :  { %2539 = vrot.lane.b32.xlu1 %v12022_v59, %s7436_s3  ;;  %v3881_v56 = vsel %vm3833_vm7, %v3816_v18, %v2902_v48  ;;  %v15468_v21 = vld [vmem:[#allocation18_spill] sm:$0xff] }
 0x576   :  { %v12036_v44 = vpop.permute.xlu0 %2713  ;;  %v4942_v4 = vadd.f32 %v4941_v58, %v4940_v57  ;;  %v3946_v15 = vsel %vm3898_vm8, %v3881_v56, %v3094_v63  ;;  %v15469_v63 = vld [vmem:[#allocation164_spill] sm:$0xff] }
 0x577   :  { %v12046_v27 = vpop.permute.xlu1 %2523  ;;  %v4011_v39 = vsel %vm3963_vm9, %v3946_v15, %v3286_v46  ;;  %v3623_v13 = vsel %vm698_vm1, %v11487_v47, %v15469_v63  ;;  %v15470_v47 = vld [vmem:[#allocation84_spill] sm:$0xff] }
 0x578   :  { %3493 = vrot.lane.b32.xlu0 %v15467_v52, %s7441_s21  ;;  %v3688_v46 = vsel %vm3639_vm5, %v3623_v13, %v11930_v34  ;;  %v15471_v18 = vrot.slane %v15470_v47, 2 }
 0x579   :  { %3303 = vrot.lane.b32.xlu1 %v15468_v21, %s7440_s20  ;;  %v3753_v57 = vsel %vm3704_vm6, %v3688_v46, %v11959_v28 }
 0x57a   :  { %v3478_v35 = vpop.permute.xlu0 %3477  ;;  %v3817_v58 = vsel %vm118_vm0, %v3753_v57, %v11980_v17  ;;  %v1979_v56 = vsel %vm1826_vm4, %v1977_v45, %v15471_v18 }
 0x57b   :  { %v4076_v7 = vsel %vm4028_vm11, %v4011_v39, %v3478_v35  ;;  %v3288_v12 = vpop.permute.xlu1 %3287  ;;  %v3882_v15 = vsel %vm3833_vm7, %v3817_v58, %v2904_v32 }
 0x57c   :  { %2921 = vrot.lane.b32.xlu0 %v15467_v52, %s7439_s19  ;;  %7083 = vmatmul.mubr.msk.f32.gmra.mrb[78].mxu1 %vm4102_vm10, %v4076_v7  ;;  %v3947_v34 = vsel %vm3898_vm8, %v3882_v15, %v3096_v30  ;;  %v15475_v15 = vld [vmem:[#allocation178_spill] sm:$0xff] }
 0x57d   :  { %2731 = vrot.lane.b32.xlu1 %v15468_v21, %s7438_s18  ;;  %v4012_v28 = vsel %vm3963_vm9, %v3947_v34, %v3288_v12  ;;  %v15473_v21 = vld [vmem:[#allocation160_spill] sm:$0xff]  ;;  %v3624_v34 = vsel %vm698_vm1, %v11557_v10, %v15475_v15 }
 0x57e   :  { %v2906_v48 = vpop.permute.xlu0 %2905 }
 0x57f   :  { %v12067_v16 = vpop.permute.xlu1 %2715 }
 0x580   :  { %2349 = vrot.lane.b32.xlu0 %v15467_v52, %s7437_s17  ;;  %v12079_v52 = vld [vmem:[#allocation2 + $0x308] sm:$0xff] }
 0x581   :  { %3495 = vrot.lane.b32.xlu1 %v1979_v56, %s7441_s21 }
 0x582   :  { %v12071_v9 = vpop.permute.xlu0 %2333 }
 0x583   :  { %v3480_v17 = vpop.permute.xlu1 %3479 }
 0x584   :  { %3113 = vrot.lane.b32.xlu0 %v12079_v52, %s7435_s2  ;;  %v4077_v35 = vsel %vm4028_vm11, %v4012_v28, %v3480_v17  ;;  %v3689_v17 = vsel %vm3639_vm5, %v3624_v34, %v11984_v43 }
 0x585   :  { %2923 = vrot.lane.b32.xlu1 %v1979_v56, %s7439_s19  ;;  %7085 = vmatprep.mubr.msk.f32.mxu1 %vm4102_vm10, %v4077_v35 }
 0x586   :  { %v3098_v39 = vpop.permute.xlu0 %3097 }
 0x587   :  { %v2908_v32 = vpop.permute.xlu1 %2907 }
 0x588   :  { %2541 = vrot.lane.b32.xlu0 %v12079_v52, %s7436_s3 }
 0x589   :  { %2351 = vrot.lane.b32.xlu1 %v1979_v56, %s7437_s17  ;;  %v12109_v56 = vld [vmem:[#allocation2 + $0x318] sm:$0xff] }
 0x58a   :  { %v12089_v30 = vpop.permute.xlu0 %2525  ;;  %v1982_v15 = vrot.slane %v12109_v56, 2 }
 0x58b   :  { %v12091_v7 = vpop.f32.mrb[64].mxu1  ;;  %v12104_v46 = vpop.permute.xlu1 %2335 }
 0x58c   :  { %15472 = vst [vmem:[#allocation108_spill] sm:$0xff] %v12091_v7  ;;  %3305 = vrot.lane.b32.xlu0 %v15473_v21, %s7440_s20  ;;  %v12096_v12 = vpop.f32.mrb[65].mxu1  ;;  %v4849_v45 = vmul.f32 %v12091_v7, %v12091_v7  ;;  %v4747_v47 = vsel %vm698_vm1, %v12091_v7, 0.0 }
 0x58d   :  { %15474 = vst [vmem:[#allocation136_spill] sm:$0xff] %v12096_v12  ;;  %v4745_v63 = vsel %vm698_vm1, %v12096_v12, 0.0  ;;  %v4848_v13 = vmul.f32 %v12096_v12, %v12096_v12  ;;  %3115 = vrot.lane.b32.xlu1 %v12109_v56, %s7435_s2 }
 0x58e   :  { %v4746_v57 = vadd.f32 %v4745_v63, %v4744_v1  ;;  %v3290_v58 = vpop.permute.xlu0 %3289  ;;  %v4945_v35 = vsel %vm698_vm1, %v4849_v45, 0.0 }
 0x58f   :  { %v4943_v18 = vsel %vm698_vm1, %v4848_v13, 0.0  ;;  %v3100_v63 = vpop.permute.xlu1 %3099  ;;  %v3754_v13 = vsel %vm3704_vm6, %v3689_v17, %v12002_v54 }
 0x590   :  { %v4944_v28 = vadd.f32 %v4943_v18, %v4942_v4  ;;  %2733 = vrot.lane.b32.xlu0 %v15473_v21, %s7438_s18  ;;  %v4748_v1 = vadd.f32 %v4747_v47, %v4746_v57  ;;  %v3818_v10 = vsel %vm118_vm0, %v3754_v13, %v12036_v44  ;;  %v15476_v21 = vld [vmem:[#allocation92_spill] sm:$0xff] }
 0x591   :  { %2543 = vrot.lane.b32.xlu1 %v12109_v56, %s7436_s3  ;;  %v3883_v4 = vsel %vm3833_vm7, %v3818_v10, %v2906_v48  ;;  %v15477_v18 = vld [vmem:[#allocation20_spill] sm:$0xff] }
 0x592   :  { %v12123_v7 = vpop.permute.xlu0 %2717  ;;  %v4946_v12 = vadd.f32 %v4945_v35, %v4944_v28  ;;  %v3948_v43 = vsel %vm3898_vm8, %v3883_v4, %v3098_v39  ;;  %v15478_v39 = vld [vmem:[#allocation165_spill] sm:$0xff] }
 0x593   :  { %v12133_v45 = vpop.permute.xlu1 %2527  ;;  %v4013_v54 = vsel %vm3963_vm9, %v3948_v43, %v3290_v58  ;;  %v3625_v34 = vsel %vm698_vm1, %v11574_v53, %v15478_v39  ;;  %v15479_v53 = vld [vmem:[#allocation87_spill] sm:$0xff] }
 0x594   :  { %3497 = vrot.lane.b32.xlu0 %v15476_v21, %s7441_s21  ;;  %v3690_v58 = vsel %vm3639_vm5, %v3625_v34, %v12017_v49  ;;  %v15480_v10 = vrot.slane %v15479_v53, 2  ;;  %v1563_v53 = vld [vmem:[#allocation2 + $0x330] sm:$0xff] }
 0x595   :  { %3307 = vrot.lane.b32.xlu1 %v15477_v18, %s7440_s20  ;;  %v3755_v28 = vsel %vm3704_vm6, %v3690_v58, %v12046_v27  ;;  %v1998_v5 = vrot.slane %v1563_v53, 1 }
 0x596   :  { %v3482_v57 = vpop.permute.xlu0 %3481  ;;  %v3819_v35 = vsel %vm118_vm0, %v3755_v28, %v12067_v16  ;;  %v1984_v4 = vsel %vm1826_vm4, %v1982_v15, %v15480_v10 }
 0x597   :  { %v4078_v47 = vsel %vm4028_vm11, %v4013_v54, %v3482_v57  ;;  %v3292_v44 = vpop.permute.xlu1 %3291  ;;  %v3884_v43 = vsel %vm3833_vm7, %v3819_v35, %v2908_v32 }
 0x598   :  { %2925 = vrot.lane.b32.xlu0 %v15476_v21, %s7439_s19  ;;  %7086 = vmatmul.mubr.msk.f32.gmra.mrb[80].mxu1 %vm4102_vm10, %v4078_v47  ;;  %v3949_v49 = vsel %vm3898_vm8, %v3884_v43, %v3100_v63  ;;  %v15484_v43 = vld [vmem:[#allocation180_spill] sm:$0xff] }
 0x599   :  { %2735 = vrot.lane.b32.xlu1 %v15477_v18, %s7438_s18  ;;  %v4014_v27 = vsel %vm3963_vm9, %v3949_v49, %v3292_v44  ;;  %v15482_v18 = vld [vmem:[#allocation161_spill] sm:$0xff]  ;;  %v3626_v49 = vsel %vm698_vm1, %v11644_v26, %v15484_v43 }
 0x59a   :  { %v2910_v48 = vpop.permute.xlu0 %2909 }
 0x59b   :  { %v12154_v17 = vpop.permute.xlu1 %2719 }
 0x59c   :  { %2353 = vrot.lane.b32.xlu0 %v15476_v21, %s7437_s17  ;;  %v12166_v21 = vld [vmem:[#allocation2 + $0x320] sm:$0xff] }
 0x59d   :  { %3499 = vrot.lane.b32.xlu1 %v1984_v4, %s7441_s21 }
 0x59e   :  { %v12158_v13 = vpop.permute.xlu0 %2337 }
 0x59f   :  { %v3484_v16 = vpop.permute.xlu1 %3483 }
 0x5a0   :  { %3117 = vrot.lane.b32.xlu0 %v12166_v21, %s7435_s2  ;;  %v4079_v57 = vsel %vm4028_vm11, %v4014_v27, %v3484_v16 }
 0x5a1   :  { %2927 = vrot.lane.b32.xlu1 %v1984_v4, %s7439_s19  ;;  %7088 = vmatprep.mubr.msk.f32.mxu1 %vm4102_vm10, %v4079_v57 }
 0x5a2   :  { %v3102_v54 = vpop.permute.xlu0 %3101 }
 0x5a3   :  { %v2912_v32 = vpop.permute.xlu1 %2911 }
 0x5a4   :  { %2545 = vrot.lane.b32.xlu0 %v12166_v21, %s7436_s3 }
 0x5a5   :  { %2355 = vrot.lane.b32.xlu1 %v1984_v4, %s7437_s17 }
 0x5a6   :  { %v12176_v63 = vpop.permute.xlu0 %2529 }
 0x5a7   :  { %v12178_v47 = vpop.f32.mrb[66].mxu1  ;;  %v12191_v58 = vpop.permute.xlu1 %2339 }
 0x5a8   :  { %15481 = vst [vmem:[#allocation49_spill] sm:$0xff] %v12178_v47  ;;  %3309 = vrot.lane.b32.xlu0 %v15482_v18, %s7440_s20  ;;  %v12183_v44 = vpop.f32.mrb[67].mxu1  ;;  %v4851_v15 = vmul.f32 %v12178_v47, %v12178_v47  ;;  %v4751_v10 = vsel %vm698_vm1, %v12178_v47, 0.0  ;;  %v1564_v47 = vld [vmem:[#allocation2 + $0x338] sm:$0xff] }
 0x5a9   :  { %15483 = vst [vmem:[#allocation86_spill] sm:$0xff] %v12183_v44  ;;  %v4749_v39 = vsel %vm698_vm1, %v12183_v44, 0.0  ;;  %v4850_v34 = vmul.f32 %v12183_v44, %v12183_v44  ;;  %3119 = vrot.lane.b32.xlu1 %v1563_v53, %s7435_s2 }
 0x5aa   :  { %v4750_v28 = vadd.f32 %v4749_v39, %v4748_v1  ;;  %v3294_v35 = vpop.permute.xlu0 %3293  ;;  %v3691_v1 = vsel %vm3639_vm5, %v3626_v49, %v12071_v9  ;;  %v4949_v57 = vsel %vm698_vm1, %v4851_v15, 0.0  ;;  %v15485_v9 = vld [vmem:[#allocation94_spill] sm:$0xff]  ;;  %v1999_v15 = vrot.slane %v1564_v47, 1 }
 0x5ab   :  { %v4947_v4 = vsel %vm698_vm1, %v4850_v34, 0.0  ;;  %v3104_v39 = vpop.permute.xlu1 %3103  ;;  %v3756_v34 = vsel %vm3704_vm6, %v3691_v1, %v12089_v30 }
 0x5ac   :  { %v4948_v27 = vadd.f32 %v4947_v4, %v4946_v12  ;;  %2737 = vrot.lane.b32.xlu0 %v15482_v18, %s7438_s18  ;;  %v12202_v16 = vadd.f32 %v4751_v10, %v4750_v28  ;;  %v3820_v12 = vsel %vm118_vm0, %v3756_v34, %v12123_v7  ;;  %v2000_v43 = vsel %vm1665_vm3, %v1998_v5, %v1999_v15 }
 0x5ad   :  { %2547 = vrot.lane.b32.xlu1 %v1563_v53, %s7436_s3  ;;  %v3885_v18 = vsel %vm3833_vm7, %v3820_v12, %v2910_v48  ;;  %v2008_v48 = vrot.slane %v1563_v53, 2 }
 0x5ae   :  { %v12209_v44 = vpop.permute.xlu0 %2721  ;;  %v12211_v26 = vadd.f32 %v4949_v57, %v4948_v27  ;;  %v3950_v28 = vsel %vm3898_vm8, %v3885_v18, %v3102_v54  ;;  %v15486_v54 = vld [vmem:[#allocation23_spill] sm:$0xff] }
 0x5af   :  { %v12220_v10 = vpop.permute.xlu1 %2531  ;;  %v4015_v30 = vsel %vm3963_vm9, %v3950_v28, %v3294_v35  ;;  %v3627_v1 = vsel %vm698_vm1, %v11671_v29, %v15486_v54  ;;  %v2009_v35 = vrot.slane %v1564_v47, 2  ;;  %v1568_v54 = vld [vmem:[#allocation2 + $0x358] sm:$0x3] }
 0x5b0   :  { %3501 = vrot.lane.b32.xlu0 %v15485_v9, %s7441_s21  ;;  %v3692_v5 = vsel %vm3639_vm5, %v3627_v1, %v12104_v46  ;;  %v1565_v46 = vld [vmem:[#allocation2 + $0x340] sm:$0x3]  ;;  %v2037_v20 = vrot.slane %v1568_v54, 2 }
 0x5b1   :  { %3311 = vrot.lane.b32.xlu1 %v2000_v43, %s7440_s20  ;;  %v3757_v57 = vsel %vm3704_vm6, %v3692_v5, %v12133_v45  ;;  %v2010_v29 = vsel %vm1826_vm4, %v2008_v48, %v2009_v35 }
 0x5b2   :  { %v3486_v4 = vpop.permute.xlu0 %3485  ;;  %v3821_v53 = vsel %vm118_vm0, %v3757_v57, %v12154_v17  ;;  %v2011_v17 = vrot.slane %v1565_v46, 2 }
 0x5b3   :  { %v4080_v49 = vsel %vm4028_vm11, %v4015_v30, %v3486_v4  ;;  %v3296_v7 = vpop.permute.xlu1 %3295  ;;  %v3886_v18 = vsel %vm3833_vm7, %v3821_v53, %v2912_v32  ;;  %v1567_v53 = vld [vmem:[#allocation2 + $0x350] sm:$0xff] }
 0x5b4   :  { %2929 = vrot.lane.b32.xlu0 %v15485_v9, %s7439_s19  ;;  %7089 = vmatmul.mubr.msk.f32.gmra.mrb[82].mxu1 %vm4102_vm10, %v4080_v49 }
 0x5b5   :  { %2739 = vrot.lane.b32.xlu1 %v2000_v43, %s7438_s18  ;;  %v2001_v43 = vrot.slane %v1565_v46, 1 }
 0x5b6   :  { %v2914_v27 = vpop.permute.xlu0 %2913 }
 0x5b7   :  { %v12239_v34 = vpop.permute.xlu1 %2723 }
 0x5b8   :  { %2357 = vrot.lane.b32.xlu0 %v15485_v9, %s7437_s17  ;;  %v3951_v9 = vsel %vm3898_vm8, %v3886_v18, %v3104_v39  ;;  %v2012_v39 = vsel %vm1826_vm4, %v2009_v35, %v2011_v17  ;;  %v2027_v18 = vrot.slane %v1568_v54, 1  ;;  %v2025_v17 = vrot.slane %v1567_v53, 1 }
 0x5b9   :  { %3503 = vrot.lane.b32.xlu1 %v2010_v29, %s7441_s21  ;;  %v4016_v45 = vsel %vm3963_vm9, %v3951_v9, %v3296_v7  ;;  %v2002_v7 = vsel %vm1665_vm3, %v1999_v15, %v2001_v43 }
 0x5ba   :  { %v12243_v12 = vpop.permute.xlu0 %2341  ;;  %v2028_v33 = vsel %vm1665_vm3, %v2025_v17, %v2027_v18 }
 0x5bb   :  { %v3488_v28 = vpop.permute.xlu1 %3487 }
 0x5bc   :  { %3121 = vrot.lane.b32.xlu0 %v1564_v47, %s7435_s2  ;;  %v4081_v4 = vsel %vm4028_vm11, %v4016_v45, %v3488_v28  ;;  %v15489_v45 = vld [vmem:[#allocation182_spill] sm:$0xff] }
 0x5bd   :  { %2931 = vrot.lane.b32.xlu1 %v2010_v29, %s7439_s19  ;;  %7091 = vmatprep.mubr.msk.f32.mxu1 %vm4102_vm10, %v4081_v4  ;;  %v3628_v28 = vsel %vm698_vm1, %v11731_v40, %v15489_v45 }
 0x5be   :  { %v3106_v30 = vpop.permute.xlu0 %3105 }
 0x5bf   :  { %v2916_v32 = vpop.permute.xlu1 %2915 }
 0x5c0   :  { %2549 = vrot.lane.b32.xlu0 %v1564_v47, %s7436_s3 }
 0x5c1   :  { %2933 = vrot.lane.b32.xlu1 %v2012_v39, %s7439_s19 }
 0x5c2   :  { %v12255_v49 = vpop.permute.xlu0 %2533 }
 0x5c3   :  { %v12258_v48 = vpop.f32.mrb[68].mxu1  ;;  %v12271_v57 = vpop.permute.xlu1 %2343 }
 0x5c4   :  { %15487 = vst [vmem:[#allocation111_spill] sm:$0xff] %v12258_v48  ;;  %3313 = vrot.lane.b32.xlu0 %v2002_v7, %s7440_s20  ;;  %v12263_v1 = vpop.f32.mrb[69].mxu1  ;;  %v4853_v5 = vmul.f32 %v12258_v48, %v12258_v48  ;;  %v4755_v46 = vsel %vm698_vm1, %v12258_v48, 0.0 }
 0x5c5   :  { %15488 = vst [vmem:[#allocation112_spill] sm:$0xff] %v12263_v1  ;;  %v4753_v47 = vsel %vm698_vm1, %v12263_v1, 0.0  ;;  %v4852_v35 = vmul.f32 %v12263_v1, %v12263_v1  ;;  %3125 = vrot.lane.b32.xlu1 %v1567_v53, %s7435_s2 }
 0x5c6   :  { %v4754_v15 = vadd.f32 %v4753_v47, %v12202_v16  ;;  %v3298_v29 = vpop.permute.xlu0 %3297  ;;  %v3693_v16 = vsel %vm3639_vm5, %v3628_v28, %v12158_v13  ;;  %v4953_v47 = vsel %vm698_vm1, %v4853_v5, 0.0  ;;  %v2035_v13 = vrot.slane %v1567_v53, 2  ;;  %v1566_v5 = vld [vmem:[#allocation2 + $0x348] sm:$0xff] }
 0x5c7   :  { %v4951_v9 = vsel %vm698_vm1, %v4852_v35, 0.0  ;;  %v3108_v48 = vpop.permute.xlu1 %3107  ;;  %v3758_v35 = vsel %vm3704_vm6, %v3693_v16, %v12176_v63  ;;  %v2034_v53 = vrot.slane %v1566_v5, 2 }
 0x5c8   :  { %v4952_v4 = vadd.f32 %v4951_v9, %v12211_v26  ;;  %2741 = vrot.lane.b32.xlu0 %v2002_v7, %s7438_s18  ;;  %v4756_v43 = vadd.f32 %v4755_v46, %v4754_v15  ;;  %v3822_v26 = vsel %vm118_vm0, %v3758_v35, %v12209_v44  ;;  %v2038_v54 = vsel %vm1826_vm4, %v2035_v13, %v2037_v20 }
 0x5c9   :  { %3317 = vrot.lane.b32.xlu1 %v2028_v33, %s7440_s20  ;;  %v3887_v7 = vsel %vm3833_vm7, %v3822_v26, %v2914_v27  ;;  %v2024_v44 = vrot.slane %v1566_v5, 1 }
 0x5ca   :  { %v2726_v1 = vpop.permute.xlu0 %2725  ;;  %v4954_v40 = vadd.f32 %v4953_v47, %v4952_v4  ;;  %v3952_v15 = vsel %vm3898_vm8, %v3887_v7, %v3106_v30 }
 0x5cb   :  { %v12295_v46 = vpop.permute.xlu1 %2535  ;;  %v4017_v63 = vsel %vm3963_vm9, %v3952_v15, %v3298_v29  ;;  %v2026_v29 = vsel %vm1665_vm3, %v2024_v44, %v2025_v17 }
 0x5cc   :  { %3505 = vrot.lane.b32.xlu0 %v2012_v39, %s7441_s21  ;;  %v15490_v39 = vld [vmem:[#allocation166_spill] sm:$0xff] }
 0x5cd   :  { %3509 = vrot.lane.b32.xlu1 %v2038_v54, %s7441_s21  ;;  %v3629_v30 = vsel %vm698_vm1, %v11762_v0, %v15490_v39  ;;  %v2036_v0 = vsel %vm1826_vm4, %v2034_v53, %v2035_v13 }
 0x5ce   :  { %v3490_v18 = vpop.permute.xlu0 %3489  ;;  %v3694_v20 = vsel %vm3639_vm5, %v3629_v30, %v12191_v58 }
 0x5cf   :  { %v4082_v9 = vsel %vm4028_vm11, %v4017_v63, %v3490_v18  ;;  %v3300_v33 = vpop.permute.xlu1 %3299  ;;  %v3759_v45 = vsel %vm3704_vm6, %v3694_v20, %v12220_v10 }
 0x5d0   :  { %3123 = vrot.lane.b32.xlu0 %v1566_v5, %s7435_s2  ;;  %7092 = vmatmul.mubr.msk.f32.gmra.mrb[84].mxu1 %vm4102_vm10, %v4082_v9  ;;  %v3823_v4 = vsel %vm118_vm0, %v3759_v45, %v12239_v34 }
 0x5d1   :  { %v3888_v47 = vsel %vm3833_vm7, %v3823_v4, %v2916_v32 }
 0x5d2   :  { %v2918_v27 = vpop.permute.xlu0 %2917  ;;  %v3953_v17 = vsel %vm3898_vm8, %v3888_v47, %v3108_v48 }
 0x5d3   :  { %v2728_v28 = vpop.permute.xlu1 %2727  ;;  %v4018_v58 = vsel %vm3963_vm9, %v3953_v17, %v3300_v33  ;;  %v15491_v33 = vld [vmem:[#allocation184_spill] sm:$0xff] }
 0x5d4   :  { %3315 = vrot.lane.b32.xlu0 %v2026_v29, %s7440_s20  ;;  %v3630_v39 = vsel %vm698_vm1, %v11818_v31, %v15491_v33 }
 0x5d5   :  { %v3695_v29 = vsel %vm3639_vm5, %v3630_v39, %v12243_v12 }
 0x5d6   :  { %v12314_v16 = vpop.permute.xlu0 %2345 }
 0x5d7   :  { %v3492_v35 = vpop.permute.xlu1 %3491 }
 0x5d8   :  { %3507 = vrot.lane.b32.xlu0 %v2036_v0, %s7441_s21  ;;  %v4083_v10 = vsel %vm4028_vm11, %v4018_v58, %v3492_v35 }
 0x5d9   :  { %7094 = vmatprep.mubr.msk.f32.mxu1 %vm4102_vm10, %v4083_v10 }
 0x5da   :  { %v3110_v26 = vpop.permute.xlu0 %3109 }
 0x5db   :  { %v2920_v7 = vpop.permute.xlu1 %2919 }
 0x5de   :  { %v2538_v34 = vpop.permute.xlu0 %2537 }
 0x5df   :  { %v12323_v5 = vpop.f32.mrb[70].mxu1  ;;  %v12333_v63 = vpop.permute.xlu1 %2347 }
 0x5e0   :  { %v12325_v15 = vpop.f32.mrb[71].mxu1  ;;  %v4855_v32 = vmul.f32 %v12323_v5, %v12323_v5  ;;  %v4759_v9 = vsel %vm698_vm1, %v12323_v5, 0.0 }
 0x5e1   :  { %v4757_v48 = vsel %vm698_vm1, %v12325_v15, 0.0  ;;  %v4854_v13 = vmul.f32 %v12325_v15, %v12325_v15 }
 0x5e2   :  { %v4758_v18 = vadd.f32 %v4757_v48, %v4756_v43  ;;  %v3302_v54 = vpop.permute.xlu0 %3301  ;;  %v4957_v20 = vsel %vm698_vm1, %v4855_v32, 0.0  ;;  %v3760_v43 = vsel %vm3704_vm6, %v3695_v29, %v12255_v49  ;;  %v15492_v48 = vld [vmem:[#allocation167_spill] sm:$0xff] }
 0x5e3   :  { %v4955_v44 = vsel %vm698_vm1, %v4854_v13, 0.0  ;;  %v3112_v45 = vpop.permute.xlu1 %3111  ;;  %v3824_v0 = vsel %vm118_vm0, %v3760_v43, %v2726_v1  ;;  %v3631_v49 = vsel %vm698_vm1, %v11848_v22, %v15492_v48 }
 0x5e4   :  { %v4956_v30 = vadd.f32 %v4955_v44, %v4954_v40  ;;  %v4760_v53 = vadd.f32 %v4759_v9, %v4758_v18  ;;  %v3889_v17 = vsel %vm3833_vm7, %v3824_v0, %v2918_v27  ;;  %v3696_v1 = vsel %vm3639_vm5, %v3631_v49, %v12271_v57 }
 0x5e5   :  { %v3954_v58 = vsel %vm3898_vm8, %v3889_v17, %v3110_v26  ;;  %v3761_v27 = vsel %vm3704_vm6, %v3696_v1, %v12295_v46 }
 0x5e6   :  { %v2730_v4 = vpop.permute.xlu0 %2729  ;;  %v4958_v47 = vadd.f32 %v4957_v20, %v4956_v30  ;;  %v4019_v40 = vsel %vm3963_vm9, %v3954_v58, %v3302_v54  ;;  %v3825_v13 = vsel %vm118_vm0, %v3761_v27, %v2728_v28 }
 0x5e7   :  { %v2540_v31 = vpop.permute.xlu1 %2539  ;;  %v3890_v54 = vsel %vm3833_vm7, %v3825_v13, %v2920_v7 }
 0x5e8   :  { %v3955_v9 = vsel %vm3898_vm8, %v3890_v54, %v3112_v45 }
 0x5ea   :  { %v3494_v35 = vpop.permute.xlu0 %3493 }
 0x5eb   :  { %v4084_v12 = vsel %vm4028_vm11, %v4019_v40, %v3494_v35  ;;  %v3304_v10 = vpop.permute.xlu1 %3303  ;;  %v15493_v40 = vld [vmem:[#allocation24_spill] sm:$0xff] }
 0x5ec   :  { %7095 = vmatmul.mubr.msk.f32.gmra.mrb[86].mxu1 %vm4102_vm10, %v4084_v12  ;;  %v4020_v44 = vsel %vm3963_vm9, %v3955_v9, %v3304_v10  ;;  %v3632_v35 = vsel %vm698_vm1, %v11905_v11, %v15493_v40 }
 0x5ed   :  { %v3697_v48 = vsel %vm3639_vm5, %v3632_v35, %v12314_v16 }
 0x5ee   :  { %v2922_v32 = vpop.permute.xlu0 %2921 }
 0x5ef   :  { %v2732_v26 = vpop.permute.xlu1 %2731 }
 0x5f2   :  { %v12360_v18 = vpop.permute.xlu0 %2349 }
 0x5f3   :  { %v3496_v33 = vpop.permute.xlu1 %3495 }
 0x5f4   :  { %v4085_v22 = vsel %vm4028_vm11, %v4020_v44, %v3496_v33 }
 0x5f5   :  { %7097 = vmatprep.mubr.msk.f32.mxu1 %vm4102_vm10, %v4085_v22 }
 0x5f6   :  { %v3114_v39 = vpop.permute.xlu0 %3113 }
 0x5f7   :  { %v2924_v57 = vpop.permute.xlu1 %2923 }
 0x5fa   :  { %v2542_v30 = vpop.permute.xlu0 %2541 }
 0x5fb   :  { %v12367_v46 = vpop.f32.mrb[72].mxu1  ;;  %v12377_v45 = vpop.permute.xlu1 %2351 }
 0x5fc   :  { %v12369_v29 = vpop.f32.mrb[73].mxu1  ;;  %v4857_v28 = vmul.f32 %v12367_v46, %v12367_v46  ;;  %v4763_v17 = vsel %vm698_vm1, %v12367_v46, 0.0 }
 0x5fd   :  { %v4761_v7 = vsel %vm698_vm1, %v12369_v29, 0.0  ;;  %v4856_v20 = vmul.f32 %v12369_v29, %v12369_v29 }
 0x5fe   :  { %v4762_v43 = vadd.f32 %v4761_v7, %v4760_v53  ;;  %v3306_v0 = vpop.permute.xlu0 %3305  ;;  %v4961_v49 = vsel %vm698_vm1, %v4857_v28, 0.0  ;;  %v3762_v53 = vsel %vm3704_vm6, %v3697_v48, %v2538_v34  ;;  %v15494_v7 = vld [vmem:[#allocation168_spill] sm:$0xff] }
 0x5ff   :  { %v4959_v58 = vsel %vm698_vm1, %v4856_v20, 0.0  ;;  %v3116_v1 = vpop.permute.xlu1 %3115  ;;  %v3826_v54 = vsel %vm118_vm0, %v3762_v53, %v2730_v4  ;;  %v3633_v34 = vsel %vm698_vm1, %v11935_v41, %v15494_v7 }
 0x600   :  { %v4960_v12 = vadd.f32 %v4959_v58, %v4958_v47  ;;  %v4764_v10 = vadd.f32 %v4763_v17, %v4762_v43  ;;  %v3891_v9 = vsel %vm3833_vm7, %v3826_v54, %v2922_v32  ;;  %v3698_v4 = vsel %vm3639_vm5, %v3633_v34, %v12333_v63 }
 0x601   :  { %v3956_v44 = vsel %vm3898_vm8, %v3891_v9, %v3114_v39  ;;  %v3763_v32 = vsel %vm3704_vm6, %v3698_v4, %v2540_v31 }
 0x602   :  { %v2734_v27 = vpop.permute.xlu0 %2733  ;;  %v4962_v13 = vadd.f32 %v4961_v49, %v4960_v12  ;;  %v4021_v11 = vsel %vm3963_vm9, %v3956_v44, %v3306_v0  ;;  %v3827_v20 = vsel %vm118_vm0, %v3763_v32, %v2732_v26 }
 0x603   :  { %v2544_v33 = vpop.permute.xlu1 %2543  ;;  %v3892_v0 = vsel %vm3833_vm7, %v3827_v20, %v2924_v57 }
 0x604   :  { %v3957_v17 = vsel %vm3898_vm8, %v3892_v0, %v3116_v1 }
 0x606   :  { %v3498_v47 = vpop.permute.xlu0 %3497 }
 0x607   :  { %v4086_v22 = vsel %vm4028_vm11, %v4021_v11, %v3498_v47  ;;  %v3308_v16 = vpop.permute.xlu1 %3307  ;;  %v15495_v11 = vld [vmem:[#allocation187_spill] sm:$0xff] }
 0x608   :  { %7098 = vmatmul.mubr.msk.f32.gmra.mrb[88].mxu1 %vm4102_vm10, %v4086_v22  ;;  %v4022_v58 = vsel %vm3963_vm9, %v3957_v17, %v3308_v16  ;;  %v3634_v47 = vsel %vm698_vm1, %v11992_v24, %v15495_v11 }
 0x609   :  { %v3699_v7 = vsel %vm3639_vm5, %v3634_v47, %v12360_v18 }
 0x60a   :  { %v2926_v28 = vpop.permute.xlu0 %2925 }
 0x60b   :  { %v2736_v39 = vpop.permute.xlu1 %2735 }
 0x60e   :  { %v12402_v43 = vpop.permute.xlu0 %2353 }
 0x60f   :  { %v3500_v40 = vpop.permute.xlu1 %3499 }
 0x610   :  { %v4087_v41 = vsel %vm4028_vm11, %v4022_v58, %v3500_v40 }
 0x611   :  { %7100 = vmatprep.mubr.msk.f32.mxu1 %vm4102_vm10, %v4087_v41 }
 0x612   :  { %v3118_v35 = vpop.permute.xlu0 %3117 }
 0x613   :  { %v2928_v63 = vpop.permute.xlu1 %2927 }
 0x616   :  { %v2546_v12 = vpop.permute.xlu0 %2545 }
 0x617   :  { %v12409_v31 = vpop.f32.mrb[74].mxu1  ;;  %v12419_v1 = vpop.permute.xlu1 %2355 }
 0x618   :  { %v12411_v48 = vpop.f32.mrb[75].mxu1  ;;  %v4859_v26 = vmul.f32 %v12409_v31, %v12409_v31  ;;  %v4767_v9 = vsel %vm698_vm1, %v12409_v31, 0.0 }
 0x619   :  { %v4765_v57 = vsel %vm698_vm1, %v12411_v48, 0.0  ;;  %v4858_v49 = vmul.f32 %v12411_v48, %v12411_v48 }
 0x61a   :  { %v4766_v53 = vadd.f32 %v4765_v57, %v4764_v10  ;;  %v3310_v54 = vpop.permute.xlu0 %3309  ;;  %v4965_v34 = vsel %vm698_vm1, %v4859_v26, 0.0  ;;  %v3764_v10 = vsel %vm3704_vm6, %v3699_v7, %v2542_v30  ;;  %v15496_v57 = vld [vmem:[#allocation169_spill] sm:$0xff] }
 0x61b   :  { %v4963_v44 = vsel %vm698_vm1, %v4858_v49, 0.0  ;;  %v3120_v4 = vpop.permute.xlu1 %3119  ;;  %v3828_v0 = vsel %vm118_vm0, %v3764_v10, %v2734_v27  ;;  %v3635_v30 = vsel %vm698_vm1, %v12022_v59, %v15496_v57 }
 0x61c   :  { %v4964_v22 = vadd.f32 %v4963_v44, %v4962_v13  ;;  %v4768_v16 = vadd.f32 %v4767_v9, %v4766_v53  ;;  %v3893_v17 = vsel %vm3833_vm7, %v3828_v0, %v2926_v28  ;;  %v3700_v27 = vsel %vm3639_vm5, %v3635_v30, %v12377_v45 }
 0x61d   :  { %v3958_v58 = vsel %vm3898_vm8, %v3893_v17, %v3118_v35  ;;  %v3765_v28 = vsel %vm3704_vm6, %v3700_v27, %v2544_v33 }
 0x61e   :  { %v2738_v32 = vpop.permute.xlu0 %2737  ;;  %v4966_v20 = vadd.f32 %v4965_v34, %v4964_v22  ;;  %v4023_v24 = vsel %vm3963_vm9, %v3958_v58, %v3310_v54  ;;  %v3829_v49 = vsel %vm118_vm0, %v3765_v28, %v2736_v39 }
 0x61f   :  { %v2548_v40 = vpop.permute.xlu1 %2547  ;;  %v3894_v54 = vsel %vm3833_vm7, %v3829_v49, %v2928_v63 }
 0x620   :  { %v3959_v9 = vsel %vm3898_vm8, %v3894_v54, %v3120_v4 }
 0x622   :  { %v3502_v13 = vpop.permute.xlu0 %3501 }
 0x623   :  { %v4088_v41 = vsel %vm4028_vm11, %v4023_v24, %v3502_v13  ;;  %v3312_v18 = vpop.permute.xlu1 %3311  ;;  %v15497_v24 = vld [vmem:[#allocation188_spill] sm:$0xff] }
 0x624   :  { %7101 = vmatmul.mubr.msk.f32.gmra.mrb[90].mxu1 %vm4102_vm10, %v4088_v41  ;;  %v4024_v44 = vsel %vm3963_vm9, %v3959_v9, %v3312_v18  ;;  %v3636_v13 = vsel %vm698_vm1, %v12079_v52, %v15497_v24 }
 0x625   :  { %v3701_v57 = vsel %vm3639_vm5, %v3636_v13, %v12402_v43 }
 0x626   :  { %v2930_v26 = vpop.permute.xlu0 %2929 }
 0x627   :  { %v2740_v35 = vpop.permute.xlu1 %2739 }
 0x62a   :  { %v2358_v53 = vpop.permute.xlu0 %2357 }
 0x62b   :  { %v3504_v11 = vpop.permute.xlu1 %3503 }
 0x62c   :  { %v4089_v22 = vsel %vm4028_vm11, %v4024_v44, %v3504_v11 }
 0x62d   :  { %7103 = vmatprep.mubr.msk.f32.mxu1 %vm4102_vm10, %v4089_v22  ;;  %v15498_v22 = vld [vmem:[#allocation189_spill] sm:$0xff] }
 0x62e   :  { %v3122_v47 = vpop.permute.xlu0 %3121 }
 0x62f   :  { %v2932_v59 = vpop.permute.xlu1 %2931 }
 0x632   :  { %v2550_v45 = vpop.permute.xlu0 %2549 }
 0x633   :  { %v12449_v7 = vpop.f32.mrb[76].mxu1  ;;  %v2934_v58 = vpop.permute.xlu1 %2933 }
 0x634   :  { %v12451_v33 = vpop.f32.mrb[77].mxu1  ;;  %v4861_v39 = vmul.f32 %v12449_v7, %v12449_v7  ;;  %v4771_v0 = vsel %vm698_vm1, %v12449_v7, 0.0 }
 0x635   :  { %v4769_v63 = vsel %vm698_vm1, %v12451_v33, 0.0  ;;  %v4860_v34 = vmul.f32 %v12451_v33, %v12451_v33 }
 0x636   :  { %v4770_v4 = vadd.f32 %v4769_v63, %v4768_v16  ;;  %v3314_v10 = vpop.permute.xlu0 %3313  ;;  %v4969_v30 = vsel %vm698_vm1, %v4861_v39, 0.0  ;;  %v3766_v16 = vsel %vm3704_vm6, %v3701_v57, %v2546_v12  ;;  %v3638_v12 = vsel %vm698_vm1, %v12166_v21, %v15498_v22  ;;  %v15499_v63 = vld [vmem:[#allocation21_spill] sm:$0xff] }
 0x637   :  { %v4967_v17 = vsel %vm698_vm1, %v4860_v34, 0.0  ;;  %v3830_v49 = vsel %vm118_vm0, %v3766_v16, %v2738_v32  ;;  %v3126_v44 = vpop.permute.xlu1 %3125  ;;  %v3637_v32 = vsel %vm698_vm1, %v12109_v56, %v15499_v63 }
 0x638   :  { %v4968_v41 = vadd.f32 %v4967_v17, %v4966_v20  ;;  %v4772_v18 = vadd.f32 %v4771_v0, %v4770_v4  ;;  %v3895_v54 = vsel %vm3833_vm7, %v3830_v49, %v2930_v26  ;;  %v3703_v26 = vsel %vm3639_vm5, %v3638_v12, %v2358_v53 }
 0x639   :  { %v3960_v9 = vsel %vm3898_vm8, %v3895_v54, %v3122_v47  ;;  %v3702_v47 = vsel %vm3639_vm5, %v3637_v32, %v12419_v1  ;;  %v3768_v34 = vsel %vm3704_vm6, %v3703_v26, %v2550_v45 }
 0x63a   :  { %v2742_v27 = vpop.permute.xlu0 %2741  ;;  %v4970_v28 = vadd.f32 %v4969_v30, %v4968_v41  ;;  %v4025_v52 = vsel %vm3963_vm9, %v3960_v9, %v3314_v10  ;;  %v3767_v4 = vsel %vm3704_vm6, %v3702_v47, %v2548_v40 }
 0x63b   :  { %v3318_v39 = vpop.permute.xlu1 %3317  ;;  %v3832_v10 = vsel %vm118_vm0, %v3768_v34, %v2742_v27  ;;  %v3831_v17 = vsel %vm118_vm0, %v3767_v4, %v2740_v35  ;;  %v5225_v4 = vld [vmem:[%s14569_s7] sm:$0xff] }
 0x63c   :  { %v3896_v21 = vsel %vm3833_vm7, %v3831_v17, %v2932_v59  ;;  %v3897_v24 = vsel %vm3833_vm7, %v3832_v10, %v2934_v58  ;;  %7109 = vmatprep.subr.mxu0 %v5225_v4 }
 0x63d   :  { %v3962_v53 = vsel %vm3898_vm8, %v3897_v24, %v3126_v44  ;;  %7110 = vmatpush3.msra.mxu0 %v5225_v4 }
 0x63e   :  { %v3506_v20 = vpop.permute.xlu0 %3505  ;;  %v4027_v45 = vsel %vm3963_vm9, %v3962_v53, %v3318_v39 }
 0x63f   :  { %v4090_v11 = vsel %vm4028_vm11, %v4025_v52, %v3506_v20  ;;  %v3510_v13 = vpop.permute.xlu1 %3509 }
 0x640   :  { %7104 = vmatmul.mubr.msk.f32.gmra.mrb[92].mxu1 %vm4102_vm10, %v4090_v11  ;;  %v4092_v57 = vsel %vm4028_vm11, %v4027_v45, %v3510_v13 }
 0x642   :  { %v3124_v43 = vpop.permute.xlu0 %3123 }
 0x643   :  { %v3961_v56 = vsel %vm3898_vm8, %v3896_v21, %v3124_v43 }
 0x646   :  { %v3316_v0 = vpop.permute.xlu0 %3315 }
 0x647   :  { %v4026_v1 = vsel %vm3963_vm9, %v3961_v56, %v3316_v0 }
 0x64a   :  { %v3508_v41 = vpop.permute.xlu0 %3507 }
 0x64b   :  { %v4091_v40 = vsel %vm4028_vm11, %v4026_v1, %v3508_v41 }
 0x64c   :  { %7106 = vmatprep.mubr.msk.f32.mxu1 %vm4102_vm10, %v4091_v40 }
 0x64d   :  { %7107 = vmatmul.mubr.msk.f32.gmra.mrb[94].mxu1 %vm4102_vm10, %v4092_v57 }
 0x64f   :  { %v12498_v35 = vpop.f32.mrb[78].mxu1 }
 0x650   :  { %v12500_v59 = vpop.f32.mrb[79].mxu1  ;;  %v4863_v58 = vmul.f32 %v12498_v35, %v12498_v35  ;;  %v4775_v49 = vsel %vm698_vm1, %v12498_v35, 0.0 }
 0x651   :  { %v4773_v30 = vsel %vm698_vm1, %v12500_v59, 0.0  ;;  %v4862_v16 = vmul.f32 %v12500_v59, %v12500_v59 }
 0x652   :  { %v4774_v27 = vadd.f32 %v4773_v30, %v4772_v18  ;;  %v4973_v52 = vsel %vm698_vm1, %v4863_v58, 0.0 }
 0x653   :  { %v4971_v54 = vsel %vm698_vm1, %v4862_v16, 0.0 }
 0x654   :  { %v4972_v9 = vadd.f32 %v4971_v54, %v4970_v28  ;;  %v4776_v44 = vadd.f32 %v4775_v49, %v4774_v27 }
 0x656   :  { %v4974_v20 = vadd.f32 %v4973_v52, %v4972_v9 }
 0x66b   :  { %v12512_v11 = vpop.f32.mrb[80].mxu1 }
 0x66c   :  { %v12514_v43 = vpop.f32.mrb[81].mxu1  ;;  %v4865_v22 = vmul.f32 %v12512_v11, %v12512_v11  ;;  %v4779_v28 = vsel %vm698_vm1, %v12512_v11, 0.0 }
 0x66d   :  { %v4777_v18 = vsel %vm698_vm1, %v12514_v43, 0.0  ;;  %v4864_v12 = vmul.f32 %v12514_v43, %v12514_v43 }
 0x66e   :  { %v4778_v39 = vadd.f32 %v4777_v18, %v4776_v44  ;;  %v4977_v47 = vsel %vm698_vm1, %v4865_v22, 0.0 }
 0x66f   :  { %v4975_v63 = vsel %vm698_vm1, %v4864_v12, 0.0 }
 0x670   :  { %v4976_v32 = vadd.f32 %v4975_v63, %v4974_v20  ;;  %v4780_v26 = vadd.f32 %v4779_v28, %v4778_v39 }
 0x672   :  { %v4978_v34 = vadd.f32 %v4977_v47, %v4976_v32 }
 0x687   :  { %v12529_v10 = vpop.f32.mrb[82].mxu1 }
 0x688   :  { %v12531_v0 = vpop.f32.mrb[83].mxu1  ;;  %v4867_v17 = vmul.f32 %v12529_v10, %v12529_v10  ;;  %v4783_v13 = vsel %vm698_vm1, %v12529_v10, 0.0 }
 0x689   :  { %v4781_v21 = vsel %vm698_vm1, %v12531_v0, 0.0  ;;  %v4866_v24 = vmul.f32 %v12531_v0, %v12531_v0 }
 0x68a   :  { %v4782_v56 = vadd.f32 %v4781_v21, %v4780_v26  ;;  %v4981_v45 = vsel %vm698_vm1, %v4867_v17, 0.0 }
 0x68b   :  { %v4979_v53 = vsel %vm698_vm1, %v4866_v24, 0.0 }
 0x68c   :  { %v4980_v1 = vadd.f32 %v4979_v53, %v4978_v34  ;;  %v4784_v41 = vadd.f32 %v4783_v13, %v4782_v56 }
 0x68e   :  { %v4982_v40 = vadd.f32 %v4981_v45, %v4980_v1 }
 0x6a3   :  { %v12543_v57 = vpop.f32.mrb[84].mxu1 }
 0x6a4   :  { %v12545_v58 = vpop.f32.mrb[85].mxu1  ;;  %v4869_v30 = vmul.f32 %v12543_v57, %v12543_v57  ;;  %v4787_v54 = vsel %vm698_vm1, %v12543_v57, 0.0 }
 0x6a5   :  { %v4785_v16 = vsel %vm698_vm1, %v12545_v58, 0.0  ;;  %v4868_v27 = vmul.f32 %v12545_v58, %v12545_v58 }
 0x6a6   :  { %v4786_v49 = vadd.f32 %v4785_v16, %v4784_v41  ;;  %v4985_v20 = vsel %vm698_vm1, %v4869_v30, 0.0 }
 0x6a7   :  { %v4983_v9 = vsel %vm698_vm1, %v4868_v27, 0.0 }
 0x6a8   :  { %v4984_v44 = vadd.f32 %v4983_v9, %v4982_v40  ;;  %v4788_v52 = vadd.f32 %v4787_v54, %v4786_v49 }
 0x6aa   :  { %v4986_v22 = vadd.f32 %v4985_v20, %v4984_v44 }
 0x6bf   :  { %v12557_v18 = vpop.f32.mrb[86].mxu1 }
 0x6c0   :  { %v12559_v12 = vpop.f32.mrb[87].mxu1  ;;  %v4871_v39 = vmul.f32 %v12557_v18, %v12557_v18  ;;  %v4791_v26 = vsel %vm698_vm1, %v12557_v18, 0.0 }
 0x6c1   :  { %v4789_v28 = vsel %vm698_vm1, %v12559_v12, 0.0  ;;  %v4870_v63 = vmul.f32 %v12559_v12, %v12559_v12 }
 0x6c2   :  { %v4790_v32 = vadd.f32 %v4789_v28, %v4788_v52  ;;  %v4989_v17 = vsel %vm698_vm1, %v4871_v39, 0.0 }
 0x6c3   :  { %v4987_v47 = vsel %vm698_vm1, %v4870_v63, 0.0 }
 0x6c4   :  { %v4988_v34 = vadd.f32 %v4987_v47, %v4986_v22  ;;  %v4792_v4 = vadd.f32 %v4791_v26, %v4790_v32 }
 0x6c6   :  { %v4990_v21 = vadd.f32 %v4989_v17, %v4988_v34 }
 0x6db   :  { %v12571_v24 = vpop.f32.mrb[88].mxu1 }
 0x6dc   :  { %v12573_v56 = vpop.f32.mrb[89].mxu1  ;;  %v4873_v13 = vmul.f32 %v12571_v24, %v12571_v24  ;;  %v4795_v45 = vsel %vm698_vm1, %v12571_v24, 0.0 }
 0x6dd   :  { %v4793_v53 = vsel %vm698_vm1, %v12573_v56, 0.0  ;;  %v4872_v1 = vmul.f32 %v12573_v56, %v12573_v56 }
 0x6de   :  { %v4794_v41 = vadd.f32 %v4793_v53, %v4792_v4  ;;  %v4993_v27 = vsel %vm698_vm1, %v4873_v13, 0.0 }
 0x6df   :  { %v4991_v40 = vsel %vm698_vm1, %v4872_v1, 0.0 }
 0x6e0   :  { %v4992_v30 = vadd.f32 %v4991_v40, %v4990_v21  ;;  %v4796_v16 = vadd.f32 %v4795_v45, %v4794_v41 }
 0x6e2   :  { %v4994_v49 = vadd.f32 %v4993_v27, %v4992_v30 }
 0x6f7   :  { %v12585_v54 = vpop.f32.mrb[90].mxu1 }
 0x6f8   :  { %15500 = vst [vmem:[#allocation114_spill] sm:$0xff] %v12585_v54  ;;  %v12587_v9 = vpop.f32.mrb[91].mxu1  ;;  %v4875_v44 = vmul.f32 %v12585_v54, %v12585_v54  ;;  %v4799_v39 = vsel %vm698_vm1, %v12585_v54, 0.0 }
 0x6f9   :  { %v4797_v52 = vsel %vm698_vm1, %v12587_v9, 0.0  ;;  %v4874_v20 = vmul.f32 %v12587_v9, %v12587_v9 }
 0x6fa   :  { %v4798_v22 = vadd.f32 %v4797_v52, %v4796_v16  ;;  %v4997_v26 = vsel %vm698_vm1, %v4875_v44, 0.0 }
 0x6fb   :  { %v4995_v28 = vsel %vm698_vm1, %v4874_v20, 0.0 }
 0x6fc   :  { %v4996_v63 = vadd.f32 %v4995_v28, %v4994_v49  ;;  %v4800_v32 = vadd.f32 %v4799_v39, %v4798_v22 }
 0x6fe   :  { %v4998_v47 = vadd.f32 %v4997_v26, %v4996_v63 }
 0x713   :  { %v12599_v34 = vpop.f32.mrb[92].mxu1 }
 0x714   :  { %15501 = vst [vmem:[#allocation80_spill] sm:$0xff] %v12599_v34  ;;  %v12601_v4 = vpop.f32.mrb[93].mxu1  ;;  %v4877_v17 = vmul.f32 %v12599_v34, %v12599_v34  ;;  %v4803_v1 = vsel %vm698_vm1, %v12599_v34, 0.0 }
 0x715   :  { %15502 = vst [vmem:[#allocation162_spill] sm:$0xff] %v12601_v4  ;;  %v4801_v21 = vsel %vm698_vm1, %v12601_v4, 0.0  ;;  %v4876_v13 = vmul.f32 %v12601_v4, %v12601_v4 }
 0x716   :  { %v4802_v53 = vadd.f32 %v4801_v21, %v4800_v32  ;;  %v5001_v30 = vsel %vm698_vm1, %v4877_v17, 0.0 }
 0x717   :  { %v4999_v41 = vsel %vm698_vm1, %v4876_v13, 0.0 }
 0x718   :  { %v5000_v45 = vadd.f32 %v4999_v41, %v4998_v47  ;;  %v4804_v40 = vadd.f32 %v4803_v1, %v4802_v53 }
 0x71a   :  { %v5002_v16 = vadd.f32 %v5001_v30, %v5000_v45 }
 0x720   :  { %v12613_v27 = vpop.f32.mrb[94].mxu1 }
 0x721   :  { %15503 = vst [vmem:[#allocation66_spill] sm:$0xff] %v12613_v27  ;;  %v4671_v49 = vpop.f32.mrb[95].mxu1  ;;  %v4879_v44 = vmul.f32 %v12613_v27, %v12613_v27  ;;  %v4807_v39 = vsel %vm698_vm1, %v12613_v27, 0.0 }
 0x722   :  { %v4805_v52 = vsel %vm698_vm1, %v4671_v49, 0.0  ;;  %v4878_v20 = vmul.f32 %v4671_v49, %v4671_v49 }
 0x723   :  { %v4806_v22 = vadd.f32 %v4805_v52, %v4804_v40  ;;  %v5005_v26 = vsel %vm698_vm1, %v4879_v44, 0.0  ;;  %v4680_v44 = vld [vmem:[%s14567_s5] sm:$0x1] }
 0x724   :  { %v5003_v28 = vsel %vm698_vm1, %v4878_v20, 0.0 }
 0x725   :  { %v4808_v63 = vadd.f32 %v4807_v39, %v4806_v22  ;;  %v5004_v32 = vadd.f32 %v5003_v28, %v5002_v16 }
 0x727   :  { %v4809_v47 = vrot.slane %v4808_v63, 4  ;;  %v5006_v17 = vadd.f32 %v5005_v26, %v5004_v32  ;;  %v15504_v26 = vld [vmem:[#allocation33_spill] sm:$0xff] }
 0x729   :  { %v4810_v21 = vadd.f32 %v4809_v47, %v4808_v63  ;;  %v5007_v13 = vrot.slane %v5006_v17, 4  ;;  %v4681_v63 = vld [vmem:[%s14568_s6] sm:$0x1] }
 0x72b   :  { %v4811_v53 = vrot.slane %v4810_v21, 2  ;;  %v5008_v1 = vadd.f32 %v5007_v13, %v5006_v17 }
 0x72d   :  { %v4812_v41 = vadd.f32 %v4811_v53, %v4810_v21  ;;  %v5009_v45 = vrot.slane %v5008_v1, 2 }
 0x72f   :  { %v4813_v30 = vrot.slane %v4812_v41, 1  ;;  %v5010_v34 = vadd.f32 %v5009_v45, %v5008_v1  ;;  %v15506_v1 = vld [vmem:[#allocation93_spill] sm:$0xff]  ;;  %v15508_v45 = vld [vmem:[#allocation96_spill] sm:$0xff] }
 0x731   :  { %v4814_v40 = vadd.f32 %v4813_v30, %v4812_v41  ;;  %v5011_v52 = vrot.slane %v5010_v34, 1  ;;  %v15507_v41 = vld [vmem:[#allocation63_spill] sm:$0xff]  ;;  %v15509_v30 = vld [vmem:[#allocation134_spill] sm:$0xff] }
 0x733   :  { %v4815_v4 = vmul.f32 0.001953125, %v4814_v40  ;;  %v5012_v27 = vadd.f32 %v5011_v52, %v5010_v34  ;;  %v15510_v40 = vld [vmem:[#allocation132_spill] sm:$0xff]  ;;  %v15511_v52 = vld [vmem:[#allocation103_spill] sm:$0xff] }
 0x735   :  { %v5013_v54 = vmul.f32 0.001953125, %v5012_v27  ;;  %v5014_v20 = vmul.f32 %v4815_v4, %v4815_v4 }
 0x737   :  { %v5015_v22 = vsub.f32 %v5013_v54, %v5014_v20 }
 0x739   :  { %v5016_v16 = vadd.f32 1e-05, %v5015_v22  ;;  %v15512_v22 = vld [vmem:[#allocation74_spill] sm:$0xff] }
 0x73b   :  { %7248 = vrsqrt.f32 %v5016_v16 }
 0x745   :  { %v7249_v39 = vpop.eup %7248 }
 0x746   :  { %v5018_v28 = vmul.f32 %v7249_v39, %v4680_v44  ;;  %v15513_v44 = vld [vmem:[#allocation98_spill] sm:$0xff] }
 0x748   :  { %v5019_v32 = vmul.f32 %v5018_v28, %v4815_v4  ;;  %v12629_v47 = vrot.slane %v5018_v28, %v15504_v26  ;;  %v15514_v28 = vld [vmem:[#allocation106_spill] sm:$0xff] }
 0x74a   :  { %v5020_v34 = vsub.f32 %v4681_v63, %v5019_v32  ;;  %v5089_v27 = vmul.f32 %v12629_v47, %v4671_v49  ;;  %v12634_v54 = vmul.f32 %v12629_v47, %v11088_v3  ;;  %v12638_v17 = vmul.f32 %v11080_v36, %v12629_v47  ;;  %v15515_v32 = vld [vmem:[#allocation100_spill] sm:$0xff] }
 0x74b   :  { %v12642_v21 = vmul.f32 %v12629_v47, %v11134_v37  ;;  %v12646_v4 = vmul.f32 %v11128_v25, %v12629_v47  ;;  %v12650_v13 = vmul.f32 %v12629_v47, %v11167_v42  ;;  %v12654_v3 = vmul.f32 %v11165_v62, %v12629_v47 }
 0x74c   :  { %v12657_v49 = vrot.slane %v5020_v34, %v15504_v26  ;;  %v12661_v36 = vmul.f32 %v12629_v47, %v11219_v23  ;;  %v12665_v37 = vmul.f32 %v11213_v38, %v12629_v47  ;;  %v12669_v25 = vmul.f32 %v12629_v47, %v11267_v8  ;;  %v15524_v26 = vld [vmem:[#allocation86_spill] sm:$0xff] }
 0x74d   :  { %v12673_v42 = vmul.f32 %v11265_v6, %v12629_v47  ;;  %v12677_v62 = vmul.f32 %v12629_v47, %v11314_v61  ;;  %v12681_v23 = vmul.f32 %v11311_v14, %v12629_v47  ;;  %v12685_v38 = vmul.f32 %v12629_v47, %v11364_v60 }
 0x74e   :  { %v12688_v53 = vadd.f32 %v12657_v49, %v5089_v27  ;;  %v12692_v8 = vmul.f32 %v11362_v55, %v12629_v47  ;;  %v12696_v6 = vmul.f32 %v12629_v47, %v11405_v2  ;;  %v12700_v61 = vmul.f32 %v11401_v19, %v12629_v47  ;;  %v15516_v27 = vld [vmem:[#allocation105_spill] sm:$0xff] }
 0x74f   :  { %v12704_v14 = vmul.f32 %v12629_v47, %v11456_v51  ;;  %v12708_v60 = vmul.f32 %v11450_v50, %v12629_v47  ;;  %v12712_v55 = vmul.f32 %v12629_v47, %v15506_v1  ;;  %v12716_v2 = vmul.f32 %v15507_v41, %v12629_v47  ;;  %v15517_v41 = vld [vmem:[#allocation102_spill] sm:$0xff] }
 0x750   :  { %15505 = vst [vmem:[#allocation137_spill] sm:$0xff] %v12688_v53  ;;  %v12720_v19 = vmul.f32 %v12629_v47, %v15508_v45  ;;  %v12724_v51 = vmul.f32 %v15509_v30, %v12629_v47  ;;  %v12728_v50 = vmul.f32 %v12629_v47, %v15510_v40  ;;  %v12732_v20 = vmul.f32 %v15511_v52, %v12629_v47  ;;  %v15518_v30 = vld [vmem:[#allocation15_spill] sm:$0xff]  ;;  %v15520_v52 = vld [vmem:[#allocation109_spill] sm:$0xff] }
 0x751   :  { %v12736_v16 = vmul.f32 %v12629_v47, %v15512_v22  ;;  %v12740_v39 = vmul.f32 %v15513_v44, %v12629_v47  ;;  %v12744_v63 = vmul.f32 %v12629_v47, %v15514_v28  ;;  %v12748_v34 = vmul.f32 %v15515_v32, %v12629_v47  ;;  %v15522_v44 = vld [vmem:[#allocation136_spill] sm:$0xff]  ;;  %v15525_v53 = vld [vmem:[#allocation49_spill] sm:$0xff] }
 0x752   :  { %v12752_v1 = vmul.f32 %v12629_v47, %v15516_v27  ;;  %v12756_v45 = vmul.f32 %v15517_v41, %v12629_v47  ;;  %v12760_v40 = vmul.f32 %v12629_v47, %v15518_v30  ;;  %v12764_v22 = vmul.f32 %v15520_v52, %v12629_v47  ;;  %v15523_v32 = vld [vmem:[#allocation108_spill] sm:$0xff] }
 0x753   :  { %v12768_v28 = vmul.f32 %v12629_v47, %v15522_v44  ;;  %v12772_v27 = vmul.f32 %v15523_v32, %v12629_v47  ;;  %v12776_v41 = vmul.f32 %v12629_v47, %v15524_v26  ;;  %v12780_v30 = vmul.f32 %v15525_v53, %v12629_v47 }
 0x754   :  { %15519 = vst [vmem:[#allocation51_spill] sm:$0xff] %v12760_v40  ;;  %15521 = vst [vmem:[#allocation172_spill] sm:$0xff] %v12764_v22  ;;  %v15526_v40 = vld [vmem:[#allocation112_spill] sm:$0xff]  ;;  %v15527_v22 = vld [vmem:[#allocation111_spill] sm:$0xff]  ;;  %v12792_v32 = vmul.f32 %v12629_v47, %v12325_v15  ;;  %v12796_v26 = vmul.f32 %v12323_v5, %v12629_v47  ;;  %v12800_v53 = vmul.f32 %v12629_v47, %v12369_v29 }
 0x755   :  { %v12784_v52 = vmul.f32 %v12629_v47, %v15526_v40  ;;  %v12788_v44 = vmul.f32 %v15527_v22, %v12629_v47  ;;  %v12804_v40 = vmul.f32 %v12367_v46, %v12629_v47  ;;  %v12808_v22 = vmul.f32 %v12629_v47, %v12411_v48 }
 0x756   :  { %v12812_v15 = vmul.f32 %v12409_v31, %v12629_v47  ;;  %v12816_v5 = vmul.f32 %v12629_v47, %v12451_v33  ;;  %v12820_v29 = vmul.f32 %v12449_v7, %v12629_v47  ;;  %v12824_v46 = vmul.f32 %v12629_v47, %v12500_v59 }
 0x757   :  { %v12828_v48 = vmul.f32 %v12498_v35, %v12629_v47  ;;  %v12832_v31 = vmul.f32 %v12629_v47, %v12514_v43  ;;  %v12836_v33 = vmul.f32 %v12512_v11, %v12629_v47  ;;  %v12840_v7 = vmul.f32 %v12629_v47, %v12531_v0 }
 0x758   :  { %v12844_v59 = vmul.f32 %v12529_v10, %v12629_v47  ;;  %v12848_v35 = vmul.f32 %v12629_v47, %v12545_v58  ;;  %v12852_v43 = vmul.f32 %v12543_v57, %v12629_v47  ;;  %v12856_v11 = vmul.f32 %v12629_v47, %v12559_v12 }
 0x759   :  { %v12860_v0 = vmul.f32 %v12557_v18, %v12629_v47  ;;  %v12864_v10 = vmul.f32 %v12629_v47, %v12573_v56  ;;  %v12868_v58 = vmul.f32 %v12571_v24, %v12629_v47  ;;  %v12872_v57 = vmul.f32 %v12629_v47, %v12587_v9 }
 0x75a   :  { %15528 = vst [vmem:[#allocation117_spill] sm:$0xff] %v12852_v43  ;;  %15529 = vst [vmem:[#allocation115_spill] sm:$0xff] %v12856_v11  ;;  %v15532_v43 = vld [vmem:[#allocation114_spill] sm:$0xff]  ;;  %v12892_v9 = vadd.f32 %v12657_v49, %v12634_v54  ;;  %v12912_v54 = vadd.f32 %v12657_v49, %v12654_v3  ;;  %v12932_v3 = vadd.f32 %v12657_v49, %v12677_v62 }
 0x75b   :  { %15530 = vst [vmem:[#allocation135_spill] sm:$0xff] %v12860_v0  ;;  %15531 = vst [vmem:[#allocation120_spill] sm:$0xff] %v12864_v10  ;;  %v12876_v12 = vmul.f32 %v15532_v43, %v12629_v47  ;;  %v15533_v11 = vld [vmem:[#allocation162_spill] sm:$0xff]  ;;  %v15534_v0 = vld [vmem:[#allocation80_spill] sm:$0xff]  ;;  %v12896_v43 = vadd.f32 %v12657_v49, %v12638_v17  ;;  %v12916_v17 = vadd.f32 %v12657_v49, %v12661_v36 }
 0x75c   :  { %v12880_v18 = vmul.f32 %v12629_v47, %v15533_v11  ;;  %v12884_v56 = vmul.f32 %v15534_v0, %v12629_v47  ;;  %v15535_v10 = vld [vmem:[#allocation66_spill] sm:$0xff]  ;;  %v12900_v11 = vadd.f32 %v12657_v49, %v12642_v21  ;;  %v12904_v0 = vadd.f32 %v12657_v49, %v12646_v4 }
 0x75d   :  { %v12888_v24 = vmul.f32 %v15535_v10, %v12629_v47  ;;  %v12908_v47 = vadd.f32 %v12657_v49, %v12650_v13  ;;  %v12920_v21 = vadd.f32 %v12657_v49, %v12665_v37  ;;  %v12924_v4 = vadd.f32 %v12657_v49, %v12669_v25  ;;  %v15537_v10 = vld [vmem:[#allocation51_spill] sm:$0xff] }
 0x75e   :  { %v12928_v13 = vadd.f32 %v12657_v49, %v12673_v42  ;;  %v12936_v36 = vadd.f32 %v12657_v49, %v12681_v23  ;;  %v12940_v37 = vadd.f32 %v12657_v49, %v12685_v38  ;;  %v12944_v25 = vadd.f32 %v12657_v49, %v12692_v8 }
 0x75f   :  { %v12948_v42 = vadd.f32 %v12657_v49, %v12696_v6  ;;  %v12952_v62 = vadd.f32 %v12657_v49, %v12700_v61  ;;  %v12956_v23 = vadd.f32 %v12657_v49, %v12704_v14  ;;  %v12960_v38 = vadd.f32 %v12657_v49, %v12708_v60 }
 0x760   :  { %v12964_v8 = vadd.f32 %v12657_v49, %v12712_v55  ;;  %v12968_v6 = vadd.f32 %v12657_v49, %v12716_v2  ;;  %v12972_v61 = vadd.f32 %v12657_v49, %v12720_v19  ;;  %v12976_v14 = vadd.f32 %v12657_v49, %v12724_v51 }
 0x761   :  { %v12980_v60 = vadd.f32 %v12657_v49, %v12728_v50  ;;  %v12984_v55 = vadd.f32 %v12657_v49, %v12732_v20  ;;  %v12988_v2 = vadd.f32 %v12657_v49, %v12736_v16  ;;  %v12992_v19 = vadd.f32 %v12657_v49, %v12740_v39 }
 0x762   :  { %v12996_v51 = vadd.f32 %v12657_v49, %v12744_v63  ;;  %v13000_v50 = vadd.f32 %v12657_v49, %v12748_v34  ;;  %v13004_v20 = vadd.f32 %v12657_v49, %v12752_v1  ;;  %v13008_v16 = vadd.f32 %v12657_v49, %v12756_v45 }
 0x763   :  { %15536 = vst [vmem:[#allocation32_spill] sm:$0xff] %v12992_v19  ;;  %v13012_v39 = vadd.f32 %v12657_v49, %v15537_v10  ;;  %v15538_v19 = vld [vmem:[#allocation172_spill] sm:$0xff]  ;;  %v13020_v34 = vadd.f32 %v12657_v49, %v12768_v28  ;;  %v13024_v1 = vadd.f32 %v12657_v49, %v12772_v27  ;;  %v13028_v45 = vadd.f32 %v12657_v49, %v12776_v41 }
 0x764   :  { %v13016_v63 = vadd.f32 %v12657_v49, %v15538_v19  ;;  %v13032_v10 = vadd.f32 %v12657_v49, %v12780_v30  ;;  %v13036_v19 = vadd.f32 %v12657_v49, %v12784_v52  ;;  %v13040_v28 = vadd.f32 %v12657_v49, %v12788_v44 }
 0x765   :  { %v13044_v27 = vadd.f32 %v12657_v49, %v12792_v32  ;;  %v13048_v41 = vadd.f32 %v12657_v49, %v12796_v26  ;;  %v13052_v30 = vadd.f32 %v12657_v49, %v12800_v53  ;;  %v13056_v52 = vadd.f32 %v12657_v49, %v12804_v40 }
 0x766   :  { %v13060_v44 = vadd.f32 %v12657_v49, %v12808_v22  ;;  %v13064_v32 = vadd.f32 %v12657_v49, %v12812_v15  ;;  %v13068_v26 = vadd.f32 %v12657_v49, %v12816_v5  ;;  %v13072_v53 = vadd.f32 %v12657_v49, %v12820_v29 }
 0x767   :  { %v13076_v40 = vadd.f32 %v12657_v49, %v12824_v46  ;;  %v13080_v22 = vadd.f32 %v12657_v49, %v12828_v48  ;;  %v13084_v15 = vadd.f32 %v12657_v49, %v12832_v31  ;;  %v13088_v5 = vadd.f32 %v12657_v49, %v12836_v33 }
 0x768   :  { %v13092_v29 = vadd.f32 %v12657_v49, %v12840_v7  ;;  %v13096_v46 = vadd.f32 %v12657_v49, %v12844_v59  ;;  %v13100_v48 = vadd.f32 %v12657_v49, %v12848_v35  ;;  %v13120_v35 = vadd.f32 %v12657_v49, %v12868_v58 }
 0x769   :  { %15539 = vst [vmem:[#allocation69_spill] sm:$0xff] %v13080_v22  ;;  %15540 = vst [vmem:[#allocation39_spill] sm:$0xff] %v13084_v15  ;;  %v15543_v22 = vld [vmem:[#allocation117_spill] sm:$0xff]  ;;  %v15544_v15 = vld [vmem:[#allocation115_spill] sm:$0xff]  ;;  %v13140_v58 = vadd.f32 %v12657_v49, %v12888_v24  ;;  %v5168_v24 = vmax.f32 %v12920_v21, 0.0  ;;  %v5176_v21 = vmax.f32 %v12952_v62, 0.0 }
 0x76a   :  { %15541 = vst [vmem:[#allocation47_spill] sm:$0xff] %v13088_v5  ;;  %15542 = vst [vmem:[#allocation55_spill] sm:$0xff] %v13092_v29  ;;  %v13104_v31 = vadd.f32 %v12657_v49, %v15543_v22  ;;  %v13108_v33 = vadd.f32 %v12657_v49, %v15544_v15  ;;  %v15545_v5 = vld [vmem:[#allocation135_spill] sm:$0xff]  ;;  %v15546_v29 = vld [vmem:[#allocation120_spill] sm:$0xff]  ;;  %v13124_v22 = vadd.f32 %v12657_v49, %v12872_v57  ;;  %v5162_v57 = vmax.f32 %v12896_v43, 0.0 }
 0x76b   :  { %v13112_v7 = vadd.f32 %v12657_v49, %v15545_v5  ;;  %v13116_v59 = vadd.f32 %v12657_v49, %v15546_v29  ;;  %15547 = vst [vmem:[#allocation91_spill] sm:$0xff] %v13120_v35  ;;  %v13128_v15 = vadd.f32 %v12657_v49, %v12876_v12  ;;  %v13132_v5 = vadd.f32 %v12657_v49, %v12880_v18 }
 0x76c   :  { %15548 = vst [vmem:[#allocation174_spill] sm:$0xff] %v13124_v22  ;;  %v13136_v29 = vadd.f32 %v12657_v49, %v12884_v56  ;;  %v5161_v35 = vmax.f32 %v12892_v9, 0.0  ;;  %v5163_v22 = vmax.f32 %v12900_v11, 0.0  ;;  %v5164_v12 = vmax.f32 %v12904_v0, 0.0 }
 0x76d   :  { %v5165_v18 = vmax.f32 %v12908_v47, 0.0  ;;  %v5166_v49 = vmax.f32 %v12912_v54, 0.0  ;;  %v5167_v56 = vmax.f32 %v12916_v17, 0.0  ;;  %v5169_v9 = vmax.f32 %v12924_v4, 0.0 }
 0x76e   :  { %7111 = vmatprep.mubr.msk.f32.mxu0 %vm698_vm1, %v5161_v35  ;;  %v5170_v43 = vmax.f32 %v12928_v13, 0.0  ;;  %v5171_v11 = vmax.f32 %v12932_v3, 0.0  ;;  %v5172_v0 = vmax.f32 %v12936_v36, 0.0  ;;  %v5173_v47 = vmax.f32 %v12940_v37, 0.0 }
 0x76f   :  { %7112 = vmatmul.mubr.msk.f32.vlgmr.msra.gmra.mrb[32].mxu0 %vm698_vm1, %v5162_v57  ;;  %v5174_v54 = vmax.f32 %v12944_v25, 0.0  ;;  %v5175_v17 = vmax.f32 %v12948_v42, 0.0  ;;  %v5177_v4 = vmax.f32 %v12956_v23, 0.0  ;;  %v5178_v13 = vmax.f32 %v12960_v38, 0.0  ;;  %v15549_v38 = vld [vmem:[#allocation32_spill] sm:$0xff] }
 0x770   :  { %7114 = vmatprep.mubr.msk.f32.mxu0 %vm698_vm1, %v5163_v22  ;;  %v5179_v3 = vmax.f32 %v12964_v8, 0.0  ;;  %v5180_v36 = vmax.f32 %v12968_v6, 0.0  ;;  %v5181_v37 = vmax.f32 %v12972_v61, 0.0  ;;  %v5182_v25 = vmax.f32 %v12976_v14, 0.0  ;;  %v15551_v35 = vld [vmem:[#allocation39_spill] sm:$0xff] }
 0x771   :  { %v5183_v42 = vmax.f32 %v12980_v60, 0.0  ;;  %v5184_v62 = vmax.f32 %v12984_v55, 0.0  ;;  %v5185_v23 = vmax.f32 %v12988_v2, 0.0  ;;  %v5186_v8 = vmax.f32 %v15549_v38, 0.0  ;;  %v15553_v57 = vld [vmem:[#allocation55_spill] sm:$0xff] }
 0x772   :  { %v5187_v6 = vmax.f32 %v12996_v51, 0.0  ;;  %v5188_v61 = vmax.f32 %v13000_v50, 0.0  ;;  %v5189_v14 = vmax.f32 %v13004_v20, 0.0  ;;  %v5190_v60 = vmax.f32 %v13008_v16, 0.0 }
 0x773   :  { %7115 = vmatmul.mubr.msk.f32.gmra.mrb[34].mxu0 %vm698_vm1, %v5164_v12  ;;  %v5191_v55 = vmax.f32 %v13012_v39, 0.0  ;;  %v5192_v2 = vmax.f32 %v13016_v63, 0.0  ;;  %v5193_v51 = vmax.f32 %v13020_v34, 0.0  ;;  %v5194_v50 = vmax.f32 %v13024_v1, 0.0 }
 0x774   :  { %7117 = vmatprep.mubr.msk.f32.mxu0 %vm698_vm1, %v5165_v18  ;;  %v5195_v20 = vmax.f32 %v13028_v45, 0.0  ;;  %v5196_v16 = vmax.f32 %v13032_v10, 0.0  ;;  %v5197_v39 = vmax.f32 %v13036_v19, 0.0  ;;  %v5198_v63 = vmax.f32 %v13040_v28, 0.0 }
 0x775   :  { %v5199_v34 = vmax.f32 %v13044_v27, 0.0  ;;  %v5200_v1 = vmax.f32 %v13048_v41, 0.0  ;;  %v5201_v45 = vmax.f32 %v13052_v30, 0.0  ;;  %v5202_v10 = vmax.f32 %v13056_v52, 0.0  ;;  %v15550_v52 = vld [vmem:[#allocation69_spill] sm:$0xff] }
 0x776   :  { %v5203_v19 = vmax.f32 %v13060_v44, 0.0  ;;  %v5204_v28 = vmax.f32 %v13064_v32, 0.0  ;;  %v5205_v27 = vmax.f32 %v13068_v26, 0.0  ;;  %v5206_v41 = vmax.f32 %v13072_v53, 0.0  ;;  %v15552_v32 = vld [vmem:[#allocation47_spill] sm:$0xff] }
 0x777   :  { %7118 = vmatmul.mubr.msk.f32.gmra.mrb[36].mxu0 %vm698_vm1, %v5166_v49  ;;  %v5207_v30 = vmax.f32 %v13076_v40, 0.0  ;;  %v5208_v44 = vmax.f32 %v15550_v52, 0.0  ;;  %v5209_v22 = vmax.f32 %v15551_v35, 0.0  ;;  %v5210_v26 = vmax.f32 %v15552_v32, 0.0 }
 0x778   :  { %7120 = vmatprep.mubr.msk.f32.mxu0 %vm698_vm1, %v5167_v56  ;;  %v5211_v12 = vmax.f32 %v15553_v57, 0.0  ;;  %v5212_v53 = vmax.f32 %v13096_v46, 0.0  ;;  %v5213_v40 = vmax.f32 %v13100_v48, 0.0  ;;  %v5214_v18 = vmax.f32 %v13104_v31, 0.0  ;;  %v15554_v46 = vld [vmem:[#allocation91_spill] sm:$0xff] }
 0x779   :  { %v5215_v49 = vmax.f32 %v13108_v33, 0.0  ;;  %v5216_v56 = vmax.f32 %v13112_v7, 0.0  ;;  %v5218_v48 = vmax.f32 %v15554_v46, 0.0  ;;  %v5220_v31 = vmax.f32 %v13128_v15, 0.0 }
 0x77a   :  { %v5221_v33 = vmax.f32 %v13132_v5, 0.0  ;;  %v5222_v7 = vmax.f32 %v13136_v29, 0.0 }
 0x77b   :  { %7121 = vmatmul.mubr.msk.f32.gmra.mrb[38].mxu0 %vm698_vm1, %v5168_v24  ;;  %v5217_v24 = vmax.f32 %v13116_v59, 0.0  ;;  %v15556_v59 = vld [vmem:[#allocation137_spill] sm:$0xff] }
 0x77c   :  { %7123 = vmatprep.mubr.msk.f32.mxu0 %vm698_vm1, %v5169_v9  ;;  %v15555_v9 = vld [vmem:[#allocation174_spill] sm:$0xff] }
 0x77f   :  { %7124 = vmatmul.mubr.msk.f32.gmra.mrb[40].mxu0 %vm698_vm1, %v5170_v43  ;;  %v5219_v43 = vmax.f32 %v15555_v9, 0.0 }
 0x780   :  { %7126 = vmatprep.mubr.msk.f32.mxu0 %vm698_vm1, %v5171_v11  ;;  %v5223_v11 = vmax.f32 %v15556_v59, 0.0 }
 0x783   :  { %7127 = vmatmul.mubr.msk.f32.gmra.mrb[42].mxu0 %vm698_vm1, %v5172_v0  ;;  %v5224_v0 = vmax.f32 %v13140_v58, 0.0 }
 0x784   :  { %7129 = vmatprep.mubr.msk.f32.mxu0 %vm698_vm1, %v5173_v47 }
 0x787   :  { %7130 = vmatmul.mubr.msk.f32.gmra.mrb[44].mxu0 %vm698_vm1, %v5174_v54 }
 0x788   :  { %7132 = vmatprep.mubr.msk.f32.mxu0 %vm698_vm1, %v5175_v17 }
 0x78b   :  { %7133 = vmatmul.mubr.msk.f32.gmra.mrb[46].mxu0 %vm698_vm1, %v5176_v21 }
 0x78c   :  { %7135 = vmatprep.mubr.msk.f32.mxu0 %vm698_vm1, %v5177_v4 }
 0x78f   :  { %7136 = vmatmul.mubr.msk.f32.gmra.mrb[48].mxu0 %vm698_vm1, %v5178_v13 }
 0x790   :  { %7138 = vmatprep.mubr.msk.f32.mxu0 %vm698_vm1, %v5179_v3 }
 0x793   :  { %7139 = vmatmul.mubr.msk.f32.gmra.mrb[50].mxu0 %vm698_vm1, %v5180_v36 }
 0x794   :  { %7141 = vmatprep.mubr.msk.f32.mxu0 %vm698_vm1, %v5181_v37 }
 0x797   :  { %7142 = vmatmul.mubr.msk.f32.gmra.mrb[52].mxu0 %vm698_vm1, %v5182_v25 }
 0x798   :  { %7144 = vmatprep.mubr.msk.f32.mxu0 %vm698_vm1, %v5183_v42 }
 0x79b   :  { %7145 = vmatmul.mubr.msk.f32.gmra.mrb[54].mxu0 %vm698_vm1, %v5184_v62 }
 0x79c   :  { %7147 = vmatprep.mubr.msk.f32.mxu0 %vm698_vm1, %v5185_v23 }
 0x79f   :  { %7148 = vmatmul.mubr.msk.f32.gmra.mrb[56].mxu0 %vm698_vm1, %v5186_v8 }
 0x7a0   :  { %7150 = vmatprep.mubr.msk.f32.mxu0 %vm698_vm1, %v5187_v6 }
 0x7a3   :  { %7151 = vmatmul.mubr.msk.f32.gmra.mrb[58].mxu0 %vm698_vm1, %v5188_v61 }
 0x7a4   :  { %7153 = vmatprep.mubr.msk.f32.mxu0 %vm698_vm1, %v5189_v14 }
 0x7a7   :  { %7154 = vmatmul.mubr.msk.f32.gmra.mrb[60].mxu0 %vm698_vm1, %v5190_v60 }
 0x7a8   :  { %7156 = vmatprep.mubr.msk.f32.mxu0 %vm698_vm1, %v5191_v55 }
 0x7ab   :  { %7157 = vmatmul.mubr.msk.f32.gmra.mrb[62].mxu0 %vm698_vm1, %v5192_v2 }
 0x7ac   :  { %7159 = vmatprep.mubr.msk.f32.mxu0 %vm698_vm1, %v5193_v51 }
 0x7af   :  { %7160 = vmatmul.mubr.msk.f32.gmra.mrb[64].mxu0 %vm698_vm1, %v5194_v50 }
 0x7b0   :  { %7162 = vmatprep.mubr.msk.f32.mxu0 %vm698_vm1, %v5195_v20 }
 0x7b3   :  { %7163 = vmatmul.mubr.msk.f32.gmra.mrb[66].mxu0 %vm698_vm1, %v5196_v16 }
 0x7b4   :  { %7165 = vmatprep.mubr.msk.f32.mxu0 %vm698_vm1, %v5197_v39 }
 0x7b7   :  { %7166 = vmatmul.mubr.msk.f32.gmra.mrb[68].mxu0 %vm698_vm1, %v5198_v63 }
 0x7b8   :  { %7168 = vmatprep.mubr.msk.f32.mxu0 %vm698_vm1, %v5199_v34 }
 0x7bb   :  { %7169 = vmatmul.mubr.msk.f32.gmra.mrb[70].mxu0 %vm698_vm1, %v5200_v1 }
 0x7bc   :  { %7171 = vmatprep.mubr.msk.f32.mxu0 %vm698_vm1, %v5201_v45 }
 0x7bf   :  { %7172 = vmatmul.mubr.msk.f32.gmra.mrb[72].mxu0 %vm698_vm1, %v5202_v10 }
 0x7c0   :  { %7174 = vmatprep.mubr.msk.f32.mxu0 %vm698_vm1, %v5203_v19 }
 0x7c3   :  { %7175 = vmatmul.mubr.msk.f32.gmra.mrb[74].mxu0 %vm698_vm1, %v5204_v28 }
 0x7c4   :  { %7177 = vmatprep.mubr.msk.f32.mxu0 %vm698_vm1, %v5205_v27 }
 0x7c7   :  { %7178 = vmatmul.mubr.msk.f32.gmra.mrb[76].mxu0 %vm698_vm1, %v5206_v41 }
 0x7c8   :  { %7180 = vmatprep.mubr.msk.f32.mxu0 %vm698_vm1, %v5207_v30 }
 0x7cb   :  { %7181 = vmatmul.mubr.msk.f32.gmra.mrb[78].mxu0 %vm698_vm1, %v5208_v44 }
 0x7cc   :  { %7183 = vmatprep.mubr.msk.f32.mxu0 %vm698_vm1, %v5209_v22 }
 0x7cf   :  { %7184 = vmatmul.mubr.msk.f32.gmra.mrb[80].mxu0 %vm698_vm1, %v5210_v26 }
 0x7d0   :  { %7186 = vmatprep.mubr.msk.f32.mxu0 %vm698_vm1, %v5211_v12 }
 0x7d3   :  { %7187 = vmatmul.mubr.msk.f32.gmra.mrb[82].mxu0 %vm698_vm1, %v5212_v53 }
 0x7d4   :  { %7189 = vmatprep.mubr.msk.f32.mxu0 %vm698_vm1, %v5213_v40 }
 0x7d7   :  { %7190 = vmatmul.mubr.msk.f32.gmra.mrb[84].mxu0 %vm698_vm1, %v5214_v18 }
 0x7d8   :  { %7192 = vmatprep.mubr.msk.f32.mxu0 %vm698_vm1, %v5215_v49 }
 0x7db   :  { %7193 = vmatmul.mubr.msk.f32.gmra.mrb[86].mxu0 %vm698_vm1, %v5216_v56 }
 0x7dc   :  { %7195 = vmatprep.mubr.msk.f32.mxu0 %vm698_vm1, %v5217_v24 }
 0x7df   :  { %7196 = vmatmul.mubr.msk.f32.gmra.mrb[88].mxu0 %vm698_vm1, %v5218_v48 }
 0x7e0   :  { %7198 = vmatprep.mubr.msk.f32.mxu0 %vm698_vm1, %v5219_v43 }
 0x7e3   :  { %7199 = vmatmul.mubr.msk.f32.gmra.mrb[90].mxu0 %vm698_vm1, %v5220_v31 }
 0x7e4   :  { %7201 = vmatprep.mubr.msk.f32.mxu0 %vm698_vm1, %v5221_v33 }
 0x7e7   :  { %7202 = vmatmul.mubr.msk.f32.gmra.mrb[92].mxu0 %vm698_vm1, %v5222_v7 }
 0x7e8   :  { %7204 = vmatprep.mubr.msk.f32.mxu0 %vm698_vm1, %v5223_v11 }
 0x7eb   :  { %7205 = vmatmul.mubr.msk.f32.gmra.mrb[94].mxu0 %vm698_vm1, %v5224_v0 }
 0x842   :  { %v13270_v47 = vpop.f32.mrb[32].mxu0 }
 0x843   :  { %v5806_v15 = vsel %vm118_vm0, %v13270_v47, 0.0  ;;  %v5940_v5 = vmul.f32 %v13270_v47, %v13270_v47  ;;  %v13276_v54 = vpop.f32.mrb[33].mxu0 }
 0x844   :  { %v5805_v29 = vsel %vm118_vm0, %v13276_v54, 0.0  ;;  %v5939_v17 = vmul.f32 %v13276_v54, %v13276_v54 }
 0x845   :  { %v6004_v58 = vsel %vm118_vm0, %v5940_v5, 0.0  ;;  %v5807_v21 = vadd.f32 %v5806_v15, %v5805_v29 }
 0x846   :  { %v6003_v4 = vsel %vm118_vm0, %v5939_v17, 0.0  ;;  %v13284_v13 = vpop.f32.mrb[34].mxu0 }
 0x847   :  { %v6005_v3 = vadd.f32 %v6004_v58, %v6003_v4  ;;  %v13286_v36 = vpop.f32.mrb[35].mxu0  ;;  %v5942_v37 = vmul.f32 %v13284_v13, %v13284_v13  ;;  %v5810_v23 = vsel %vm118_vm0, %v13284_v13, 0.0 }
 0x848   :  { %v5808_v25 = vsel %vm118_vm0, %v13286_v36, 0.0  ;;  %v5941_v42 = vmul.f32 %v13286_v36, %v13286_v36 }
 0x849   :  { %v5809_v62 = vadd.f32 %v5808_v25, %v5807_v21  ;;  %v6008_v60 = vsel %vm118_vm0, %v5942_v37, 0.0 }
 0x84a   :  { %v6006_v38 = vsel %vm118_vm0, %v5941_v42, 0.0  ;;  %v13297_v8 = vpop.f32.mrb[36].mxu0 }
 0x84b   :  { %v5811_v6 = vadd.f32 %v5810_v23, %v5809_v62  ;;  %v6007_v61 = vadd.f32 %v6006_v38, %v6005_v3  ;;  %v13299_v14 = vpop.f32.mrb[37].mxu0  ;;  %v5944_v55 = vmul.f32 %v13297_v8, %v13297_v8  ;;  %v5814_v16 = vsel %vm118_vm0, %v13297_v8, 0.0 }
 0x84c   :  { %v5812_v2 = vsel %vm118_vm0, %v13299_v14, 0.0  ;;  %v5943_v51 = vmul.f32 %v13299_v14, %v13299_v14 }
 0x84d   :  { %v6009_v50 = vadd.f32 %v6008_v60, %v6007_v61  ;;  %v5813_v20 = vadd.f32 %v5812_v2, %v5811_v6  ;;  %v6012_v10 = vsel %vm118_vm0, %v5944_v55, 0.0 }
 0x84e   :  { %v6010_v39 = vsel %vm118_vm0, %v5943_v51, 0.0  ;;  %v13311_v63 = vpop.f32.mrb[38].mxu0 }
 0x84f   :  { %v6011_v34 = vadd.f32 %v6010_v39, %v6009_v50  ;;  %v13313_v1 = vpop.f32.mrb[39].mxu0  ;;  %v5815_v45 = vadd.f32 %v5814_v16, %v5813_v20  ;;  %v5946_v19 = vmul.f32 %v13311_v63, %v13311_v63  ;;  %v5818_v52 = vsel %vm118_vm0, %v13311_v63, 0.0 }
 0x850   :  { %v5816_v28 = vsel %vm118_vm0, %v13313_v1, 0.0  ;;  %v5945_v27 = vmul.f32 %v13313_v1, %v13313_v1 }
 0x851   :  { %v5817_v41 = vadd.f32 %v5816_v28, %v5815_v45  ;;  %v6013_v30 = vadd.f32 %v6012_v10, %v6011_v34  ;;  %v6016_v57 = vsel %vm118_vm0, %v5946_v19, 0.0 }
 0x852   :  { %v6014_v44 = vsel %vm118_vm0, %v5945_v27, 0.0  ;;  %v13325_v35 = vpop.f32.mrb[40].mxu0 }
 0x853   :  { %v6015_v22 = vadd.f32 %v6014_v44, %v6013_v30  ;;  %v13327_v32 = vpop.f32.mrb[41].mxu0  ;;  %v5819_v26 = vadd.f32 %v5818_v52, %v5817_v41  ;;  %v5948_v12 = vmul.f32 %v13325_v35, %v13325_v35  ;;  %v5822_v56 = vsel %vm118_vm0, %v13325_v35, 0.0 }
 0x854   :  { %v5820_v53 = vsel %vm118_vm0, %v13327_v32, 0.0  ;;  %v5947_v40 = vmul.f32 %v13327_v32, %v13327_v32 }
 0x855   :  { %v5821_v18 = vadd.f32 %v5820_v53, %v5819_v26  ;;  %v6017_v49 = vadd.f32 %v6016_v57, %v6015_v22  ;;  %v6020_v31 = vsel %vm118_vm0, %v5948_v12, 0.0 }
 0x856   :  { %v6018_v24 = vsel %vm118_vm0, %v5947_v40, 0.0  ;;  %v13339_v46 = vpop.f32.mrb[42].mxu0 }
 0x857   :  { %v6019_v48 = vadd.f32 %v6018_v24, %v6017_v49  ;;  %v13341_v9 = vpop.f32.mrb[43].mxu0  ;;  %v5823_v43 = vadd.f32 %v5822_v56, %v5821_v18  ;;  %v5950_v33 = vmul.f32 %v13339_v46, %v13339_v46  ;;  %v5826_v15 = vsel %vm118_vm0, %v13339_v46, 0.0 }
 0x858   :  { %v5824_v7 = vsel %vm118_vm0, %v13341_v9, 0.0  ;;  %v5949_v59 = vmul.f32 %v13341_v9, %v13341_v9 }
 0x859   :  { %v5825_v11 = vadd.f32 %v5824_v7, %v5823_v43  ;;  %v6021_v0 = vadd.f32 %v6020_v31, %v6019_v48  ;;  %v6024_v4 = vsel %vm118_vm0, %v5950_v33, 0.0 }
 0x85a   :  { %v6022_v5 = vsel %vm118_vm0, %v5949_v59, 0.0  ;;  %v13353_v29 = vpop.f32.mrb[44].mxu0 }
 0x85b   :  { %v6023_v17 = vadd.f32 %v6022_v5, %v6021_v0  ;;  %v13355_v58 = vpop.f32.mrb[45].mxu0  ;;  %v5827_v21 = vadd.f32 %v5826_v15, %v5825_v11  ;;  %v5952_v3 = vmul.f32 %v13353_v29, %v13353_v29  ;;  %v5830_v23 = vsel %vm118_vm0, %v13353_v29, 0.0 }
 0x85c   :  { %v5828_v37 = vsel %vm118_vm0, %v13355_v58, 0.0  ;;  %v5951_v25 = vmul.f32 %v13355_v58, %v13355_v58 }
 0x85d   :  { %v5829_v42 = vadd.f32 %v5828_v37, %v5827_v21  ;;  %v6025_v62 = vadd.f32 %v6024_v4, %v6023_v17  ;;  %v6028_v2 = vsel %vm118_vm0, %v5952_v3, 0.0 }
 0x85e   :  { %v6026_v38 = vsel %vm118_vm0, %v5951_v25, 0.0  ;;  %v13367_v6 = vpop.f32.mrb[46].mxu0 }
 0x85f   :  { %v6027_v61 = vadd.f32 %v6026_v38, %v6025_v62  ;;  %v13369_v60 = vpop.f32.mrb[47].mxu0  ;;  %v5831_v55 = vadd.f32 %v5830_v23, %v5829_v42  ;;  %v5954_v51 = vmul.f32 %v13367_v6, %v13367_v6  ;;  %v5834_v34 = vsel %vm118_vm0, %v13367_v6, 0.0 }
 0x860   :  { %v5832_v50 = vsel %vm118_vm0, %v13369_v60, 0.0  ;;  %v5953_v20 = vmul.f32 %v13369_v60, %v13369_v60 }
 0x861   :  { %v5833_v16 = vadd.f32 %v5832_v50, %v5831_v55  ;;  %v6029_v39 = vadd.f32 %v6028_v2, %v6027_v61  ;;  %v6032_v41 = vsel %vm118_vm0, %v5954_v51, 0.0 }
 0x862   :  { %v6030_v45 = vsel %vm118_vm0, %v5953_v20, 0.0  ;;  %v13381_v10 = vpop.f32.mrb[48].mxu0 }
 0x863   :  { %v6031_v19 = vadd.f32 %v6030_v45, %v6029_v39  ;;  %v13383_v28 = vpop.f32.mrb[49].mxu0  ;;  %v5835_v27 = vadd.f32 %v5834_v34, %v5833_v16  ;;  %v5956_v30 = vmul.f32 %v13381_v10, %v13381_v10  ;;  %v5838_v57 = vsel %vm118_vm0, %v13381_v10, 0.0 }
 0x864   :  { %v5836_v52 = vsel %vm118_vm0, %v13383_v28, 0.0  ;;  %v5955_v44 = vmul.f32 %v13383_v28, %v13383_v28 }
 0x865   :  { %v5837_v22 = vadd.f32 %v5836_v52, %v5835_v27  ;;  %v6033_v26 = vadd.f32 %v6032_v41, %v6031_v19  ;;  %v6036_v56 = vsel %vm118_vm0, %v5956_v30, 0.0 }
 0x866   :  { %v6034_v12 = vsel %vm118_vm0, %v5955_v44, 0.0  ;;  %v13395_v53 = vpop.f32.mrb[50].mxu0 }
 0x867   :  { %v6035_v40 = vadd.f32 %v6034_v12, %v6033_v26  ;;  %v13397_v18 = vpop.f32.mrb[51].mxu0  ;;  %v5839_v49 = vadd.f32 %v5838_v57, %v5837_v22  ;;  %v5958_v24 = vmul.f32 %v13395_v53, %v13395_v53  ;;  %v5842_v7 = vsel %vm118_vm0, %v13395_v53, 0.0 }
 0x868   :  { %v5840_v48 = vsel %vm118_vm0, %v13397_v18, 0.0  ;;  %v5957_v43 = vmul.f32 %v13397_v18, %v13397_v18 }
 0x869   :  { %v5841_v31 = vadd.f32 %v5840_v48, %v5839_v49  ;;  %v6037_v33 = vadd.f32 %v6036_v56, %v6035_v40  ;;  %v6040_v17 = vsel %vm118_vm0, %v5958_v24, 0.0 }
 0x86a   :  { %v6038_v59 = vsel %vm118_vm0, %v5957_v43, 0.0  ;;  %v13409_v11 = vpop.f32.mrb[52].mxu0 }
 0x86b   :  { %v6039_v0 = vadd.f32 %v6038_v59, %v6037_v33  ;;  %v13411_v15 = vpop.f32.mrb[53].mxu0  ;;  %v5843_v5 = vadd.f32 %v5842_v7, %v5841_v31  ;;  %v5960_v21 = vmul.f32 %v13409_v11, %v13409_v11  ;;  %v5846_v42 = vsel %vm118_vm0, %v13409_v11, 0.0 }
 0x86c   :  { %v5844_v4 = vsel %vm118_vm0, %v13411_v15, 0.0  ;;  %v5959_v3 = vmul.f32 %v13411_v15, %v13411_v15 }
 0x86d   :  { %v5845_v37 = vadd.f32 %v5844_v4, %v5843_v5  ;;  %v6041_v25 = vadd.f32 %v6040_v17, %v6039_v0  ;;  %v6044_v2 = vsel %vm118_vm0, %v5960_v21, 0.0 }
 0x86e   :  { %v6042_v62 = vsel %vm118_vm0, %v5959_v3, 0.0  ;;  %v13423_v23 = vpop.f32.mrb[54].mxu0 }
 0x86f   :  { %v6043_v38 = vadd.f32 %v6042_v62, %v6041_v25  ;;  %v13425_v61 = vpop.f32.mrb[55].mxu0  ;;  %v5847_v55 = vadd.f32 %v5846_v42, %v5845_v37  ;;  %v5962_v51 = vmul.f32 %v13423_v23, %v13423_v23  ;;  %v5850_v34 = vsel %vm118_vm0, %v13423_v23, 0.0 }
 0x870   :  { %v5848_v50 = vsel %vm118_vm0, %v13425_v61, 0.0  ;;  %v5961_v20 = vmul.f32 %v13425_v61, %v13425_v61 }
 0x871   :  { %v5849_v16 = vadd.f32 %v5848_v50, %v5847_v55  ;;  %v6045_v39 = vadd.f32 %v6044_v2, %v6043_v38  ;;  %v6048_v52 = vsel %vm118_vm0, %v5962_v51, 0.0 }
 0x872   :  { %v6046_v45 = vsel %vm118_vm0, %v5961_v20, 0.0  ;;  %v13437_v19 = vpop.f32.mrb[56].mxu0 }
 0x873   :  { %v6047_v27 = vadd.f32 %v6046_v45, %v6045_v39  ;;  %v13439_v41 = vpop.f32.mrb[57].mxu0  ;;  %v5851_v30 = vadd.f32 %v5850_v34, %v5849_v16  ;;  %v5964_v44 = vmul.f32 %v13437_v19, %v13437_v19  ;;  %v5854_v40 = vsel %vm118_vm0, %v13437_v19, 0.0 }
 0x874   :  { %v5852_v22 = vsel %vm118_vm0, %v13439_v41, 0.0  ;;  %v5963_v26 = vmul.f32 %v13439_v41, %v13439_v41 }
 0x875   :  { %v5853_v57 = vadd.f32 %v5852_v22, %v5851_v30  ;;  %v6049_v12 = vadd.f32 %v6048_v52, %v6047_v27  ;;  %v6052_v31 = vsel %vm118_vm0, %v5964_v44, 0.0 }
 0x876   :  { %v6050_v49 = vsel %vm118_vm0, %v5963_v26, 0.0  ;;  %v13451_v56 = vpop.f32.mrb[58].mxu0 }
 0x877   :  { %v6051_v24 = vadd.f32 %v6050_v49, %v6049_v12  ;;  %v13453_v48 = vpop.f32.mrb[59].mxu0  ;;  %v5855_v43 = vadd.f32 %v5854_v40, %v5853_v57  ;;  %v5966_v33 = vmul.f32 %v13451_v56, %v13451_v56  ;;  %v5858_v17 = vsel %vm118_vm0, %v13451_v56, 0.0 }
 0x878   :  { %v5856_v7 = vsel %vm118_vm0, %v13453_v48, 0.0  ;;  %v5965_v59 = vmul.f32 %v13453_v48, %v13453_v48 }
 0x879   :  { %v5857_v0 = vadd.f32 %v5856_v7, %v5855_v43  ;;  %v6053_v5 = vadd.f32 %v6052_v31, %v6051_v24  ;;  %v6056_v42 = vsel %vm118_vm0, %v5966_v33, 0.0 }
 0x87a   :  { %v6054_v21 = vsel %vm118_vm0, %v5965_v59, 0.0  ;;  %v13465_v4 = vpop.f32.mrb[60].mxu0 }
 0x87b   :  { %v6055_v3 = vadd.f32 %v6054_v21, %v6053_v5  ;;  %v13467_v37 = vpop.f32.mrb[61].mxu0  ;;  %v5859_v25 = vadd.f32 %v5858_v17, %v5857_v0  ;;  %v5968_v62 = vmul.f32 %v13465_v4, %v13465_v4  ;;  %v5862_v50 = vsel %vm118_vm0, %v13465_v4, 0.0 }
 0x87c   :  { %v5860_v38 = vsel %vm118_vm0, %v13467_v37, 0.0  ;;  %v5967_v55 = vmul.f32 %v13467_v37, %v13467_v37 }
 0x87d   :  { %v5861_v2 = vadd.f32 %v5860_v38, %v5859_v25  ;;  %v6057_v51 = vadd.f32 %v6056_v42, %v6055_v3  ;;  %v6060_v27 = vsel %vm118_vm0, %v5968_v62, 0.0 }
 0x87e   :  { %v6058_v20 = vsel %vm118_vm0, %v5967_v55, 0.0  ;;  %v13479_v16 = vpop.f32.mrb[62].mxu0 }
 0x87f   :  { %v6059_v39 = vadd.f32 %v6058_v20, %v6057_v51  ;;  %v13481_v34 = vpop.f32.mrb[63].mxu0  ;;  %v5863_v45 = vadd.f32 %v5862_v50, %v5861_v2  ;;  %v5970_v30 = vmul.f32 %v13479_v16, %v13479_v16  ;;  %v5866_v57 = vsel %vm118_vm0, %v13479_v16, 0.0 }
 0x880   :  { %v5864_v52 = vsel %vm118_vm0, %v13481_v34, 0.0  ;;  %v5969_v44 = vmul.f32 %v13481_v34, %v13481_v34 }
 0x881   :  { %v5865_v22 = vadd.f32 %v5864_v52, %v5863_v45  ;;  %v6061_v26 = vadd.f32 %v6060_v27, %v6059_v39  ;;  %v6064_v31 = vsel %vm118_vm0, %v5970_v30, 0.0 }
 0x882   :  { %v6062_v12 = vsel %vm118_vm0, %v5969_v44, 0.0  ;;  %v13493_v40 = vpop.f32.mrb[64].mxu0 }
 0x883   :  { %v6063_v49 = vadd.f32 %v6062_v12, %v6061_v26  ;;  %v13495_v24 = vpop.f32.mrb[65].mxu0  ;;  %v5867_v43 = vadd.f32 %v5866_v57, %v5865_v22  ;;  %v5972_v33 = vmul.f32 %v13493_v40, %v13493_v40  ;;  %v5870_v17 = vsel %vm118_vm0, %v13493_v40, 0.0 }
 0x884   :  { %v5868_v7 = vsel %vm118_vm0, %v13495_v24, 0.0  ;;  %v5971_v59 = vmul.f32 %v13495_v24, %v13495_v24 }
 0x885   :  { %v5869_v0 = vadd.f32 %v5868_v7, %v5867_v43  ;;  %v6065_v5 = vadd.f32 %v6064_v31, %v6063_v49  ;;  %v6068_v38 = vsel %vm118_vm0, %v5972_v33, 0.0 }
 0x886   :  { %v6066_v21 = vsel %vm118_vm0, %v5971_v59, 0.0  ;;  %v13507_v3 = vpop.f32.mrb[66].mxu0 }
 0x887   :  { %v6067_v25 = vadd.f32 %v6066_v21, %v6065_v5  ;;  %v13509_v42 = vpop.f32.mrb[67].mxu0  ;;  %v5871_v62 = vadd.f32 %v5870_v17, %v5869_v0  ;;  %v5974_v55 = vmul.f32 %v13507_v3, %v13507_v3  ;;  %v5874_v39 = vsel %vm118_vm0, %v13507_v3, 0.0 }
 0x888   :  { %v5872_v2 = vsel %vm118_vm0, %v13509_v42, 0.0  ;;  %v5973_v51 = vmul.f32 %v13509_v42, %v13509_v42 }
 0x889   :  { %v5873_v50 = vadd.f32 %v5872_v2, %v5871_v62  ;;  %v6069_v20 = vadd.f32 %v6068_v38, %v6067_v25  ;;  %v6072_v22 = vsel %vm118_vm0, %v5974_v55, 0.0 }
 0x88a   :  { %v6070_v45 = vsel %vm118_vm0, %v5973_v51, 0.0  ;;  %v13521_v27 = vpop.f32.mrb[68].mxu0 }
 0x88b   :  { %v6071_v30 = vadd.f32 %v6070_v45, %v6069_v20  ;;  %v13523_v52 = vpop.f32.mrb[69].mxu0  ;;  %v5875_v44 = vadd.f32 %v5874_v39, %v5873_v50  ;;  %v5976_v26 = vmul.f32 %v13521_v27, %v13521_v27  ;;  %v5878_v31 = vsel %vm118_vm0, %v13521_v27, 0.0 }
 0x88c   :  { %v5876_v57 = vsel %vm118_vm0, %v13523_v52, 0.0  ;;  %v5975_v12 = vmul.f32 %v13523_v52, %v13523_v52 }
 0x88d   :  { %v5877_v49 = vadd.f32 %v5876_v57, %v5875_v44  ;;  %v6073_v43 = vadd.f32 %v6072_v22, %v6071_v30  ;;  %v6076_v17 = vsel %vm118_vm0, %v5976_v26, 0.0 }
 0x88e   :  { %v6074_v33 = vsel %vm118_vm0, %v5975_v12, 0.0  ;;  %v13535_v7 = vpop.f32.mrb[70].mxu0 }
 0x88f   :  { %15557 = vst [vmem:[#allocation123_spill] sm:$0xff] %v13535_v7  ;;  %v6075_v59 = vadd.f32 %v6074_v33, %v6073_v43  ;;  %v13537_v0 = vpop.f32.mrb[71].mxu0  ;;  %v5879_v5 = vadd.f32 %v5878_v31, %v5877_v49  ;;  %v5978_v21 = vmul.f32 %v13535_v7, %v13535_v7  ;;  %v5882_v2 = vsel %vm118_vm0, %v13535_v7, 0.0 }
 0x890   :  { %v5880_v25 = vsel %vm118_vm0, %v13537_v0, 0.0  ;;  %v5977_v62 = vmul.f32 %v13537_v0, %v13537_v0 }
 0x891   :  { %v5881_v38 = vadd.f32 %v5880_v25, %v5879_v5  ;;  %v6077_v55 = vadd.f32 %v6076_v17, %v6075_v59  ;;  %v6080_v30 = vsel %vm118_vm0, %v5978_v21, 0.0 }
 0x892   :  { %v6078_v51 = vsel %vm118_vm0, %v5977_v62, 0.0  ;;  %v13549_v50 = vpop.f32.mrb[72].mxu0 }
 0x893   :  { %15558 = vst [vmem:[#allocation41_spill] sm:$0xff] %v13549_v50  ;;  %v6079_v20 = vadd.f32 %v6078_v51, %v6077_v55  ;;  %v13551_v39 = vpop.f32.mrb[73].mxu0  ;;  %v5883_v45 = vadd.f32 %v5882_v2, %v5881_v38  ;;  %v5980_v44 = vmul.f32 %v13549_v50, %v13549_v50  ;;  %v5886_v49 = vsel %vm118_vm0, %v13549_v50, 0.0 }
 0x894   :  { %15559 = vst [vmem:[#allocation118_spill] sm:$0xff] %v13551_v39  ;;  %v5884_v22 = vsel %vm118_vm0, %v13551_v39, 0.0  ;;  %v5979_v26 = vmul.f32 %v13551_v39, %v13551_v39 }
 0x895   :  { %v5885_v57 = vadd.f32 %v5884_v22, %v5883_v45  ;;  %v6081_v12 = vadd.f32 %v6080_v30, %v6079_v20  ;;  %v6084_v17 = vsel %vm118_vm0, %v5980_v44, 0.0 }
 0x896   :  { %v6082_v43 = vsel %vm118_vm0, %v5979_v26, 0.0  ;;  %v13563_v31 = vpop.f32.mrb[74].mxu0 }
 0x897   :  { %15560 = vst [vmem:[#allocation126_spill] sm:$0xff] %v13563_v31  ;;  %v6083_v33 = vadd.f32 %v6082_v43, %v6081_v12  ;;  %v13565_v59 = vpop.f32.mrb[75].mxu0  ;;  %v5887_v5 = vadd.f32 %v5886_v49, %v5885_v57  ;;  %v5982_v21 = vmul.f32 %v13563_v31, %v13563_v31  ;;  %v5890_v2 = vsel %vm118_vm0, %v13563_v31, 0.0 }
 0x898   :  { %15561 = vst [vmem:[#allocation156_spill] sm:$0xff] %v13565_v59  ;;  %v5888_v25 = vsel %vm118_vm0, %v13565_v59, 0.0  ;;  %v5981_v62 = vmul.f32 %v13565_v59, %v13565_v59 }
 0x899   :  { %v5889_v38 = vadd.f32 %v5888_v25, %v5887_v5  ;;  %v6085_v55 = vadd.f32 %v6084_v17, %v6083_v33  ;;  %v6088_v22 = vsel %vm118_vm0, %v5982_v21, 0.0 }
 0x89a   :  { %v6086_v51 = vsel %vm118_vm0, %v5981_v62, 0.0  ;;  %v13577_v20 = vpop.f32.mrb[76].mxu0 }
 0x89b   :  { %15562 = vst [vmem:[#allocation10_spill] sm:$0xff] %v13577_v20  ;;  %v6087_v45 = vadd.f32 %v6086_v51, %v6085_v55  ;;  %v13579_v30 = vpop.f32.mrb[77].mxu0  ;;  %v5891_v44 = vadd.f32 %v5890_v2, %v5889_v38  ;;  %v5984_v26 = vmul.f32 %v13577_v20, %v13577_v20  ;;  %v5894_v33 = vsel %vm118_vm0, %v13577_v20, 0.0 }
 0x89c   :  { %15563 = vst [vmem:[#allocation72_spill] sm:$0xff] %v13579_v30  ;;  %v5892_v57 = vsel %vm118_vm0, %v13579_v30, 0.0  ;;  %v5983_v12 = vmul.f32 %v13579_v30, %v13579_v30 }
 0x89d   :  { %v5893_v49 = vadd.f32 %v5892_v57, %v5891_v44  ;;  %v6089_v43 = vadd.f32 %v6088_v22, %v6087_v45  ;;  %v6092_v38 = vsel %vm118_vm0, %v5984_v26, 0.0 }
 0x89e   :  { %v6090_v5 = vsel %vm118_vm0, %v5983_v12, 0.0  ;;  %v13591_v17 = vpop.f32.mrb[78].mxu0 }
 0x89f   :  { %15564 = vst [vmem:[#allocation44_spill] sm:$0xff] %v13591_v17  ;;  %v6091_v25 = vadd.f32 %v6090_v5, %v6089_v43  ;;  %v13593_v21 = vpop.f32.mrb[79].mxu0  ;;  %v5895_v62 = vadd.f32 %v5894_v33, %v5893_v49  ;;  %v5986_v55 = vmul.f32 %v13591_v17, %v13591_v17  ;;  %v5898_v22 = vsel %vm118_vm0, %v13591_v17, 0.0 }
 0x8a0   :  { %15565 = vst [vmem:[#allocation129_spill] sm:$0xff] %v13593_v21  ;;  %v5896_v2 = vsel %vm118_vm0, %v13593_v21, 0.0  ;;  %v5985_v51 = vmul.f32 %v13593_v21, %v13593_v21 }
 0x8a1   :  { %v5897_v45 = vadd.f32 %v5896_v2, %v5895_v62  ;;  %v6093_v44 = vadd.f32 %v6092_v38, %v6091_v25  ;;  %v6096_v33 = vsel %vm118_vm0, %v5986_v55, 0.0 }
 0x8a2   :  { %v6094_v57 = vsel %vm118_vm0, %v5985_v51, 0.0  ;;  %v13605_v12 = vpop.f32.mrb[80].mxu0 }
 0x8a3   :  { %15566 = vst [vmem:[#allocation95_spill] sm:$0xff] %v13605_v12  ;;  %v6095_v49 = vadd.f32 %v6094_v57, %v6093_v44  ;;  %v13607_v26 = vpop.f32.mrb[81].mxu0  ;;  %v5899_v43 = vadd.f32 %v5898_v22, %v5897_v45  ;;  %v5988_v5 = vmul.f32 %v13605_v12, %v13605_v12  ;;  %v5902_v51 = vsel %vm118_vm0, %v13605_v12, 0.0 }
 0x8a4   :  { %15567 = vst [vmem:[#allocation140_spill] sm:$0xff] %v13607_v26  ;;  %v5900_v62 = vsel %vm118_vm0, %v13607_v26, 0.0  ;;  %v5987_v25 = vmul.f32 %v13607_v26, %v13607_v26 }
 0x8a5   :  { %v5901_v38 = vadd.f32 %v5900_v62, %v5899_v43  ;;  %v6097_v2 = vadd.f32 %v6096_v33, %v6095_v49  ;;  %v6100_v17 = vsel %vm118_vm0, %v5988_v5, 0.0 }
 0x8a6   :  { %v6098_v44 = vsel %vm118_vm0, %v5987_v25, 0.0  ;;  %v13619_v57 = vpop.f32.mrb[82].mxu0 }
 0x8a7   :  { %15568 = vst [vmem:[#allocation131_spill] sm:$0xff] %v13619_v57  ;;  %v6099_v45 = vadd.f32 %v6098_v44, %v6097_v2  ;;  %v13621_v55 = vpop.f32.mrb[83].mxu0  ;;  %v5903_v22 = vadd.f32 %v5902_v51, %v5901_v38  ;;  %v5990_v21 = vmul.f32 %v13619_v57, %v13619_v57  ;;  %v5906_v25 = vsel %vm118_vm0, %v13619_v57, 0.0 }
 0x8a8   :  { %15569 = vst [vmem:[#allocation12_spill] sm:$0xff] %v13621_v55  ;;  %v5904_v43 = vsel %vm118_vm0, %v13621_v55, 0.0  ;;  %v5989_v49 = vmul.f32 %v13621_v55, %v13621_v55 }
 0x8a9   :  { %v5905_v33 = vadd.f32 %v5904_v43, %v5903_v22  ;;  %v6101_v62 = vadd.f32 %v6100_v17, %v6099_v45  ;;  %v6104_v12 = vsel %vm118_vm0, %v5990_v21, 0.0 }
 0x8aa   :  { %v6102_v2 = vsel %vm118_vm0, %v5989_v49, 0.0  ;;  %v13633_v44 = vpop.f32.mrb[84].mxu0 }
 0x8ab   :  { %15570 = vst [vmem:[#allocation176_spill] sm:$0xff] %v13633_v44  ;;  %v6103_v38 = vadd.f32 %v6102_v2, %v6101_v62  ;;  %v13635_v5 = vpop.f32.mrb[85].mxu0  ;;  %v5907_v51 = vadd.f32 %v5906_v25, %v5905_v33  ;;  %v5992_v26 = vmul.f32 %v13633_v44, %v13633_v44  ;;  %v5910_v49 = vsel %vm118_vm0, %v13633_v44, 0.0 }
 0x8ac   :  { %15571 = vst [vmem:[#allocation190_spill] sm:$0xff] %v13635_v5  ;;  %v5908_v22 = vsel %vm118_vm0, %v13635_v5, 0.0  ;;  %v5991_v17 = vmul.f32 %v13635_v5, %v13635_v5 }
 0x8ad   :  { %v5909_v45 = vadd.f32 %v5908_v22, %v5907_v51  ;;  %v6105_v43 = vadd.f32 %v6104_v12, %v6103_v38  ;;  %v6108_v57 = vsel %vm118_vm0, %v5992_v26, 0.0 }
 0x8ae   :  { %v6106_v62 = vsel %vm118_vm0, %v5991_v17, 0.0  ;;  %v13647_v2 = vpop.f32.mrb[86].mxu0 }
 0x8af   :  { %15572 = vst [vmem:[#allocation22_spill] sm:$0xff] %v13647_v2  ;;  %v6107_v33 = vadd.f32 %v6106_v62, %v6105_v43  ;;  %v13649_v21 = vpop.f32.mrb[87].mxu0  ;;  %v5911_v25 = vadd.f32 %v5910_v49, %v5909_v45  ;;  %v5994_v55 = vmul.f32 %v13647_v2, %v13647_v2  ;;  %v5914_v17 = vsel %vm118_vm0, %v13647_v2, 0.0 }
 0x8b0   :  { %15573 = vst [vmem:[#allocation121_spill] sm:$0xff] %v13649_v21  ;;  %v5912_v51 = vsel %vm118_vm0, %v13649_v21, 0.0  ;;  %v5993_v12 = vmul.f32 %v13649_v21, %v13649_v21 }
 0x8b1   :  { %v5913_v38 = vadd.f32 %v5912_v51, %v5911_v25  ;;  %v6109_v22 = vadd.f32 %v6108_v57, %v6107_v33  ;;  %v6112_v44 = vsel %vm118_vm0, %v5994_v55, 0.0 }
 0x8b2   :  { %v6110_v43 = vsel %vm118_vm0, %v5993_v12, 0.0  ;;  %v13661_v62 = vpop.f32.mrb[88].mxu0 }
 0x8b3   :  { %15574 = vst [vmem:[#allocation133_spill] sm:$0xff] %v13661_v62  ;;  %v6111_v45 = vadd.f32 %v6110_v43, %v6109_v22  ;;  %v13663_v26 = vpop.f32.mrb[89].mxu0  ;;  %v5915_v49 = vadd.f32 %v5914_v17, %v5913_v38  ;;  %v5996_v5 = vmul.f32 %v13661_v62, %v13661_v62  ;;  %v5918_v12 = vsel %vm118_vm0, %v13661_v62, 0.0 }
 0x8b4   :  { %15575 = vst [vmem:[#allocation76_spill] sm:$0xff] %v13663_v26  ;;  %v5916_v25 = vsel %vm118_vm0, %v13663_v26, 0.0  ;;  %v5995_v57 = vmul.f32 %v13663_v26, %v13663_v26 }
 0x8b5   :  { %v5917_v33 = vadd.f32 %v5916_v25, %v5915_v49  ;;  %v6113_v51 = vadd.f32 %v6112_v44, %v6111_v45  ;;  %v6116_v2 = vsel %vm118_vm0, %v5996_v5, 0.0 }
 0x8b6   :  { %v6114_v22 = vsel %vm118_vm0, %v5995_v57, 0.0  ;;  %v13675_v43 = vpop.f32.mrb[90].mxu0 }
 0x8b7   :  { %15576 = vst [vmem:[#allocation26_spill] sm:$0xff] %v13675_v43  ;;  %v6115_v38 = vadd.f32 %v6114_v22, %v6113_v51  ;;  %v13677_v55 = vpop.f32.mrb[91].mxu0  ;;  %v5919_v17 = vadd.f32 %v5918_v12, %v5917_v33  ;;  %v5998_v21 = vmul.f32 %v13675_v43, %v13675_v43  ;;  %v5922_v57 = vsel %vm118_vm0, %v13675_v43, 0.0 }
 0x8b8   :  { %15577 = vst [vmem:[#allocation30_spill] sm:$0xff] %v13677_v55  ;;  %v5920_v49 = vsel %vm118_vm0, %v13677_v55, 0.0  ;;  %v5997_v44 = vmul.f32 %v13677_v55, %v13677_v55 }
 0x8b9   :  { %v5921_v45 = vadd.f32 %v5920_v49, %v5919_v17  ;;  %v6117_v25 = vadd.f32 %v6116_v2, %v6115_v38  ;;  %v6120_v62 = vsel %vm118_vm0, %v5998_v21, 0.0 }
 0x8ba   :  { %v6118_v51 = vsel %vm118_vm0, %v5997_v44, 0.0  ;;  %v13689_v22 = vpop.f32.mrb[92].mxu0 }
 0x8bb   :  { %15578 = vst [vmem:[#allocation11_spill] sm:$0xff] %v13689_v22  ;;  %v6119_v33 = vadd.f32 %v6118_v51, %v6117_v25  ;;  %v13691_v5 = vpop.f32.mrb[93].mxu0  ;;  %v5923_v12 = vadd.f32 %v5922_v57, %v5921_v45  ;;  %v6000_v26 = vmul.f32 %v13689_v22, %v13689_v22  ;;  %v5926_v44 = vsel %vm118_vm0, %v13689_v22, 0.0 }
 0x8bc   :  { %15579 = vst [vmem:[#allocation142_spill] sm:$0xff] %v13691_v5  ;;  %v5924_v17 = vsel %vm118_vm0, %v13691_v5, 0.0  ;;  %v5999_v2 = vmul.f32 %v13691_v5, %v13691_v5 }
 0x8bd   :  { %v5925_v38 = vadd.f32 %v5924_v17, %v5923_v12  ;;  %v6121_v49 = vadd.f32 %v6120_v62, %v6119_v33  ;;  %v6124_v43 = vsel %vm118_vm0, %v6000_v26, 0.0 }
 0x8be   :  { %v6122_v25 = vsel %vm118_vm0, %v5999_v2, 0.0  ;;  %v13703_v51 = vpop.f32.mrb[94].mxu0 }
 0x8bf   :  { %15580 = vst [vmem:[#allocation191_spill] sm:$0xff] %v13703_v51  ;;  %v6123_v45 = vadd.f32 %v6122_v25, %v6121_v49  ;;  %v5794_v21 = vpop.f32.mrb[95].mxu0  ;;  %v5927_v57 = vadd.f32 %v5926_v44, %v5925_v38  ;;  %v6002_v55 = vmul.f32 %v13703_v51, %v13703_v51  ;;  %v5930_v33 = vsel %vm118_vm0, %v13703_v51, 0.0 }
 0x8c0   :  { %v5928_v20 = vsel %vm118_vm0, %v5794_v21, 0.0  ;;  %v6001_v5 = vmul.f32 %v5794_v21, %v5794_v21 }
 0x8c1   :  { %v5929_v12 = vadd.f32 %v5928_v20, %v5927_v57  ;;  %v6125_v62 = vadd.f32 %v6124_v43, %v6123_v45  ;;  %v6128_v49 = vsel %vm118_vm0, %v6002_v55, 0.0  ;;  %v5803_v55 = vld [vmem:[%s14570_s8] sm:$0x1]  ;;  %s7442_s8 = smov [#allocation6]  }
 0x8c2   :  { %v6126_v17 = vsel %vm118_vm0, %v6001_v5, 0.0 }
 0x8c3   :  { %v5931_v2 = vadd.f32 %v5930_v33, %v5929_v12  ;;  %v6127_v22 = vadd.f32 %v6126_v17, %v6125_v62 }
 0x8c5   :  { %v5932_v38 = vrot.slane %v5931_v2, 4  ;;  %v6129_v44 = vadd.f32 %v6128_v49, %v6127_v22 }
 0x8c7   :  { %v5933_v26 = vadd.f32 %v5932_v38, %v5931_v2  ;;  %v6130_v25 = vrot.slane %v6129_v44, 4 }
 0x8c9   :  { %v5934_v30 = vrot.slane %v5933_v26, 2  ;;  %v6131_v31 = vadd.f32 %v6130_v25, %v6129_v44 }
 0x8cb   :  { %v5935_v59 = vadd.f32 %v5934_v30, %v5933_v26  ;;  %v6132_v50 = vrot.slane %v6131_v31, 2  ;;  %v5804_v30 = vld [vmem:[%s14571_s9] sm:$0x1]  ;;  %v7320_v26 = vld [vmem:[#allocation3 + $0x1f0] sm:$0xff]  ;;  %s6481_s9 = sshll.u32 %s7442_s8, 4  ;;  %s6482_s9 = int_to_ptr.vmem [resolvable:$true] %s6481_s9 }
 0x8cc   :  { %s7406_s21 = scalar_lea.vmem %s6482_s9, 8192  ;;  %p7411_p9 = scmp.lt.s32.totalorder %s6482_s9, %s6482_s9 }
 0x8cd   :  { %v5936_v39 = vrot.slane %v5935_v59, 1  ;;  %v6133_v20 = vadd.f32 %v6132_v50, %v6131_v31  ;;  %p7407_p8 = scmp.ne.s32.totalorder %s6482_s9, %s7406_s21  ;;  %p7412_p10 = scmp.lt.s32.totalorder %s7406_s21, %s7406_s21 }
 0x8cf   :  { %v5937_v43 = vadd.f32 %v5936_v39, %v5935_v59  ;;  %v6134_v45 = vrot.slane %v6133_v20, 1  ;;  %v15581_v39 = vld [vmem:[#allocation33_spill] sm:$0xff]  ;;  %p7413_p11 = por %p7412_p10, %p7411_p9 }
 0x8d1   :  { %v5938_v57 = vmul.f32 0.001953125, %v5937_v43  ;;  %v6135_v51 = vadd.f32 %v6134_v45, %v6133_v20  ;;  %v15582_v43 = vld [vmem:[#allocation123_spill] sm:$0xff]  ;;  %v15583_v45 = vld [vmem:[#allocation118_spill] sm:$0xff]  ;;  %p7414_p12 = pnand %p7413_p11, %p7407_p8 }
 0x8d3   :  { %v6136_v7 = vmul.f32 0.001953125, %v6135_v51  ;;  %v6137_v5 = vmul.f32 %v5938_v57, %v5938_v57 }
 0x8d5   :  { %v6138_v12 = vsub.f32 %v6136_v7, %v6137_v5  ;;  %v15585_v5 = vld [vmem:[#allocation156_spill] sm:$0xff] }
 0x8d7   :  { %v6139_v62 = vadd.f32 1e-05, %v6138_v12  ;;  %v15586_v12 = vld [vmem:[#allocation126_spill] sm:$0xff] }
 0x8d9   :  { %7250 = vrsqrt.f32 %v6139_v62  ;;  %v15587_v62 = vld [vmem:[#allocation72_spill] sm:$0xff] }
 0x8e3   :  { %v7251_v22 = vpop.eup %7250 }
 0x8e4   :  { %v6141_v33 = vmul.f32 %v7251_v22, %v5803_v55  ;;  %v15588_v22 = vld [vmem:[#allocation10_spill] sm:$0xff] }
 0x8e6   :  { %v6142_v50 = vmul.f32 %v6141_v33, %v5938_v57  ;;  %v13720_v31 = vrot.slane %v6141_v33, %v15581_v39  ;;  %v15584_v57 = vld [vmem:[#allocation41_spill] sm:$0xff] }
 0x8e8   :  { %v6143_v59 = vsub.f32 %v5804_v30, %v6142_v50  ;;  %v6212_v51 = vmul.f32 %v13720_v31, %v5794_v21  ;;  %v13725_v7 = vmul.f32 %v13720_v31, %v13276_v54  ;;  %v13729_v17 = vmul.f32 %v13270_v47, %v13720_v31  ;;  %v15589_v30 = vld [vmem:[#allocation129_spill] sm:$0xff] }
 0x8e9   :  { %v13733_v2 = vmul.f32 %v13720_v31, %v13286_v36  ;;  %v13737_v49 = vmul.f32 %v13284_v13, %v13720_v31  ;;  %v13741_v38 = vmul.f32 %v13720_v31, %v13299_v14  ;;  %v13745_v54 = vmul.f32 %v13297_v8, %v13720_v31 }
 0x8ea   :  { %v13748_v21 = vrot.slane %v6143_v59, %v15581_v39  ;;  %v13752_v47 = vmul.f32 %v13720_v31, %v13313_v1  ;;  %v13756_v36 = vmul.f32 %v13311_v63, %v13720_v31  ;;  %v13760_v13 = vmul.f32 %v13720_v31, %v13327_v32  ;;  %v15590_v39 = vld [vmem:[#allocation44_spill] sm:$0xff] }
 0x8eb   :  { %v13764_v14 = vmul.f32 %v13325_v35, %v13720_v31  ;;  %v13768_v8 = vmul.f32 %v13720_v31, %v13341_v9  ;;  %v13772_v1 = vmul.f32 %v13339_v46, %v13720_v31  ;;  %v13776_v63 = vmul.f32 %v13720_v31, %v13355_v58 }
 0x8ec   :  { %v6282_v44 = vadd.f32 %v13748_v21, %v6212_v51  ;;  %v13781_v32 = vmul.f32 %v13353_v29, %v13720_v31  ;;  %v13785_v35 = vmul.f32 %v13720_v31, %v13369_v60  ;;  %v13789_v9 = vmul.f32 %v13367_v6, %v13720_v31  ;;  %v15591_v51 = vld [vmem:[#allocation140_spill] sm:$0xff] }
 0x8ed   :  { %v13793_v46 = vmul.f32 %v13720_v31, %v13383_v28  ;;  %v13797_v58 = vmul.f32 %v13381_v10, %v13720_v31  ;;  %v13801_v29 = vmul.f32 %v13720_v31, %v13397_v18  ;;  %v13805_v60 = vmul.f32 %v13395_v53, %v13720_v31 }
 0x8ee   :  { %v6346_v25 = vadd.f32 %v7320_v26, %v6282_v44  ;;  %v13809_v6 = vmul.f32 %v13720_v31, %v13411_v15  ;;  %v13813_v28 = vmul.f32 %v13409_v11, %v13720_v31  ;;  %v13817_v10 = vmul.f32 %v13720_v31, %v13425_v61  ;;  %v15592_v26 = vld [vmem:[#allocation95_spill] sm:$0xff] }
 0x8ef   :  { %v13821_v18 = vmul.f32 %v13423_v23, %v13720_v31  ;;  %v13825_v53 = vmul.f32 %v13720_v31, %v13439_v41  ;;  %v13829_v15 = vmul.f32 %v13437_v19, %v13720_v31  ;;  %v13833_v11 = vmul.f32 %v13720_v31, %v13453_v48 }
 0x8f0   :  { %v6410_v20 = vmax.f32 %v6346_v25, 0.0  ;;  %v13837_v61 = vmul.f32 %v13451_v56, %v13720_v31  ;;  %v13841_v23 = vmul.f32 %v13720_v31, %v13467_v37  ;;  %v13845_v41 = vmul.f32 %v13465_v4, %v13720_v31 }
 0x8f1   :  { %v13849_v19 = vmul.f32 %v13720_v31, %v13481_v34  ;;  %v13853_v48 = vmul.f32 %v13479_v16, %v13720_v31  ;;  %v13857_v56 = vmul.f32 %v13720_v31, %v13495_v24  ;;  %v13861_v37 = vmul.f32 %v13493_v40, %v13720_v31 }
 0x8f2   :  { %6474 = vst.msk [vmem:[#allocation6 + $0x1f0] sm:$0xff] %vm118_vm0, %v6410_v20  ;;  %v13866_v4 = vmul.f32 %v13720_v31, %v13509_v42  ;;  %v13870_v34 = vmul.f32 %v13507_v3, %v13720_v31  ;;  %v13874_v16 = vmul.f32 %v13720_v31, %v13523_v52  ;;  %v13878_v24 = vmul.f32 %v13521_v27, %v13720_v31  ;;  %v15593_v20 = vld [vmem:[#allocation12_spill] sm:$0xff] }
 0x8f3   :  { %v13882_v40 = vmul.f32 %v13720_v31, %v13537_v0  ;;  %v13886_v42 = vmul.f32 %v15582_v43, %v13720_v31  ;;  %v13890_v3 = vmul.f32 %v13720_v31, %v15583_v45  ;;  %v13894_v52 = vmul.f32 %v15584_v57, %v13720_v31  ;;  %v15594_v45 = vld [vmem:[#allocation131_spill] sm:$0xff] }
 0x8f4   :  { %v13898_v27 = vmul.f32 %v13720_v31, %v15585_v5  ;;  %v13902_v0 = vmul.f32 %v15586_v12, %v13720_v31  ;;  %v13906_v55 = vmul.f32 %v13720_v31, %v15587_v62  ;;  %v13910_v33 = vmul.f32 %v15588_v22, %v13720_v31  ;;  %v15596_v5 = vld [vmem:[#allocation190_spill] sm:$0xff]  ;;  %v15598_v62 = vld [vmem:[#allocation176_spill] sm:$0xff] }
 0x8f5   :  { %v13914_v50 = vmul.f32 %v13720_v31, %v15589_v30  ;;  %v13918_v59 = vmul.f32 %v15590_v39, %v13720_v31  ;;  %v13922_v44 = vmul.f32 %v13720_v31, %v15591_v51  ;;  %v13926_v25 = vmul.f32 %v15592_v26, %v13720_v31  ;;  %v15600_v30 = vld [vmem:[#allocation121_spill] sm:$0xff]  ;;  %v15602_v51 = vld [vmem:[#allocation22_spill] sm:$0xff] }
 0x8f6   :  { %v13930_v43 = vmul.f32 %v13720_v31, %v15593_v20  ;;  %v13934_v57 = vmul.f32 %v15594_v45, %v13720_v31  ;;  %v13938_v12 = vmul.f32 %v13720_v31, %v15596_v5  ;;  %v13942_v22 = vmul.f32 %v15598_v62, %v13720_v31  ;;  %v15604_v20 = vld [vmem:[#allocation76_spill] sm:$0xff] }
 0x8f7   :  { %v13946_v39 = vmul.f32 %v13720_v31, %v15600_v30  ;;  %v13950_v26 = vmul.f32 %v15602_v51, %v13720_v31  ;;  %v13954_v45 = vmul.f32 %v13720_v31, %v15604_v20 }
 0x8f8   :  { %15595 = vst [vmem:[#allocation42_spill] sm:$0xff] %v13934_v57  ;;  %15597 = vst [vmem:[#allocation177_spill] sm:$0xff] %v13938_v12  ;;  %v15606_v57 = vld [vmem:[#allocation133_spill] sm:$0xff]  ;;  %v15607_v12 = vld [vmem:[#allocation30_spill] sm:$0xff] }
 0x8f9   :  { %15599 = vst [vmem:[#allocation28_spill] sm:$0xff] %v13942_v22  ;;  %15601 = vst [vmem:[#allocation124_spill] sm:$0xff] %v13946_v39  ;;  %v13958_v5 = vmul.f32 %v15606_v57, %v13720_v31  ;;  %v13962_v62 = vmul.f32 %v13720_v31, %v15607_v12  ;;  %v15608_v22 = vld [vmem:[#allocation26_spill] sm:$0xff]  ;;  %v13982_v12 = vadd.f32 %v13748_v21, %v13725_v7 }
 0x8fa   :  { %15603 = vst [vmem:[#allocation34_spill] sm:$0xff] %v13950_v26  ;;  %15605 = vst [vmem:[#allocation78_spill] sm:$0xff] %v13954_v45  ;;  %v13966_v30 = vmul.f32 %v15608_v22, %v13720_v31  ;;  %v15609_v39 = vld [vmem:[#allocation142_spill] sm:$0xff]  ;;  %v15610_v26 = vld [vmem:[#allocation11_spill] sm:$0xff]  ;;  %v13986_v22 = vadd.f32 %v13748_v21, %v13729_v17  ;;  %v14002_v7 = vadd.f32 %v13748_v21, %v13745_v54 }
 0x8fb   :  { %v13970_v51 = vmul.f32 %v13720_v31, %v15609_v39  ;;  %v13974_v20 = vmul.f32 %v15610_v26, %v13720_v31  ;;  %v15611_v45 = vld [vmem:[#allocation191_spill] sm:$0xff]  ;;  %v13990_v39 = vadd.f32 %v13748_v21, %v13733_v2  ;;  %v13994_v26 = vadd.f32 %v13748_v21, %v13737_v49 }
 0x8fc   :  { %v13978_v57 = vmul.f32 %v15611_v45, %v13720_v31  ;;  %v13998_v31 = vadd.f32 %v13748_v21, %v13741_v38  ;;  %v14006_v17 = vadd.f32 %v13748_v21, %v13752_v47  ;;  %v14010_v2 = vadd.f32 %v13748_v21, %v13756_v36 }
 0x8fd   :  { %v14014_v49 = vadd.f32 %v13748_v21, %v13760_v13  ;;  %v14018_v38 = vadd.f32 %v13748_v21, %v13764_v14  ;;  %v14022_v54 = vadd.f32 %v13748_v21, %v13768_v8  ;;  %v14026_v47 = vadd.f32 %v13748_v21, %v13772_v1 }
 0x8fe   :  { %v14030_v36 = vadd.f32 %v13748_v21, %v13776_v63  ;;  %v14034_v13 = vadd.f32 %v13748_v21, %v13781_v32  ;;  %v14038_v14 = vadd.f32 %v13748_v21, %v13785_v35  ;;  %v14042_v8 = vadd.f32 %v13748_v21, %v13789_v9 }
 0x8ff   :  { %v14046_v1 = vadd.f32 %v13748_v21, %v13793_v46  ;;  %v14050_v63 = vadd.f32 %v13748_v21, %v13797_v58  ;;  %v14054_v32 = vadd.f32 %v13748_v21, %v13801_v29  ;;  %v14058_v35 = vadd.f32 %v13748_v21, %v13805_v60  ;;  %v15617_v45 = vld [vmem:[#allocation42_spill] sm:$0xff] }
 0x900   :  { %v14062_v9 = vadd.f32 %v13748_v21, %v13809_v6  ;;  %v14066_v46 = vadd.f32 %v13748_v21, %v13813_v28  ;;  %v14070_v58 = vadd.f32 %v13748_v21, %v13817_v10  ;;  %v14074_v29 = vadd.f32 %v13748_v21, %v13821_v18 }
 0x901   :  { %v14078_v60 = vadd.f32 %v13748_v21, %v13825_v53  ;;  %v14082_v6 = vadd.f32 %v13748_v21, %v13829_v15  ;;  %v14086_v28 = vadd.f32 %v13748_v21, %v13833_v11  ;;  %v14090_v10 = vadd.f32 %v13748_v21, %v13837_v61 }
 0x902   :  { %v14094_v18 = vadd.f32 %v13748_v21, %v13841_v23  ;;  %v14098_v53 = vadd.f32 %v13748_v21, %v13845_v41  ;;  %v14102_v15 = vadd.f32 %v13748_v21, %v13849_v19  ;;  %v14106_v11 = vadd.f32 %v13748_v21, %v13853_v48 }
 0x903   :  { %v14110_v61 = vadd.f32 %v13748_v21, %v13857_v56  ;;  %v14114_v23 = vadd.f32 %v13748_v21, %v13861_v37  ;;  %v14118_v41 = vadd.f32 %v13748_v21, %v13866_v4  ;;  %v14122_v19 = vadd.f32 %v13748_v21, %v13870_v34 }
 0x904   :  { %v14126_v48 = vadd.f32 %v13748_v21, %v13874_v16  ;;  %v14130_v56 = vadd.f32 %v13748_v21, %v13878_v24  ;;  %v14134_v37 = vadd.f32 %v13748_v21, %v13882_v40  ;;  %v14138_v4 = vadd.f32 %v13748_v21, %v13886_v42 }
 0x905   :  { %v14142_v34 = vadd.f32 %v13748_v21, %v13890_v3  ;;  %v14146_v16 = vadd.f32 %v13748_v21, %v13894_v52  ;;  %v14150_v24 = vadd.f32 %v13748_v21, %v13898_v27  ;;  %v14154_v40 = vadd.f32 %v13748_v21, %v13902_v0 }
 0x906   :  { %v14158_v42 = vadd.f32 %v13748_v21, %v13906_v55  ;;  %v14162_v3 = vadd.f32 %v13748_v21, %v13910_v33  ;;  %v14166_v52 = vadd.f32 %v13748_v21, %v13914_v50  ;;  %v14170_v27 = vadd.f32 %v13748_v21, %v13918_v59 }
 0x907   :  { %v14174_v0 = vadd.f32 %v13748_v21, %v13922_v44  ;;  %v14178_v55 = vadd.f32 %v13748_v21, %v13926_v25  ;;  %v14182_v33 = vadd.f32 %v13748_v21, %v13930_v43  ;;  %v14186_v50 = vadd.f32 %v13748_v21, %v15617_v45 }
 0x908   :  { %15612 = vst [vmem:[#allocation36_spill] sm:$0xff] %v14166_v52  ;;  %15613 = vst [vmem:[#allocation14_spill] sm:$0xff] %v14170_v27  ;;  %v15618_v52 = vld [vmem:[#allocation177_spill] sm:$0xff]  ;;  %v15619_v27 = vld [vmem:[#allocation28_spill] sm:$0xff] }
 0x909   :  { %15614 = vst [vmem:[#allocation144_spill] sm:$0xff] %v14174_v0  ;;  %15615 = vst [vmem:[#allocation192_spill] sm:$0xff] %v14178_v55  ;;  %v14190_v59 = vadd.f32 %v13748_v21, %v15618_v52  ;;  %v14194_v44 = vadd.f32 %v13748_v21, %v15619_v27  ;;  %v15620_v0 = vld [vmem:[#allocation124_spill] sm:$0xff]  ;;  %v15621_v55 = vld [vmem:[#allocation34_spill] sm:$0xff]  ;;  %v14210_v52 = vadd.f32 %v13748_v21, %v13958_v5 }
 0x90a   :  { %15616 = vst [vmem:[#allocation179_spill] sm:$0xff] %v14182_v33  ;;  %v14198_v25 = vadd.f32 %v13748_v21, %v15620_v0  ;;  %v14202_v43 = vadd.f32 %v13748_v21, %v15621_v55  ;;  %v15622_v33 = vld [vmem:[#allocation78_spill] sm:$0xff]  ;;  %v14214_v27 = vadd.f32 %v13748_v21, %v13962_v62  ;;  %v14218_v0 = vadd.f32 %v13748_v21, %v13966_v30 }
 0x90b   :  { %v14206_v45 = vadd.f32 %v13748_v21, %v15622_v33  ;;  %15623 = vst [vmem:[#allocation40_spill] sm:$0xff] %v14210_v52  ;;  %v14222_v55 = vadd.f32 %v13748_v21, %v13970_v51  ;;  %v14226_v33 = vadd.f32 %v13748_v21, %v13974_v20  ;;  %v14230_v5 = vadd.f32 %v13748_v21, %v13978_v57  ;;  %v7321_v52 = vld [vmem:[#allocation3] sm:$0xff]  ;;  %v7326_v57 = vld [vmem:[#allocation3 + $0x28] sm:$0xff] }
 0x90c   :  { %15624 = vst [vmem:[#allocation127_spill] sm:$0xff] %v14214_v27  ;;  %15625 = vst [vmem:[#allocation97_spill] sm:$0xff] %v14218_v0  ;;  %v14233_v62 = vadd.f32 %v7321_v52, %v13982_v12  ;;  %v7322_v27 = vld [vmem:[#allocation3 + $0x8] sm:$0xff]  ;;  %v7323_v0 = vld [vmem:[#allocation3 + $0x10] sm:$0xff]  ;;  %v14248_v12 = vadd.f32 %v7326_v57, %v14002_v7 }
 0x90d   :  { %15626 = vst [vmem:[#allocation45_spill] sm:$0xff] %v14222_v55  ;;  %15627 = vst [vmem:[#allocation43_spill] sm:$0xff] %v14226_v33  ;;  %v14236_v30 = vadd.f32 %v7322_v27, %v13986_v22  ;;  %v14239_v51 = vadd.f32 %v7323_v0, %v13990_v39  ;;  %v7324_v55 = vld [vmem:[#allocation3 + $0x18] sm:$0xff]  ;;  %v7325_v33 = vld [vmem:[#allocation3 + $0x20] sm:$0xff] }
 0x90e   :  { %v14242_v20 = vadd.f32 %v7324_v55, %v13994_v26  ;;  %v14245_v21 = vadd.f32 %v7325_v33, %v13998_v31  ;;  %v7327_v52 = vld [vmem:[#allocation3 + $0x30] sm:$0xff]  ;;  %v7328_v27 = vld [vmem:[#allocation3 + $0x38] sm:$0xff]  ;;  %v7329_v0 = vld [vmem:[#allocation3 + $0x40] sm:$0xff] }
 0x90f   :  { %v14251_v22 = vadd.f32 %v7327_v52, %v14006_v17  ;;  %v14254_v39 = vadd.f32 %v7328_v27, %v14010_v2  ;;  %v14257_v26 = vadd.f32 %v7329_v0, %v14014_v49  ;;  %v7330_v55 = vld [vmem:[#allocation3 + $0x48] sm:$0xff]  ;;  %v7331_v33 = vld [vmem:[#allocation3 + $0x50] sm:$0xff]  ;;  %v7332_v57 = vld [vmem:[#allocation3 + $0x58] sm:$0xff] }
 0x910   :  { %v14260_v31 = vadd.f32 %v7330_v55, %v14018_v38  ;;  %v14263_v7 = vadd.f32 %v7331_v33, %v14022_v54  ;;  %v14266_v17 = vadd.f32 %v7332_v57, %v14026_v47  ;;  %v7333_v52 = vld [vmem:[#allocation3 + $0x60] sm:$0xff]  ;;  %v7334_v27 = vld [vmem:[#allocation3 + $0x68] sm:$0xff]  ;;  %v7335_v0 = vld [vmem:[#allocation3 + $0x70] sm:$0xff] }
 0x911   :  { %v14269_v2 = vadd.f32 %v7333_v52, %v14030_v36  ;;  %v14272_v49 = vadd.f32 %v7334_v27, %v14034_v13  ;;  %v14275_v38 = vadd.f32 %v7335_v0, %v14038_v14  ;;  %v7336_v55 = vld [vmem:[#allocation3 + $0x78] sm:$0xff]  ;;  %v7337_v33 = vld [vmem:[#allocation3 + $0x80] sm:$0xff]  ;;  %v7338_v57 = vld [vmem:[#allocation3 + $0x88] sm:$0xff] }
 0x912   :  { %v14278_v54 = vadd.f32 %v7336_v55, %v14042_v8  ;;  %v14281_v47 = vadd.f32 %v7337_v33, %v14046_v1  ;;  %v14284_v36 = vadd.f32 %v7338_v57, %v14050_v63  ;;  %v7339_v52 = vld [vmem:[#allocation3 + $0x90] sm:$0xff]  ;;  %v7340_v27 = vld [vmem:[#allocation3 + $0x98] sm:$0xff]  ;;  %v7341_v0 = vld [vmem:[#allocation3 + $0xa0] sm:$0xff] }
 0x913   :  { %v14287_v13 = vadd.f32 %v7339_v52, %v14054_v32  ;;  %v14290_v14 = vadd.f32 %v7340_v27, %v14058_v35  ;;  %v14293_v8 = vadd.f32 %v7341_v0, %v14062_v9  ;;  %v7342_v55 = vld [vmem:[#allocation3 + $0xa8] sm:$0xff]  ;;  %v7343_v33 = vld [vmem:[#allocation3 + $0xb0] sm:$0xff]  ;;  %v7344_v57 = vld [vmem:[#allocation3 + $0xb8] sm:$0xff] }
 0x914   :  { %v14296_v1 = vadd.f32 %v7342_v55, %v14066_v46  ;;  %v14299_v63 = vadd.f32 %v7343_v33, %v14070_v58  ;;  %v14302_v32 = vadd.f32 %v7344_v57, %v14074_v29  ;;  %v7345_v52 = vld [vmem:[#allocation3 + $0xc0] sm:$0xff]  ;;  %v7346_v27 = vld [vmem:[#allocation3 + $0xc8] sm:$0xff]  ;;  %v7347_v0 = vld [vmem:[#allocation3 + $0xd0] sm:$0xff] }
 0x915   :  { %v14305_v35 = vadd.f32 %v7345_v52, %v14078_v60  ;;  %v14308_v9 = vadd.f32 %v7346_v27, %v14082_v6  ;;  %v14311_v46 = vadd.f32 %v7347_v0, %v14086_v28  ;;  %v7348_v55 = vld [vmem:[#allocation3 + $0xd8] sm:$0xff]  ;;  %v7349_v33 = vld [vmem:[#allocation3 + $0xe0] sm:$0xff]  ;;  %v7350_v57 = vld [vmem:[#allocation3 + $0xe8] sm:$0xff] }
 0x916   :  { %v14314_v58 = vadd.f32 %v7348_v55, %v14090_v10  ;;  %v14317_v29 = vadd.f32 %v7349_v33, %v14094_v18  ;;  %v14320_v60 = vadd.f32 %v7350_v57, %v14098_v53  ;;  %v7351_v52 = vld [vmem:[#allocation3 + $0xf0] sm:$0xff]  ;;  %v7352_v27 = vld [vmem:[#allocation3 + $0xf8] sm:$0xff]  ;;  %v7353_v0 = vld [vmem:[#allocation3 + $0x100] sm:$0xff] }
 0x917   :  { %v14323_v6 = vadd.f32 %v7351_v52, %v14102_v15  ;;  %v14326_v28 = vadd.f32 %v7352_v27, %v14106_v11  ;;  %v14329_v10 = vadd.f32 %v7353_v0, %v14110_v61  ;;  %v7354_v55 = vld [vmem:[#allocation3 + $0x108] sm:$0xff]  ;;  %v7355_v33 = vld [vmem:[#allocation3 + $0x110] sm:$0xff]  ;;  %v7356_v57 = vld [vmem:[#allocation3 + $0x118] sm:$0xff] }
 0x918   :  { %v14332_v18 = vadd.f32 %v7354_v55, %v14114_v23  ;;  %v14335_v53 = vadd.f32 %v7355_v33, %v14118_v41  ;;  %v14338_v15 = vadd.f32 %v7356_v57, %v14122_v19  ;;  %v7357_v52 = vld [vmem:[#allocation3 + $0x120] sm:$0xff]  ;;  %v7358_v27 = vld [vmem:[#allocation3 + $0x128] sm:$0xff]  ;;  %v7359_v0 = vld [vmem:[#allocation3 + $0x130] sm:$0xff] }
 0x919   :  { %v14341_v11 = vadd.f32 %v7357_v52, %v14126_v48  ;;  %v14344_v61 = vadd.f32 %v7358_v27, %v14130_v56  ;;  %v14347_v23 = vadd.f32 %v7359_v0, %v14134_v37  ;;  %v7360_v55 = vld [vmem:[#allocation3 + $0x138] sm:$0xff]  ;;  %v7361_v33 = vld [vmem:[#allocation3 + $0x140] sm:$0xff]  ;;  %v7362_v57 = vld [vmem:[#allocation3 + $0x148] sm:$0xff] }
 0x91a   :  { %v14350_v41 = vadd.f32 %v7360_v55, %v14138_v4  ;;  %v14353_v19 = vadd.f32 %v7361_v33, %v14142_v34  ;;  %v14356_v48 = vadd.f32 %v7362_v57, %v14146_v16  ;;  %v7363_v52 = vld [vmem:[#allocation3 + $0x150] sm:$0xff]  ;;  %v7364_v27 = vld [vmem:[#allocation3 + $0x158] sm:$0xff]  ;;  %v7365_v0 = vld [vmem:[#allocation3 + $0x160] sm:$0xff] }
 0x91b   :  { %v14359_v56 = vadd.f32 %v7363_v52, %v14150_v24  ;;  %v14362_v37 = vadd.f32 %v7364_v27, %v14154_v40  ;;  %v14365_v4 = vadd.f32 %v7365_v0, %v14158_v42  ;;  %v7366_v55 = vld [vmem:[#allocation3 + $0x168] sm:$0xff]  ;;  %v7367_v33 = vld [vmem:[#allocation3 + $0x170] sm:$0xff]  ;;  %v7368_v57 = vld [vmem:[#allocation3 + $0x178] sm:$0xff] }
 0x91c   :  { %15628 = vst [vmem:[#allocation13_spill] sm:$0xff] %v14353_v19  ;;  %15629 = vst [vmem:[#allocation58_spill] sm:$0xff] %v14356_v48  ;;  %v14368_v34 = vadd.f32 %v7366_v55, %v14162_v3  ;;  %v15633_v19 = vld [vmem:[#allocation36_spill] sm:$0xff]  ;;  %v15634_v48 = vld [vmem:[#allocation14_spill] sm:$0xff] }
 0x91d   :  { %15630 = vst [vmem:[#allocation53_spill] sm:$0xff] %v14359_v56  ;;  %15631 = vst [vmem:[#allocation181_spill] sm:$0xff] %v14362_v37  ;;  %v14371_v16 = vadd.f32 %v7367_v33, %v15633_v19  ;;  %v14374_v24 = vadd.f32 %v7368_v57, %v15634_v48  ;;  %v7369_v52 = vld [vmem:[#allocation3 + $0x180] sm:$0xff]  ;;  %v15635_v56 = vld [vmem:[#allocation144_spill] sm:$0xff] }
 0x91e   :  { %15632 = vst [vmem:[#allocation138_spill] sm:$0xff] %v14365_v4  ;;  %v14377_v40 = vadd.f32 %v7369_v52, %v15635_v56  ;;  %v7370_v27 = vld [vmem:[#allocation3 + $0x188] sm:$0xff]  ;;  %v15636_v37 = vld [vmem:[#allocation192_spill] sm:$0xff]  ;;  %v7371_v0 = vld [vmem:[#allocation3 + $0x190] sm:$0xff] }
 0x91f   :  { %v14380_v42 = vadd.f32 %v7370_v27, %v15636_v37  ;;  %v15637_v4 = vld [vmem:[#allocation179_spill] sm:$0xff]  ;;  %v7372_v55 = vld [vmem:[#allocation3 + $0x198] sm:$0xff]  ;;  %v7373_v33 = vld [vmem:[#allocation3 + $0x1a0] sm:$0xff] }
 0x920   :  { %v14383_v3 = vadd.f32 %v7371_v0, %v15637_v4  ;;  %v14386_v19 = vadd.f32 %v7372_v55, %v14186_v50  ;;  %v14389_v48 = vadd.f32 %v7373_v33, %v14190_v59  ;;  %v7374_v57 = vld [vmem:[#allocation3 + $0x1a8] sm:$0xff]  ;;  %v7375_v52 = vld [vmem:[#allocation3 + $0x1b0] sm:$0xff]  ;;  %v7376_v27 = vld [vmem:[#allocation3 + $0x1b8] sm:$0xff] }
 0x921   :  { %v14392_v56 = vadd.f32 %v7374_v57, %v14194_v44  ;;  %v14395_v37 = vadd.f32 %v7375_v52, %v14198_v25  ;;  %v14398_v4 = vadd.f32 %v7376_v27, %v14202_v43  ;;  %v7377_v0 = vld [vmem:[#allocation3 + $0x1c0] sm:$0xff]  ;;  %v7378_v55 = vld [vmem:[#allocation3 + $0x1c8] sm:$0xff]  ;;  %v7379_v33 = vld [vmem:[#allocation3 + $0x1d0] sm:$0xff] }
 0x922   :  { %15638 = vst [vmem:[#allocation99_spill] sm:$0xff] %v14386_v19  ;;  %15639 = vst [vmem:[#allocation52_spill] sm:$0xff] %v14389_v48  ;;  %v14401_v50 = vadd.f32 %v7377_v0, %v14206_v45  ;;  %v15643_v19 = vld [vmem:[#allocation40_spill] sm:$0xff]  ;;  %v15644_v48 = vld [vmem:[#allocation127_spill] sm:$0xff] }
 0x923   :  { %15640 = vst [vmem:[#allocation46_spill] sm:$0xff] %v14392_v56  ;;  %15641 = vst [vmem:[#allocation16_spill] sm:$0xff] %v14395_v37  ;;  %v14404_v59 = vadd.f32 %v7378_v55, %v15643_v19  ;;  %v14407_v44 = vadd.f32 %v7379_v33, %v15644_v48  ;;  %v7380_v57 = vld [vmem:[#allocation3 + $0x1d8] sm:$0xff]  ;;  %v15645_v56 = vld [vmem:[#allocation97_spill] sm:$0xff]  ;;  %v6348_v55 = vmax.f32 %v14233_v62, 0.0  ;;  %v6349_v48 = vmax.f32 %v14236_v30, 0.0 }
 0x924   :  { %15642 = vst [vmem:[#allocation61_spill] sm:$0xff] %v14398_v4  ;;  %v14410_v25 = vadd.f32 %v7380_v57, %v15645_v56  ;;  %v7381_v52 = vld [vmem:[#allocation3 + $0x1e0] sm:$0xff]  ;;  %v7382_v27 = vld [vmem:[#allocation3 + $0x1e8] sm:$0xff]  ;;  %v15647_v4 = vld [vmem:[#allocation43_spill] sm:$0xff]  ;;  %v6350_v33 = vmax.f32 %v14239_v51, 0.0  ;;  %v6351_v56 = vmax.f32 %v14242_v20, 0.0 }
 0x925   :  { %v15646_v37 = vld [vmem:[#allocation45_spill] sm:$0xff]  ;;  %v14416_v45 = vadd.f32 %v7382_v27, %v15647_v4  ;;  %v7383_v0 = vld [vmem:[#allocation3 + $0x1f8] sm:$0xff]  ;;  %v6352_v57 = vmax.f32 %v14245_v21, 0.0  ;;  %v6355_v4 = vmax.f32 %v14254_v39, 0.0  ;;  %v6356_v27 = vmax.f32 %v14257_v26, 0.0  ;;  %6412 = vst.msk [vmem:[#allocation6] sm:$0xff] %vm118_vm0, %v6348_v55 }
 0x926   :  { %v14413_v43 = vadd.f32 %v7381_v52, %v15646_v37  ;;  %v14419_v19 = vadd.f32 %v7383_v0, %v14230_v5  ;;  %v6353_v37 = vmax.f32 %v14248_v12, 0.0  ;;  %v6354_v52 = vmax.f32 %v14251_v22, 0.0  ;;  %6413 = vst.msk [vmem:[#allocation6 + $0x8] sm:$0xff] %vm118_vm0, %v6349_v48  ;;  %6414 = vst.msk [vmem:[#allocation6 + $0x10] sm:$0xff] %vm118_vm0, %v6350_v33  ;;  %v15652_v0 = vld [vmem:[#allocation138_spill] sm:$0xff] }
 0x927   :  { %v6357_v5 = vmax.f32 %v14260_v31, 0.0  ;;  %v6358_v62 = vmax.f32 %v14263_v7, 0.0  ;;  %v6359_v30 = vmax.f32 %v14266_v17, 0.0  ;;  %v6360_v51 = vmax.f32 %v14269_v2, 0.0  ;;  %6415 = vst.msk [vmem:[#allocation6 + $0x18] sm:$0xff] %vm118_vm0, %v6351_v56  ;;  %6416 = vst.msk [vmem:[#allocation6 + $0x20] sm:$0xff] %vm118_vm0, %v6352_v57 }
 0x928   :  { %v6361_v20 = vmax.f32 %v14272_v49, 0.0  ;;  %v6362_v21 = vmax.f32 %v14275_v38, 0.0  ;;  %v6363_v12 = vmax.f32 %v14278_v54, 0.0  ;;  %v6364_v22 = vmax.f32 %v14281_v47, 0.0  ;;  %6417 = vst.msk [vmem:[#allocation6 + $0x28] sm:$0xff] %vm118_vm0, %v6353_v37  ;;  %6418 = vst.msk [vmem:[#allocation6 + $0x30] sm:$0xff] %vm118_vm0, %v6354_v52 }
 0x929   :  { %6419 = vst.msk [vmem:[#allocation6 + $0x38] sm:$0xff] %vm118_vm0, %v6355_v4  ;;  %6420 = vst.msk [vmem:[#allocation6 + $0x40] sm:$0xff] %vm118_vm0, %v6356_v27  ;;  %v6365_v39 = vmax.f32 %v14284_v36, 0.0  ;;  %v6366_v26 = vmax.f32 %v14287_v13, 0.0  ;;  %v6367_v31 = vmax.f32 %v14290_v14, 0.0  ;;  %v6368_v7 = vmax.f32 %v14293_v8, 0.0 }
 0x92a   :  { %6421 = vst.msk [vmem:[#allocation6 + $0x48] sm:$0xff] %vm118_vm0, %v6357_v5  ;;  %6422 = vst.msk [vmem:[#allocation6 + $0x50] sm:$0xff] %vm118_vm0, %v6358_v62  ;;  %v6369_v17 = vmax.f32 %v14296_v1, 0.0  ;;  %v6370_v2 = vmax.f32 %v14299_v63, 0.0  ;;  %v6371_v49 = vmax.f32 %v14302_v32, 0.0  ;;  %v6372_v38 = vmax.f32 %v14305_v35, 0.0 }
 0x92b   :  { %6423 = vst.msk [vmem:[#allocation6 + $0x58] sm:$0xff] %vm118_vm0, %v6359_v30  ;;  %6424 = vst.msk [vmem:[#allocation6 + $0x60] sm:$0xff] %vm118_vm0, %v6360_v51  ;;  %v6373_v54 = vmax.f32 %v14308_v9, 0.0  ;;  %v6374_v47 = vmax.f32 %v14311_v46, 0.0  ;;  %v6375_v36 = vmax.f32 %v14314_v58, 0.0  ;;  %v6376_v13 = vmax.f32 %v14317_v29, 0.0 }
 0x92c   :  { %6425 = vst.msk [vmem:[#allocation6 + $0x68] sm:$0xff] %vm118_vm0, %v6361_v20  ;;  %6426 = vst.msk [vmem:[#allocation6 + $0x70] sm:$0xff] %vm118_vm0, %v6362_v21  ;;  %v6377_v14 = vmax.f32 %v14320_v60, 0.0  ;;  %v6378_v8 = vmax.f32 %v14323_v6, 0.0  ;;  %v6379_v1 = vmax.f32 %v14326_v28, 0.0  ;;  %v6380_v63 = vmax.f32 %v14329_v10, 0.0 }
 0x92d   :  { %6427 = vst.msk [vmem:[#allocation6 + $0x78] sm:$0xff] %vm118_vm0, %v6363_v12  ;;  %6428 = vst.msk [vmem:[#allocation6 + $0x80] sm:$0xff] %vm118_vm0, %v6364_v22  ;;  %v6381_v32 = vmax.f32 %v14332_v18, 0.0  ;;  %v6382_v35 = vmax.f32 %v14335_v53, 0.0  ;;  %v6383_v9 = vmax.f32 %v14338_v15, 0.0  ;;  %v6384_v46 = vmax.f32 %v14341_v11, 0.0 }
 0x92e   :  { %6429 = vst.msk [vmem:[#allocation6 + $0x88] sm:$0xff] %vm118_vm0, %v6365_v39  ;;  %6430 = vst.msk [vmem:[#allocation6 + $0x90] sm:$0xff] %vm118_vm0, %v6366_v26  ;;  %v6385_v58 = vmax.f32 %v14344_v61, 0.0  ;;  %v6386_v29 = vmax.f32 %v14347_v23, 0.0  ;;  %v6387_v60 = vmax.f32 %v14350_v41, 0.0  ;;  %v15648_v6 = vld [vmem:[#allocation13_spill] sm:$0xff] }
 0x92f   :  { %6431 = vst.msk [vmem:[#allocation6 + $0x98] sm:$0xff] %vm118_vm0, %v6367_v31  ;;  %6432 = vst.msk [vmem:[#allocation6 + $0xa0] sm:$0xff] %vm118_vm0, %v6368_v7  ;;  %v6388_v28 = vmax.f32 %v15648_v6, 0.0  ;;  %v15649_v10 = vld [vmem:[#allocation58_spill] sm:$0xff]  ;;  %v15650_v53 = vld [vmem:[#allocation53_spill] sm:$0xff]  ;;  %v6392_v23 = vmax.f32 %v15652_v0, 0.0 }
 0x930   :  { %6433 = vst.msk [vmem:[#allocation6 + $0xa8] sm:$0xff] %vm118_vm0, %v6369_v17  ;;  %6434 = vst.msk [vmem:[#allocation6 + $0xb0] sm:$0xff] %vm118_vm0, %v6370_v2  ;;  %v6389_v18 = vmax.f32 %v15649_v10, 0.0  ;;  %v6390_v15 = vmax.f32 %v15650_v53, 0.0  ;;  %v15651_v11 = vld [vmem:[#allocation181_spill] sm:$0xff]  ;;  %v6393_v41 = vmax.f32 %v14368_v34, 0.0 }
 0x931   :  { %6435 = vst.msk [vmem:[#allocation6 + $0xb8] sm:$0xff] %vm118_vm0, %v6371_v49  ;;  %6436 = vst.msk [vmem:[#allocation6 + $0xc0] sm:$0xff] %vm118_vm0, %v6372_v38  ;;  %v6391_v61 = vmax.f32 %v15651_v11, 0.0  ;;  %v6394_v55 = vmax.f32 %v14371_v16, 0.0  ;;  %v6395_v48 = vmax.f32 %v14374_v24, 0.0  ;;  %v6396_v33 = vmax.f32 %v14377_v40, 0.0 }
 0x932   :  { %6437 = vst.msk [vmem:[#allocation6 + $0xc8] sm:$0xff] %vm118_vm0, %v6373_v54  ;;  %6438 = vst.msk [vmem:[#allocation6 + $0xd0] sm:$0xff] %vm118_vm0, %v6374_v47  ;;  %v6397_v56 = vmax.f32 %v14380_v42, 0.0  ;;  %v6398_v57 = vmax.f32 %v14383_v3, 0.0  ;;  %v15653_v37 = vld [vmem:[#allocation99_spill] sm:$0xff]  ;;  %v15654_v52 = vld [vmem:[#allocation52_spill] sm:$0xff] }
 0x933   :  { %6439 = vst.msk [vmem:[#allocation6 + $0xd8] sm:$0xff] %vm118_vm0, %v6375_v36  ;;  %6440 = vst.msk [vmem:[#allocation6 + $0xe0] sm:$0xff] %vm118_vm0, %v6376_v13  ;;  %v6399_v34 = vmax.f32 %v15653_v37, 0.0  ;;  %v6400_v16 = vmax.f32 %v15654_v52, 0.0  ;;  %v15655_v24 = vld [vmem:[#allocation46_spill] sm:$0xff]  ;;  %v15656_v4 = vld [vmem:[#allocation16_spill] sm:$0xff] }
 0x934   :  { %6441 = vst.msk [vmem:[#allocation6 + $0xe8] sm:$0xff] %vm118_vm0, %v6377_v14  ;;  %6442 = vst.msk [vmem:[#allocation6 + $0xf0] sm:$0xff] %vm118_vm0, %v6378_v8  ;;  %v6401_v40 = vmax.f32 %v15655_v24, 0.0  ;;  %v6402_v42 = vmax.f32 %v15656_v4, 0.0  ;;  %v15657_v27 = vld [vmem:[#allocation61_spill] sm:$0xff]  ;;  %v6404_v5 = vmax.f32 %v14401_v50, 0.0 }
 0x935   :  { %6443 = vst.msk [vmem:[#allocation6 + $0xf8] sm:$0xff] %vm118_vm0, %v6379_v1  ;;  %6444 = vst.msk [vmem:[#allocation6 + $0x100] sm:$0xff] %vm118_vm0, %v6380_v63  ;;  %v6403_v3 = vmax.f32 %v15657_v27, 0.0  ;;  %v6405_v62 = vmax.f32 %v14404_v59, 0.0  ;;  %v6406_v30 = vmax.f32 %v14407_v44, 0.0  ;;  %v6407_v51 = vmax.f32 %v14410_v25, 0.0 }
 0x936   :  { %6445 = vst.msk [vmem:[#allocation6 + $0x108] sm:$0xff] %vm118_vm0, %v6381_v32  ;;  %6446 = vst.msk [vmem:[#allocation6 + $0x110] sm:$0xff] %vm118_vm0, %v6382_v35  ;;  %v6408_v20 = vmax.f32 %v14413_v43, 0.0  ;;  %v6409_v50 = vmax.f32 %v14416_v45, 0.0  ;;  %v6411_v21 = vmax.f32 %v14419_v19, 0.0 }
 0x937   :  { %6447 = vst.msk [vmem:[#allocation6 + $0x118] sm:$0xff] %vm118_vm0, %v6383_v9  ;;  %6448 = vst.msk [vmem:[#allocation6 + $0x120] sm:$0xff] %vm118_vm0, %v6384_v46 }
 0x938   :  { %6449 = vst.msk [vmem:[#allocation6 + $0x128] sm:$0xff] %vm118_vm0, %v6385_v58  ;;  %6450 = vst.msk [vmem:[#allocation6 + $0x130] sm:$0xff] %vm118_vm0, %v6386_v29 }
 0x939   :  { %6451 = vst.msk [vmem:[#allocation6 + $0x138] sm:$0xff] %vm118_vm0, %v6387_v60  ;;  %6452 = vst.msk [vmem:[#allocation6 + $0x140] sm:$0xff] %vm118_vm0, %v6388_v28 }
 0x93a   :  { %6453 = vst.msk [vmem:[#allocation6 + $0x148] sm:$0xff] %vm118_vm0, %v6389_v18  ;;  %6454 = vst.msk [vmem:[#allocation6 + $0x150] sm:$0xff] %vm118_vm0, %v6390_v15 }
 0x93b   :  { %6455 = vst.msk [vmem:[#allocation6 + $0x158] sm:$0xff] %vm118_vm0, %v6391_v61  ;;  %6456 = vst.msk [vmem:[#allocation6 + $0x160] sm:$0xff] %vm118_vm0, %v6392_v23 }
 0x93c   :  { %6457 = vst.msk [vmem:[#allocation6 + $0x168] sm:$0xff] %vm118_vm0, %v6393_v41  ;;  %6458 = vst.msk [vmem:[#allocation6 + $0x170] sm:$0xff] %vm118_vm0, %v6394_v55 }
 0x93d   :  { %6459 = vst.msk [vmem:[#allocation6 + $0x178] sm:$0xff] %vm118_vm0, %v6395_v48  ;;  %6460 = vst.msk [vmem:[#allocation6 + $0x180] sm:$0xff] %vm118_vm0, %v6396_v33 }
 0x93e   :  { %6461 = vst.msk [vmem:[#allocation6 + $0x188] sm:$0xff] %vm118_vm0, %v6397_v56  ;;  %6462 = vst.msk [vmem:[#allocation6 + $0x190] sm:$0xff] %vm118_vm0, %v6398_v57 }
 0x93f   :  { %6463 = vst.msk [vmem:[#allocation6 + $0x198] sm:$0xff] %vm118_vm0, %v6399_v34  ;;  %6464 = vst.msk [vmem:[#allocation6 + $0x1a0] sm:$0xff] %vm118_vm0, %v6400_v16 }
 0x940   :  { %6465 = vst.msk [vmem:[#allocation6 + $0x1a8] sm:$0xff] %vm118_vm0, %v6401_v40  ;;  %6466 = vst.msk [vmem:[#allocation6 + $0x1b0] sm:$0xff] %vm118_vm0, %v6402_v42 }
 0x941   :  { %6467 = vst.msk [vmem:[#allocation6 + $0x1b8] sm:$0xff] %vm118_vm0, %v6403_v3  ;;  %6468 = vst.msk [vmem:[#allocation6 + $0x1c0] sm:$0xff] %vm118_vm0, %v6404_v5 }
 0x942   :  { %6469 = vst.msk [vmem:[#allocation6 + $0x1c8] sm:$0xff] %vm118_vm0, %v6405_v62  ;;  %6470 = vst.msk [vmem:[#allocation6 + $0x1d0] sm:$0xff] %vm118_vm0, %v6406_v30 }
 0x943   :  { %6471 = vst.msk [vmem:[#allocation6 + $0x1d8] sm:$0xff] %vm118_vm0, %v6407_v51  ;;  %6472 = vst.msk [vmem:[#allocation6 + $0x1e0] sm:$0xff] %vm118_vm0, %v6408_v20 }
 0x944   :  { %6473 = vst.msk [vmem:[#allocation6 + $0x1e8] sm:$0xff] %vm118_vm0, %v6409_v50  ;;  %6475 = vst.msk [vmem:[#allocation6 + $0x1f8] sm:$0xff] %vm118_vm0, %v6411_v21 }
 0x945   :  { %7417 = shalt.err (!%p7414_p12)
}
 0x946   :  { %s7418_s29 = scalar_lea.hbm %s14572_s10, 8192 }
 0x947   :  { %p7419_p13 = scmp.ne.s32.totalorder %s14572_s10, %s7418_s29  ;;  %p7422_p0 = scmp.lt.u32.totalorder %s7418_s29, %s14572_s10 }
 0x949   :  { %p7424_p1 = pnand %p7422_p0, %p7419_p13 }
 0x94b   :  { %7427 = shalt.err (!%p7424_p1)
}
 0x94c   :  { %6487 = dma.vmem_to_hbm [thread:$0]  %s6482_s9, 8192, %s14572_s10, [#allocation5], %s7433_s23, %s7433_s23, %s7434_s24  }
 0x94d   :  { %7430 = dma.done.wait [#allocation5], 8192  }
 0x94e   :  { %7431 = vsyncadd [#allocation5], 4294959104 }
 0x94f   :  { %6491 = vsyncpa [#allocation4], 1 }
 0x950   :  { %6492 = vsyncpa [#allocation5], 1 }

</bundles_post_ra>
